<compile_context>
chip_gen: v7x
topology: tpu7x:2x2x1
jax: 0.10.0
libtpu: 0.0.40
codegen_flags: <defaults>
</compile_context>

<pallas_src>
import math

import jax
import jax.numpy as jnp
import numpy as np
from jax.experimental import pallas as pl
from jax.experimental.pallas import tpu as pltpu

_NEG = -1e30  # finite "-inf" sentinel for the max-pool padding / guards


# ----------------------------------------------------------------------------
# fused kernel builder
# ----------------------------------------------------------------------------
def _make_fused_kernel(H, W, Cin, F):
    Wp0 = W + 2                  # padded row width for conv0's input
    L0 = H * Wp0                 # flattened conv0 output slab length
    Ho, Wo = H // 2, W // 2      # spatial dims after the 3x3/s2 maxpool
    Wp1 = Wo + 2                 # padded row width inside the residual blocks
    L1 = Ho * Wp1
    CROWS = 4                    # conv0 spatial rows per accumulation chunk
    assert H % CROWS == 0
    CLEN = CROWS * Wp0
    NCHUNK = L0 // CLEN

    def kernel(x_ref, w0_ref, b0_ref, wr_ref, br_ref, m0_ref, sel_ref, m1_ref,
               o_ref, xpad_s, pool_s, hpad_s, ypad_s):
        f32 = jnp.float32

        # ------------------------------------------------------------------
        # Stage 1: zero-pad the input image into a flattened VMEM scratch.
        # ------------------------------------------------------------------
        xpad_s[...] = jnp.zeros_like(xpad_s)
        for y in range(H):
            xpad_s[pl.ds((y + 1) * Wp0 + 1, W), :] = x_ref[0, y]

        # ------------------------------------------------------------------
        # Stage 2: conv0 = Conv2d(Cin->F, 3x3, pad 1).
        # Each (dy,dx) tap is a stride-1 window of the flattened padded input
        # (offset dy*Wp0+dx) -> 9 accumulated MXU matmuls, no relayout copies.
        # Result (with 2 junk columns per Wp0-wide row) is written into
        # pool_s = [top guard | conv rows | bottom guard], guards = -1e30.
        # ------------------------------------------------------------------
        pool_s[...] = jnp.full(pool_s.shape, _NEG, f32)
        for c in range(NCHUNK):                       # chunked accumulator
            base = c * CLEN
            acc = jnp.zeros((CLEN, F), f32)
            for t in range(9):
                dy, dx = t // 3, t % 3
                patch = xpad_s[pl.ds(dy * Wp0 + dx + base, CLEN), :]
                acc = acc + jnp.dot(patch, w0_ref[t],
                                    preferred_element_type=f32)
            # bias + additive junk-column mask (0 on valid cols, -1e30 on the
            # two junk columns of every padded-width row)
            acc = acc + b0_ref[...] + m0_ref[pl.ds(base, CLEN), :]
            pool_s[pl.ds(Wp0 + base, CLEN), :] = acc

        # ------------------------------------------------------------------
        # Stage 3: MaxPool2d(3x3, stride 2, pad 1).
        # Column neighbours are +-1 and row neighbours +-Wp0 in the flattened
        # layout; guards / junk columns carry the -inf sentinel so the window
        # max matches PyTorch's -inf padding.
        # ------------------------------------------------------------------
        cm = pool_s[pl.ds(Wp0, L0), :]
        cm = jnp.maximum(cm, pool_s[pl.ds(Wp0 - 1, L0), :])
        cm = jnp.maximum(cm, pool_s[pl.ds(Wp0 + 1, L0), :])
        pool_s[pl.ds(Wp0, L0), :] = cm
        rm = pool_s[pl.ds(Wp0, L0), :]
        rm = jnp.maximum(rm, pool_s[pl.ds(0, L0), :])
        rm = jnp.maximum(rm, pool_s[pl.ds(2 * Wp0, L0), :])
        # stride-2 decimation as a constant 0/1 selection matmul (MXU);
        # avoids sublane-strided loads entirely.
        dec = jnp.dot(sel_ref[...], rm, preferred_element_type=f32)  # (Ho*Wo,F)

        # ------------------------------------------------------------------
        # Stage 4: scatter pooled map into the zero-padded residual buffer.
        # ------------------------------------------------------------------
        hpad_s[...] = jnp.zeros_like(hpad_s)
        ypad_s[...] = jnp.zeros_like(ypad_s)
        for oh in range(Ho):
            hpad_s[pl.ds((oh + 1) * Wp1 + 1, Wo), :] = dec[oh * Wo:(oh + 1) * Wo]

        # ------------------------------------------------------------------
        # Stage 5: two residual blocks, entirely in VMEM:
        #   h = h + conv_b(relu(conv_a(relu(h))))
        # ReLU fused into the tap loads (relu(0)=0 keeps the zero padding
        # exact); m1 zeroes the junk columns so padded borders stay exact 0.
        # ------------------------------------------------------------------
        m1 = m1_ref[...]                              # (L1, 1) in {0, 1}
        for blk in range(2):
            acc = jnp.zeros((L1, F), f32)
            for t in range(9):
                dy, dx = t // 3, t % 3
                patch = jnp.maximum(hpad_s[pl.ds(dy * Wp1 + dx, L1), :], 0.0)
                acc = acc + jnp.dot(patch, wr_ref[2 * blk, t],
                                    preferred_element_type=f32)
            ypad_s[pl.ds(Wp1 + 1, L1), :] = (acc + br_ref[2 * blk]) * m1

            acc = jnp.zeros((L1, F), f32)
            for t in range(9):
                dy, dx = t // 3, t % 3
                patch = jnp.maximum(ypad_s[pl.ds(dy * Wp1 + dx, L1), :], 0.0)
                acc = acc + jnp.dot(patch, wr_ref[2 * blk + 1, t],
                                    preferred_element_type=f32)
            upd = (acc + br_ref[2 * blk + 1]) * m1
            hpad_s[pl.ds(Wp1 + 1, L1), :] = hpad_s[pl.ds(Wp1 + 1, L1), :] + upd

        # ------------------------------------------------------------------
        # Stage 6: write the valid interior as the (Ho, Wo, F) output.
        # ------------------------------------------------------------------
        for oh in range(Ho):
            o_ref[0, oh] = hpad_s[pl.ds((oh + 1) * Wp1 + 1, Wo), :]

    return kernel


# ----------------------------------------------------------------------------
# wrapper: single fused pallas_call over the batch
# ----------------------------------------------------------------------------
def resblock_forward_pallas(x_nhwc, p):
    """x_nhwc: (N,H,W,Cin) f32; p: HWIO conv params.  Returns (N,H/2,W/2,F)."""
    N, H, W, Cin = x_nhwc.shape
    F = p["b0"].shape[0]
    assert H % 4 == 0 and W % 2 == 0
    Wp0, L0 = W + 2, H * (W + 2)
    Ho, Wo = H // 2, W // 2
    Wp1, L1 = Wo + 2, Ho * (Wo + 2)

    # tiny constant tables (trace-time numpy; avoids in-kernel int div/mod)
    col0 = np.arange(L0) % Wp0
    m0 = np.where(col0 < W, 0.0, _NEG).astype(np.float32).reshape(L0, 1)
    j = np.arange(Ho * Wo)
    sel = np.zeros((Ho * Wo, L0), np.float32)
    sel[j, 2 * (j // Wo) * Wp0 + 2 * (j % Wo)] = 1.0
    col1 = np.arange(L1) % Wp1
    m1 = (col1 < Wo).astype(np.float32).reshape(L1, 1)

    # parameters reshaped once: HWIO (3,3,ci,co) -> (9,ci,co); residual convs
    # stacked as (4,9,F,F)/(4,1,F) in order r1a, r1b, r2a, r2b.
    w0 = p["w0"].reshape(9, Cin, F)
    b0 = p["b0"].reshape(1, F)
    wres = jnp.stack([p["r1wa"].reshape(9, F, F), p["r1wb"].reshape(9, F, F),
                      p["r2wa"].reshape(9, F, F), p["r2wb"].reshape(9, F, F)])
    bres = jnp.stack([p["r1ba"], p["r1bb"],
                      p["r2ba"], p["r2bb"]]).reshape(4, 1, F)

    rows_x = (H + 2) * Wp0 + 2        # flattened padded input (+ tap headroom)
    rows_p = 2 * Wp0 + L0             # conv0 output with -inf guard rows
    rows_h = (Ho + 2) * Wp1 + 2       # padded residual buffers (+ headroom)

    kernel = _make_fused_kernel(H, W, Cin, F)
    return pl.pallas_call(
        kernel,
        out_shape=jax.ShapeDtypeStruct((N, Ho, Wo, F), jnp.float32),
        grid_spec=pltpu.PrefetchScalarGridSpec(
            num_scalar_prefetch=0,
            grid=(N,),                               # one image per grid step
            in_specs=[
                pl.BlockSpec((1, H, W, Cin), lambda n: (n, 0, 0, 0)),
                pl.BlockSpec((9, Cin, F), lambda n: (0, 0, 0)),
                pl.BlockSpec((1, F), lambda n: (0, 0)),
                pl.BlockSpec((4, 9, F, F), lambda n: (0, 0, 0, 0)),
                pl.BlockSpec((4, 1, F), lambda n: (0, 0, 0)),
                pl.BlockSpec((L0, 1), lambda n: (0, 0)),
                pl.BlockSpec((Ho * Wo, L0), lambda n: (0, 0)),
                pl.BlockSpec((L1, 1), lambda n: (0, 0)),
            ],
            out_specs=pl.BlockSpec((1, Ho, Wo, F), lambda n: (n, 0, 0, 0)),
            scratch_shapes=[
                pltpu.VMEM((rows_x, Cin), jnp.float32),   # zero-padded input
                pltpu.VMEM((rows_p, F), jnp.float32),     # conv0 out / pool buf
                pltpu.VMEM((rows_h, F), jnp.float32),     # padded h
                pltpu.VMEM((rows_h, F), jnp.float32),     # padded y
            ],
        ),
        compiler_params=pltpu.CompilerParams(
            dimension_semantics=("parallel",)),  # v7x: batch split over 2 TCs
    )(x_nhwc, w0, b0, wres, bres,
      jnp.asarray(m0), jnp.asarray(sel), jnp.asarray(m1))


# ----------------------------------------------------------------------------
# pure-JAX reference
# ----------------------------------------------------------------------------
def _conv_ref(x, w, b):
    return jax.lax.conv_general_dilated(
        x, w, window_strides=(1, 1), padding=((1, 1), (1, 1)),
        dimension_numbers=("NHWC", "HWIO", "NHWC"),
    ) + b


def resblock_forward_ref(x_nhwc, p):
    h = _conv_ref(x_nhwc, p["w0"], p["b0"])
    h = jax.lax.reduce_window(
        h, -jnp.inf, jax.lax.max,
        window_dimensions=(1, 3, 3, 1), window_strides=(1, 2, 2, 1),
        padding=((0, 0), (1, 1), (1, 1), (0, 0)),
    )
    for pfx in ("r1", "r2"):
        y = _conv_ref(jax.nn.relu(h), p[pfx + "wa"], p[pfx + "ba"])
        y = _conv_ref(jax.nn.relu(y), p[pfx + "wb"], p[pfx + "bb"])
        h = h + y
    return h


# ----------------------------------------------------------------------------
# deterministic parameter init (shapes match nn.Conv2d(.., 3x3, pad=1))
# ----------------------------------------------------------------------------
def _conv_init(key, cin, cout):
    kw, kb = jax.random.split(key)
    bound = 1.0 / math.sqrt(cin * 3 * 3)          # torch-style uniform bound
    w = jax.random.uniform(kw, (3, 3, cin, cout), jnp.float32, -bound, bound)
    b = jax.random.uniform(kb, (cout,), jnp.float32, -bound, bound)
    return w, b


def make_params(key, in_ch, filters):
    keys = jax.random.split(key, 5)
    pp = {}
    pp["w0"], pp["b0"] = _conv_init(keys[0], in_ch, filters)
    pp["r1wa"], pp["r1ba"] = _conv_init(keys[1], filters, filters)
    pp["r1wb"], pp["r1bb"] = _conv_init(keys[2], filters, filters)
    pp["r2wa"], pp["r2ba"] = _conv_init(keys[3], filters, filters)
    pp["r2wb"], pp["r2bb"] = _conv_init(keys[4], filters, filters)
    return pp


if __name__ == "__main__":
    N, C_IN, H, W = 2, 4, 16, 16
    FILTERS = 32

    root = jax.random.PRNGKey(0)
    kx, kp = jax.random.split(root)
    x_nchw = jax.random.normal(kx, (N, C_IN, H, W), jnp.float32)  # PyTorch layout
    params = make_params(kp, C_IN, FILTERS)

    x_nhwc = jnp.transpose(x_nchw, (0, 2, 3, 1))  # glue: NCHW -> NHWC

    out = jax.jit(resblock_forward_pallas)(x_nhwc, params)
    out = jax.block_until_ready(out)

    ref = jax.block_until_ready(resblock_forward_ref(x_nhwc, params))
    np.testing.assert_allclose(np.asarray(out), np.asarray(ref),
                               rtol=2e-3, atol=2e-3)
    assert out.shape == (N, H // 2, W // 2, FILTERS)

    print("KERNEL_OK")
</pallas_src>

<mosaic_0001>
module attributes {stable_mosaic.version = 11 : i64} {
  func.func @kernel(%arg0: i32, %arg1: memref<1x16x16x4xf32, #tpu.memory_space<vmem>>, %arg2: memref<9x4x32xf32, #tpu.memory_space<vmem>>, %arg3: memref<1x32xf32, #tpu.memory_space<vmem>>, %arg4: memref<4x9x32x32xf32, #tpu.memory_space<vmem>>, %arg5: memref<4x1x32xf32, #tpu.memory_space<vmem>>, %arg6: memref<288x1xf32, #tpu.memory_space<vmem>>, %arg7: memref<64x288xf32, #tpu.memory_space<vmem>>, %arg8: memref<80x1xf32, #tpu.memory_space<vmem>>, %arg9: memref<1x8x8x32xf32, #tpu.memory_space<vmem>>, %arg10: memref<326x4xf32, #tpu.memory_space<vmem>>, %arg11: memref<324x32xf32, #tpu.memory_space<vmem>>, %arg12: memref<102x32xf32, #tpu.memory_space<vmem>>, %arg13: memref<102x32xf32, #tpu.memory_space<vmem>>) attributes {dimension_semantics = [#tpu.dimension_semantics<parallel>], iteration_bounds = array<i64: 2>, scalar_prefetch = 0 : i64, scratch_operands = 4 : i64, tpu.core_type = #tpu.core_type<tc>, window_params = [{transform_indices = @transform_0, window_bounds = array<i64: 1, 16, 16, 4>}, {pipeline_mode = #tpu.pipeline_mode<synchronous>, transform_indices = @transform_1, window_bounds = array<i64: 9, 4, 32>}, {pipeline_mode = #tpu.pipeline_mode<synchronous>, transform_indices = @transform_2, window_bounds = array<i64: 1, 32>}, {pipeline_mode = #tpu.pipeline_mode<synchronous>, transform_indices = @transform_3, window_bounds = array<i64: 4, 9, 32, 32>}, {pipeline_mode = #tpu.pipeline_mode<synchronous>, transform_indices = @transform_4, window_bounds = array<i64: 4, 1, 32>}, {pipeline_mode = #tpu.pipeline_mode<synchronous>, transform_indices = @transform_5, window_bounds = array<i64: 288, 1>}, {pipeline_mode = #tpu.pipeline_mode<synchronous>, transform_indices = @transform_6, window_bounds = array<i64: 64, 288>}, {pipeline_mode = #tpu.pipeline_mode<synchronous>, transform_indices = @transform_7, window_bounds = array<i64: 80, 1>}, {transform_indices = @transform_8, window_bounds = array<i64: 1, 8, 8, 32>}]} {
    %cst = arith.constant 0.000000e+00 : f32
    %0 = vector.broadcast %cst : f32 to vector<326x4xf32>
    %c0 = arith.constant 0 : index
    %c0_0 = arith.constant 0 : index
    %1 = vector.load %arg10[%c0, %c0_0] : memref<326x4xf32, #tpu.memory_space<vmem>>, vector<326x4xf32>
    tpu.vector_store %arg10[%c0, %c0_0], %0 {strides = array<i32>} : memref<326x4xf32, #tpu.memory_space<vmem>>, vector<326x4xf32>,
    %c0_1 = arith.constant 0 : index
    %c0_2 = arith.constant 0 : index
    %c0_3 = arith.constant 0 : index
    %c0_4 = arith.constant 0 : index
    %2 = vector.load %arg1[%c0_1, %c0_2, %c0_3, %c0_4] : memref<1x16x16x4xf32, #tpu.memory_space<vmem>>, vector<1x1x16x4xf32>
    %3 = vector.shape_cast %2 : vector<1x1x16x4xf32> to vector<16x4xf32>
    %c19 = arith.constant 19 : index
    %c0_5 = arith.constant 0 : index
    %4 = vector.load %arg10[%c19, %c0_5] : memref<326x4xf32, #tpu.memory_space<vmem>>, vector<16x4xf32>
    tpu.vector_store %arg10[%c19, %c0_5], %3 {strides = array<i32>} : memref<326x4xf32, #tpu.memory_space<vmem>>, vector<16x4xf32>,
    %c0_6 = arith.constant 0 : index
    %c1 = arith.constant 1 : index
    %c0_7 = arith.constant 0 : index
    %c0_8 = arith.constant 0 : index
    %5 = vector.load %arg1[%c0_6, %c1, %c0_7, %c0_8] : memref<1x16x16x4xf32, #tpu.memory_space<vmem>>, vector<1x1x16x4xf32>
    %6 = vector.shape_cast %5 : vector<1x1x16x4xf32> to vector<16x4xf32>
    %c37 = arith.constant 37 : index
    %c0_9 = arith.constant 0 : index
    %7 = vector.load %arg10[%c37, %c0_9] : memref<326x4xf32, #tpu.memory_space<vmem>>, vector<16x4xf32>
    tpu.vector_store %arg10[%c37, %c0_9], %6 {strides = array<i32>} : memref<326x4xf32, #tpu.memory_space<vmem>>, vector<16x4xf32>,
    %c0_10 = arith.constant 0 : index
    %c2 = arith.constant 2 : index
    %c0_11 = arith.constant 0 : index
    %c0_12 = arith.constant 0 : index
    %8 = vector.load %arg1[%c0_10, %c2, %c0_11, %c0_12] : memref<1x16x16x4xf32, #tpu.memory_space<vmem>>, vector<1x1x16x4xf32>
    %9 = vector.shape_cast %8 : vector<1x1x16x4xf32> to vector<16x4xf32>
    %c55 = arith.constant 55 : index
    %c0_13 = arith.constant 0 : index
    %10 = vector.load %arg10[%c55, %c0_13] : memref<326x4xf32, #tpu.memory_space<vmem>>, vector<16x4xf32>
    tpu.vector_store %arg10[%c55, %c0_13], %9 {strides = array<i32>} : memref<326x4xf32, #tpu.memory_space<vmem>>, vector<16x4xf32>,
    %c0_14 = arith.constant 0 : index
    %c3 = arith.constant 3 : index
    %c0_15 = arith.constant 0 : index
    %c0_16 = arith.constant 0 : index
    %11 = vector.load %arg1[%c0_14, %c3, %c0_15, %c0_16] : memref<1x16x16x4xf32, #tpu.memory_space<vmem>>, vector<1x1x16x4xf32>
    %12 = vector.shape_cast %11 : vector<1x1x16x4xf32> to vector<16x4xf32>
    %c73 = arith.constant 73 : index
    %c0_17 = arith.constant 0 : index
    %13 = vector.load %arg10[%c73, %c0_17] : memref<326x4xf32, #tpu.memory_space<vmem>>, vector<16x4xf32>
    tpu.vector_store %arg10[%c73, %c0_17], %12 {strides = array<i32>} : memref<326x4xf32, #tpu.memory_space<vmem>>, vector<16x4xf32>,
    %c0_18 = arith.constant 0 : index
    %c4 = arith.constant 4 : index
    %c0_19 = arith.constant 0 : index
    %c0_20 = arith.constant 0 : index
    %14 = vector.load %arg1[%c0_18, %c4, %c0_19, %c0_20] : memref<1x16x16x4xf32, #tpu.memory_space<vmem>>, vector<1x1x16x4xf32>
    %15 = vector.shape_cast %14 : vector<1x1x16x4xf32> to vector<16x4xf32>
    %c91 = arith.constant 91 : index
    %c0_21 = arith.constant 0 : index
    %16 = vector.load %arg10[%c91, %c0_21] : memref<326x4xf32, #tpu.memory_space<vmem>>, vector<16x4xf32>
    tpu.vector_store %arg10[%c91, %c0_21], %15 {strides = array<i32>} : memref<326x4xf32, #tpu.memory_space<vmem>>, vector<16x4xf32>,
    %c0_22 = arith.constant 0 : index
    %c5 = arith.constant 5 : index
    %c0_23 = arith.constant 0 : index
    %c0_24 = arith.constant 0 : index
    %17 = vector.load %arg1[%c0_22, %c5, %c0_23, %c0_24] : memref<1x16x16x4xf32, #tpu.memory_space<vmem>>, vector<1x1x16x4xf32>
    %18 = vector.shape_cast %17 : vector<1x1x16x4xf32> to vector<16x4xf32>
    %c109 = arith.constant 109 : index
    %c0_25 = arith.constant 0 : index
    %19 = vector.load %arg10[%c109, %c0_25] : memref<326x4xf32, #tpu.memory_space<vmem>>, vector<16x4xf32>
    tpu.vector_store %arg10[%c109, %c0_25], %18 {strides = array<i32>} : memref<326x4xf32, #tpu.memory_space<vmem>>, vector<16x4xf32>,
    %c0_26 = arith.constant 0 : index
    %c6 = arith.constant 6 : index
    %c0_27 = arith.constant 0 : index
    %c0_28 = arith.constant 0 : index
    %20 = vector.load %arg1[%c0_26, %c6, %c0_27, %c0_28] : memref<1x16x16x4xf32, #tpu.memory_space<vmem>>, vector<1x1x16x4xf32>
    %21 = vector.shape_cast %20 : vector<1x1x16x4xf32> to vector<16x4xf32>
    %c127 = arith.constant 127 : index
    %c0_29 = arith.constant 0 : index
    %22 = vector.load %arg10[%c127, %c0_29] : memref<326x4xf32, #tpu.memory_space<vmem>>, vector<16x4xf32>
    tpu.vector_store %arg10[%c127, %c0_29], %21 {strides = array<i32>} : memref<326x4xf32, #tpu.memory_space<vmem>>, vector<16x4xf32>,
    %c0_30 = arith.constant 0 : index
    %c7 = arith.constant 7 : index
    %c0_31 = arith.constant 0 : index
    %c0_32 = arith.constant 0 : index
    %23 = vector.load %arg1[%c0_30, %c7, %c0_31, %c0_32] : memref<1x16x16x4xf32, #tpu.memory_space<vmem>>, vector<1x1x16x4xf32>
    %24 = vector.shape_cast %23 : vector<1x1x16x4xf32> to vector<16x4xf32>
    %c145 = arith.constant 145 : index
    %c0_33 = arith.constant 0 : index
    %25 = vector.load %arg10[%c145, %c0_33] : memref<326x4xf32, #tpu.memory_space<vmem>>, vector<16x4xf32>
    tpu.vector_store %arg10[%c145, %c0_33], %24 {strides = array<i32>} : memref<326x4xf32, #tpu.memory_space<vmem>>, vector<16x4xf32>,
    %c0_34 = arith.constant 0 : index
    %c8 = arith.constant 8 : index
    %c0_35 = arith.constant 0 : index
    %c0_36 = arith.constant 0 : index
    %26 = vector.load %arg1[%c0_34, %c8, %c0_35, %c0_36] : memref<1x16x16x4xf32, #tpu.memory_space<vmem>>, vector<1x1x16x4xf32>
    %27 = vector.shape_cast %26 : vector<1x1x16x4xf32> to vector<16x4xf32>
    %c163 = arith.constant 163 : index
    %c0_37 = arith.constant 0 : index
    %28 = vector.load %arg10[%c163, %c0_37] : memref<326x4xf32, #tpu.memory_space<vmem>>, vector<16x4xf32>
    tpu.vector_store %arg10[%c163, %c0_37], %27 {strides = array<i32>} : memref<326x4xf32, #tpu.memory_space<vmem>>, vector<16x4xf32>,
    %c0_38 = arith.constant 0 : index
    %c9 = arith.constant 9 : index
    %c0_39 = arith.constant 0 : index
    %c0_40 = arith.constant 0 : index
    %29 = vector.load %arg1[%c0_38, %c9, %c0_39, %c0_40] : memref<1x16x16x4xf32, #tpu.memory_space<vmem>>, vector<1x1x16x4xf32>
    %30 = vector.shape_cast %29 : vector<1x1x16x4xf32> to vector<16x4xf32>
    %c181 = arith.constant 181 : index
    %c0_41 = arith.constant 0 : index
    %31 = vector.load %arg10[%c181, %c0_41] : memref<326x4xf32, #tpu.memory_space<vmem>>, vector<16x4xf32>
    tpu.vector_store %arg10[%c181, %c0_41], %30 {strides = array<i32>} : memref<326x4xf32, #tpu.memory_space<vmem>>, vector<16x4xf32>,
    %c0_42 = arith.constant 0 : index
    %c10 = arith.constant 10 : index
    %c0_43 = arith.constant 0 : index
    %c0_44 = arith.constant 0 : index
    %32 = vector.load %arg1[%c0_42, %c10, %c0_43, %c0_44] : memref<1x16x16x4xf32, #tpu.memory_space<vmem>>, vector<1x1x16x4xf32>
    %33 = vector.shape_cast %32 : vector<1x1x16x4xf32> to vector<16x4xf32>
    %c199 = arith.constant 199 : index
    %c0_45 = arith.constant 0 : index
    %34 = vector.load %arg10[%c199, %c0_45] : memref<326x4xf32, #tpu.memory_space<vmem>>, vector<16x4xf32>
    tpu.vector_store %arg10[%c199, %c0_45], %33 {strides = array<i32>} : memref<326x4xf32, #tpu.memory_space<vmem>>, vector<16x4xf32>,
    %c0_46 = arith.constant 0 : index
    %c11 = arith.constant 11 : index
    %c0_47 = arith.constant 0 : index
    %c0_48 = arith.constant 0 : index
    %35 = vector.load %arg1[%c0_46, %c11, %c0_47, %c0_48] : memref<1x16x16x4xf32, #tpu.memory_space<vmem>>, vector<1x1x16x4xf32>
    %36 = vector.shape_cast %35 : vector<1x1x16x4xf32> to vector<16x4xf32>
    %c217 = arith.constant 217 : index
    %c0_49 = arith.constant 0 : index
    %37 = vector.load %arg10[%c217, %c0_49] : memref<326x4xf32, #tpu.memory_space<vmem>>, vector<16x4xf32>
    tpu.vector_store %arg10[%c217, %c0_49], %36 {strides = array<i32>} : memref<326x4xf32, #tpu.memory_space<vmem>>, vector<16x4xf32>,
    %c0_50 = arith.constant 0 : index
    %c12 = arith.constant 12 : index
    %c0_51 = arith.constant 0 : index
    %c0_52 = arith.constant 0 : index
    %38 = vector.load %arg1[%c0_50, %c12, %c0_51, %c0_52] : memref<1x16x16x4xf32, #tpu.memory_space<vmem>>, vector<1x1x16x4xf32>
    %39 = vector.shape_cast %38 : vector<1x1x16x4xf32> to vector<16x4xf32>
    %c235 = arith.constant 235 : index
    %c0_53 = arith.constant 0 : index
    %40 = vector.load %arg10[%c235, %c0_53] : memref<326x4xf32, #tpu.memory_space<vmem>>, vector<16x4xf32>
    tpu.vector_store %arg10[%c235, %c0_53], %39 {strides = array<i32>} : memref<326x4xf32, #tpu.memory_space<vmem>>, vector<16x4xf32>,
    %c0_54 = arith.constant 0 : index
    %c13 = arith.constant 13 : index
    %c0_55 = arith.constant 0 : index
    %c0_56 = arith.constant 0 : index
    %41 = vector.load %arg1[%c0_54, %c13, %c0_55, %c0_56] : memref<1x16x16x4xf32, #tpu.memory_space<vmem>>, vector<1x1x16x4xf32>
    %42 = vector.shape_cast %41 : vector<1x1x16x4xf32> to vector<16x4xf32>
    %c253 = arith.constant 253 : index
    %c0_57 = arith.constant 0 : index
    %43 = vector.load %arg10[%c253, %c0_57] : memref<326x4xf32, #tpu.memory_space<vmem>>, vector<16x4xf32>
    tpu.vector_store %arg10[%c253, %c0_57], %42 {strides = array<i32>} : memref<326x4xf32, #tpu.memory_space<vmem>>, vector<16x4xf32>,
    %c0_58 = arith.constant 0 : index
    %c14 = arith.constant 14 : index
    %c0_59 = arith.constant 0 : index
    %c0_60 = arith.constant 0 : index
    %44 = vector.load %arg1[%c0_58, %c14, %c0_59, %c0_60] : memref<1x16x16x4xf32, #tpu.memory_space<vmem>>, vector<1x1x16x4xf32>
    %45 = vector.shape_cast %44 : vector<1x1x16x4xf32> to vector<16x4xf32>
    %c271 = arith.constant 271 : index
    %c0_61 = arith.constant 0 : index
    %46 = vector.load %arg10[%c271, %c0_61] : memref<326x4xf32, #tpu.memory_space<vmem>>, vector<16x4xf32>
    tpu.vector_store %arg10[%c271, %c0_61], %45 {strides = array<i32>} : memref<326x4xf32, #tpu.memory_space<vmem>>, vector<16x4xf32>,
    %c0_62 = arith.constant 0 : index
    %c15 = arith.constant 15 : index
    %c0_63 = arith.constant 0 : index
    %c0_64 = arith.constant 0 : index
    %47 = vector.load %arg1[%c0_62, %c15, %c0_63, %c0_64] : memref<1x16x16x4xf32, #tpu.memory_space<vmem>>, vector<1x1x16x4xf32>
    %48 = vector.shape_cast %47 : vector<1x1x16x4xf32> to vector<16x4xf32>
    %c289 = arith.constant 289 : index
    %c0_65 = arith.constant 0 : index
    %49 = vector.load %arg10[%c289, %c0_65] : memref<326x4xf32, #tpu.memory_space<vmem>>, vector<16x4xf32>
    tpu.vector_store %arg10[%c289, %c0_65], %48 {strides = array<i32>} : memref<326x4xf32, #tpu.memory_space<vmem>>, vector<16x4xf32>,
    %cst_66 = arith.constant -1.000000e+30 : f32
    %50 = vector.broadcast %cst_66 : f32 to vector<324x32xf32>
    %c0_67 = arith.constant 0 : index
    %c0_68 = arith.constant 0 : index
    %51 = vector.load %arg11[%c0_67, %c0_68] : memref<324x32xf32, #tpu.memory_space<vmem>>, vector<324x32xf32>
    tpu.vector_store %arg11[%c0_67, %c0_68], %50 {strides = array<i32>} : memref<324x32xf32, #tpu.memory_space<vmem>>, vector<324x32xf32>,
    %cst_69 = arith.constant 0.000000e+00 : f32
    %52 = vector.broadcast %cst_69 : f32 to vector<72x32xf32>
    %c0_70 = arith.constant 0 : index
    %c0_71 = arith.constant 0 : index
    %53 = vector.load %arg10[%c0_70, %c0_71] : memref<326x4xf32, #tpu.memory_space<vmem>>, vector<72x4xf32>
    %c0_72 = arith.constant 0 : index
    %c0_73 = arith.constant 0 : index
    %c0_74 = arith.constant 0 : index
    %54 = vector.load %arg2[%c0_72, %c0_73, %c0_74] : memref<9x4x32xf32, #tpu.memory_space<vmem>>, vector<1x4x32xf32>
    %55 = vector.shape_cast %54 : vector<1x4x32xf32> to vector<4x32xf32>
    %cst_75 = arith.constant dense<0.000000e+00> : vector<72x32xf32>
    %56 = tpu.matmul %53, %55, %cst_75 {dimension_numbers = #tpu.dot_dimension_numbers<[1], [0], [0], [1], [0, 0, 1, 1], [], []>} : vector<72x4xf32>, vector<4x32xf32>, vector<72x32xf32> -> vector<72x32xf32>
    %57 = arith.addf %52, %56 : vector<72x32xf32>
    %c1_76 = arith.constant 1 : index
    %c0_77 = arith.constant 0 : index
    %58 = vector.load %arg10[%c1_76, %c0_77] : memref<326x4xf32, #tpu.memory_space<vmem>>, vector<72x4xf32>
    %c1_78 = arith.constant 1 : index
    %c0_79 = arith.constant 0 : index
    %c0_80 = arith.constant 0 : index
    %59 = vector.load %arg2[%c1_78, %c0_79, %c0_80] : memref<9x4x32xf32, #tpu.memory_space<vmem>>, vector<1x4x32xf32>
    %60 = vector.shape_cast %59 : vector<1x4x32xf32> to vector<4x32xf32>
    %cst_81 = arith.constant dense<0.000000e+00> : vector<72x32xf32>
    %61 = tpu.matmul %58, %60, %cst_81 {dimension_numbers = #tpu.dot_dimension_numbers<[1], [0], [0], [1], [0, 0, 1, 1], [], []>} : vector<72x4xf32>, vector<4x32xf32>, vector<72x32xf32> -> vector<72x32xf32>
    %62 = arith.addf %57, %61 : vector<72x32xf32>
    %c2_82 = arith.constant 2 : index
    %c0_83 = arith.constant 0 : index
    %63 = vector.load %arg10[%c2_82, %c0_83] : memref<326x4xf32, #tpu.memory_space<vmem>>, vector<72x4xf32>
    %c2_84 = arith.constant 2 : index
    %c0_85 = arith.constant 0 : index
    %c0_86 = arith.constant 0 : index
    %64 = vector.load %arg2[%c2_84, %c0_85, %c0_86] : memref<9x4x32xf32, #tpu.memory_space<vmem>>, vector<1x4x32xf32>
    %65 = vector.shape_cast %64 : vector<1x4x32xf32> to vector<4x32xf32>
    %cst_87 = arith.constant dense<0.000000e+00> : vector<72x32xf32>
    %66 = tpu.matmul %63, %65, %cst_87 {dimension_numbers = #tpu.dot_dimension_numbers<[1], [0], [0], [1], [0, 0, 1, 1], [], []>} : vector<72x4xf32>, vector<4x32xf32>, vector<72x32xf32> -> vector<72x32xf32>
    %67 = arith.addf %62, %66 : vector<72x32xf32>
    %c18 = arith.constant 18 : index
    %c0_88 = arith.constant 0 : index
    %68 = vector.load %arg10[%c18, %c0_88] : memref<326x4xf32, #tpu.memory_space<vmem>>, vector<72x4xf32>
    %c3_89 = arith.constant 3 : index
    %c0_90 = arith.constant 0 : index
    %c0_91 = arith.constant 0 : index
    %69 = vector.load %arg2[%c3_89, %c0_90, %c0_91] : memref<9x4x32xf32, #tpu.memory_space<vmem>>, vector<1x4x32xf32>
    %70 = vector.shape_cast %69 : vector<1x4x32xf32> to vector<4x32xf32>
    %cst_92 = arith.constant dense<0.000000e+00> : vector<72x32xf32>
    %71 = tpu.matmul %68, %70, %cst_92 {dimension_numbers = #tpu.dot_dimension_numbers<[1], [0], [0], [1], [0, 0, 1, 1], [], []>} : vector<72x4xf32>, vector<4x32xf32>, vector<72x32xf32> -> vector<72x32xf32>
    %72 = arith.addf %67, %71 : vector<72x32xf32>
    %c19_93 = arith.constant 19 : index
    %c0_94 = arith.constant 0 : index
    %73 = vector.load %arg10[%c19_93, %c0_94] : memref<326x4xf32, #tpu.memory_space<vmem>>, vector<72x4xf32>
    %c4_95 = arith.constant 4 : index
    %c0_96 = arith.constant 0 : index
    %c0_97 = arith.constant 0 : index
    %74 = vector.load %arg2[%c4_95, %c0_96, %c0_97] : memref<9x4x32xf32, #tpu.memory_space<vmem>>, vector<1x4x32xf32>
    %75 = vector.shape_cast %74 : vector<1x4x32xf32> to vector<4x32xf32>
    %cst_98 = arith.constant dense<0.000000e+00> : vector<72x32xf32>
    %76 = tpu.matmul %73, %75, %cst_98 {dimension_numbers = #tpu.dot_dimension_numbers<[1], [0], [0], [1], [0, 0, 1, 1], [], []>} : vector<72x4xf32>, vector<4x32xf32>, vector<72x32xf32> -> vector<72x32xf32>
    %77 = arith.addf %72, %76 : vector<72x32xf32>
    %c20 = arith.constant 20 : index
    %c0_99 = arith.constant 0 : index
    %78 = vector.load %arg10[%c20, %c0_99] : memref<326x4xf32, #tpu.memory_space<vmem>>, vector<72x4xf32>
    %c5_100 = arith.constant 5 : index
    %c0_101 = arith.constant 0 : index
    %c0_102 = arith.constant 0 : index
    %79 = vector.load %arg2[%c5_100, %c0_101, %c0_102] : memref<9x4x32xf32, #tpu.memory_space<vmem>>, vector<1x4x32xf32>
    %80 = vector.shape_cast %79 : vector<1x4x32xf32> to vector<4x32xf32>
    %cst_103 = arith.constant dense<0.000000e+00> : vector<72x32xf32>
    %81 = tpu.matmul %78, %80, %cst_103 {dimension_numbers = #tpu.dot_dimension_numbers<[1], [0], [0], [1], [0, 0, 1, 1], [], []>} : vector<72x4xf32>, vector<4x32xf32>, vector<72x32xf32> -> vector<72x32xf32>
    %82 = arith.addf %77, %81 : vector<72x32xf32>
    %c36 = arith.constant 36 : index
    %c0_104 = arith.constant 0 : index
    %83 = vector.load %arg10[%c36, %c0_104] : memref<326x4xf32, #tpu.memory_space<vmem>>, vector<72x4xf32>
    %c6_105 = arith.constant 6 : index
    %c0_106 = arith.constant 0 : index
    %c0_107 = arith.constant 0 : index
    %84 = vector.load %arg2[%c6_105, %c0_106, %c0_107] : memref<9x4x32xf32, #tpu.memory_space<vmem>>, vector<1x4x32xf32>
    %85 = vector.shape_cast %84 : vector<1x4x32xf32> to vector<4x32xf32>
    %cst_108 = arith.constant dense<0.000000e+00> : vector<72x32xf32>
    %86 = tpu.matmul %83, %85, %cst_108 {dimension_numbers = #tpu.dot_dimension_numbers<[1], [0], [0], [1], [0, 0, 1, 1], [], []>} : vector<72x4xf32>, vector<4x32xf32>, vector<72x32xf32> -> vector<72x32xf32>
    %87 = arith.addf %82, %86 : vector<72x32xf32>
    %c37_109 = arith.constant 37 : index
    %c0_110 = arith.constant 0 : index
    %88 = vector.load %arg10[%c37_109, %c0_110] : memref<326x4xf32, #tpu.memory_space<vmem>>, vector<72x4xf32>
    %c7_111 = arith.constant 7 : index
    %c0_112 = arith.constant 0 : index
    %c0_113 = arith.constant 0 : index
    %89 = vector.load %arg2[%c7_111, %c0_112, %c0_113] : memref<9x4x32xf32, #tpu.memory_space<vmem>>, vector<1x4x32xf32>
    %90 = vector.shape_cast %89 : vector<1x4x32xf32> to vector<4x32xf32>
    %cst_114 = arith.constant dense<0.000000e+00> : vector<72x32xf32>
    %91 = tpu.matmul %88, %90, %cst_114 {dimension_numbers = #tpu.dot_dimension_numbers<[1], [0], [0], [1], [0, 0, 1, 1], [], []>} : vector<72x4xf32>, vector<4x32xf32>, vector<72x32xf32> -> vector<72x32xf32>
    %92 = arith.addf %87, %91 : vector<72x32xf32>
    %c38 = arith.constant 38 : index
    %c0_115 = arith.constant 0 : index
    %93 = vector.load %arg10[%c38, %c0_115] : memref<326x4xf32, #tpu.memory_space<vmem>>, vector<72x4xf32>
    %c8_116 = arith.constant 8 : index
    %c0_117 = arith.constant 0 : index
    %c0_118 = arith.constant 0 : index
    %94 = vector.load %arg2[%c8_116, %c0_117, %c0_118] : memref<9x4x32xf32, #tpu.memory_space<vmem>>, vector<1x4x32xf32>
    %95 = vector.shape_cast %94 : vector<1x4x32xf32> to vector<4x32xf32>
    %cst_119 = arith.constant dense<0.000000e+00> : vector<72x32xf32>
    %96 = tpu.matmul %93, %95, %cst_119 {dimension_numbers = #tpu.dot_dimension_numbers<[1], [0], [0], [1], [0, 0, 1, 1], [], []>} : vector<72x4xf32>, vector<4x32xf32>, vector<72x32xf32> -> vector<72x32xf32>
    %97 = arith.addf %92, %96 : vector<72x32xf32>
    %c0_120 = arith.constant 0 : index
    %c0_121 = arith.constant 0 : index
    %98 = vector.load %arg3[%c0_120, %c0_121] : memref<1x32xf32, #tpu.memory_space<vmem>>, vector<1x32xf32>
    %99 = vector.broadcast %98 : vector<1x32xf32> to vector<72x32xf32>
    %100 = arith.addf %97, %99 : vector<72x32xf32>
    %c0_122 = arith.constant 0 : index
    %c0_123 = arith.constant 0 : index
    %101 = vector.load %arg6[%c0_122, %c0_123] : memref<288x1xf32, #tpu.memory_space<vmem>>, vector<72x1xf32>
    %102 = vector.broadcast %101 : vector<72x1xf32> to vector<72x32xf32>
    %103 = arith.addf %100, %102 : vector<72x32xf32>
    %c18_124 = arith.constant 18 : index
    %c0_125 = arith.constant 0 : index
    %104 = vector.load %arg11[%c18_124, %c0_125] : memref<324x32xf32, #tpu.memory_space<vmem>>, vector<72x32xf32>
    tpu.vector_store %arg11[%c18_124, %c0_125], %103 {strides = array<i32>} : memref<324x32xf32, #tpu.memory_space<vmem>>, vector<72x32xf32>,
    %cst_126 = arith.constant 0.000000e+00 : f32
    %105 = vector.broadcast %cst_126 : f32 to vector<72x32xf32>
    %c72 = arith.constant 72 : index
    %c0_127 = arith.constant 0 : index
    %106 = vector.load %arg10[%c72, %c0_127] : memref<326x4xf32, #tpu.memory_space<vmem>>, vector<72x4xf32>
    %c0_128 = arith.constant 0 : index
    %c0_129 = arith.constant 0 : index
    %c0_130 = arith.constant 0 : index
    %107 = vector.load %arg2[%c0_128, %c0_129, %c0_130] : memref<9x4x32xf32, #tpu.memory_space<vmem>>, vector<1x4x32xf32>
    %108 = vector.shape_cast %107 : vector<1x4x32xf32> to vector<4x32xf32>
    %cst_131 = arith.constant dense<0.000000e+00> : vector<72x32xf32>
    %109 = tpu.matmul %106, %108, %cst_131 {dimension_numbers = #tpu.dot_dimension_numbers<[1], [0], [0], [1], [0, 0, 1, 1], [], []>} : vector<72x4xf32>, vector<4x32xf32>, vector<72x32xf32> -> vector<72x32xf32>
    %110 = arith.addf %105, %109 : vector<72x32xf32>
    %c73_132 = arith.constant 73 : index
    %c0_133 = arith.constant 0 : index
    %111 = vector.load %arg10[%c73_132, %c0_133] : memref<326x4xf32, #tpu.memory_space<vmem>>, vector<72x4xf32>
    %c1_134 = arith.constant 1 : index
    %c0_135 = arith.constant 0 : index
    %c0_136 = arith.constant 0 : index
    %112 = vector.load %arg2[%c1_134, %c0_135, %c0_136] : memref<9x4x32xf32, #tpu.memory_space<vmem>>, vector<1x4x32xf32>
    %113 = vector.shape_cast %112 : vector<1x4x32xf32> to vector<4x32xf32>
    %cst_137 = arith.constant dense<0.000000e+00> : vector<72x32xf32>
    %114 = tpu.matmul %111, %113, %cst_137 {dimension_numbers = #tpu.dot_dimension_numbers<[1], [0], [0], [1], [0, 0, 1, 1], [], []>} : vector<72x4xf32>, vector<4x32xf32>, vector<72x32xf32> -> vector<72x32xf32>
    %115 = arith.addf %110, %114 : vector<72x32xf32>
    %c74 = arith.constant 74 : index
    %c0_138 = arith.constant 0 : index
    %116 = vector.load %arg10[%c74, %c0_138] : memref<326x4xf32, #tpu.memory_space<vmem>>, vector<72x4xf32>
    %c2_139 = arith.constant 2 : index
    %c0_140 = arith.constant 0 : index
    %c0_141 = arith.constant 0 : index
    %117 = vector.load %arg2[%c2_139, %c0_140, %c0_141] : memref<9x4x32xf32, #tpu.memory_space<vmem>>, vector<1x4x32xf32>
    %118 = vector.shape_cast %117 : vector<1x4x32xf32> to vector<4x32xf32>
    %cst_142 = arith.constant dense<0.000000e+00> : vector<72x32xf32>
    %119 = tpu.matmul %116, %118, %cst_142 {dimension_numbers = #tpu.dot_dimension_numbers<[1], [0], [0], [1], [0, 0, 1, 1], [], []>} : vector<72x4xf32>, vector<4x32xf32>, vector<72x32xf32> -> vector<72x32xf32>
    %120 = arith.addf %115, %119 : vector<72x32xf32>
    %c90 = arith.constant 90 : index
    %c0_143 = arith.constant 0 : index
    %121 = vector.load %arg10[%c90, %c0_143] : memref<326x4xf32, #tpu.memory_space<vmem>>, vector<72x4xf32>
    %c3_144 = arith.constant 3 : index
    %c0_145 = arith.constant 0 : index
    %c0_146 = arith.constant 0 : index
    %122 = vector.load %arg2[%c3_144, %c0_145, %c0_146] : memref<9x4x32xf32, #tpu.memory_space<vmem>>, vector<1x4x32xf32>
    %123 = vector.shape_cast %122 : vector<1x4x32xf32> to vector<4x32xf32>
    %cst_147 = arith.constant dense<0.000000e+00> : vector<72x32xf32>
    %124 = tpu.matmul %121, %123, %cst_147 {dimension_numbers = #tpu.dot_dimension_numbers<[1], [0], [0], [1], [0, 0, 1, 1], [], []>} : vector<72x4xf32>, vector<4x32xf32>, vector<72x32xf32> -> vector<72x32xf32>
    %125 = arith.addf %120, %124 : vector<72x32xf32>
    %c91_148 = arith.constant 91 : index
    %c0_149 = arith.constant 0 : index
    %126 = vector.load %arg10[%c91_148, %c0_149] : memref<326x4xf32, #tpu.memory_space<vmem>>, vector<72x4xf32>
    %c4_150 = arith.constant 4 : index
    %c0_151 = arith.constant 0 : index
    %c0_152 = arith.constant 0 : index
    %127 = vector.load %arg2[%c4_150, %c0_151, %c0_152] : memref<9x4x32xf32, #tpu.memory_space<vmem>>, vector<1x4x32xf32>
    %128 = vector.shape_cast %127 : vector<1x4x32xf32> to vector<4x32xf32>
    %cst_153 = arith.constant dense<0.000000e+00> : vector<72x32xf32>
    %129 = tpu.matmul %126, %128, %cst_153 {dimension_numbers = #tpu.dot_dimension_numbers<[1], [0], [0], [1], [0, 0, 1, 1], [], []>} : vector<72x4xf32>, vector<4x32xf32>, vector<72x32xf32> -> vector<72x32xf32>
    %130 = arith.addf %125, %129 : vector<72x32xf32>
    %c92 = arith.constant 92 : index
    %c0_154 = arith.constant 0 : index
    %131 = vector.load %arg10[%c92, %c0_154] : memref<326x4xf32, #tpu.memory_space<vmem>>, vector<72x4xf32>
    %c5_155 = arith.constant 5 : index
    %c0_156 = arith.constant 0 : index
    %c0_157 = arith.constant 0 : index
    %132 = vector.load %arg2[%c5_155, %c0_156, %c0_157] : memref<9x4x32xf32, #tpu.memory_space<vmem>>, vector<1x4x32xf32>
    %133 = vector.shape_cast %132 : vector<1x4x32xf32> to vector<4x32xf32>
    %cst_158 = arith.constant dense<0.000000e+00> : vector<72x32xf32>
    %134 = tpu.matmul %131, %133, %cst_158 {dimension_numbers = #tpu.dot_dimension_numbers<[1], [0], [0], [1], [0, 0, 1, 1], [], []>} : vector<72x4xf32>, vector<4x32xf32>, vector<72x32xf32> -> vector<72x32xf32>
    %135 = arith.addf %130, %134 : vector<72x32xf32>
    %c108 = arith.constant 108 : index
    %c0_159 = arith.constant 0 : index
    %136 = vector.load %arg10[%c108, %c0_159] : memref<326x4xf32, #tpu.memory_space<vmem>>, vector<72x4xf32>
    %c6_160 = arith.constant 6 : index
    %c0_161 = arith.constant 0 : index
    %c0_162 = arith.constant 0 : index
    %137 = vector.load %arg2[%c6_160, %c0_161, %c0_162] : memref<9x4x32xf32, #tpu.memory_space<vmem>>, vector<1x4x32xf32>
    %138 = vector.shape_cast %137 : vector<1x4x32xf32> to vector<4x32xf32>
    %cst_163 = arith.constant dense<0.000000e+00> : vector<72x32xf32>
    %139 = tpu.matmul %136, %138, %cst_163 {dimension_numbers = #tpu.dot_dimension_numbers<[1], [0], [0], [1], [0, 0, 1, 1], [], []>} : vector<72x4xf32>, vector<4x32xf32>, vector<72x32xf32> -> vector<72x32xf32>
    %140 = arith.addf %135, %139 : vector<72x32xf32>
    %c109_164 = arith.constant 109 : index
    %c0_165 = arith.constant 0 : index
    %141 = vector.load %arg10[%c109_164, %c0_165] : memref<326x4xf32, #tpu.memory_space<vmem>>, vector<72x4xf32>
    %c7_166 = arith.constant 7 : index
    %c0_167 = arith.constant 0 : index
    %c0_168 = arith.constant 0 : index
    %142 = vector.load %arg2[%c7_166, %c0_167, %c0_168] : memref<9x4x32xf32, #tpu.memory_space<vmem>>, vector<1x4x32xf32>
    %143 = vector.shape_cast %142 : vector<1x4x32xf32> to vector<4x32xf32>
    %cst_169 = arith.constant dense<0.000000e+00> : vector<72x32xf32>
    %144 = tpu.matmul %141, %143, %cst_169 {dimension_numbers = #tpu.dot_dimension_numbers<[1], [0], [0], [1], [0, 0, 1, 1], [], []>} : vector<72x4xf32>, vector<4x32xf32>, vector<72x32xf32> -> vector<72x32xf32>
    %145 = arith.addf %140, %144 : vector<72x32xf32>
    %c110 = arith.constant 110 : index
    %c0_170 = arith.constant 0 : index
    %146 = vector.load %arg10[%c110, %c0_170] : memref<326x4xf32, #tpu.memory_space<vmem>>, vector<72x4xf32>
    %c8_171 = arith.constant 8 : index
    %c0_172 = arith.constant 0 : index
    %c0_173 = arith.constant 0 : index
    %147 = vector.load %arg2[%c8_171, %c0_172, %c0_173] : memref<9x4x32xf32, #tpu.memory_space<vmem>>, vector<1x4x32xf32>
    %148 = vector.shape_cast %147 : vector<1x4x32xf32> to vector<4x32xf32>
    %cst_174 = arith.constant dense<0.000000e+00> : vector<72x32xf32>
    %149 = tpu.matmul %146, %148, %cst_174 {dimension_numbers = #tpu.dot_dimension_numbers<[1], [0], [0], [1], [0, 0, 1, 1], [], []>} : vector<72x4xf32>, vector<4x32xf32>, vector<72x32xf32> -> vector<72x32xf32>
    %150 = arith.addf %145, %149 : vector<72x32xf32>
    %c0_175 = arith.constant 0 : index
    %c0_176 = arith.constant 0 : index
    %151 = vector.load %arg3[%c0_175, %c0_176] : memref<1x32xf32, #tpu.memory_space<vmem>>, vector<1x32xf32>
    %152 = vector.broadcast %151 : vector<1x32xf32> to vector<72x32xf32>
    %153 = arith.addf %150, %152 : vector<72x32xf32>
    %c72_177 = arith.constant 72 : index
    %c0_178 = arith.constant 0 : index
    %154 = vector.load %arg6[%c72_177, %c0_178] : memref<288x1xf32, #tpu.memory_space<vmem>>, vector<72x1xf32>
    %155 = vector.broadcast %154 : vector<72x1xf32> to vector<72x32xf32>
    %156 = arith.addf %153, %155 : vector<72x32xf32>
    %c90_179 = arith.constant 90 : index
    %c0_180 = arith.constant 0 : index
    %157 = vector.load %arg11[%c90_179, %c0_180] : memref<324x32xf32, #tpu.memory_space<vmem>>, vector<72x32xf32>
    tpu.vector_store %arg11[%c90_179, %c0_180], %156 {strides = array<i32>} : memref<324x32xf32, #tpu.memory_space<vmem>>, vector<72x32xf32>,
    %cst_181 = arith.constant 0.000000e+00 : f32
    %158 = vector.broadcast %cst_181 : f32 to vector<72x32xf32>
    %c144 = arith.constant 144 : index
    %c0_182 = arith.constant 0 : index
    %159 = vector.load %arg10[%c144, %c0_182] : memref<326x4xf32, #tpu.memory_space<vmem>>, vector<72x4xf32>
    %c0_183 = arith.constant 0 : index
    %c0_184 = arith.constant 0 : index
    %c0_185 = arith.constant 0 : index
    %160 = vector.load %arg2[%c0_183, %c0_184, %c0_185] : memref<9x4x32xf32, #tpu.memory_space<vmem>>, vector<1x4x32xf32>
    %161 = vector.shape_cast %160 : vector<1x4x32xf32> to vector<4x32xf32>
    %cst_186 = arith.constant dense<0.000000e+00> : vector<72x32xf32>
    %162 = tpu.matmul %159, %161, %cst_186 {dimension_numbers = #tpu.dot_dimension_numbers<[1], [0], [0], [1], [0, 0, 1, 1], [], []>} : vector<72x4xf32>, vector<4x32xf32>, vector<72x32xf32> -> vector<72x32xf32>
    %163 = arith.addf %158, %162 : vector<72x32xf32>
    %c145_187 = arith.constant 145 : index
    %c0_188 = arith.constant 0 : index
    %164 = vector.load %arg10[%c145_187, %c0_188] : memref<326x4xf32, #tpu.memory_space<vmem>>, vector<72x4xf32>
    %c1_189 = arith.constant 1 : index
    %c0_190 = arith.constant 0 : index
    %c0_191 = arith.constant 0 : index
    %165 = vector.load %arg2[%c1_189, %c0_190, %c0_191] : memref<9x4x32xf32, #tpu.memory_space<vmem>>, vector<1x4x32xf32>
    %166 = vector.shape_cast %165 : vector<1x4x32xf32> to vector<4x32xf32>
    %cst_192 = arith.constant dense<0.000000e+00> : vector<72x32xf32>
    %167 = tpu.matmul %164, %166, %cst_192 {dimension_numbers = #tpu.dot_dimension_numbers<[1], [0], [0], [1], [0, 0, 1, 1], [], []>} : vector<72x4xf32>, vector<4x32xf32>, vector<72x32xf32> -> vector<72x32xf32>
    %168 = arith.addf %163, %167 : vector<72x32xf32>
    %c146 = arith.constant 146 : index
    %c0_193 = arith.constant 0 : index
    %169 = vector.load %arg10[%c146, %c0_193] : memref<326x4xf32, #tpu.memory_space<vmem>>, vector<72x4xf32>
    %c2_194 = arith.constant 2 : index
    %c0_195 = arith.constant 0 : index
    %c0_196 = arith.constant 0 : index
    %170 = vector.load %arg2[%c2_194, %c0_195, %c0_196] : memref<9x4x32xf32, #tpu.memory_space<vmem>>, vector<1x4x32xf32>
    %171 = vector.shape_cast %170 : vector<1x4x32xf32> to vector<4x32xf32>
    %cst_197 = arith.constant dense<0.000000e+00> : vector<72x32xf32>
    %172 = tpu.matmul %169, %171, %cst_197 {dimension_numbers = #tpu.dot_dimension_numbers<[1], [0], [0], [1], [0, 0, 1, 1], [], []>} : vector<72x4xf32>, vector<4x32xf32>, vector<72x32xf32> -> vector<72x32xf32>
    %173 = arith.addf %168, %172 : vector<72x32xf32>
    %c162 = arith.constant 162 : index
    %c0_198 = arith.constant 0 : index
    %174 = vector.load %arg10[%c162, %c0_198] : memref<326x4xf32, #tpu.memory_space<vmem>>, vector<72x4xf32>
    %c3_199 = arith.constant 3 : index
    %c0_200 = arith.constant 0 : index
    %c0_201 = arith.constant 0 : index
    %175 = vector.load %arg2[%c3_199, %c0_200, %c0_201] : memref<9x4x32xf32, #tpu.memory_space<vmem>>, vector<1x4x32xf32>
    %176 = vector.shape_cast %175 : vector<1x4x32xf32> to vector<4x32xf32>
    %cst_202 = arith.constant dense<0.000000e+00> : vector<72x32xf32>
    %177 = tpu.matmul %174, %176, %cst_202 {dimension_numbers = #tpu.dot_dimension_numbers<[1], [0], [0], [1], [0, 0, 1, 1], [], []>} : vector<72x4xf32>, vector<4x32xf32>, vector<72x32xf32> -> vector<72x32xf32>
    %178 = arith.addf %173, %177 : vector<72x32xf32>
    %c163_203 = arith.constant 163 : index
    %c0_204 = arith.constant 0 : index
    %179 = vector.load %arg10[%c163_203, %c0_204] : memref<326x4xf32, #tpu.memory_space<vmem>>, vector<72x4xf32>
    %c4_205 = arith.constant 4 : index
    %c0_206 = arith.constant 0 : index
    %c0_207 = arith.constant 0 : index
    %180 = vector.load %arg2[%c4_205, %c0_206, %c0_207] : memref<9x4x32xf32, #tpu.memory_space<vmem>>, vector<1x4x32xf32>
    %181 = vector.shape_cast %180 : vector<1x4x32xf32> to vector<4x32xf32>
    %cst_208 = arith.constant dense<0.000000e+00> : vector<72x32xf32>
    %182 = tpu.matmul %179, %181, %cst_208 {dimension_numbers = #tpu.dot_dimension_numbers<[1], [0], [0], [1], [0, 0, 1, 1], [], []>} : vector<72x4xf32>, vector<4x32xf32>, vector<72x32xf32> -> vector<72x32xf32>
    %183 = arith.addf %178, %182 : vector<72x32xf32>
    %c164 = arith.constant 164 : index
    %c0_209 = arith.constant 0 : index
    %184 = vector.load %arg10[%c164, %c0_209] : memref<326x4xf32, #tpu.memory_space<vmem>>, vector<72x4xf32>
    %c5_210 = arith.constant 5 : index
    %c0_211 = arith.constant 0 : index
    %c0_212 = arith.constant 0 : index
    %185 = vector.load %arg2[%c5_210, %c0_211, %c0_212] : memref<9x4x32xf32, #tpu.memory_space<vmem>>, vector<1x4x32xf32>
    %186 = vector.shape_cast %185 : vector<1x4x32xf32> to vector<4x32xf32>
    %cst_213 = arith.constant dense<0.000000e+00> : vector<72x32xf32>
    %187 = tpu.matmul %184, %186, %cst_213 {dimension_numbers = #tpu.dot_dimension_numbers<[1], [0], [0], [1], [0, 0, 1, 1], [], []>} : vector<72x4xf32>, vector<4x32xf32>, vector<72x32xf32> -> vector<72x32xf32>
    %188 = arith.addf %183, %187 : vector<72x32xf32>
    %c180 = arith.constant 180 : index
    %c0_214 = arith.constant 0 : index
    %189 = vector.load %arg10[%c180, %c0_214] : memref<326x4xf32, #tpu.memory_space<vmem>>, vector<72x4xf32>
    %c6_215 = arith.constant 6 : index
    %c0_216 = arith.constant 0 : index
    %c0_217 = arith.constant 0 : index
    %190 = vector.load %arg2[%c6_215, %c0_216, %c0_217] : memref<9x4x32xf32, #tpu.memory_space<vmem>>, vector<1x4x32xf32>
    %191 = vector.shape_cast %190 : vector<1x4x32xf32> to vector<4x32xf32>
    %cst_218 = arith.constant dense<0.000000e+00> : vector<72x32xf32>
    %192 = tpu.matmul %189, %191, %cst_218 {dimension_numbers = #tpu.dot_dimension_numbers<[1], [0], [0], [1], [0, 0, 1, 1], [], []>} : vector<72x4xf32>, vector<4x32xf32>, vector<72x32xf32> -> vector<72x32xf32>
    %193 = arith.addf %188, %192 : vector<72x32xf32>
    %c181_219 = arith.constant 181 : index
    %c0_220 = arith.constant 0 : index
    %194 = vector.load %arg10[%c181_219, %c0_220] : memref<326x4xf32, #tpu.memory_space<vmem>>, vector<72x4xf32>
    %c7_221 = arith.constant 7 : index
    %c0_222 = arith.constant 0 : index
    %c0_223 = arith.constant 0 : index
    %195 = vector.load %arg2[%c7_221, %c0_222, %c0_223] : memref<9x4x32xf32, #tpu.memory_space<vmem>>, vector<1x4x32xf32>
    %196 = vector.shape_cast %195 : vector<1x4x32xf32> to vector<4x32xf32>
    %cst_224 = arith.constant dense<0.000000e+00> : vector<72x32xf32>
    %197 = tpu.matmul %194, %196, %cst_224 {dimension_numbers = #tpu.dot_dimension_numbers<[1], [0], [0], [1], [0, 0, 1, 1], [], []>} : vector<72x4xf32>, vector<4x32xf32>, vector<72x32xf32> -> vector<72x32xf32>
    %198 = arith.addf %193, %197 : vector<72x32xf32>
    %c182 = arith.constant 182 : index
    %c0_225 = arith.constant 0 : index
    %199 = vector.load %arg10[%c182, %c0_225] : memref<326x4xf32, #tpu.memory_space<vmem>>, vector<72x4xf32>
    %c8_226 = arith.constant 8 : index
    %c0_227 = arith.constant 0 : index
    %c0_228 = arith.constant 0 : index
    %200 = vector.load %arg2[%c8_226, %c0_227, %c0_228] : memref<9x4x32xf32, #tpu.memory_space<vmem>>, vector<1x4x32xf32>
    %201 = vector.shape_cast %200 : vector<1x4x32xf32> to vector<4x32xf32>
    %cst_229 = arith.constant dense<0.000000e+00> : vector<72x32xf32>
    %202 = tpu.matmul %199, %201, %cst_229 {dimension_numbers = #tpu.dot_dimension_numbers<[1], [0], [0], [1], [0, 0, 1, 1], [], []>} : vector<72x4xf32>, vector<4x32xf32>, vector<72x32xf32> -> vector<72x32xf32>
    %203 = arith.addf %198, %202 : vector<72x32xf32>
    %c0_230 = arith.constant 0 : index
    %c0_231 = arith.constant 0 : index
    %204 = vector.load %arg3[%c0_230, %c0_231] : memref<1x32xf32, #tpu.memory_space<vmem>>, vector<1x32xf32>
    %205 = vector.broadcast %204 : vector<1x32xf32> to vector<72x32xf32>
    %206 = arith.addf %203, %205 : vector<72x32xf32>
    %c144_232 = arith.constant 144 : index
    %c0_233 = arith.constant 0 : index
    %207 = vector.load %arg6[%c144_232, %c0_233] : memref<288x1xf32, #tpu.memory_space<vmem>>, vector<72x1xf32>
    %208 = vector.broadcast %207 : vector<72x1xf32> to vector<72x32xf32>
    %209 = arith.addf %206, %208 : vector<72x32xf32>
    %c162_234 = arith.constant 162 : index
    %c0_235 = arith.constant 0 : index
    %210 = vector.load %arg11[%c162_234, %c0_235] : memref<324x32xf32, #tpu.memory_space<vmem>>, vector<72x32xf32>
    tpu.vector_store %arg11[%c162_234, %c0_235], %209 {strides = array<i32>} : memref<324x32xf32, #tpu.memory_space<vmem>>, vector<72x32xf32>,
    %cst_236 = arith.constant 0.000000e+00 : f32
    %211 = vector.broadcast %cst_236 : f32 to vector<72x32xf32>
    %c216 = arith.constant 216 : index
    %c0_237 = arith.constant 0 : index
    %212 = vector.load %arg10[%c216, %c0_237] : memref<326x4xf32, #tpu.memory_space<vmem>>, vector<72x4xf32>
    %c0_238 = arith.constant 0 : index
    %c0_239 = arith.constant 0 : index
    %c0_240 = arith.constant 0 : index
    %213 = vector.load %arg2[%c0_238, %c0_239, %c0_240] : memref<9x4x32xf32, #tpu.memory_space<vmem>>, vector<1x4x32xf32>
    %214 = vector.shape_cast %213 : vector<1x4x32xf32> to vector<4x32xf32>
    %cst_241 = arith.constant dense<0.000000e+00> : vector<72x32xf32>
    %215 = tpu.matmul %212, %214, %cst_241 {dimension_numbers = #tpu.dot_dimension_numbers<[1], [0], [0], [1], [0, 0, 1, 1], [], []>} : vector<72x4xf32>, vector<4x32xf32>, vector<72x32xf32> -> vector<72x32xf32>
    %216 = arith.addf %211, %215 : vector<72x32xf32>
    %c217_242 = arith.constant 217 : index
    %c0_243 = arith.constant 0 : index
    %217 = vector.load %arg10[%c217_242, %c0_243] : memref<326x4xf32, #tpu.memory_space<vmem>>, vector<72x4xf32>
    %c1_244 = arith.constant 1 : index
    %c0_245 = arith.constant 0 : index
    %c0_246 = arith.constant 0 : index
    %218 = vector.load %arg2[%c1_244, %c0_245, %c0_246] : memref<9x4x32xf32, #tpu.memory_space<vmem>>, vector<1x4x32xf32>
    %219 = vector.shape_cast %218 : vector<1x4x32xf32> to vector<4x32xf32>
    %cst_247 = arith.constant dense<0.000000e+00> : vector<72x32xf32>
    %220 = tpu.matmul %217, %219, %cst_247 {dimension_numbers = #tpu.dot_dimension_numbers<[1], [0], [0], [1], [0, 0, 1, 1], [], []>} : vector<72x4xf32>, vector<4x32xf32>, vector<72x32xf32> -> vector<72x32xf32>
    %221 = arith.addf %216, %220 : vector<72x32xf32>
    %c218 = arith.constant 218 : index
    %c0_248 = arith.constant 0 : index
    %222 = vector.load %arg10[%c218, %c0_248] : memref<326x4xf32, #tpu.memory_space<vmem>>, vector<72x4xf32>
    %c2_249 = arith.constant 2 : index
    %c0_250 = arith.constant 0 : index
    %c0_251 = arith.constant 0 : index
    %223 = vector.load %arg2[%c2_249, %c0_250, %c0_251] : memref<9x4x32xf32, #tpu.memory_space<vmem>>, vector<1x4x32xf32>
    %224 = vector.shape_cast %223 : vector<1x4x32xf32> to vector<4x32xf32>
    %cst_252 = arith.constant dense<0.000000e+00> : vector<72x32xf32>
    %225 = tpu.matmul %222, %224, %cst_252 {dimension_numbers = #tpu.dot_dimension_numbers<[1], [0], [0], [1], [0, 0, 1, 1], [], []>} : vector<72x4xf32>, vector<4x32xf32>, vector<72x32xf32> -> vector<72x32xf32>
    %226 = arith.addf %221, %225 : vector<72x32xf32>
    %c234 = arith.constant 234 : index
    %c0_253 = arith.constant 0 : index
    %227 = vector.load %arg10[%c234, %c0_253] : memref<326x4xf32, #tpu.memory_space<vmem>>, vector<72x4xf32>
    %c3_254 = arith.constant 3 : index
    %c0_255 = arith.constant 0 : index
    %c0_256 = arith.constant 0 : index
    %228 = vector.load %arg2[%c3_254, %c0_255, %c0_256] : memref<9x4x32xf32, #tpu.memory_space<vmem>>, vector<1x4x32xf32>
    %229 = vector.shape_cast %228 : vector<1x4x32xf32> to vector<4x32xf32>
    %cst_257 = arith.constant dense<0.000000e+00> : vector<72x32xf32>
    %230 = tpu.matmul %227, %229, %cst_257 {dimension_numbers = #tpu.dot_dimension_numbers<[1], [0], [0], [1], [0, 0, 1, 1], [], []>} : vector<72x4xf32>, vector<4x32xf32>, vector<72x32xf32> -> vector<72x32xf32>
    %231 = arith.addf %226, %230 : vector<72x32xf32>
    %c235_258 = arith.constant 235 : index
    %c0_259 = arith.constant 0 : index
    %232 = vector.load %arg10[%c235_258, %c0_259] : memref<326x4xf32, #tpu.memory_space<vmem>>, vector<72x4xf32>
    %c4_260 = arith.constant 4 : index
    %c0_261 = arith.constant 0 : index
    %c0_262 = arith.constant 0 : index
    %233 = vector.load %arg2[%c4_260, %c0_261, %c0_262] : memref<9x4x32xf32, #tpu.memory_space<vmem>>, vector<1x4x32xf32>
    %234 = vector.shape_cast %233 : vector<1x4x32xf32> to vector<4x32xf32>
    %cst_263 = arith.constant dense<0.000000e+00> : vector<72x32xf32>
    %235 = tpu.matmul %232, %234, %cst_263 {dimension_numbers = #tpu.dot_dimension_numbers<[1], [0], [0], [1], [0, 0, 1, 1], [], []>} : vector<72x4xf32>, vector<4x32xf32>, vector<72x32xf32> -> vector<72x32xf32>
    %236 = arith.addf %231, %235 : vector<72x32xf32>
    %c236 = arith.constant 236 : index
    %c0_264 = arith.constant 0 : index
    %237 = vector.load %arg10[%c236, %c0_264] : memref<326x4xf32, #tpu.memory_space<vmem>>, vector<72x4xf32>
    %c5_265 = arith.constant 5 : index
    %c0_266 = arith.constant 0 : index
    %c0_267 = arith.constant 0 : index
    %238 = vector.load %arg2[%c5_265, %c0_266, %c0_267] : memref<9x4x32xf32, #tpu.memory_space<vmem>>, vector<1x4x32xf32>
    %239 = vector.shape_cast %238 : vector<1x4x32xf32> to vector<4x32xf32>
    %cst_268 = arith.constant dense<0.000000e+00> : vector<72x32xf32>
    %240 = tpu.matmul %237, %239, %cst_268 {dimension_numbers = #tpu.dot_dimension_numbers<[1], [0], [0], [1], [0, 0, 1, 1], [], []>} : vector<72x4xf32>, vector<4x32xf32>, vector<72x32xf32> -> vector<72x32xf32>
    %241 = arith.addf %236, %240 : vector<72x32xf32>
    %c252 = arith.constant 252 : index
    %c0_269 = arith.constant 0 : index
    %242 = vector.load %arg10[%c252, %c0_269] : memref<326x4xf32, #tpu.memory_space<vmem>>, vector<72x4xf32>
    %c6_270 = arith.constant 6 : index
    %c0_271 = arith.constant 0 : index
    %c0_272 = arith.constant 0 : index
    %243 = vector.load %arg2[%c6_270, %c0_271, %c0_272] : memref<9x4x32xf32, #tpu.memory_space<vmem>>, vector<1x4x32xf32>
    %244 = vector.shape_cast %243 : vector<1x4x32xf32> to vector<4x32xf32>
    %cst_273 = arith.constant dense<0.000000e+00> : vector<72x32xf32>
    %245 = tpu.matmul %242, %244, %cst_273 {dimension_numbers = #tpu.dot_dimension_numbers<[1], [0], [0], [1], [0, 0, 1, 1], [], []>} : vector<72x4xf32>, vector<4x32xf32>, vector<72x32xf32> -> vector<72x32xf32>
    %246 = arith.addf %241, %245 : vector<72x32xf32>
    %c253_274 = arith.constant 253 : index
    %c0_275 = arith.constant 0 : index
    %247 = vector.load %arg10[%c253_274, %c0_275] : memref<326x4xf32, #tpu.memory_space<vmem>>, vector<72x4xf32>
    %c7_276 = arith.constant 7 : index
    %c0_277 = arith.constant 0 : index
    %c0_278 = arith.constant 0 : index
    %248 = vector.load %arg2[%c7_276, %c0_277, %c0_278] : memref<9x4x32xf32, #tpu.memory_space<vmem>>, vector<1x4x32xf32>
    %249 = vector.shape_cast %248 : vector<1x4x32xf32> to vector<4x32xf32>
    %cst_279 = arith.constant dense<0.000000e+00> : vector<72x32xf32>
    %250 = tpu.matmul %247, %249, %cst_279 {dimension_numbers = #tpu.dot_dimension_numbers<[1], [0], [0], [1], [0, 0, 1, 1], [], []>} : vector<72x4xf32>, vector<4x32xf32>, vector<72x32xf32> -> vector<72x32xf32>
    %251 = arith.addf %246, %250 : vector<72x32xf32>
    %c254 = arith.constant 254 : index
    %c0_280 = arith.constant 0 : index
    %252 = vector.load %arg10[%c254, %c0_280] : memref<326x4xf32, #tpu.memory_space<vmem>>, vector<72x4xf32>
    %c8_281 = arith.constant 8 : index
    %c0_282 = arith.constant 0 : index
    %c0_283 = arith.constant 0 : index
    %253 = vector.load %arg2[%c8_281, %c0_282, %c0_283] : memref<9x4x32xf32, #tpu.memory_space<vmem>>, vector<1x4x32xf32>
    %254 = vector.shape_cast %253 : vector<1x4x32xf32> to vector<4x32xf32>
    %cst_284 = arith.constant dense<0.000000e+00> : vector<72x32xf32>
    %255 = tpu.matmul %252, %254, %cst_284 {dimension_numbers = #tpu.dot_dimension_numbers<[1], [0], [0], [1], [0, 0, 1, 1], [], []>} : vector<72x4xf32>, vector<4x32xf32>, vector<72x32xf32> -> vector<72x32xf32>
    %256 = arith.addf %251, %255 : vector<72x32xf32>
    %c0_285 = arith.constant 0 : index
    %c0_286 = arith.constant 0 : index
    %257 = vector.load %arg3[%c0_285, %c0_286] : memref<1x32xf32, #tpu.memory_space<vmem>>, vector<1x32xf32>
    %258 = vector.broadcast %257 : vector<1x32xf32> to vector<72x32xf32>
    %259 = arith.addf %256, %258 : vector<72x32xf32>
    %c216_287 = arith.constant 216 : index
    %c0_288 = arith.constant 0 : index
    %260 = vector.load %arg6[%c216_287, %c0_288] : memref<288x1xf32, #tpu.memory_space<vmem>>, vector<72x1xf32>
    %261 = vector.broadcast %260 : vector<72x1xf32> to vector<72x32xf32>
    %262 = arith.addf %259, %261 : vector<72x32xf32>
    %c234_289 = arith.constant 234 : index
    %c0_290 = arith.constant 0 : index
    %263 = vector.load %arg11[%c234_289, %c0_290] : memref<324x32xf32, #tpu.memory_space<vmem>>, vector<72x32xf32>
    tpu.vector_store %arg11[%c234_289, %c0_290], %262 {strides = array<i32>} : memref<324x32xf32, #tpu.memory_space<vmem>>, vector<72x32xf32>,
    %c18_291 = arith.constant 18 : index
    %c0_292 = arith.constant 0 : index
    %264 = vector.load %arg11[%c18_291, %c0_292] : memref<324x32xf32, #tpu.memory_space<vmem>>, vector<288x32xf32>
    %c17 = arith.constant 17 : index
    %c0_293 = arith.constant 0 : index
    %265 = vector.load %arg11[%c17, %c0_293] : memref<324x32xf32, #tpu.memory_space<vmem>>, vector<288x32xf32>
    %266 = arith.maximumf %264, %265 : vector<288x32xf32>
    %c19_294 = arith.constant 19 : index
    %c0_295 = arith.constant 0 : index
    %267 = vector.load %arg11[%c19_294, %c0_295] : memref<324x32xf32, #tpu.memory_space<vmem>>, vector<288x32xf32>
    %268 = arith.maximumf %266, %267 : vector<288x32xf32>
    %c18_296 = arith.constant 18 : index
    %c0_297 = arith.constant 0 : index
    %269 = vector.load %arg11[%c18_296, %c0_297] : memref<324x32xf32, #tpu.memory_space<vmem>>, vector<288x32xf32>
    tpu.vector_store %arg11[%c18_296, %c0_297], %268 {strides = array<i32>} : memref<324x32xf32, #tpu.memory_space<vmem>>, vector<288x32xf32>,
    %c18_298 = arith.constant 18 : index
    %c0_299 = arith.constant 0 : index
    %270 = vector.load %arg11[%c18_298, %c0_299] : memref<324x32xf32, #tpu.memory_space<vmem>>, vector<288x32xf32>
    %c0_300 = arith.constant 0 : index
    %c0_301 = arith.constant 0 : index
    %271 = vector.load %arg11[%c0_300, %c0_301] : memref<324x32xf32, #tpu.memory_space<vmem>>, vector<288x32xf32>
    %272 = arith.maximumf %270, %271 : vector<288x32xf32>
    %c36_302 = arith.constant 36 : index
    %c0_303 = arith.constant 0 : index
    %273 = vector.load %arg11[%c36_302, %c0_303] : memref<324x32xf32, #tpu.memory_space<vmem>>, vector<288x32xf32>
    %274 = arith.maximumf %272, %273 : vector<288x32xf32>
    %c0_304 = arith.constant 0 : index
    %c0_305 = arith.constant 0 : index
    %275 = vector.load %arg7[%c0_304, %c0_305] : memref<64x288xf32, #tpu.memory_space<vmem>>, vector<64x288xf32>
    %cst_306 = arith.constant dense<0.000000e+00> : vector<64x32xf32>
    %276 = tpu.matmul %275, %274, %cst_306 {dimension_numbers = #tpu.dot_dimension_numbers<[1], [0], [0], [1], [0, 0, 1, 1], [], []>} : vector<64x288xf32>, vector<288x32xf32>, vector<64x32xf32> -> vector<64x32xf32>
    %cst_307 = arith.constant 0.000000e+00 : f32
    %277 = vector.broadcast %cst_307 : f32 to vector<102x32xf32>
    %c0_308 = arith.constant 0 : index
    %c0_309 = arith.constant 0 : index
    %278 = vector.load %arg12[%c0_308, %c0_309] : memref<102x32xf32, #tpu.memory_space<vmem>>, vector<102x32xf32>
    tpu.vector_store %arg12[%c0_308, %c0_309], %277 {strides = array<i32>} : memref<102x32xf32, #tpu.memory_space<vmem>>, vector<102x32xf32>,
    %cst_310 = arith.constant 0.000000e+00 : f32
    %279 = vector.broadcast %cst_310 : f32 to vector<102x32xf32>
    %c0_311 = arith.constant 0 : index
    %c0_312 = arith.constant 0 : index
    %280 = vector.load %arg13[%c0_311, %c0_312] : memref<102x32xf32, #tpu.memory_space<vmem>>, vector<102x32xf32>
    tpu.vector_store %arg13[%c0_311, %c0_312], %279 {strides = array<i32>} : memref<102x32xf32, #tpu.memory_space<vmem>>, vector<102x32xf32>,
    %281 = vector.extract_strided_slice %276 {offsets = [0, 0], sizes = [8, 32], strides = [1, 1]} : vector<64x32xf32> to vector<8x32xf32>
    %c11_313 = arith.constant 11 : index
    %c0_314 = arith.constant 0 : index
    %282 = vector.load %arg12[%c11_313, %c0_314] : memref<102x32xf32, #tpu.memory_space<vmem>>, vector<8x32xf32>
    tpu.vector_store %arg12[%c11_313, %c0_314], %281 {strides = array<i32>} : memref<102x32xf32, #tpu.memory_space<vmem>>, vector<8x32xf32>,
    %283 = vector.extract_strided_slice %276 {offsets = [8, 0], sizes = [8, 32], strides = [1, 1]} : vector<64x32xf32> to vector<8x32xf32>
    %c21 = arith.constant 21 : index
    %c0_315 = arith.constant 0 : index
    %284 = vector.load %arg12[%c21, %c0_315] : memref<102x32xf32, #tpu.memory_space<vmem>>, vector<8x32xf32>
    tpu.vector_store %arg12[%c21, %c0_315], %283 {strides = array<i32>} : memref<102x32xf32, #tpu.memory_space<vmem>>, vector<8x32xf32>,
    %285 = vector.extract_strided_slice %276 {offsets = [16, 0], sizes = [8, 32], strides = [1, 1]} : vector<64x32xf32> to vector<8x32xf32>
    %c31 = arith.constant 31 : index
    %c0_316 = arith.constant 0 : index
    %286 = vector.load %arg12[%c31, %c0_316] : memref<102x32xf32, #tpu.memory_space<vmem>>, vector<8x32xf32>
    tpu.vector_store %arg12[%c31, %c0_316], %285 {strides = array<i32>} : memref<102x32xf32, #tpu.memory_space<vmem>>, vector<8x32xf32>,
    %287 = vector.extract_strided_slice %276 {offsets = [24, 0], sizes = [8, 32], strides = [1, 1]} : vector<64x32xf32> to vector<8x32xf32>
    %c41 = arith.constant 41 : index
    %c0_317 = arith.constant 0 : index
    %288 = vector.load %arg12[%c41, %c0_317] : memref<102x32xf32, #tpu.memory_space<vmem>>, vector<8x32xf32>
    tpu.vector_store %arg12[%c41, %c0_317], %287 {strides = array<i32>} : memref<102x32xf32, #tpu.memory_space<vmem>>, vector<8x32xf32>,
    %289 = vector.extract_strided_slice %276 {offsets = [32, 0], sizes = [8, 32], strides = [1, 1]} : vector<64x32xf32> to vector<8x32xf32>
    %c51 = arith.constant 51 : index
    %c0_318 = arith.constant 0 : index
    %290 = vector.load %arg12[%c51, %c0_318] : memref<102x32xf32, #tpu.memory_space<vmem>>, vector<8x32xf32>
    tpu.vector_store %arg12[%c51, %c0_318], %289 {strides = array<i32>} : memref<102x32xf32, #tpu.memory_space<vmem>>, vector<8x32xf32>,
    %291 = vector.extract_strided_slice %276 {offsets = [40, 0], sizes = [8, 32], strides = [1, 1]} : vector<64x32xf32> to vector<8x32xf32>
    %c61 = arith.constant 61 : index
    %c0_319 = arith.constant 0 : index
    %292 = vector.load %arg12[%c61, %c0_319] : memref<102x32xf32, #tpu.memory_space<vmem>>, vector<8x32xf32>
    tpu.vector_store %arg12[%c61, %c0_319], %291 {strides = array<i32>} : memref<102x32xf32, #tpu.memory_space<vmem>>, vector<8x32xf32>,
    %293 = vector.extract_strided_slice %276 {offsets = [48, 0], sizes = [8, 32], strides = [1, 1]} : vector<64x32xf32> to vector<8x32xf32>
    %c71 = arith.constant 71 : index
    %c0_320 = arith.constant 0 : index
    %294 = vector.load %arg12[%c71, %c0_320] : memref<102x32xf32, #tpu.memory_space<vmem>>, vector<8x32xf32>
    tpu.vector_store %arg12[%c71, %c0_320], %293 {strides = array<i32>} : memref<102x32xf32, #tpu.memory_space<vmem>>, vector<8x32xf32>,
    %295 = vector.extract_strided_slice %276 {offsets = [56, 0], sizes = [8, 32], strides = [1, 1]} : vector<64x32xf32> to vector<8x32xf32>
    %c81 = arith.constant 81 : index
    %c0_321 = arith.constant 0 : index
    %296 = vector.load %arg12[%c81, %c0_321] : memref<102x32xf32, #tpu.memory_space<vmem>>, vector<8x32xf32>
    tpu.vector_store %arg12[%c81, %c0_321], %295 {strides = array<i32>} : memref<102x32xf32, #tpu.memory_space<vmem>>, vector<8x32xf32>,
    %c0_322 = arith.constant 0 : index
    %c0_323 = arith.constant 0 : index
    %297 = vector.load %arg8[%c0_322, %c0_323] : memref<80x1xf32, #tpu.memory_space<vmem>>, vector<80x1xf32>
    %cst_324 = arith.constant 0.000000e+00 : f32
    %298 = vector.broadcast %cst_324 : f32 to vector<80x32xf32>
    %c0_325 = arith.constant 0 : index
    %c0_326 = arith.constant 0 : index
    %299 = vector.load %arg12[%c0_325, %c0_326] : memref<102x32xf32, #tpu.memory_space<vmem>>, vector<80x32xf32>
    %cst_327 = arith.constant 0.000000e+00 : f32
    %300 = vector.broadcast %cst_327 : f32 to vector<80x32xf32>
    %301 = arith.maximumf %299, %300 : vector<80x32xf32>
    %c0_328 = arith.constant 0 : index
    %c0_329 = arith.constant 0 : index
    %c0_330 = arith.constant 0 : index
    %c0_331 = arith.constant 0 : index
    %302 = vector.load %arg4[%c0_328, %c0_329, %c0_330, %c0_331] : memref<4x9x32x32xf32, #tpu.memory_space<vmem>>, vector<1x1x32x32xf32>
    %303 = vector.shape_cast %302 : vector<1x1x32x32xf32> to vector<32x32xf32>
    %cst_332 = arith.constant dense<0.000000e+00> : vector<80x32xf32>
    %304 = tpu.matmul %301, %303, %cst_332 {dimension_numbers = #tpu.dot_dimension_numbers<[1], [0], [0], [1], [0, 0, 1, 1], [], []>} : vector<80x32xf32>, vector<32x32xf32>, vector<80x32xf32> -> vector<80x32xf32>
    %305 = arith.addf %298, %304 : vector<80x32xf32>
    %c1_333 = arith.constant 1 : index
    %c0_334 = arith.constant 0 : index
    %306 = vector.load %arg12[%c1_333, %c0_334] : memref<102x32xf32, #tpu.memory_space<vmem>>, vector<80x32xf32>
    %cst_335 = arith.constant 0.000000e+00 : f32
    %307 = vector.broadcast %cst_335 : f32 to vector<80x32xf32>
    %308 = arith.maximumf %306, %307 : vector<80x32xf32>
    %c0_336 = arith.constant 0 : index
    %c1_337 = arith.constant 1 : index
    %c0_338 = arith.constant 0 : index
    %c0_339 = arith.constant 0 : index
    %309 = vector.load %arg4[%c0_336, %c1_337, %c0_338, %c0_339] : memref<4x9x32x32xf32, #tpu.memory_space<vmem>>, vector<1x1x32x32xf32>
    %310 = vector.shape_cast %309 : vector<1x1x32x32xf32> to vector<32x32xf32>
    %cst_340 = arith.constant dense<0.000000e+00> : vector<80x32xf32>
    %311 = tpu.matmul %308, %310, %cst_340 {dimension_numbers = #tpu.dot_dimension_numbers<[1], [0], [0], [1], [0, 0, 1, 1], [], []>} : vector<80x32xf32>, vector<32x32xf32>, vector<80x32xf32> -> vector<80x32xf32>
    %312 = arith.addf %305, %311 : vector<80x32xf32>
    %c2_341 = arith.constant 2 : index
    %c0_342 = arith.constant 0 : index
    %313 = vector.load %arg12[%c2_341, %c0_342] : memref<102x32xf32, #tpu.memory_space<vmem>>, vector<80x32xf32>
    %cst_343 = arith.constant 0.000000e+00 : f32
    %314 = vector.broadcast %cst_343 : f32 to vector<80x32xf32>
    %315 = arith.maximumf %313, %314 : vector<80x32xf32>
    %c0_344 = arith.constant 0 : index
    %c2_345 = arith.constant 2 : index
    %c0_346 = arith.constant 0 : index
    %c0_347 = arith.constant 0 : index
    %316 = vector.load %arg4[%c0_344, %c2_345, %c0_346, %c0_347] : memref<4x9x32x32xf32, #tpu.memory_space<vmem>>, vector<1x1x32x32xf32>
    %317 = vector.shape_cast %316 : vector<1x1x32x32xf32> to vector<32x32xf32>
    %cst_348 = arith.constant dense<0.000000e+00> : vector<80x32xf32>
    %318 = tpu.matmul %315, %317, %cst_348 {dimension_numbers = #tpu.dot_dimension_numbers<[1], [0], [0], [1], [0, 0, 1, 1], [], []>} : vector<80x32xf32>, vector<32x32xf32>, vector<80x32xf32> -> vector<80x32xf32>
    %319 = arith.addf %312, %318 : vector<80x32xf32>
    %c10_349 = arith.constant 10 : index
    %c0_350 = arith.constant 0 : index
    %320 = vector.load %arg12[%c10_349, %c0_350] : memref<102x32xf32, #tpu.memory_space<vmem>>, vector<80x32xf32>
    %cst_351 = arith.constant 0.000000e+00 : f32
    %321 = vector.broadcast %cst_351 : f32 to vector<80x32xf32>
    %322 = arith.maximumf %320, %321 : vector<80x32xf32>
    %c0_352 = arith.constant 0 : index
    %c3_353 = arith.constant 3 : index
    %c0_354 = arith.constant 0 : index
    %c0_355 = arith.constant 0 : index
    %323 = vector.load %arg4[%c0_352, %c3_353, %c0_354, %c0_355] : memref<4x9x32x32xf32, #tpu.memory_space<vmem>>, vector<1x1x32x32xf32>
    %324 = vector.shape_cast %323 : vector<1x1x32x32xf32> to vector<32x32xf32>
    %cst_356 = arith.constant dense<0.000000e+00> : vector<80x32xf32>
    %325 = tpu.matmul %322, %324, %cst_356 {dimension_numbers = #tpu.dot_dimension_numbers<[1], [0], [0], [1], [0, 0, 1, 1], [], []>} : vector<80x32xf32>, vector<32x32xf32>, vector<80x32xf32> -> vector<80x32xf32>
    %326 = arith.addf %319, %325 : vector<80x32xf32>
    %c11_357 = arith.constant 11 : index
    %c0_358 = arith.constant 0 : index
    %327 = vector.load %arg12[%c11_357, %c0_358] : memref<102x32xf32, #tpu.memory_space<vmem>>, vector<80x32xf32>
    %cst_359 = arith.constant 0.000000e+00 : f32
    %328 = vector.broadcast %cst_359 : f32 to vector<80x32xf32>
    %329 = arith.maximumf %327, %328 : vector<80x32xf32>
    %c0_360 = arith.constant 0 : index
    %c4_361 = arith.constant 4 : index
    %c0_362 = arith.constant 0 : index
    %c0_363 = arith.constant 0 : index
    %330 = vector.load %arg4[%c0_360, %c4_361, %c0_362, %c0_363] : memref<4x9x32x32xf32, #tpu.memory_space<vmem>>, vector<1x1x32x32xf32>
    %331 = vector.shape_cast %330 : vector<1x1x32x32xf32> to vector<32x32xf32>
    %cst_364 = arith.constant dense<0.000000e+00> : vector<80x32xf32>
    %332 = tpu.matmul %329, %331, %cst_364 {dimension_numbers = #tpu.dot_dimension_numbers<[1], [0], [0], [1], [0, 0, 1, 1], [], []>} : vector<80x32xf32>, vector<32x32xf32>, vector<80x32xf32> -> vector<80x32xf32>
    %333 = arith.addf %326, %332 : vector<80x32xf32>
    %c12_365 = arith.constant 12 : index
    %c0_366 = arith.constant 0 : index
    %334 = vector.load %arg12[%c12_365, %c0_366] : memref<102x32xf32, #tpu.memory_space<vmem>>, vector<80x32xf32>
    %cst_367 = arith.constant 0.000000e+00 : f32
    %335 = vector.broadcast %cst_367 : f32 to vector<80x32xf32>
    %336 = arith.maximumf %334, %335 : vector<80x32xf32>
    %c0_368 = arith.constant 0 : index
    %c5_369 = arith.constant 5 : index
    %c0_370 = arith.constant 0 : index
    %c0_371 = arith.constant 0 : index
    %337 = vector.load %arg4[%c0_368, %c5_369, %c0_370, %c0_371] : memref<4x9x32x32xf32, #tpu.memory_space<vmem>>, vector<1x1x32x32xf32>
    %338 = vector.shape_cast %337 : vector<1x1x32x32xf32> to vector<32x32xf32>
    %cst_372 = arith.constant dense<0.000000e+00> : vector<80x32xf32>
    %339 = tpu.matmul %336, %338, %cst_372 {dimension_numbers = #tpu.dot_dimension_numbers<[1], [0], [0], [1], [0, 0, 1, 1], [], []>} : vector<80x32xf32>, vector<32x32xf32>, vector<80x32xf32> -> vector<80x32xf32>
    %340 = arith.addf %333, %339 : vector<80x32xf32>
    %c20_373 = arith.constant 20 : index
    %c0_374 = arith.constant 0 : index
    %341 = vector.load %arg12[%c20_373, %c0_374] : memref<102x32xf32, #tpu.memory_space<vmem>>, vector<80x32xf32>
    %cst_375 = arith.constant 0.000000e+00 : f32
    %342 = vector.broadcast %cst_375 : f32 to vector<80x32xf32>
    %343 = arith.maximumf %341, %342 : vector<80x32xf32>
    %c0_376 = arith.constant 0 : index
    %c6_377 = arith.constant 6 : index
    %c0_378 = arith.constant 0 : index
    %c0_379 = arith.constant 0 : index
    %344 = vector.load %arg4[%c0_376, %c6_377, %c0_378, %c0_379] : memref<4x9x32x32xf32, #tpu.memory_space<vmem>>, vector<1x1x32x32xf32>
    %345 = vector.shape_cast %344 : vector<1x1x32x32xf32> to vector<32x32xf32>
    %cst_380 = arith.constant dense<0.000000e+00> : vector<80x32xf32>
    %346 = tpu.matmul %343, %345, %cst_380 {dimension_numbers = #tpu.dot_dimension_numbers<[1], [0], [0], [1], [0, 0, 1, 1], [], []>} : vector<80x32xf32>, vector<32x32xf32>, vector<80x32xf32> -> vector<80x32xf32>
    %347 = arith.addf %340, %346 : vector<80x32xf32>
    %c21_381 = arith.constant 21 : index
    %c0_382 = arith.constant 0 : index
    %348 = vector.load %arg12[%c21_381, %c0_382] : memref<102x32xf32, #tpu.memory_space<vmem>>, vector<80x32xf32>
    %cst_383 = arith.constant 0.000000e+00 : f32
    %349 = vector.broadcast %cst_383 : f32 to vector<80x32xf32>
    %350 = arith.maximumf %348, %349 : vector<80x32xf32>
    %c0_384 = arith.constant 0 : index
    %c7_385 = arith.constant 7 : index
    %c0_386 = arith.constant 0 : index
    %c0_387 = arith.constant 0 : index
    %351 = vector.load %arg4[%c0_384, %c7_385, %c0_386, %c0_387] : memref<4x9x32x32xf32, #tpu.memory_space<vmem>>, vector<1x1x32x32xf32>
    %352 = vector.shape_cast %351 : vector<1x1x32x32xf32> to vector<32x32xf32>
    %cst_388 = arith.constant dense<0.000000e+00> : vector<80x32xf32>
    %353 = tpu.matmul %350, %352, %cst_388 {dimension_numbers = #tpu.dot_dimension_numbers<[1], [0], [0], [1], [0, 0, 1, 1], [], []>} : vector<80x32xf32>, vector<32x32xf32>, vector<80x32xf32> -> vector<80x32xf32>
    %354 = arith.addf %347, %353 : vector<80x32xf32>
    %c22 = arith.constant 22 : index
    %c0_389 = arith.constant 0 : index
    %355 = vector.load %arg12[%c22, %c0_389] : memref<102x32xf32, #tpu.memory_space<vmem>>, vector<80x32xf32>
    %cst_390 = arith.constant 0.000000e+00 : f32
    %356 = vector.broadcast %cst_390 : f32 to vector<80x32xf32>
    %357 = arith.maximumf %355, %356 : vector<80x32xf32>
    %c0_391 = arith.constant 0 : index
    %c8_392 = arith.constant 8 : index
    %c0_393 = arith.constant 0 : index
    %c0_394 = arith.constant 0 : index
    %358 = vector.load %arg4[%c0_391, %c8_392, %c0_393, %c0_394] : memref<4x9x32x32xf32, #tpu.memory_space<vmem>>, vector<1x1x32x32xf32>
    %359 = vector.shape_cast %358 : vector<1x1x32x32xf32> to vector<32x32xf32>
    %cst_395 = arith.constant dense<0.000000e+00> : vector<80x32xf32>
    %360 = tpu.matmul %357, %359, %cst_395 {dimension_numbers = #tpu.dot_dimension_numbers<[1], [0], [0], [1], [0, 0, 1, 1], [], []>} : vector<80x32xf32>, vector<32x32xf32>, vector<80x32xf32> -> vector<80x32xf32>
    %361 = arith.addf %354, %360 : vector<80x32xf32>
    %c0_396 = arith.constant 0 : index
    %c0_397 = arith.constant 0 : index
    %c0_398 = arith.constant 0 : index
    %362 = vector.load %arg5[%c0_396, %c0_397, %c0_398] : memref<4x1x32xf32, #tpu.memory_space<vmem>>, vector<1x1x32xf32>
    %363 = vector.shape_cast %362 : vector<1x1x32xf32> to vector<1x32xf32>
    %364 = vector.broadcast %363 : vector<1x32xf32> to vector<80x32xf32>
    %365 = arith.addf %361, %364 : vector<80x32xf32>
    %366 = vector.broadcast %297 : vector<80x1xf32> to vector<80x32xf32>
    %367 = arith.mulf %365, %366 : vector<80x32xf32>
    %c11_399 = arith.constant 11 : index
    %c0_400 = arith.constant 0 : index
    %368 = vector.load %arg13[%c11_399, %c0_400] : memref<102x32xf32, #tpu.memory_space<vmem>>, vector<80x32xf32>
    tpu.vector_store %arg13[%c11_399, %c0_400], %367 {strides = array<i32>} : memref<102x32xf32, #tpu.memory_space<vmem>>, vector<80x32xf32>,
    %cst_401 = arith.constant 0.000000e+00 : f32
    %369 = vector.broadcast %cst_401 : f32 to vector<80x32xf32>
    %c0_402 = arith.constant 0 : index
    %c0_403 = arith.constant 0 : index
    %370 = vector.load %arg13[%c0_402, %c0_403] : memref<102x32xf32, #tpu.memory_space<vmem>>, vector<80x32xf32>
    %cst_404 = arith.constant 0.000000e+00 : f32
    %371 = vector.broadcast %cst_404 : f32 to vector<80x32xf32>
    %372 = arith.maximumf %370, %371 : vector<80x32xf32>
    %c1_405 = arith.constant 1 : index
    %c0_406 = arith.constant 0 : index
    %c0_407 = arith.constant 0 : index
    %c0_408 = arith.constant 0 : index
    %373 = vector.load %arg4[%c1_405, %c0_406, %c0_407, %c0_408] : memref<4x9x32x32xf32, #tpu.memory_space<vmem>>, vector<1x1x32x32xf32>
    %374 = vector.shape_cast %373 : vector<1x1x32x32xf32> to vector<32x32xf32>
    %cst_409 = arith.constant dense<0.000000e+00> : vector<80x32xf32>
    %375 = tpu.matmul %372, %374, %cst_409 {dimension_numbers = #tpu.dot_dimension_numbers<[1], [0], [0], [1], [0, 0, 1, 1], [], []>} : vector<80x32xf32>, vector<32x32xf32>, vector<80x32xf32> -> vector<80x32xf32>
    %376 = arith.addf %369, %375 : vector<80x32xf32>
    %c1_410 = arith.constant 1 : index
    %c0_411 = arith.constant 0 : index
    %377 = vector.load %arg13[%c1_410, %c0_411] : memref<102x32xf32, #tpu.memory_space<vmem>>, vector<80x32xf32>
    %cst_412 = arith.constant 0.000000e+00 : f32
    %378 = vector.broadcast %cst_412 : f32 to vector<80x32xf32>
    %379 = arith.maximumf %377, %378 : vector<80x32xf32>
    %c1_413 = arith.constant 1 : index
    %c1_414 = arith.constant 1 : index
    %c0_415 = arith.constant 0 : index
    %c0_416 = arith.constant 0 : index
    %380 = vector.load %arg4[%c1_413, %c1_414, %c0_415, %c0_416] : memref<4x9x32x32xf32, #tpu.memory_space<vmem>>, vector<1x1x32x32xf32>
    %381 = vector.shape_cast %380 : vector<1x1x32x32xf32> to vector<32x32xf32>
    %cst_417 = arith.constant dense<0.000000e+00> : vector<80x32xf32>
    %382 = tpu.matmul %379, %381, %cst_417 {dimension_numbers = #tpu.dot_dimension_numbers<[1], [0], [0], [1], [0, 0, 1, 1], [], []>} : vector<80x32xf32>, vector<32x32xf32>, vector<80x32xf32> -> vector<80x32xf32>
    %383 = arith.addf %376, %382 : vector<80x32xf32>
    %c2_418 = arith.constant 2 : index
    %c0_419 = arith.constant 0 : index
    %384 = vector.load %arg13[%c2_418, %c0_419] : memref<102x32xf32, #tpu.memory_space<vmem>>, vector<80x32xf32>
    %cst_420 = arith.constant 0.000000e+00 : f32
    %385 = vector.broadcast %cst_420 : f32 to vector<80x32xf32>
    %386 = arith.maximumf %384, %385 : vector<80x32xf32>
    %c1_421 = arith.constant 1 : index
    %c2_422 = arith.constant 2 : index
    %c0_423 = arith.constant 0 : index
    %c0_424 = arith.constant 0 : index
    %387 = vector.load %arg4[%c1_421, %c2_422, %c0_423, %c0_424] : memref<4x9x32x32xf32, #tpu.memory_space<vmem>>, vector<1x1x32x32xf32>
    %388 = vector.shape_cast %387 : vector<1x1x32x32xf32> to vector<32x32xf32>
    %cst_425 = arith.constant dense<0.000000e+00> : vector<80x32xf32>
    %389 = tpu.matmul %386, %388, %cst_425 {dimension_numbers = #tpu.dot_dimension_numbers<[1], [0], [0], [1], [0, 0, 1, 1], [], []>} : vector<80x32xf32>, vector<32x32xf32>, vector<80x32xf32> -> vector<80x32xf32>
    %390 = arith.addf %383, %389 : vector<80x32xf32>
    %c10_426 = arith.constant 10 : index
    %c0_427 = arith.constant 0 : index
    %391 = vector.load %arg13[%c10_426, %c0_427] : memref<102x32xf32, #tpu.memory_space<vmem>>, vector<80x32xf32>
    %cst_428 = arith.constant 0.000000e+00 : f32
    %392 = vector.broadcast %cst_428 : f32 to vector<80x32xf32>
    %393 = arith.maximumf %391, %392 : vector<80x32xf32>
    %c1_429 = arith.constant 1 : index
    %c3_430 = arith.constant 3 : index
    %c0_431 = arith.constant 0 : index
    %c0_432 = arith.constant 0 : index
    %394 = vector.load %arg4[%c1_429, %c3_430, %c0_431, %c0_432] : memref<4x9x32x32xf32, #tpu.memory_space<vmem>>, vector<1x1x32x32xf32>
    %395 = vector.shape_cast %394 : vector<1x1x32x32xf32> to vector<32x32xf32>
    %cst_433 = arith.constant dense<0.000000e+00> : vector<80x32xf32>
    %396 = tpu.matmul %393, %395, %cst_433 {dimension_numbers = #tpu.dot_dimension_numbers<[1], [0], [0], [1], [0, 0, 1, 1], [], []>} : vector<80x32xf32>, vector<32x32xf32>, vector<80x32xf32> -> vector<80x32xf32>
    %397 = arith.addf %390, %396 : vector<80x32xf32>
    %c11_434 = arith.constant 11 : index
    %c0_435 = arith.constant 0 : index
    %398 = vector.load %arg13[%c11_434, %c0_435] : memref<102x32xf32, #tpu.memory_space<vmem>>, vector<80x32xf32>
    %cst_436 = arith.constant 0.000000e+00 : f32
    %399 = vector.broadcast %cst_436 : f32 to vector<80x32xf32>
    %400 = arith.maximumf %398, %399 : vector<80x32xf32>
    %c1_437 = arith.constant 1 : index
    %c4_438 = arith.constant 4 : index
    %c0_439 = arith.constant 0 : index
    %c0_440 = arith.constant 0 : index
    %401 = vector.load %arg4[%c1_437, %c4_438, %c0_439, %c0_440] : memref<4x9x32x32xf32, #tpu.memory_space<vmem>>, vector<1x1x32x32xf32>
    %402 = vector.shape_cast %401 : vector<1x1x32x32xf32> to vector<32x32xf32>
    %cst_441 = arith.constant dense<0.000000e+00> : vector<80x32xf32>
    %403 = tpu.matmul %400, %402, %cst_441 {dimension_numbers = #tpu.dot_dimension_numbers<[1], [0], [0], [1], [0, 0, 1, 1], [], []>} : vector<80x32xf32>, vector<32x32xf32>, vector<80x32xf32> -> vector<80x32xf32>
    %404 = arith.addf %397, %403 : vector<80x32xf32>
    %c12_442 = arith.constant 12 : index
    %c0_443 = arith.constant 0 : index
    %405 = vector.load %arg13[%c12_442, %c0_443] : memref<102x32xf32, #tpu.memory_space<vmem>>, vector<80x32xf32>
    %cst_444 = arith.constant 0.000000e+00 : f32
    %406 = vector.broadcast %cst_444 : f32 to vector<80x32xf32>
    %407 = arith.maximumf %405, %406 : vector<80x32xf32>
    %c1_445 = arith.constant 1 : index
    %c5_446 = arith.constant 5 : index
    %c0_447 = arith.constant 0 : index
    %c0_448 = arith.constant 0 : index
    %408 = vector.load %arg4[%c1_445, %c5_446, %c0_447, %c0_448] : memref<4x9x32x32xf32, #tpu.memory_space<vmem>>, vector<1x1x32x32xf32>
    %409 = vector.shape_cast %408 : vector<1x1x32x32xf32> to vector<32x32xf32>
    %cst_449 = arith.constant dense<0.000000e+00> : vector<80x32xf32>
    %410 = tpu.matmul %407, %409, %cst_449 {dimension_numbers = #tpu.dot_dimension_numbers<[1], [0], [0], [1], [0, 0, 1, 1], [], []>} : vector<80x32xf32>, vector<32x32xf32>, vector<80x32xf32> -> vector<80x32xf32>
    %411 = arith.addf %404, %410 : vector<80x32xf32>
    %c20_450 = arith.constant 20 : index
    %c0_451 = arith.constant 0 : index
    %412 = vector.load %arg13[%c20_450, %c0_451] : memref<102x32xf32, #tpu.memory_space<vmem>>, vector<80x32xf32>
    %cst_452 = arith.constant 0.000000e+00 : f32
    %413 = vector.broadcast %cst_452 : f32 to vector<80x32xf32>
    %414 = arith.maximumf %412, %413 : vector<80x32xf32>
    %c1_453 = arith.constant 1 : index
    %c6_454 = arith.constant 6 : index
    %c0_455 = arith.constant 0 : index
    %c0_456 = arith.constant 0 : index
    %415 = vector.load %arg4[%c1_453, %c6_454, %c0_455, %c0_456] : memref<4x9x32x32xf32, #tpu.memory_space<vmem>>, vector<1x1x32x32xf32>
    %416 = vector.shape_cast %415 : vector<1x1x32x32xf32> to vector<32x32xf32>
    %cst_457 = arith.constant dense<0.000000e+00> : vector<80x32xf32>
    %417 = tpu.matmul %414, %416, %cst_457 {dimension_numbers = #tpu.dot_dimension_numbers<[1], [0], [0], [1], [0, 0, 1, 1], [], []>} : vector<80x32xf32>, vector<32x32xf32>, vector<80x32xf32> -> vector<80x32xf32>
    %418 = arith.addf %411, %417 : vector<80x32xf32>
    %c21_458 = arith.constant 21 : index
    %c0_459 = arith.constant 0 : index
    %419 = vector.load %arg13[%c21_458, %c0_459] : memref<102x32xf32, #tpu.memory_space<vmem>>, vector<80x32xf32>
    %cst_460 = arith.constant 0.000000e+00 : f32
    %420 = vector.broadcast %cst_460 : f32 to vector<80x32xf32>
    %421 = arith.maximumf %419, %420 : vector<80x32xf32>
    %c1_461 = arith.constant 1 : index
    %c7_462 = arith.constant 7 : index
    %c0_463 = arith.constant 0 : index
    %c0_464 = arith.constant 0 : index
    %422 = vector.load %arg4[%c1_461, %c7_462, %c0_463, %c0_464] : memref<4x9x32x32xf32, #tpu.memory_space<vmem>>, vector<1x1x32x32xf32>
    %423 = vector.shape_cast %422 : vector<1x1x32x32xf32> to vector<32x32xf32>
    %cst_465 = arith.constant dense<0.000000e+00> : vector<80x32xf32>
    %424 = tpu.matmul %421, %423, %cst_465 {dimension_numbers = #tpu.dot_dimension_numbers<[1], [0], [0], [1], [0, 0, 1, 1], [], []>} : vector<80x32xf32>, vector<32x32xf32>, vector<80x32xf32> -> vector<80x32xf32>
    %425 = arith.addf %418, %424 : vector<80x32xf32>
    %c22_466 = arith.constant 22 : index
    %c0_467 = arith.constant 0 : index
    %426 = vector.load %arg13[%c22_466, %c0_467] : memref<102x32xf32, #tpu.memory_space<vmem>>, vector<80x32xf32>
    %cst_468 = arith.constant 0.000000e+00 : f32
    %427 = vector.broadcast %cst_468 : f32 to vector<80x32xf32>
    %428 = arith.maximumf %426, %427 : vector<80x32xf32>
    %c1_469 = arith.constant 1 : index
    %c8_470 = arith.constant 8 : index
    %c0_471 = arith.constant 0 : index
    %c0_472 = arith.constant 0 : index
    %429 = vector.load %arg4[%c1_469, %c8_470, %c0_471, %c0_472] : memref<4x9x32x32xf32, #tpu.memory_space<vmem>>, vector<1x1x32x32xf32>
    %430 = vector.shape_cast %429 : vector<1x1x32x32xf32> to vector<32x32xf32>
    %cst_473 = arith.constant dense<0.000000e+00> : vector<80x32xf32>
    %431 = tpu.matmul %428, %430, %cst_473 {dimension_numbers = #tpu.dot_dimension_numbers<[1], [0], [0], [1], [0, 0, 1, 1], [], []>} : vector<80x32xf32>, vector<32x32xf32>, vector<80x32xf32> -> vector<80x32xf32>
    %432 = arith.addf %425, %431 : vector<80x32xf32>
    %c1_474 = arith.constant 1 : index
    %c0_475 = arith.constant 0 : index
    %c0_476 = arith.constant 0 : index
    %433 = vector.load %arg5[%c1_474, %c0_475, %c0_476] : memref<4x1x32xf32, #tpu.memory_space<vmem>>, vector<1x1x32xf32>
    %434 = vector.shape_cast %433 : vector<1x1x32xf32> to vector<1x32xf32>
    %435 = vector.broadcast %434 : vector<1x32xf32> to vector<80x32xf32>
    %436 = arith.addf %432, %435 : vector<80x32xf32>
    %437 = vector.broadcast %297 : vector<80x1xf32> to vector<80x32xf32>
    %438 = arith.mulf %436, %437 : vector<80x32xf32>
    %c11_477 = arith.constant 11 : index
    %c0_478 = arith.constant 0 : index
    %439 = vector.load %arg12[%c11_477, %c0_478] : memref<102x32xf32, #tpu.memory_space<vmem>>, vector<80x32xf32>
    %440 = arith.addf %439, %438 : vector<80x32xf32>
    %c11_479 = arith.constant 11 : index
    %c0_480 = arith.constant 0 : index
    %441 = vector.load %arg12[%c11_479, %c0_480] : memref<102x32xf32, #tpu.memory_space<vmem>>, vector<80x32xf32>
    tpu.vector_store %arg12[%c11_479, %c0_480], %440 {strides = array<i32>} : memref<102x32xf32, #tpu.memory_space<vmem>>, vector<80x32xf32>,
    %cst_481 = arith.constant 0.000000e+00 : f32
    %442 = vector.broadcast %cst_481 : f32 to vector<80x32xf32>
    %c0_482 = arith.constant 0 : index
    %c0_483 = arith.constant 0 : index
    %443 = vector.load %arg12[%c0_482, %c0_483] : memref<102x32xf32, #tpu.memory_space<vmem>>, vector<80x32xf32>
    %cst_484 = arith.constant 0.000000e+00 : f32
    %444 = vector.broadcast %cst_484 : f32 to vector<80x32xf32>
    %445 = arith.maximumf %443, %444 : vector<80x32xf32>
    %c2_485 = arith.constant 2 : index
    %c0_486 = arith.constant 0 : index
    %c0_487 = arith.constant 0 : index
    %c0_488 = arith.constant 0 : index
    %446 = vector.load %arg4[%c2_485, %c0_486, %c0_487, %c0_488] : memref<4x9x32x32xf32, #tpu.memory_space<vmem>>, vector<1x1x32x32xf32>
    %447 = vector.shape_cast %446 : vector<1x1x32x32xf32> to vector<32x32xf32>
    %cst_489 = arith.constant dense<0.000000e+00> : vector<80x32xf32>
    %448 = tpu.matmul %445, %447, %cst_489 {dimension_numbers = #tpu.dot_dimension_numbers<[1], [0], [0], [1], [0, 0, 1, 1], [], []>} : vector<80x32xf32>, vector<32x32xf32>, vector<80x32xf32> -> vector<80x32xf32>
    %449 = arith.addf %442, %448 : vector<80x32xf32>
    %c1_490 = arith.constant 1 : index
    %c0_491 = arith.constant 0 : index
    %450 = vector.load %arg12[%c1_490, %c0_491] : memref<102x32xf32, #tpu.memory_space<vmem>>, vector<80x32xf32>
    %cst_492 = arith.constant 0.000000e+00 : f32
    %451 = vector.broadcast %cst_492 : f32 to vector<80x32xf32>
    %452 = arith.maximumf %450, %451 : vector<80x32xf32>
    %c2_493 = arith.constant 2 : index
    %c1_494 = arith.constant 1 : index
    %c0_495 = arith.constant 0 : index
    %c0_496 = arith.constant 0 : index
    %453 = vector.load %arg4[%c2_493, %c1_494, %c0_495, %c0_496] : memref<4x9x32x32xf32, #tpu.memory_space<vmem>>, vector<1x1x32x32xf32>
    %454 = vector.shape_cast %453 : vector<1x1x32x32xf32> to vector<32x32xf32>
    %cst_497 = arith.constant dense<0.000000e+00> : vector<80x32xf32>
    %455 = tpu.matmul %452, %454, %cst_497 {dimension_numbers = #tpu.dot_dimension_numbers<[1], [0], [0], [1], [0, 0, 1, 1], [], []>} : vector<80x32xf32>, vector<32x32xf32>, vector<80x32xf32> -> vector<80x32xf32>
    %456 = arith.addf %449, %455 : vector<80x32xf32>
    %c2_498 = arith.constant 2 : index
    %c0_499 = arith.constant 0 : index
    %457 = vector.load %arg12[%c2_498, %c0_499] : memref<102x32xf32, #tpu.memory_space<vmem>>, vector<80x32xf32>
    %cst_500 = arith.constant 0.000000e+00 : f32
    %458 = vector.broadcast %cst_500 : f32 to vector<80x32xf32>
    %459 = arith.maximumf %457, %458 : vector<80x32xf32>
    %c2_501 = arith.constant 2 : index
    %c2_502 = arith.constant 2 : index
    %c0_503 = arith.constant 0 : index
    %c0_504 = arith.constant 0 : index
    %460 = vector.load %arg4[%c2_501, %c2_502, %c0_503, %c0_504] : memref<4x9x32x32xf32, #tpu.memory_space<vmem>>, vector<1x1x32x32xf32>
    %461 = vector.shape_cast %460 : vector<1x1x32x32xf32> to vector<32x32xf32>
    %cst_505 = arith.constant dense<0.000000e+00> : vector<80x32xf32>
    %462 = tpu.matmul %459, %461, %cst_505 {dimension_numbers = #tpu.dot_dimension_numbers<[1], [0], [0], [1], [0, 0, 1, 1], [], []>} : vector<80x32xf32>, vector<32x32xf32>, vector<80x32xf32> -> vector<80x32xf32>
    %463 = arith.addf %456, %462 : vector<80x32xf32>
    %c10_506 = arith.constant 10 : index
    %c0_507 = arith.constant 0 : index
    %464 = vector.load %arg12[%c10_506, %c0_507] : memref<102x32xf32, #tpu.memory_space<vmem>>, vector<80x32xf32>
    %cst_508 = arith.constant 0.000000e+00 : f32
    %465 = vector.broadcast %cst_508 : f32 to vector<80x32xf32>
    %466 = arith.maximumf %464, %465 : vector<80x32xf32>
    %c2_509 = arith.constant 2 : index
    %c3_510 = arith.constant 3 : index
    %c0_511 = arith.constant 0 : index
    %c0_512 = arith.constant 0 : index
    %467 = vector.load %arg4[%c2_509, %c3_510, %c0_511, %c0_512] : memref<4x9x32x32xf32, #tpu.memory_space<vmem>>, vector<1x1x32x32xf32>
    %468 = vector.shape_cast %467 : vector<1x1x32x32xf32> to vector<32x32xf32>
    %cst_513 = arith.constant dense<0.000000e+00> : vector<80x32xf32>
    %469 = tpu.matmul %466, %468, %cst_513 {dimension_numbers = #tpu.dot_dimension_numbers<[1], [0], [0], [1], [0, 0, 1, 1], [], []>} : vector<80x32xf32>, vector<32x32xf32>, vector<80x32xf32> -> vector<80x32xf32>
    %470 = arith.addf %463, %469 : vector<80x32xf32>
    %c11_514 = arith.constant 11 : index
    %c0_515 = arith.constant 0 : index
    %471 = vector.load %arg12[%c11_514, %c0_515] : memref<102x32xf32, #tpu.memory_space<vmem>>, vector<80x32xf32>
    %cst_516 = arith.constant 0.000000e+00 : f32
    %472 = vector.broadcast %cst_516 : f32 to vector<80x32xf32>
    %473 = arith.maximumf %471, %472 : vector<80x32xf32>
    %c2_517 = arith.constant 2 : index
    %c4_518 = arith.constant 4 : index
    %c0_519 = arith.constant 0 : index
    %c0_520 = arith.constant 0 : index
    %474 = vector.load %arg4[%c2_517, %c4_518, %c0_519, %c0_520] : memref<4x9x32x32xf32, #tpu.memory_space<vmem>>, vector<1x1x32x32xf32>
    %475 = vector.shape_cast %474 : vector<1x1x32x32xf32> to vector<32x32xf32>
    %cst_521 = arith.constant dense<0.000000e+00> : vector<80x32xf32>
    %476 = tpu.matmul %473, %475, %cst_521 {dimension_numbers = #tpu.dot_dimension_numbers<[1], [0], [0], [1], [0, 0, 1, 1], [], []>} : vector<80x32xf32>, vector<32x32xf32>, vector<80x32xf32> -> vector<80x32xf32>
    %477 = arith.addf %470, %476 : vector<80x32xf32>
    %c12_522 = arith.constant 12 : index
    %c0_523 = arith.constant 0 : index
    %478 = vector.load %arg12[%c12_522, %c0_523] : memref<102x32xf32, #tpu.memory_space<vmem>>, vector<80x32xf32>
    %cst_524 = arith.constant 0.000000e+00 : f32
    %479 = vector.broadcast %cst_524 : f32 to vector<80x32xf32>
    %480 = arith.maximumf %478, %479 : vector<80x32xf32>
    %c2_525 = arith.constant 2 : index
    %c5_526 = arith.constant 5 : index
    %c0_527 = arith.constant 0 : index
    %c0_528 = arith.constant 0 : index
    %481 = vector.load %arg4[%c2_525, %c5_526, %c0_527, %c0_528] : memref<4x9x32x32xf32, #tpu.memory_space<vmem>>, vector<1x1x32x32xf32>
    %482 = vector.shape_cast %481 : vector<1x1x32x32xf32> to vector<32x32xf32>
    %cst_529 = arith.constant dense<0.000000e+00> : vector<80x32xf32>
    %483 = tpu.matmul %480, %482, %cst_529 {dimension_numbers = #tpu.dot_dimension_numbers<[1], [0], [0], [1], [0, 0, 1, 1], [], []>} : vector<80x32xf32>, vector<32x32xf32>, vector<80x32xf32> -> vector<80x32xf32>
    %484 = arith.addf %477, %483 : vector<80x32xf32>
    %c20_530 = arith.constant 20 : index
    %c0_531 = arith.constant 0 : index
    %485 = vector.load %arg12[%c20_530, %c0_531] : memref<102x32xf32, #tpu.memory_space<vmem>>, vector<80x32xf32>
    %cst_532 = arith.constant 0.000000e+00 : f32
    %486 = vector.broadcast %cst_532 : f32 to vector<80x32xf32>
    %487 = arith.maximumf %485, %486 : vector<80x32xf32>
    %c2_533 = arith.constant 2 : index
    %c6_534 = arith.constant 6 : index
    %c0_535 = arith.constant 0 : index
    %c0_536 = arith.constant 0 : index
    %488 = vector.load %arg4[%c2_533, %c6_534, %c0_535, %c0_536] : memref<4x9x32x32xf32, #tpu.memory_space<vmem>>, vector<1x1x32x32xf32>
    %489 = vector.shape_cast %488 : vector<1x1x32x32xf32> to vector<32x32xf32>
    %cst_537 = arith.constant dense<0.000000e+00> : vector<80x32xf32>
    %490 = tpu.matmul %487, %489, %cst_537 {dimension_numbers = #tpu.dot_dimension_numbers<[1], [0], [0], [1], [0, 0, 1, 1], [], []>} : vector<80x32xf32>, vector<32x32xf32>, vector<80x32xf32> -> vector<80x32xf32>
    %491 = arith.addf %484, %490 : vector<80x32xf32>
    %c21_538 = arith.constant 21 : index
    %c0_539 = arith.constant 0 : index
    %492 = vector.load %arg12[%c21_538, %c0_539] : memref<102x32xf32, #tpu.memory_space<vmem>>, vector<80x32xf32>
    %cst_540 = arith.constant 0.000000e+00 : f32
    %493 = vector.broadcast %cst_540 : f32 to vector<80x32xf32>
    %494 = arith.maximumf %492, %493 : vector<80x32xf32>
    %c2_541 = arith.constant 2 : index
    %c7_542 = arith.constant 7 : index
    %c0_543 = arith.constant 0 : index
    %c0_544 = arith.constant 0 : index
    %495 = vector.load %arg4[%c2_541, %c7_542, %c0_543, %c0_544] : memref<4x9x32x32xf32, #tpu.memory_space<vmem>>, vector<1x1x32x32xf32>
    %496 = vector.shape_cast %495 : vector<1x1x32x32xf32> to vector<32x32xf32>
    %cst_545 = arith.constant dense<0.000000e+00> : vector<80x32xf32>
    %497 = tpu.matmul %494, %496, %cst_545 {dimension_numbers = #tpu.dot_dimension_numbers<[1], [0], [0], [1], [0, 0, 1, 1], [], []>} : vector<80x32xf32>, vector<32x32xf32>, vector<80x32xf32> -> vector<80x32xf32>
    %498 = arith.addf %491, %497 : vector<80x32xf32>
    %c22_546 = arith.constant 22 : index
    %c0_547 = arith.constant 0 : index
    %499 = vector.load %arg12[%c22_546, %c0_547] : memref<102x32xf32, #tpu.memory_space<vmem>>, vector<80x32xf32>
    %cst_548 = arith.constant 0.000000e+00 : f32
    %500 = vector.broadcast %cst_548 : f32 to vector<80x32xf32>
    %501 = arith.maximumf %499, %500 : vector<80x32xf32>
    %c2_549 = arith.constant 2 : index
    %c8_550 = arith.constant 8 : index
    %c0_551 = arith.constant 0 : index
    %c0_552 = arith.constant 0 : index
    %502 = vector.load %arg4[%c2_549, %c8_550, %c0_551, %c0_552] : memref<4x9x32x32xf32, #tpu.memory_space<vmem>>, vector<1x1x32x32xf32>
    %503 = vector.shape_cast %502 : vector<1x1x32x32xf32> to vector<32x32xf32>
    %cst_553 = arith.constant dense<0.000000e+00> : vector<80x32xf32>
    %504 = tpu.matmul %501, %503, %cst_553 {dimension_numbers = #tpu.dot_dimension_numbers<[1], [0], [0], [1], [0, 0, 1, 1], [], []>} : vector<80x32xf32>, vector<32x32xf32>, vector<80x32xf32> -> vector<80x32xf32>
    %505 = arith.addf %498, %504 : vector<80x32xf32>
    %c2_554 = arith.constant 2 : index
    %c0_555 = arith.constant 0 : index
    %c0_556 = arith.constant 0 : index
    %506 = vector.load %arg5[%c2_554, %c0_555, %c0_556] : memref<4x1x32xf32, #tpu.memory_space<vmem>>, vector<1x1x32xf32>
    %507 = vector.shape_cast %506 : vector<1x1x32xf32> to vector<1x32xf32>
    %508 = vector.broadcast %507 : vector<1x32xf32> to vector<80x32xf32>
    %509 = arith.addf %505, %508 : vector<80x32xf32>
    %510 = vector.broadcast %297 : vector<80x1xf32> to vector<80x32xf32>
    %511 = arith.mulf %509, %510 : vector<80x32xf32>
    %c11_557 = arith.constant 11 : index
    %c0_558 = arith.constant 0 : index
    %512 = vector.load %arg13[%c11_557, %c0_558] : memref<102x32xf32, #tpu.memory_space<vmem>>, vector<80x32xf32>
    tpu.vector_store %arg13[%c11_557, %c0_558], %511 {strides = array<i32>} : memref<102x32xf32, #tpu.memory_space<vmem>>, vector<80x32xf32>,
    %cst_559 = arith.constant 0.000000e+00 : f32
    %513 = vector.broadcast %cst_559 : f32 to vector<80x32xf32>
    %c0_560 = arith.constant 0 : index
    %c0_561 = arith.constant 0 : index
    %514 = vector.load %arg13[%c0_560, %c0_561] : memref<102x32xf32, #tpu.memory_space<vmem>>, vector<80x32xf32>
    %cst_562 = arith.constant 0.000000e+00 : f32
    %515 = vector.broadcast %cst_562 : f32 to vector<80x32xf32>
    %516 = arith.maximumf %514, %515 : vector<80x32xf32>
    %c3_563 = arith.constant 3 : index
    %c0_564 = arith.constant 0 : index
    %c0_565 = arith.constant 0 : index
    %c0_566 = arith.constant 0 : index
    %517 = vector.load %arg4[%c3_563, %c0_564, %c0_565, %c0_566] : memref<4x9x32x32xf32, #tpu.memory_space<vmem>>, vector<1x1x32x32xf32>
    %518 = vector.shape_cast %517 : vector<1x1x32x32xf32> to vector<32x32xf32>
    %cst_567 = arith.constant dense<0.000000e+00> : vector<80x32xf32>
    %519 = tpu.matmul %516, %518, %cst_567 {dimension_numbers = #tpu.dot_dimension_numbers<[1], [0], [0], [1], [0, 0, 1, 1], [], []>} : vector<80x32xf32>, vector<32x32xf32>, vector<80x32xf32> -> vector<80x32xf32>
    %520 = arith.addf %513, %519 : vector<80x32xf32>
    %c1_568 = arith.constant 1 : index
    %c0_569 = arith.constant 0 : index
    %521 = vector.load %arg13[%c1_568, %c0_569] : memref<102x32xf32, #tpu.memory_space<vmem>>, vector<80x32xf32>
    %cst_570 = arith.constant 0.000000e+00 : f32
    %522 = vector.broadcast %cst_570 : f32 to vector<80x32xf32>
    %523 = arith.maximumf %521, %522 : vector<80x32xf32>
    %c3_571 = arith.constant 3 : index
    %c1_572 = arith.constant 1 : index
    %c0_573 = arith.constant 0 : index
    %c0_574 = arith.constant 0 : index
    %524 = vector.load %arg4[%c3_571, %c1_572, %c0_573, %c0_574] : memref<4x9x32x32xf32, #tpu.memory_space<vmem>>, vector<1x1x32x32xf32>
    %525 = vector.shape_cast %524 : vector<1x1x32x32xf32> to vector<32x32xf32>
    %cst_575 = arith.constant dense<0.000000e+00> : vector<80x32xf32>
    %526 = tpu.matmul %523, %525, %cst_575 {dimension_numbers = #tpu.dot_dimension_numbers<[1], [0], [0], [1], [0, 0, 1, 1], [], []>} : vector<80x32xf32>, vector<32x32xf32>, vector<80x32xf32> -> vector<80x32xf32>
    %527 = arith.addf %520, %526 : vector<80x32xf32>
    %c2_576 = arith.constant 2 : index
    %c0_577 = arith.constant 0 : index
    %528 = vector.load %arg13[%c2_576, %c0_577] : memref<102x32xf32, #tpu.memory_space<vmem>>, vector<80x32xf32>
    %cst_578 = arith.constant 0.000000e+00 : f32
    %529 = vector.broadcast %cst_578 : f32 to vector<80x32xf32>
    %530 = arith.maximumf %528, %529 : vector<80x32xf32>
    %c3_579 = arith.constant 3 : index
    %c2_580 = arith.constant 2 : index
    %c0_581 = arith.constant 0 : index
    %c0_582 = arith.constant 0 : index
    %531 = vector.load %arg4[%c3_579, %c2_580, %c0_581, %c0_582] : memref<4x9x32x32xf32, #tpu.memory_space<vmem>>, vector<1x1x32x32xf32>
    %532 = vector.shape_cast %531 : vector<1x1x32x32xf32> to vector<32x32xf32>
    %cst_583 = arith.constant dense<0.000000e+00> : vector<80x32xf32>
    %533 = tpu.matmul %530, %532, %cst_583 {dimension_numbers = #tpu.dot_dimension_numbers<[1], [0], [0], [1], [0, 0, 1, 1], [], []>} : vector<80x32xf32>, vector<32x32xf32>, vector<80x32xf32> -> vector<80x32xf32>
    %534 = arith.addf %527, %533 : vector<80x32xf32>
    %c10_584 = arith.constant 10 : index
    %c0_585 = arith.constant 0 : index
    %535 = vector.load %arg13[%c10_584, %c0_585] : memref<102x32xf32, #tpu.memory_space<vmem>>, vector<80x32xf32>
    %cst_586 = arith.constant 0.000000e+00 : f32
    %536 = vector.broadcast %cst_586 : f32 to vector<80x32xf32>
    %537 = arith.maximumf %535, %536 : vector<80x32xf32>
    %c3_587 = arith.constant 3 : index
    %c3_588 = arith.constant 3 : index
    %c0_589 = arith.constant 0 : index
    %c0_590 = arith.constant 0 : index
    %538 = vector.load %arg4[%c3_587, %c3_588, %c0_589, %c0_590] : memref<4x9x32x32xf32, #tpu.memory_space<vmem>>, vector<1x1x32x32xf32>
    %539 = vector.shape_cast %538 : vector<1x1x32x32xf32> to vector<32x32xf32>
    %cst_591 = arith.constant dense<0.000000e+00> : vector<80x32xf32>
    %540 = tpu.matmul %537, %539, %cst_591 {dimension_numbers = #tpu.dot_dimension_numbers<[1], [0], [0], [1], [0, 0, 1, 1], [], []>} : vector<80x32xf32>, vector<32x32xf32>, vector<80x32xf32> -> vector<80x32xf32>
    %541 = arith.addf %534, %540 : vector<80x32xf32>
    %c11_592 = arith.constant 11 : index
    %c0_593 = arith.constant 0 : index
    %542 = vector.load %arg13[%c11_592, %c0_593] : memref<102x32xf32, #tpu.memory_space<vmem>>, vector<80x32xf32>
    %cst_594 = arith.constant 0.000000e+00 : f32
    %543 = vector.broadcast %cst_594 : f32 to vector<80x32xf32>
    %544 = arith.maximumf %542, %543 : vector<80x32xf32>
    %c3_595 = arith.constant 3 : index
    %c4_596 = arith.constant 4 : index
    %c0_597 = arith.constant 0 : index
    %c0_598 = arith.constant 0 : index
    %545 = vector.load %arg4[%c3_595, %c4_596, %c0_597, %c0_598] : memref<4x9x32x32xf32, #tpu.memory_space<vmem>>, vector<1x1x32x32xf32>
    %546 = vector.shape_cast %545 : vector<1x1x32x32xf32> to vector<32x32xf32>
    %cst_599 = arith.constant dense<0.000000e+00> : vector<80x32xf32>
    %547 = tpu.matmul %544, %546, %cst_599 {dimension_numbers = #tpu.dot_dimension_numbers<[1], [0], [0], [1], [0, 0, 1, 1], [], []>} : vector<80x32xf32>, vector<32x32xf32>, vector<80x32xf32> -> vector<80x32xf32>
    %548 = arith.addf %541, %547 : vector<80x32xf32>
    %c12_600 = arith.constant 12 : index
    %c0_601 = arith.constant 0 : index
    %549 = vector.load %arg13[%c12_600, %c0_601] : memref<102x32xf32, #tpu.memory_space<vmem>>, vector<80x32xf32>
    %cst_602 = arith.constant 0.000000e+00 : f32
    %550 = vector.broadcast %cst_602 : f32 to vector<80x32xf32>
    %551 = arith.maximumf %549, %550 : vector<80x32xf32>
    %c3_603 = arith.constant 3 : index
    %c5_604 = arith.constant 5 : index
    %c0_605 = arith.constant 0 : index
    %c0_606 = arith.constant 0 : index
    %552 = vector.load %arg4[%c3_603, %c5_604, %c0_605, %c0_606] : memref<4x9x32x32xf32, #tpu.memory_space<vmem>>, vector<1x1x32x32xf32>
    %553 = vector.shape_cast %552 : vector<1x1x32x32xf32> to vector<32x32xf32>
    %cst_607 = arith.constant dense<0.000000e+00> : vector<80x32xf32>
    %554 = tpu.matmul %551, %553, %cst_607 {dimension_numbers = #tpu.dot_dimension_numbers<[1], [0], [0], [1], [0, 0, 1, 1], [], []>} : vector<80x32xf32>, vector<32x32xf32>, vector<80x32xf32> -> vector<80x32xf32>
    %555 = arith.addf %548, %554 : vector<80x32xf32>
    %c20_608 = arith.constant 20 : index
    %c0_609 = arith.constant 0 : index
    %556 = vector.load %arg13[%c20_608, %c0_609] : memref<102x32xf32, #tpu.memory_space<vmem>>, vector<80x32xf32>
    %cst_610 = arith.constant 0.000000e+00 : f32
    %557 = vector.broadcast %cst_610 : f32 to vector<80x32xf32>
    %558 = arith.maximumf %556, %557 : vector<80x32xf32>
    %c3_611 = arith.constant 3 : index
    %c6_612 = arith.constant 6 : index
    %c0_613 = arith.constant 0 : index
    %c0_614 = arith.constant 0 : index
    %559 = vector.load %arg4[%c3_611, %c6_612, %c0_613, %c0_614] : memref<4x9x32x32xf32, #tpu.memory_space<vmem>>, vector<1x1x32x32xf32>
    %560 = vector.shape_cast %559 : vector<1x1x32x32xf32> to vector<32x32xf32>
    %cst_615 = arith.constant dense<0.000000e+00> : vector<80x32xf32>
    %561 = tpu.matmul %558, %560, %cst_615 {dimension_numbers = #tpu.dot_dimension_numbers<[1], [0], [0], [1], [0, 0, 1, 1], [], []>} : vector<80x32xf32>, vector<32x32xf32>, vector<80x32xf32> -> vector<80x32xf32>
    %562 = arith.addf %555, %561 : vector<80x32xf32>
    %c21_616 = arith.constant 21 : index
    %c0_617 = arith.constant 0 : index
    %563 = vector.load %arg13[%c21_616, %c0_617] : memref<102x32xf32, #tpu.memory_space<vmem>>, vector<80x32xf32>
    %cst_618 = arith.constant 0.000000e+00 : f32
    %564 = vector.broadcast %cst_618 : f32 to vector<80x32xf32>
    %565 = arith.maximumf %563, %564 : vector<80x32xf32>
    %c3_619 = arith.constant 3 : index
    %c7_620 = arith.constant 7 : index
    %c0_621 = arith.constant 0 : index
    %c0_622 = arith.constant 0 : index
    %566 = vector.load %arg4[%c3_619, %c7_620, %c0_621, %c0_622] : memref<4x9x32x32xf32, #tpu.memory_space<vmem>>, vector<1x1x32x32xf32>
    %567 = vector.shape_cast %566 : vector<1x1x32x32xf32> to vector<32x32xf32>
    %cst_623 = arith.constant dense<0.000000e+00> : vector<80x32xf32>
    %568 = tpu.matmul %565, %567, %cst_623 {dimension_numbers = #tpu.dot_dimension_numbers<[1], [0], [0], [1], [0, 0, 1, 1], [], []>} : vector<80x32xf32>, vector<32x32xf32>, vector<80x32xf32> -> vector<80x32xf32>
    %569 = arith.addf %562, %568 : vector<80x32xf32>
    %c22_624 = arith.constant 22 : index
    %c0_625 = arith.constant 0 : index
    %570 = vector.load %arg13[%c22_624, %c0_625] : memref<102x32xf32, #tpu.memory_space<vmem>>, vector<80x32xf32>
    %cst_626 = arith.constant 0.000000e+00 : f32
    %571 = vector.broadcast %cst_626 : f32 to vector<80x32xf32>
    %572 = arith.maximumf %570, %571 : vector<80x32xf32>
    %c3_627 = arith.constant 3 : index
    %c8_628 = arith.constant 8 : index
    %c0_629 = arith.constant 0 : index
    %c0_630 = arith.constant 0 : index
    %573 = vector.load %arg4[%c3_627, %c8_628, %c0_629, %c0_630] : memref<4x9x32x32xf32, #tpu.memory_space<vmem>>, vector<1x1x32x32xf32>
    %574 = vector.shape_cast %573 : vector<1x1x32x32xf32> to vector<32x32xf32>
    %cst_631 = arith.constant dense<0.000000e+00> : vector<80x32xf32>
    %575 = tpu.matmul %572, %574, %cst_631 {dimension_numbers = #tpu.dot_dimension_numbers<[1], [0], [0], [1], [0, 0, 1, 1], [], []>} : vector<80x32xf32>, vector<32x32xf32>, vector<80x32xf32> -> vector<80x32xf32>
    %576 = arith.addf %569, %575 : vector<80x32xf32>
    %c3_632 = arith.constant 3 : index
    %c0_633 = arith.constant 0 : index
    %c0_634 = arith.constant 0 : index
    %577 = vector.load %arg5[%c3_632, %c0_633, %c0_634] : memref<4x1x32xf32, #tpu.memory_space<vmem>>, vector<1x1x32xf32>
    %578 = vector.shape_cast %577 : vector<1x1x32xf32> to vector<1x32xf32>
    %579 = vector.broadcast %578 : vector<1x32xf32> to vector<80x32xf32>
    %580 = arith.addf %576, %579 : vector<80x32xf32>
    %581 = vector.broadcast %297 : vector<80x1xf32> to vector<80x32xf32>
    %582 = arith.mulf %580, %581 : vector<80x32xf32>
    %c11_635 = arith.constant 11 : index
    %c0_636 = arith.constant 0 : index
    %583 = vector.load %arg12[%c11_635, %c0_636] : memref<102x32xf32, #tpu.memory_space<vmem>>, vector<80x32xf32>
    %584 = arith.addf %583, %582 : vector<80x32xf32>
    %c11_637 = arith.constant 11 : index
    %c0_638 = arith.constant 0 : index
    %585 = vector.load %arg12[%c11_637, %c0_638] : memref<102x32xf32, #tpu.memory_space<vmem>>, vector<80x32xf32>
    tpu.vector_store %arg12[%c11_637, %c0_638], %584 {strides = array<i32>} : memref<102x32xf32, #tpu.memory_space<vmem>>, vector<80x32xf32>,
    %c11_639 = arith.constant 11 : index
    %c0_640 = arith.constant 0 : index
    %586 = vector.load %arg12[%c11_639, %c0_640] : memref<102x32xf32, #tpu.memory_space<vmem>>, vector<8x32xf32>
    %c0_641 = arith.constant 0 : index
    %c0_642 = arith.constant 0 : index
    %c0_643 = arith.constant 0 : index
    %c0_644 = arith.constant 0 : index
    %587 = vector.load %arg9[%c0_641, %c0_642, %c0_643, %c0_644] : memref<1x8x8x32xf32, #tpu.memory_space<vmem>>, vector<1x1x8x32xf32>
    %588 = vector.shape_cast %587 : vector<1x1x8x32xf32> to vector<8x32xf32>
    %589 = vector.shape_cast %586 : vector<8x32xf32> to vector<1x1x8x32xf32>
    tpu.vector_store %arg9[%c0_641, %c0_642, %c0_643, %c0_644], %589 {strides = array<i32>} : memref<1x8x8x32xf32, #tpu.memory_space<vmem>>, vector<1x1x8x32xf32>,
    %c21_645 = arith.constant 21 : index
    %c0_646 = arith.constant 0 : index
    %590 = vector.load %arg12[%c21_645, %c0_646] : memref<102x32xf32, #tpu.memory_space<vmem>>, vector<8x32xf32>
    %c0_647 = arith.constant 0 : index
    %c1_648 = arith.constant 1 : index
    %c0_649 = arith.constant 0 : index
    %c0_650 = arith.constant 0 : index
    %591 = vector.load %arg9[%c0_647, %c1_648, %c0_649, %c0_650] : memref<1x8x8x32xf32, #tpu.memory_space<vmem>>, vector<1x1x8x32xf32>
    %592 = vector.shape_cast %591 : vector<1x1x8x32xf32> to vector<8x32xf32>
    %593 = vector.shape_cast %590 : vector<8x32xf32> to vector<1x1x8x32xf32>
    tpu.vector_store %arg9[%c0_647, %c1_648, %c0_649, %c0_650], %593 {strides = array<i32>} : memref<1x8x8x32xf32, #tpu.memory_space<vmem>>, vector<1x1x8x32xf32>,
    %c31_651 = arith.constant 31 : index
    %c0_652 = arith.constant 0 : index
    %594 = vector.load %arg12[%c31_651, %c0_652] : memref<102x32xf32, #tpu.memory_space<vmem>>, vector<8x32xf32>
    %c0_653 = arith.constant 0 : index
    %c2_654 = arith.constant 2 : index
    %c0_655 = arith.constant 0 : index
    %c0_656 = arith.constant 0 : index
    %595 = vector.load %arg9[%c0_653, %c2_654, %c0_655, %c0_656] : memref<1x8x8x32xf32, #tpu.memory_space<vmem>>, vector<1x1x8x32xf32>
    %596 = vector.shape_cast %595 : vector<1x1x8x32xf32> to vector<8x32xf32>
    %597 = vector.shape_cast %594 : vector<8x32xf32> to vector<1x1x8x32xf32>
    tpu.vector_store %arg9[%c0_653, %c2_654, %c0_655, %c0_656], %597 {strides = array<i32>} : memref<1x8x8x32xf32, #tpu.memory_space<vmem>>, vector<1x1x8x32xf32>,
    %c41_657 = arith.constant 41 : index
    %c0_658 = arith.constant 0 : index
    %598 = vector.load %arg12[%c41_657, %c0_658] : memref<102x32xf32, #tpu.memory_space<vmem>>, vector<8x32xf32>
    %c0_659 = arith.constant 0 : index
    %c3_660 = arith.constant 3 : index
    %c0_661 = arith.constant 0 : index
    %c0_662 = arith.constant 0 : index
    %599 = vector.load %arg9[%c0_659, %c3_660, %c0_661, %c0_662] : memref<1x8x8x32xf32, #tpu.memory_space<vmem>>, vector<1x1x8x32xf32>
    %600 = vector.shape_cast %599 : vector<1x1x8x32xf32> to vector<8x32xf32>
    %601 = vector.shape_cast %598 : vector<8x32xf32> to vector<1x1x8x32xf32>
    tpu.vector_store %arg9[%c0_659, %c3_660, %c0_661, %c0_662], %601 {strides = array<i32>} : memref<1x8x8x32xf32, #tpu.memory_space<vmem>>, vector<1x1x8x32xf32>,
    %c51_663 = arith.constant 51 : index
    %c0_664 = arith.constant 0 : index
    %602 = vector.load %arg12[%c51_663, %c0_664] : memref<102x32xf32, #tpu.memory_space<vmem>>, vector<8x32xf32>
    %c0_665 = arith.constant 0 : index
    %c4_666 = arith.constant 4 : index
    %c0_667 = arith.constant 0 : index
    %c0_668 = arith.constant 0 : index
    %603 = vector.load %arg9[%c0_665, %c4_666, %c0_667, %c0_668] : memref<1x8x8x32xf32, #tpu.memory_space<vmem>>, vector<1x1x8x32xf32>
    %604 = vector.shape_cast %603 : vector<1x1x8x32xf32> to vector<8x32xf32>
    %605 = vector.shape_cast %602 : vector<8x32xf32> to vector<1x1x8x32xf32>
    tpu.vector_store %arg9[%c0_665, %c4_666, %c0_667, %c0_668], %605 {strides = array<i32>} : memref<1x8x8x32xf32, #tpu.memory_space<vmem>>, vector<1x1x8x32xf32>,
    %c61_669 = arith.constant 61 : index
    %c0_670 = arith.constant 0 : index
    %606 = vector.load %arg12[%c61_669, %c0_670] : memref<102x32xf32, #tpu.memory_space<vmem>>, vector<8x32xf32>
    %c0_671 = arith.constant 0 : index
    %c5_672 = arith.constant 5 : index
    %c0_673 = arith.constant 0 : index
    %c0_674 = arith.constant 0 : index
    %607 = vector.load %arg9[%c0_671, %c5_672, %c0_673, %c0_674] : memref<1x8x8x32xf32, #tpu.memory_space<vmem>>, vector<1x1x8x32xf32>
    %608 = vector.shape_cast %607 : vector<1x1x8x32xf32> to vector<8x32xf32>
    %609 = vector.shape_cast %606 : vector<8x32xf32> to vector<1x1x8x32xf32>
    tpu.vector_store %arg9[%c0_671, %c5_672, %c0_673, %c0_674], %609 {strides = array<i32>} : memref<1x8x8x32xf32, #tpu.memory_space<vmem>>, vector<1x1x8x32xf32>,
    %c71_675 = arith.constant 71 : index
    %c0_676 = arith.constant 0 : index
    %610 = vector.load %arg12[%c71_675, %c0_676] : memref<102x32xf32, #tpu.memory_space<vmem>>, vector<8x32xf32>
    %c0_677 = arith.constant 0 : index
    %c6_678 = arith.constant 6 : index
    %c0_679 = arith.constant 0 : index
    %c0_680 = arith.constant 0 : index
    %611 = vector.load %arg9[%c0_677, %c6_678, %c0_679, %c0_680] : memref<1x8x8x32xf32, #tpu.memory_space<vmem>>, vector<1x1x8x32xf32>
    %612 = vector.shape_cast %611 : vector<1x1x8x32xf32> to vector<8x32xf32>
    %613 = vector.shape_cast %610 : vector<8x32xf32> to vector<1x1x8x32xf32>
    tpu.vector_store %arg9[%c0_677, %c6_678, %c0_679, %c0_680], %613 {strides = array<i32>} : memref<1x8x8x32xf32, #tpu.memory_space<vmem>>, vector<1x1x8x32xf32>,
    %c81_681 = arith.constant 81 : index
    %c0_682 = arith.constant 0 : index
    %614 = vector.load %arg12[%c81_681, %c0_682] : memref<102x32xf32, #tpu.memory_space<vmem>>, vector<8x32xf32>
    %c0_683 = arith.constant 0 : index
    %c7_684 = arith.constant 7 : index
    %c0_685 = arith.constant 0 : index
    %c0_686 = arith.constant 0 : index
    %615 = vector.load %arg9[%c0_683, %c7_684, %c0_685, %c0_686] : memref<1x8x8x32xf32, #tpu.memory_space<vmem>>, vector<1x1x8x32xf32>
    %616 = vector.shape_cast %615 : vector<1x1x8x32xf32> to vector<8x32xf32>
    %617 = vector.shape_cast %614 : vector<8x32xf32> to vector<1x1x8x32xf32>
    tpu.vector_store %arg9[%c0_683, %c7_684, %c0_685, %c0_686], %617 {strides = array<i32>} : memref<1x8x8x32xf32, #tpu.memory_space<vmem>>, vector<1x1x8x32xf32>,
    return
  }
  func.func @transform_0(%arg0: i32) -> (i32, i32, i32, i32) {
    %c0_i32 = arith.constant 0 : i32
    %c0_i32_0 = arith.constant 0 : i32
    %c0_i32_1 = arith.constant 0 : i32
    %c0_i32_2 = arith.constant 0 : i32
    return %arg0, %c0_i32, %c0_i32_0, %c0_i32_1 : i32, i32, i32, i32
  }
  func.func @transform_1(%arg0: i32) -> (i32, i32, i32) {
    %c0_i32 = arith.constant 0 : i32
    %c0_i32_0 = arith.constant 0 : i32
    %c0_i32_1 = arith.constant 0 : i32
    %c0_i32_2 = arith.constant 0 : i32
    return %c0_i32, %c0_i32_0, %c0_i32_1 : i32, i32, i32
  }
  func.func @transform_2(%arg0: i32) -> (i32, i32) {
    %c0_i32 = arith.constant 0 : i32
    %c0_i32_0 = arith.constant 0 : i32
    %c0_i32_1 = arith.constant 0 : i32
    return %c0_i32, %c0_i32_0 : i32, i32
  }
  func.func @transform_3(%arg0: i32) -> (i32, i32, i32, i32) {
    %c0_i32 = arith.constant 0 : i32
    %c0_i32_0 = arith.constant 0 : i32
    %c0_i32_1 = arith.constant 0 : i32
    %c0_i32_2 = arith.constant 0 : i32
    %c0_i32_3 = arith.constant 0 : i32
    return %c0_i32, %c0_i32_0, %c0_i32_1, %c0_i32_2 : i32, i32, i32, i32
  }
  func.func @transform_4(%arg0: i32) -> (i32, i32, i32) {
    %c0_i32 = arith.constant 0 : i32
    %c0_i32_0 = arith.constant 0 : i32
    %c0_i32_1 = arith.constant 0 : i32
    %c0_i32_2 = arith.constant 0 : i32
    return %c0_i32, %c0_i32_0, %c0_i32_1 : i32, i32, i32
  }
  func.func @transform_5(%arg0: i32) -> (i32, i32) {
    %c0_i32 = arith.constant 0 : i32
    %c0_i32_0 = arith.constant 0 : i32
    %c0_i32_1 = arith.constant 0 : i32
    return %c0_i32, %c0_i32_0 : i32, i32
  }
  func.func @transform_6(%arg0: i32) -> (i32, i32) {
    %c0_i32 = arith.constant 0 : i32
    %c0_i32_0 = arith.constant 0 : i32
    %c0_i32_1 = arith.constant 0 : i32
    return %c0_i32, %c0_i32_0 : i32, i32
  }
  func.func @transform_7(%arg0: i32) -> (i32, i32) {
    %c0_i32 = arith.constant 0 : i32
    %c0_i32_0 = arith.constant 0 : i32
    %c0_i32_1 = arith.constant 0 : i32
    return %c0_i32, %c0_i32_0 : i32, i32
  }
  func.func @transform_8(%arg0: i32) -> (i32, i32, i32, i32) {
    %c0_i32 = arith.constant 0 : i32
    %c0_i32_0 = arith.constant 0 : i32
    %c0_i32_1 = arith.constant 0 : i32
    %c0_i32_2 = arith.constant 0 : i32
    return %arg0, %c0_i32, %c0_i32_0, %c0_i32_1 : i32, i32, i32, i32
  }
}

</mosaic_0001>

<bundles_post_ra>
// kernel: resblock_forward_pallas.1
= control target key start
LH: loop header
LB: loop body
LE: loop exit
PB: predicated region body
PF: predicated region fallthrough
CT: control target
= control target key end

     0   :  { %13 = vsyncpa [#allocation7], 0  ;;  %s21784_s0 = inlined_call_operand.vmem [shape: f32[2,16,16,4], index: 0, kind: input, shape index: {}]   ;;  %s21785_s1 = inlined_call_operand.vmem [shape: f32[9,4,32], index: 1, kind: input, shape index: {}]   ;;  %s21786_s2 = inlined_call_operand.vmem [shape: f32[1,32], index: 2, kind: input, shape index: {}]   ;;  %s21787_s3 = inlined_call_operand.vmem [shape: f32[4,9,32,32], index: 3, kind: input, shape index: {}]   ;;  %s21788_s4 = inlined_call_operand.vmem [shape: f32[4,1,32], index: 4, kind: input, shape index: {}]   ;;  %s21789_s5 = inlined_call_operand.vmem [shape: f32[288,1], index: 5, kind: input, shape index: {}]   ;;  %s21790_s6 = inlined_call_operand.vmem [shape: f32[64,288], index: 6, kind: input, shape index: {}]   ;;  %s21791_s7 = inlined_call_operand.vmem [shape: f32[80,1], index: 7, kind: input, shape index: {}]   ;;  %s21792_s8 = inlined_call_operand.hbm [shape: f32[2,8,8,32], index: 8, kind: output, shape index: {}]  }
   0x1   :  { %15 = vsyncpa [#allocation7 + $0x1], 0  ;;  %s18520_s27 = smov 0   ;;  %s18522_s28 = smov 0  }
   0x2   :  { %s18524_s29 = smov 0   ;;  %s18526_s30 = smov 0  }
   0x3 LB: > { %s18541_s9 = sadd.s32 4294967295, %s18466_s30   ;;  %s13920_s10 = sadd.s32 4294967294, %s18466_s30   ;;  %s18466_s30 = sphi %s18526_s30, %s21798_s30   ;;  %s18462_s29 = sphi %s18524_s29, %s21797_s29   ;;  %s18458_s28 = sphi %s18522_s28, %s21796_s28   ;;  %s18454_s27 = sphi %s18520_s27, %s21795_s27  }
   0x4   : > { %s18545_s11 = sadd.s32 1, %s18466_s30   ;;  %s201_s12 = sadd.s32 1, %s18462_s29 }
   0x5   : > { %s198_s13 = ssub.s32 %s18466_s30, %s18545_s11  ;;  %p211_p0 = scmp.ne.s32.totalorder %s18462_s29, %s18458_s28 }
   0x6   : > { %p199_p1 = scmp.eq.s32.totalorder %s198_s13, 0  ;;  %p212_p2 = scmp.eq.s32.totalorder %s18541_s9, 1 }
   0x7   : > { %p217_p3 = scmp.ne.s32.totalorder %s18458_s28, %s18454_s27  ;;  %p218_p4 = scmp.eq.s32.totalorder %s13920_s10, 1 }
   0x8   : > { %s18556_s14 = scalar_select %p199_p1, %s18462_s29, %s201_s12  }
   0x9   : > { %p18558_p5 = por %p212_p2, %p211_p0  ;;  %p18562_p6 = por %p218_p4, %p217_p3 }
   0xa   : > { %p13923_p7 = scmp.ge.s32.totalorder %s18466_s30, 1  ;;  %p265_p8 = scmp.lt.s32.totalorder %s18466_s30, 3 }
   0xc   : > { %p266_p9 = pnand %p13923_p7, %p265_p8 }
   0xd   : > { %v13957_v0 = vld [vmem:[%s21785_s1 + $0x4] sm:$0xf] (!%p266_p9)  ;;  %vm517_vm0 = vcmask (!%p266_p9), 1043456   ;;  %vm304_vm1 = vcmask (!%p266_p9), 31744   ;;  %v18468_v1 = vmov (!%p266_p9), 0.0   ;;  %vm18469_vm2 = vmmov (!%p266_p9), 0  }
   0xe   : > { %269 = sbr.rel (%p266_p9) target bundleno = 2758 (0xac6), region = 52  ;;  %15814 = vmatprep.subr.mxu0 (!%p266_p9), %v18468_v1  ;;  %15816 = vmatprep.mubr.msk.f32.mxu0 (!%p266_p9), %vm18469_vm2, %v18468_v1  ;;  %305 = vst.msk [vmem:[#allocation2] sm:$0xff] (!%p266_p9), %vm304_vm1, %v18468_v1  ;;  %306 = vst.msk [vmem:[#allocation2 + $0x8] sm:$0xff] (!%p266_p9), %vm304_vm1, %v18468_v1  ;;  %p299_p10 = scmp.lt.s32.totalorder (!%p266_p9), %s18541_s9, 1  ;;  %v13978_v2 = vld [vmem:[%s21785_s1 + $0x8] sm:$0xf] (!%p266_p9) }
   0xf   : > { %307 = vst.msk [vmem:[#allocation2 + $0x10] sm:$0xff] (!%p266_p9), %vm304_vm1, %v18468_v1  ;;  %308 = vst.msk [vmem:[#allocation2 + $0x18] sm:$0xff] (!%p266_p9), %vm304_vm1, %v18468_v1  ;;  %15815 = vmatpush3.msk.msra.mxu0 (!%p266_p9), %vm517_vm0, %v13957_v0  ;;  %18034 = vmatprep.subr.mxu1 (!%p266_p9), %v18468_v1  ;;  %v478_v17 = vld [vmem:[%s21785_s1] sm:$0xf] (!%p266_p9)  ;;  %v13989_v22 = vld [vmem:[%s21785_s1 + $0xc] sm:$0xf] (!%p266_p9) }
  0x10   : > { %309 = vst.msk [vmem:[#allocation2 + $0x20] sm:$0xff] (!%p266_p9), %vm304_vm1, %v18468_v1  ;;  %310 = vst.msk [vmem:[#allocation2 + $0x28] sm:$0xff] (!%p266_p9), %vm304_vm1, %v18468_v1  ;;  %18035 = vmatpush3.msk.msra.mxu1 (!%p266_p9), %vm517_vm0, %v13957_v0  ;;  %15837 = vmatprep.mubr.msk.f32.mxu1 (!%p266_p9), %vm18469_vm2, %v18468_v1  ;;  %v14000_v29 = vld [vmem:[%s21785_s1 + $0x10] sm:$0xf] (!%p266_p9)  ;;  %v14011_v44 = vld [vmem:[%s21785_s1 + $0x14] sm:$0xf] (!%p266_p9) }
  0x11   : > { %311 = vst.msk [vmem:[#allocation2 + $0x30] sm:$0xff] (!%p266_p9), %vm304_vm1, %v18468_v1  ;;  %312 = vst.msk [vmem:[#allocation2 + $0x38] sm:$0xff] (!%p266_p9), %vm304_vm1, %v18468_v1  ;;  %15843 = vmatprep.subr.mxu1 (!%p266_p9), %v18468_v1  ;;  %15872 = vmatprep.subr.mxu0 (!%p266_p9), %v18468_v1  ;;  %v14022_v49 = vld [vmem:[%s21785_s1 + $0x18] sm:$0xf] (!%p266_p9)  ;;  %v3413_v57 = vld [vmem:[%s21789_s5 + $0x70] sm:$0xff] (!%p266_p9)  ;;  %v18470_v61 = vmov (!%p266_p9), 0  }
  0x12   : > { %313 = vst.msk [vmem:[#allocation2 + $0x40] sm:$0xff] (!%p266_p9), %vm304_vm1, %v18468_v1  ;;  %314 = vst.msk [vmem:[#allocation2 + $0x48] sm:$0xff] (!%p266_p9), %vm304_vm1, %v18468_v1  ;;  %v3411_v59 = vld [vmem:[%s21789_s5 + $0x60] sm:$0xff] (!%p266_p9)  ;;  %18402 = vset.pattern.permute.xlu1 (!%p266_p9), %v18470_v61  ;;  %v14033_v62 = vld [vmem:[%s21785_s1 + $0x1c] sm:$0xf] (!%p266_p9)  ;;  %18401 = vset.pattern.permute.xlu0 (!%p266_p9), %v18470_v61  ;;  %vm426_vm3 = vcmask (!%p266_p9), 261120  }
  0x13   : > { %315 = vst.msk [vmem:[#allocation2 + $0x50] sm:$0xff] (!%p266_p9), %vm304_vm1, %v18468_v1  ;;  %316 = vst.msk [vmem:[#allocation2 + $0x58] sm:$0xff] (!%p266_p9), %vm304_vm1, %v18468_v1  ;;  %3444 = vperm.xlu1 (!%p266_p9), %18402, %v3413_v57   ;;  %3434 = vperm.xlu0 (!%p266_p9), %18401, %v3411_v59   ;;  %v3414_v63 = vld [vmem:[%s21789_s5 + $0x78] sm:$0xff] (!%p266_p9)  ;;  %v14088_v61 = vld [vmem:[%s21785_s1 + $0xc] sm:$0xf] (!%p266_p9)  ;;  %vm345_vm4 = vcmask (!%p266_p9), 29696  }
  0x14   : > { %317 = vst.msk [vmem:[#allocation2 + $0x60] sm:$0xff] (!%p266_p9), %vm304_vm1, %v18468_v1  ;;  %318 = vst.msk [vmem:[#allocation2 + $0x68] sm:$0xff] (!%p266_p9), %vm304_vm1, %v18468_v1  ;;  %vm467_vm5 = vcmask (!%p266_p9), 257024   ;;  %vm7148_vm6 = vcmask (!%p266_p9), 259072   ;;  %s296_s25 = sand.u32 (!%p266_p9), 1, %s18458_s28   ;;  %s14881_s12 = sshll.u32 (!%p266_p9), %s18541_s9, 10 }
  0x15   : > { %319 = vst.msk [vmem:[#allocation2 + $0x70] sm:$0xff] %vm304_vm1, %v18468_v1  ;;  %320 = vst.msk [vmem:[#allocation2 + $0x78] sm:$0xff] %vm304_vm1, %v18468_v1  ;;  %s300_s19 = scalar_select %p299_p10, %s18541_s9, 1  ;;  %v479_v6 = vld [vmem:[#allocation2 + $0x1] sm:$0xff] }
  0x16   : > { %321 = vst.msk [vmem:[#allocation2 + $0x80] sm:$0xff] %vm304_vm1, %v18468_v1  ;;  %322 = vst.msk [vmem:[#allocation2 + $0x88] sm:$0xff] %vm304_vm1, %v18468_v1  ;;  %15817 = vmatmul.mubr.msk.f32.vlgmr.msra.gmra.mrb[0].mxu0 %vm304_vm1, %v479_v6  ;;  %v480_v9 = vld [vmem:[#allocation2 + $0x9] sm:$0xff]  ;;  %v469_v20 = vld [vmem:[#allocation2] sm:$0xff]  ;;  %s13924_s26 = sshll.u32 %s296_s25, 6  ;;  %s21743_s9 = scalar_lea.sflag [#allocation7], %s296_s25 }
  0x17   : > { %323 = vst.msk [vmem:[#allocation2 + $0x90] sm:$0xff] %vm304_vm1, %v18468_v1  ;;  %324 = vst.msk [vmem:[#allocation2 + $0x98] sm:$0xff] %vm304_vm1, %v18468_v1  ;;  %s14880_s20 = sshll.u32 %s300_s19, 8  ;;  %15819 = vmatprep.mubr.msk.f32.mxu0 %vm18469_vm2, %v18468_v1  ;;  %15873 = vmatpush3.msk.msra.mxu0 %vm517_vm0, %v13978_v2  ;;  %v470_v23 = vld [vmem:[#allocation2 + $0x8] sm:$0xff]  ;;  %s21708_s10 = scalar_lea.vmem [#allocation6], %s13924_s26 }
  0x18   : > { %325 = vst.msk [vmem:[#allocation2 + $0xa0] sm:$0xff] %vm304_vm1, %v18468_v1  ;;  %326 = vst.msk [vmem:[#allocation2 + $0xa8] sm:$0xff] %vm304_vm1, %v18468_v1  ;;  %s18666_s23 = scalar_lea.vmem %s21784_s0, %s14880_s20  ;;  %15930 = vmatprep.subr.mxu0 %v18468_v1  ;;  %v771_v28 = vld [vmem:[#allocation2 + $0x2] sm:$0xff]  ;;  %v772_v31 = vld [vmem:[#allocation2 + $0xa] sm:$0xff]  ;;  %3449 = vperm.xlu1 %18402, %v3414_v63   ;;  %s13858_s13 = sshll.u32 %s21708_s10, 4  ;;  %s21735_s13 = int_to_ptr.vmem [resolvable:$true] %s13858_s13 }
  0x19   : > { %327 = vst.msk [vmem:[#allocation2 + $0xb0] sm:$0xff] %vm304_vm1, %v18468_v1  ;;  %328 = vst.msk [vmem:[#allocation2 + $0xb8] sm:$0xff] %vm304_vm1, %v18468_v1  ;;  %v13929_v3 = vld [vmem:[%s18666_s23 + $0x20] sm:$0xff]  ;;  %v13930_v4 = vld [vmem:[%s18666_s23 + $0x28] sm:$0xff]  ;;  %s21733_s19 = scalar_lea.hbm %s21792_s8, %s14881_s12  ;;  %s18404_s20 = scalar_lea.vmem %s21735_s13, 1024 }
  0x1a   : > { %329 = vst.msk [vmem:[#allocation2 + $0xc0] sm:$0xff] %vm304_vm1, %v18468_v1  ;;  %330 = vst.msk [vmem:[#allocation2 + $0xc8] sm:$0xff] %vm304_vm1, %v18468_v1  ;;  %v347_v5 = vld [vmem:[%s18666_s23] sm:$0xff]  ;;  %v348_v7 = vld [vmem:[%s18666_s23 + $0x8] sm:$0xff]  ;;  %15820 = vmatmul.mubr.msk.f32.gmra.mrb[2].mxu0 %vm304_vm1, %v480_v9  ;;  %p18405_p11 = scmp.ne.s32.totalorder %s21735_s13, %s18404_s20  ;;  %s18472_s21 = smov [#allocation6]  }
  0x1b   : > { %331 = vst.msk [vmem:[#allocation2 + $0xd0] sm:$0xff] %vm304_vm1, %v18468_v1  ;;  %332 = vst.msk [vmem:[#allocation2 + $0xd8] sm:$0xff] %vm304_vm1, %v18468_v1  ;;  %v13927_v8 = vld [vmem:[%s18666_s23 + $0x10] sm:$0xff]  ;;  %v13928_v10 = vld [vmem:[%s18666_s23 + $0x18] sm:$0xff]  ;;  %15822 = vmatprep.mubr.msk.f32.mxu0 %vm18469_vm2, %v18468_v1  ;;  %s18408_s22 = sshll.u32 %s18472_s21, 4  ;;  %s18409_s22 = int_to_ptr.vmem [resolvable:$false] %s18408_s22 }
  0x1c   : > { %333 = vst.msk [vmem:[#allocation2 + $0xe0] sm:$0xff] %vm304_vm1, %v18468_v1  ;;  %334 = vst.msk [vmem:[#allocation2 + $0xe8] sm:$0xff] %vm304_vm1, %v18468_v1  ;;  %v13931_v11 = vld [vmem:[%s18666_s23 + $0x30] sm:$0xff]  ;;  %v13932_v12 = vld [vmem:[%s18666_s23 + $0x38] sm:$0xff]  ;;  %p18406_p12 = pnand %p18405_p11, %p18558_p5  ;;  %p18411_p0 = scmp.lt.s32.totalorder %s21735_s13, %s18409_s22 }
  0x1d   : > { %335 = vst.msk [vmem:[#allocation2 + $0xf0] sm:$0xff] %vm304_vm1, %v18468_v1  ;;  %336 = vst.msk [vmem:[#allocation2 + $0xf8] sm:$0xff] %vm304_vm1, %v18468_v1  ;;  %v13933_v13 = vld [vmem:[%s18666_s23 + $0x40] sm:$0xff]  ;;  %v13934_v14 = vld [vmem:[%s18666_s23 + $0x48] sm:$0xff] }
  0x1e   : > { %337 = vst.msk [vmem:[#allocation2 + $0x100] sm:$0xff] %vm304_vm1, %v18468_v1  ;;  %338 = vst.msk [vmem:[#allocation2 + $0x108] sm:$0xff] %vm304_vm1, %v18468_v1  ;;  %v13935_v33 = vld [vmem:[%s18666_s23 + $0x50] sm:$0xff]  ;;  %v13936_v39 = vld [vmem:[%s18666_s23 + $0x58] sm:$0xff]  ;;  %p18407_p13 = pneg %p18406_p12 }
  0x1f   : > { %339 = vst.msk [vmem:[#allocation2 + $0x110] sm:$0xff] %vm304_vm1, %v18468_v1  ;;  %340 = vst.msk [vmem:[#allocation2 + $0x118] sm:$0xff] %vm304_vm1, %v18468_v1  ;;  %v13937_v42 = vld [vmem:[%s18666_s23 + $0x60] sm:$0xff]  ;;  %v13938_v45 = vld [vmem:[%s18666_s23 + $0x68] sm:$0xff] }
  0x20   : > { %341 = vst.msk [vmem:[#allocation2 + $0x120] sm:$0xff] %vm304_vm1, %v18468_v1  ;;  %342 = vst.msk [vmem:[#allocation2 + $0x128] sm:$0xff] %vm304_vm1, %v18468_v1  ;;  %v3412_v2 = vld [vmem:[%s21789_s5 + $0x68] sm:$0xff] }
  0x21   : > { %343 = vst.msk [vmem:[#allocation2 + $0x130] sm:$0xff] %vm304_vm1, %v18468_v1  ;;  %344 = vst.msk [vmem:[#allocation2 + $0x138] sm:$0xff] %vm304_vm1, %v18468_v1  ;;  %3439 = vperm.xlu0 %18401, %v3412_v2   ;;  %v1908_v9 = vld [vmem:[%s21789_s5 + $0x8] sm:$0xff] }
  0x22   : > { %359 = vst.msk [vmem:[#allocation2 + $0x37] sm:$0xff] %vm304_vm1, %v13929_v3  ;;  %360 = vst.msk [vmem:[#allocation2 + $0x3f] sm:$0xff] %vm304_vm1, %v13930_v4  ;;  %v13939_v4 = vld [vmem:[%s18666_s23 + $0x70] sm:$0xff] }
  0x23   : > { %349 = vst.msk [vmem:[#allocation2 + $0x13] sm:$0xff] %vm304_vm1, %v347_v5  ;;  %350 = vst.msk [vmem:[#allocation2 + $0x1b] sm:$0xff] %vm304_vm1, %v348_v7  ;;  %v3416_v5 = vld [vmem:[%s21789_s5 + $0x88] sm:$0xff]  ;;  %v3415_v7 = vld [vmem:[%s21789_s5 + $0x80] sm:$0xff] }
  0x24   : > { %354 = vst.msk [vmem:[#allocation2 + $0x25] sm:$0xff] %vm304_vm1, %v13927_v8  ;;  %355 = vst.msk [vmem:[#allocation2 + $0x2d] sm:$0xff] %vm304_vm1, %v13928_v10  ;;  %3459 = vperm.xlu1 %18402, %v3416_v5  }
  0x25   : > { %364 = vst.msk [vmem:[#allocation2 + $0x49] sm:$0xff] %vm304_vm1, %v13931_v11  ;;  %365 = vst.msk [vmem:[#allocation2 + $0x51] sm:$0xff] %vm304_vm1, %v13932_v12  ;;  %3454 = vperm.xlu0 %18401, %v3415_v7   ;;  %v1907_v11 = vld [vmem:[%s21789_s5] sm:$0xff] }
  0x26   : > { %369 = vst.msk [vmem:[#allocation2 + $0x5b] sm:$0xff] %vm304_vm1, %v13933_v13  ;;  %370 = vst.msk [vmem:[#allocation2 + $0x63] sm:$0xff] %vm304_vm1, %v13934_v14  ;;  %v14044_v12 = vld [vmem:[%s21785_s1 + $0x20] sm:$0xf]  ;;  %v4910_v13 = vld [vmem:[%s21789_s5 + $0x98] sm:$0xff] }
  0x27   : > { %374 = vst.msk [vmem:[#allocation2 + $0x6d] sm:$0xff] %vm304_vm1, %v13935_v33  ;;  %375 = vst.msk [vmem:[#allocation2 + $0x75] sm:$0xff] %vm304_vm1, %v13936_v39  ;;  %v1915_v33 = vld [vmem:[%s21789_s5 + $0x40] sm:$0xff] }
  0x28   : > { %379 = vst.msk [vmem:[#allocation2 + $0x7f] sm:$0xff] %vm304_vm1, %v13937_v42  ;;  %380 = vst.msk [vmem:[#allocation2 + $0x87] sm:$0xff] %vm304_vm1, %v13938_v45  ;;  %1923 = vperm.xlu1 %18402, %v1908_v9  }
  0x29   : > { %v486_v15 = vld [vmem:[#allocation2 + $0x39] sm:$0xff]  ;;  %v487_v18 = vld [vmem:[#allocation2 + $0x41] sm:$0xff]  ;;  %384 = vst.msk [vmem:[#allocation2 + $0x91] sm:$0xff] %vm304_vm1, %v13939_v4  ;;  %1918 = vperm.xlu0 %18401, %v1907_v11   ;;  %v13943_v11 = vld [vmem:[%s18666_s23 + $0x90] sm:$0xff] }
  0x2a   : > { %v481_v16 = vld [vmem:[#allocation2 + $0x11] sm:$0xff]  ;;  %15838 = vmatmul.mubr.msk.f32.vlgmr.msra.gmra.mrb[0].mxu1 %vm304_vm1, %v486_v15  ;;  %v482_v19 = vld [vmem:[#allocation2 + $0x19] sm:$0xff]  ;;  %394 = vst.msk [vmem:[#allocation2 + $0xb5] sm:$0xff] %vm304_vm1, %v13943_v11 }
  0x2b   : > { %15823 = vmatmul.mubr.msk.f32.gmra.mrb[4].mxu0 %vm304_vm1, %v481_v16  ;;  %15840 = vmatprep.mubr.msk.f32.mxu1 %vm18469_vm2, %v18468_v1  ;;  %v483_v21 = vld [vmem:[#allocation2 + $0x21] sm:$0xff]  ;;  %v484_v24 = vld [vmem:[#allocation2 + $0x29] sm:$0xff]  ;;  %v485_v26 = vld [vmem:[#allocation2 + $0x31] sm:$0xff]  ;;  %7136 = vst.msk [vmem:[#allocation4] sm:$0xff] %vm426_vm3, %v18468_v1 }
  0x2c   : > { %15825 = vmatprep.mubr.msk.f32.mxu0 %vm18469_vm2, %v18468_v1  ;;  %15844 = vmatpush3.msk.msra.mxu1 %vm517_vm0, %v478_v17  ;;  %v471_v25 = vld [vmem:[#allocation2 + $0x10] sm:$0xff]  ;;  %v472_v27 = vld [vmem:[#allocation2 + $0x18] sm:$0xff]  ;;  %v473_v30 = vld [vmem:[#allocation2 + $0x20] sm:$0xff]  ;;  %7137 = vst.msk [vmem:[#allocation4 + $0x8] sm:$0xff] %vm426_vm3, %v18468_v1 }
  0x2d   : > { %15901 = vmatprep.subr.mxu1 %v18468_v1  ;;  %v474_v32 = vld [vmem:[#allocation2 + $0x28] sm:$0xff]  ;;  %v773_v34 = vld [vmem:[#allocation2 + $0x12] sm:$0xff]  ;;  %v774_v36 = vld [vmem:[#allocation2 + $0x1a] sm:$0xff]  ;;  %4925 = vperm.xlu1 %18402, %v4910_v13   ;;  %7138 = vst.msk [vmem:[#allocation4 + $0x10] sm:$0xff] %vm426_vm3, %v18468_v1 }
  0x2e   : > { %15841 = vmatmul.mubr.msk.f32.gmra.mrb[2].mxu1 %vm304_vm1, %v487_v18  ;;  %v475_v35 = vld [vmem:[#allocation2 + $0x30] sm:$0xff]  ;;  %v476_v37 = vld [vmem:[#allocation2 + $0x38] sm:$0xff]  ;;  %v775_v38 = vld [vmem:[#allocation2 + $0x22] sm:$0xff]  ;;  %7139 = vst.msk [vmem:[#allocation4 + $0x18] sm:$0xff] %vm426_vm3, %v18468_v1 }
  0x2f   : > { %15826 = vmatmul.mubr.msk.f32.gmra.mrb[6].mxu0 %vm304_vm1, %v482_v19  ;;  %15845 = vmatprep.mubr.msk.f32.mxu1 %vm18469_vm2, %v18468_v1  ;;  %v477_v40 = vld [vmem:[#allocation2 + $0x40] sm:$0xff]  ;;  %v776_v41 = vld [vmem:[#allocation2 + $0x2a] sm:$0xff]  ;;  %v777_v43 = vld [vmem:[#allocation2 + $0x32] sm:$0xff]  ;;  %7140 = vst.msk [vmem:[#allocation4 + $0x20] sm:$0xff] %vm426_vm3, %v18468_v1 }
  0x30   : > { %15828 = vmatprep.mubr.msk.f32.mxu0 %vm18469_vm2, %v18468_v1  ;;  %v778_v46 = vld [vmem:[#allocation2 + $0x3a] sm:$0xff]  ;;  %v779_v47 = vld [vmem:[#allocation2 + $0x42] sm:$0xff]  ;;  %v1094_v52 = vld [vmem:[#allocation2 + $0x2b] sm:$0xff]  ;;  %7141 = vst.msk [vmem:[#allocation4 + $0x28] sm:$0xff] %vm426_vm3, %v18468_v1 }
  0x31   : > { %v1091_v48 = vld [vmem:[#allocation2 + $0x13] sm:$0xff]  ;;  %v1092_v50 = vld [vmem:[#allocation2 + $0x1b] sm:$0xff]  ;;  %v1093_v51 = vld [vmem:[#allocation2 + $0x23] sm:$0xff]  ;;  %7142 = vst.msk [vmem:[#allocation4 + $0x30] sm:$0xff] %vm426_vm3, %v18468_v1 }
  0x32   : > { %15846 = vmatmul.mubr.msk.f32.vlgmr.msra.gmra.mrb[4].mxu1 %vm304_vm1, %v469_v20  ;;  %v18838_v53 = vld [vmem:[#allocation2 + $0x4a] sm:$0xff]  ;;  %v1095_v54 = vld [vmem:[#allocation2 + $0x33] sm:$0xff]  ;;  %v1096_v56 = vld [vmem:[#allocation2 + $0x3b] sm:$0xff]  ;;  %7143 = vst.msk [vmem:[#allocation4 + $0x38] sm:$0xff] %vm426_vm3, %v18468_v1 }
  0x33   : > { %15829 = vmatmul.mubr.msk.f32.gmra.mrb[8].mxu0 %vm304_vm1, %v483_v21  ;;  %15848 = vmatprep.mubr.msk.f32.mxu1 %vm18469_vm2, %v18468_v1  ;;  %v18847_v55 = vld [vmem:[#allocation2 + $0x52] sm:$0xff]  ;;  %v1097_v60 = vld [vmem:[#allocation2 + $0x43] sm:$0xff]  ;;  %7144 = vst.msk [vmem:[#allocation4 + $0x40] sm:$0xff] %vm426_vm3, %v18468_v1  ;;  %7145 = vst.msk [vmem:[#allocation4 + $0x48] sm:$0xff] %vm426_vm3, %v18468_v1 }
  0x34   : > { %15831 = vmatprep.mubr.msk.f32.mxu0 %vm18469_vm2, %v18468_v1  ;;  %15902 = vmatpush3.msk.msra.mxu1 %vm517_vm0, %v13989_v22  ;;  %v1251_v58 = vld [vmem:[#allocation2 + $0x14] sm:$0xff]  ;;  %v1252_v0 = vld [vmem:[#allocation2 + $0x1c] sm:$0xff]  ;;  %v1098_v3 = vld [vmem:[#allocation2 + $0x4b] sm:$0xff]  ;;  %7146 = vst.msk [vmem:[#allocation4 + $0x50] sm:$0xff] %vm426_vm3, %v18468_v1 }
  0x35   : > { %15959 = vmatprep.subr.mxu1 %v18468_v1  ;;  %v1253_v6 = vld [vmem:[#allocation2 + $0x24] sm:$0xff]  ;;  %v1099_v8 = vld [vmem:[#allocation2 + $0x53] sm:$0xff]  ;;  %v1256_v18 = vld [vmem:[#allocation2 + $0x3c] sm:$0xff]  ;;  %7147 = vst.msk [vmem:[#allocation4 + $0x58] sm:$0xff] %vm426_vm3, %v18468_v1 }
  0x36   : > { %15849 = vmatmul.mubr.msk.f32.gmra.mrb[6].mxu1 %vm304_vm1, %v470_v23  ;;  %v1254_v10 = vld [vmem:[#allocation2 + $0x2c] sm:$0xff]  ;;  %v1255_v14 = vld [vmem:[#allocation2 + $0x34] sm:$0xff]  ;;  %v4911_v19 = vld [vmem:[%s21789_s5 + $0xa0] sm:$0xff]  ;;  %7150 = vst.msk [vmem:[#allocation5] sm:$0xff] %vm426_vm3, %v18468_v1 }
  0x37   : > { %15832 = vmatmul.mubr.msk.f32.gmra.mrb[10].mxu0 %vm304_vm1, %v484_v24  ;;  %15851 = vmatprep.mubr.msk.f32.mxu1 %vm18469_vm2, %v18468_v1  ;;  %v4909_v15 = vld [vmem:[%s21789_s5 + $0x90] sm:$0xff]  ;;  %v13940_v16 = vld [vmem:[%s18666_s23 + $0x78] sm:$0xff]  ;;  %v1257_v20 = vld [vmem:[#allocation2 + $0x44] sm:$0xff]  ;;  %7151 = vst.msk [vmem:[#allocation5 + $0x8] sm:$0xff] %vm426_vm3, %v18468_v1 }
  0x38   : > { %15834 = vmatprep.mubr.msk.f32.mxu0 %vm18469_vm2, %v18468_v1  ;;  %385 = vst.msk [vmem:[#allocation2 + $0x99] sm:$0xff] %vm304_vm1, %v13940_v16  ;;  %4920 = vperm.xlu0 %18401, %v4909_v15   ;;  %v1909_v17 = vld [vmem:[%s21789_s5 + $0x10] sm:$0xff]  ;;  %v1910_v21 = vld [vmem:[%s21789_s5 + $0x18] sm:$0xff]  ;;  %v1911_v23 = vld [vmem:[%s21789_s5 + $0x20] sm:$0xff] }
  0x39   : > { %1928 = vperm.xlu1 %18402, %v1909_v17   ;;  %v1258_v22 = vld [vmem:[#allocation2 + $0x4c] sm:$0xff]  ;;  %v1259_v24 = vld [vmem:[#allocation2 + $0x54] sm:$0xff]  ;;  %v1578_v45 = vld [vmem:[#allocation2 + $0x5d] sm:$0xff]  ;;  %7152 = vst.msk [vmem:[#allocation5 + $0x10] sm:$0xff] %vm426_vm3, %v18468_v1 }
  0x3a   : > { %15852 = vmatmul.mubr.msk.f32.gmra.mrb[8].mxu1 %vm304_vm1, %v471_v25  ;;  %v1912_v25 = vld [vmem:[%s21789_s5 + $0x28] sm:$0xff]  ;;  %v1733_v42 = vld [vmem:[#allocation2 + $0x36] sm:$0xff]  ;;  %v1982_v4 = vld [vmem:[#allocation2 + $0x60] sm:$0xff]  ;;  %7153 = vst.msk [vmem:[#allocation5 + $0x18] sm:$0xff] %vm426_vm3, %v18468_v1 }
  0x3b   : > { %15835 = vmatmul.mubr.msk.f32.gmra.mrb[12].mxu0 %vm304_vm1, %v485_v26  ;;  %15854 = vmatprep.mubr.msk.f32.mxu1 %vm18469_vm2, %v18468_v1  ;;  %v1571_v26 = vld [vmem:[#allocation2 + $0x25] sm:$0xff]  ;;  %v1732_v39 = vld [vmem:[#allocation2 + $0x2e] sm:$0xff]  ;;  %v1991_v57 = vld [vmem:[#allocation2 + $0x59] sm:$0xff]  ;;  %7154 = vst.msk [vmem:[#allocation5 + $0x20] sm:$0xff] %vm426_vm3, %v18468_v1 }
  0x3c   : > { %15874 = vmatprep.mubr.msk.f32.mxu0 %vm18469_vm2, %v18468_v1  ;;  %4930 = vperm.xlu0 %18401, %v4911_v19   ;;  %v1992_v59 = vld [vmem:[#allocation2 + $0x61] sm:$0xff]  ;;  %v1980_v63 = vld [vmem:[#allocation2 + $0x50] sm:$0xff]  ;;  %v1981_v2 = vld [vmem:[#allocation2 + $0x58] sm:$0xff]  ;;  %7155 = vst.msk [vmem:[#allocation5 + $0x28] sm:$0xff] %vm426_vm3, %v18468_v1 }
  0x3d   : > { %1938 = vperm.xlu1 %18402, %v1911_v23   ;;  %v1996_v5 = vld [vmem:[#allocation2 + $0x81] sm:$0xff]  ;;  %v1997_v7 = vld [vmem:[#allocation2 + $0x89] sm:$0xff]  ;;  %v1985_v9 = vld [vmem:[#allocation2 + $0x78] sm:$0xff]  ;;  %7156 = vst.msk [vmem:[#allocation5 + $0x30] sm:$0xff] %vm426_vm3, %v18468_v1 }
  0x3e   : > { %15855 = vmatmul.mubr.msk.f32.gmra.mrb[10].mxu1 %vm304_vm1, %v472_v27  ;;  %v1913_v27 = vld [vmem:[%s21789_s5 + $0x30] sm:$0xff]  ;;  %v13944_v13 = vld [vmem:[%s18666_s23 + $0x98] sm:$0xff]  ;;  %v13945_v15 = vld [vmem:[%s18666_s23 + $0xa0] sm:$0xff]  ;;  %7157 = vst.msk [vmem:[#allocation5 + $0x38] sm:$0xff] %vm426_vm3, %v18468_v1 }
  0x3f   : > { %15875 = vmatmul.mubr.msk.f32.vlgmr.msra.gmra.mrb[14].mxu0 %vm304_vm1, %v771_v28  ;;  %15857 = vmatprep.mubr.msk.f32.mxu1 %vm18469_vm2, %v18468_v1  ;;  %v14056_v28 = vld [vmem:[%s21785_s1 + $0x4] sm:$0xf]  ;;  %395 = vst.msk [vmem:[#allocation2 + $0xbd] sm:$0xff] %vm304_vm1, %v13944_v13  ;;  %399 = vst.msk [vmem:[#allocation2 + $0xc7] sm:$0xff] %vm304_vm1, %v13945_v15  ;;  %v14110_v16 = vld [vmem:[%s21785_s1 + $0x14] sm:$0xf] }
  0x40   : > { %15877 = vmatprep.mubr.msk.f32.mxu0 %vm18469_vm2, %v18468_v1  ;;  %15931 = vmatpush3.msk.msra.mxu0 %vm517_vm0, %v14000_v29  ;;  %v1572_v29 = vld [vmem:[#allocation2 + $0x2d] sm:$0xff]  ;;  %v2285_v23 = vld [vmem:[#allocation2 + $0x7a] sm:$0xff]  ;;  %7158 = vst.msk [vmem:[#allocation5 + $0x40] sm:$0xff] %vm426_vm3, %v18468_v1  ;;  %7159 = vst.msk [vmem:[#allocation5 + $0x48] sm:$0xff] %vm426_vm3, %v18468_v1 }
  0x41   : > { %15988 = vmatprep.subr.mxu0 %v18468_v1  ;;  %1933 = vperm.xlu0 %18401, %v1910_v21   ;;  %v2283_v17 = vld [vmem:[#allocation2 + $0x6a] sm:$0xff]  ;;  %7160 = vst.msk [vmem:[#allocation5 + $0x50] sm:$0xff] %vm426_vm3, %v18468_v1  ;;  %7161 = vst.msk [vmem:[#allocation5 + $0x58] sm:$0xff] %vm426_vm3, %v18468_v1 }
  0x42   : > { %15858 = vmatmul.mubr.msk.f32.gmra.mrb[12].mxu1 %vm304_vm1, %v473_v30  ;;  %1943 = vperm.xlu1 %18402, %v1912_v25   ;;  %v1914_v30 = vld [vmem:[%s21789_s5 + $0x38] sm:$0xff]  ;;  %346 = vst.msk [vmem:[#allocation2 + $0x140] sm:$0x3f] %vm345_vm4, %v18468_v1 }
  0x43   : > { %15878 = vmatmul.mubr.msk.f32.gmra.mrb[16].mxu0 %vm304_vm1, %v772_v31  ;;  %15860 = vmatprep.mubr.msk.f32.mxu1 %vm18469_vm2, %v18468_v1  ;;  %v18986_v31 = vld [vmem:[#allocation2 + $0x5c] sm:$0xff]  ;;  %7149 = vst.msk [vmem:[#allocation4 + $0x60] sm:$0x3f] %vm7148_vm6, %v18468_v1  ;;  %7162 = vst.msk [vmem:[#allocation5 + $0x60] sm:$0x3f] %vm7148_vm6, %v18468_v1 }
  0x44   : > { %15880 = vmatprep.mubr.msk.f32.mxu0 %vm18469_vm2, %v18468_v1 }
  0x46   : > { %15861 = vmatmul.mubr.msk.f32.gmra.mrb[14].mxu1 %vm304_vm1, %v474_v32  ;;  %1948 = vperm.xlu1 %18402, %v1913_v27   ;;  %v1573_v32 = vld [vmem:[#allocation2 + $0x35] sm:$0xff] }
  0x47   : > { %15881 = vmatmul.mubr.msk.f32.gmra.mrb[18].mxu0 %vm304_vm1, %v773_v34  ;;  %15863 = vmatprep.mubr.msk.f32.mxu1 %vm18469_vm2, %v18468_v1 }
  0x48   : > { %15883 = vmatprep.mubr.msk.f32.mxu0 %vm18469_vm2, %v18468_v1 }
  0x4a   : > { %15864 = vmatmul.mubr.msk.f32.gmra.mrb[16].mxu1 %vm304_vm1, %v475_v35  ;;  %1953 = vperm.xlu1 %18402, %v1914_v30   ;;  %v1574_v35 = vld [vmem:[#allocation2 + $0x3d] sm:$0xff] }
  0x4b   : > { %15884 = vmatmul.mubr.msk.f32.gmra.mrb[20].mxu0 %vm304_vm1, %v774_v36  ;;  %15866 = vmatprep.mubr.msk.f32.mxu1 %vm18469_vm2, %v18468_v1 }
  0x4c   : > { %15886 = vmatprep.mubr.msk.f32.mxu0 %vm18469_vm2, %v18468_v1 }
  0x4e   : > { %15867 = vmatmul.mubr.msk.f32.gmra.mrb[18].mxu1 %vm304_vm1, %v476_v37  ;;  %1958 = vperm.xlu1 %18402, %v1915_v33   ;;  %v1988_v37 = vld [vmem:[%s21785_s1] sm:$0xf] }
  0x4f   : > { %15887 = vmatmul.mubr.msk.f32.gmra.mrb[22].mxu0 %vm304_vm1, %v775_v38  ;;  %15869 = vmatprep.mubr.msk.f32.mxu1 %vm18469_vm2, %v18468_v1 }
  0x50   : > { %15889 = vmatprep.mubr.msk.f32.mxu0 %vm18469_vm2, %v18468_v1 }
  0x52   : > { %15870 = vmatmul.mubr.msk.f32.gmra.mrb[20].mxu1 %vm304_vm1, %v477_v40  ;;  %v1576_v40 = vld [vmem:[#allocation2 + $0x4d] sm:$0xff] }
  0x53   : > { %15890 = vmatmul.mubr.msk.f32.gmra.mrb[24].mxu0 %vm304_vm1, %v776_v41  ;;  %15903 = vmatprep.mubr.msk.f32.mxu1 %vm18469_vm2, %v18468_v1 }
  0x54   : > { %15892 = vmatprep.mubr.msk.f32.mxu0 %vm18469_vm2, %v18468_v1 }
  0x56   : > { %15904 = vmatmul.mubr.msk.f32.vlgmr.msra.gmra.mrb[22].mxu1 %vm304_vm1, %v773_v34  ;;  %v19000_v34 = vld [vmem:[#allocation2 + $0x64] sm:$0xff] }
  0x57   : > { %15893 = vmatmul.mubr.msk.f32.gmra.mrb[26].mxu0 %vm304_vm1, %v777_v43  ;;  %15906 = vmatprep.mubr.msk.f32.mxu1 %vm18469_vm2, %v18468_v1 }
  0x58   : > { %15895 = vmatprep.mubr.msk.f32.mxu0 %vm18469_vm2, %v18468_v1  ;;  %15960 = vmatpush3.msk.msra.mxu1 %vm517_vm0, %v14011_v44  ;;  %v1734_v44 = vld [vmem:[#allocation2 + $0x3e] sm:$0xff] }
  0x59   : > { %16017 = vmatprep.subr.mxu1 %v18468_v1 }
  0x5a   : > { %15907 = vmatmul.mubr.msk.f32.gmra.mrb[24].mxu1 %vm304_vm1, %v774_v36  ;;  %v1731_v36 = vld [vmem:[#allocation2 + $0x26] sm:$0xff] }
  0x5b   : > { %15896 = vmatmul.mubr.msk.f32.gmra.mrb[28].mxu0 %vm304_vm1, %v778_v46  ;;  %15909 = vmatprep.mubr.msk.f32.mxu1 %vm18469_vm2, %v18468_v1 }
  0x5c   : > { %15898 = vmatprep.mubr.msk.f32.mxu0 %vm18469_vm2, %v18468_v1 }
  0x5e   : > { %15910 = vmatmul.mubr.msk.f32.gmra.mrb[26].mxu1 %vm304_vm1, %v775_v38  ;;  %v1575_v38 = vld [vmem:[#allocation2 + $0x45] sm:$0xff] }
  0x5f   : > { %15899 = vmatmul.mubr.msk.f32.gmra.mrb[30].mxu0 %vm304_vm1, %v779_v47  ;;  %15912 = vmatprep.mubr.msk.f32.mxu1 %vm18469_vm2, %v18468_v1 }
  0x60   : > { %15932 = vmatprep.mubr.msk.f32.mxu0 %vm18469_vm2, %v18468_v1 }
  0x62   : > { %15913 = vmatmul.mubr.msk.f32.gmra.mrb[28].mxu1 %vm304_vm1, %v776_v41  ;;  %v13941_v41 = vld [vmem:[%s18666_s23 + $0x80] sm:$0xff] }
  0x63   : > { %15933 = vmatmul.mubr.msk.f32.vlgmr.msra.gmra.mrb[32].mxu0 %vm304_vm1, %v1091_v48  ;;  %15915 = vmatprep.mubr.msk.f32.mxu1 %vm18469_vm2, %v18468_v1  ;;  %389 = vst.msk [vmem:[#allocation2 + $0xa3] sm:$0xff] %vm304_vm1, %v13941_v41  ;;  %v1736_v48 = vld [vmem:[#allocation2 + $0x4e] sm:$0xff] }
  0x64   : > { %15935 = vmatprep.mubr.msk.f32.mxu0 %vm18469_vm2, %v18468_v1  ;;  %15989 = vmatpush3.msk.msra.mxu0 %vm517_vm0, %v14022_v49  ;;  %v1989_v49 = vld [vmem:[#allocation2 + $0x49] sm:$0xff] }
  0x65   : > { %16046 = vmatprep.subr.mxu0 %v18468_v1 }
  0x66   : > { %15916 = vmatmul.mubr.msk.f32.gmra.mrb[30].mxu1 %vm304_vm1, %v777_v43  ;;  %v1577_v43 = vld [vmem:[#allocation2 + $0x55] sm:$0xff] }
  0x67   : > { %15936 = vmatmul.mubr.msk.f32.gmra.mrb[34].mxu0 %vm304_vm1, %v1092_v50  ;;  %15918 = vmatprep.mubr.msk.f32.mxu1 %vm18469_vm2, %v18468_v1  ;;  %v1737_v50 = vld [vmem:[#allocation2 + $0x56] sm:$0xff] }
  0x68   : > { %15938 = vmatprep.mubr.msk.f32.mxu0 %vm18469_vm2, %v18468_v1 }
  0x6a   : > { %15919 = vmatmul.mubr.msk.f32.gmra.mrb[32].mxu1 %vm304_vm1, %v778_v46  ;;  %v1735_v46 = vld [vmem:[#allocation2 + $0x46] sm:$0xff] }
  0x6b   : > { %15939 = vmatmul.mubr.msk.f32.gmra.mrb[36].mxu0 %vm304_vm1, %v1093_v51  ;;  %15921 = vmatprep.mubr.msk.f32.mxu1 %vm18469_vm2, %v18468_v1  ;;  %v14077_v51 = vld [vmem:[%s21785_s1 + $0x8] sm:$0xf] }
  0x6c   : > { %15941 = vmatprep.mubr.msk.f32.mxu0 %vm18469_vm2, %v18468_v1 }
  0x6e   : > { %15922 = vmatmul.mubr.msk.f32.gmra.mrb[34].mxu1 %vm304_vm1, %v779_v47  ;;  %v1579_v47 = vld [vmem:[#allocation2 + $0x65] sm:$0xff] }
  0x6f   : > { %15942 = vmatmul.mubr.msk.f32.gmra.mrb[38].mxu0 %vm304_vm1, %v1094_v52  ;;  %15924 = vmatprep.mubr.msk.f32.mxu1 %vm18469_vm2, %v18468_v1  ;;  %v13942_v52 = vld [vmem:[%s18666_s23 + $0x88] sm:$0xff] }
  0x70   : > { %15944 = vmatprep.mubr.msk.f32.mxu0 %vm18469_vm2, %v18468_v1  ;;  %390 = vst.msk [vmem:[#allocation2 + $0xab] sm:$0xff] %vm304_vm1, %v13942_v52 }
  0x72   : > { %15925 = vmatmul.mubr.msk.f32.gmra.mrb[36].mxu1 %vm304_vm1, %v18838_v53 }
  0x73   : > { %15945 = vmatmul.mubr.msk.f32.gmra.mrb[40].mxu0 %vm304_vm1, %v1095_v54  ;;  %15927 = vmatprep.mubr.msk.f32.mxu1 %vm18469_vm2, %v18468_v1  ;;  %v1990_v54 = vld [vmem:[#allocation2 + $0x51] sm:$0xff] }
  0x74   : > { %15947 = vmatprep.mubr.msk.f32.mxu0 %vm18469_vm2, %v18468_v1 }
  0x76   : > { %15928 = vmatmul.mubr.msk.f32.gmra.mrb[38].mxu1 %vm304_vm1, %v18847_v55 }
  0x77   : > { %15948 = vmatmul.mubr.msk.f32.gmra.mrb[42].mxu0 %vm304_vm1, %v1096_v56  ;;  %15961 = vmatprep.mubr.msk.f32.mxu1 %vm18469_vm2, %v18468_v1  ;;  %v1738_v56 = vld [vmem:[#allocation2 + $0x5e] sm:$0xff] }
  0x78   : > { %15950 = vmatprep.mubr.msk.f32.mxu0 %vm18469_vm2, %v18468_v1 }
  0x7a   : > { %15962 = vmatmul.mubr.msk.f32.vlgmr.msra.gmra.mrb[40].mxu1 %vm304_vm1, %v1251_v58  ;;  %v1739_v58 = vld [vmem:[#allocation2 + $0x66] sm:$0xff] }
  0x7b   : > { %15951 = vmatmul.mubr.msk.f32.gmra.mrb[44].mxu0 %vm304_vm1, %v1097_v60  ;;  %15964 = vmatprep.mubr.msk.f32.mxu1 %vm18469_vm2, %v18468_v1  ;;  %v1979_v60 = vld [vmem:[#allocation2 + $0x48] sm:$0xff] }
  0x7c   : > { %15953 = vmatprep.mubr.msk.f32.mxu0 %vm18469_vm2, %v18468_v1  ;;  %16018 = vmatpush3.msk.msra.mxu1 %vm517_vm0, %v14033_v62  ;;  %v1993_v62 = vld [vmem:[#allocation2 + $0x69] sm:$0xff] }
  0x7d   : > { %16075 = vmatprep.subr.mxu1 %v18468_v1 }
  0x7e   : > { %15965 = vmatmul.mubr.msk.f32.gmra.mrb[42].mxu1 %vm304_vm1, %v1252_v0  ;;  %v1994_v0 = vld [vmem:[#allocation2 + $0x71] sm:$0xff] }
  0x7f   : > { %15954 = vmatmul.mubr.msk.f32.gmra.mrb[46].mxu0 %vm304_vm1, %v1098_v3  ;;  %15967 = vmatprep.mubr.msk.f32.mxu1 %vm18469_vm2, %v18468_v1  ;;  %v1995_v3 = vld [vmem:[#allocation2 + $0x79] sm:$0xff] }
  0x80   : > { %15956 = vmatprep.mubr.msk.f32.mxu0 %vm18469_vm2, %v18468_v1 }
  0x82   : > { %15968 = vmatmul.mubr.msk.f32.gmra.mrb[44].mxu1 %vm304_vm1, %v1253_v6 }
  0x83   : > { %15957 = vmatmul.mubr.msk.f32.gmra.mrb[48].mxu0 %vm304_vm1, %v1099_v8  ;;  %15970 = vmatprep.mubr.msk.f32.mxu1 %vm18469_vm2, %v18468_v1  ;;  %v1984_v8 = vld [vmem:[#allocation2 + $0x70] sm:$0xff] }
  0x84   : > { %15990 = vmatprep.mubr.msk.f32.mxu0 %vm18469_vm2, %v18468_v1 }
  0x86   : > { %15971 = vmatmul.mubr.msk.f32.gmra.mrb[46].mxu1 %vm304_vm1, %v1254_v10 }
  0x87   : > { %15991 = vmatmul.mubr.msk.f32.vlgmr.msra.gmra.mrb[50].mxu0 %vm304_vm1, %v1253_v6  ;;  %15973 = vmatprep.mubr.msk.f32.mxu1 %vm18469_vm2, %v18468_v1  ;;  %v1983_v6 = vld [vmem:[#allocation2 + $0x68] sm:$0xff] }
  0x88   : > { %15993 = vmatprep.mubr.msk.f32.mxu0 %vm18469_vm2, %v18468_v1  ;;  %16047 = vmatpush3.msk.msra.mxu0 %vm517_vm0, %v14044_v12  ;;  %v1986_v12 = vld [vmem:[#allocation2 + $0x80] sm:$0xff] }
  0x89   : > { %16104 = vmatprep.subr.mxu0 %v18468_v1 }
  0x8a   : > { %15974 = vmatmul.mubr.msk.f32.gmra.mrb[48].mxu1 %vm304_vm1, %v1255_v14 }
  0x8b   : > { %15994 = vmatmul.mubr.msk.f32.gmra.mrb[52].mxu0 %vm304_vm1, %v1254_v10  ;;  %15976 = vmatprep.mubr.msk.f32.mxu1 %vm18469_vm2, %v18468_v1  ;;  %v14099_v10 = vld [vmem:[%s21785_s1 + $0x10] sm:$0xf] }
  0x8c   : > { %15996 = vmatprep.mubr.msk.f32.mxu0 %vm18469_vm2, %v18468_v1 }
  0x8e   : > { %15977 = vmatmul.mubr.msk.f32.gmra.mrb[50].mxu1 %vm304_vm1, %v1256_v18 }
  0x8f   : > { %15997 = vmatmul.mubr.msk.f32.gmra.mrb[54].mxu0 %vm304_vm1, %v1255_v14  ;;  %15979 = vmatprep.mubr.msk.f32.mxu1 %vm18469_vm2, %v18468_v1  ;;  %v1987_v14 = vld [vmem:[#allocation2 + $0x88] sm:$0xff] }
  0x90   : > { %15999 = vmatprep.mubr.msk.f32.mxu0 %vm18469_vm2, %v18468_v1 }
  0x92   : > { %15980 = vmatmul.mubr.msk.f32.gmra.mrb[52].mxu1 %vm304_vm1, %v1257_v20 }
  0x93   : > { %16000 = vmatmul.mubr.msk.f32.gmra.mrb[56].mxu0 %vm304_vm1, %v1256_v18  ;;  %15982 = vmatprep.mubr.msk.f32.mxu1 %vm18469_vm2, %v18468_v1  ;;  %v13946_v18 = vld [vmem:[%s18666_s23 + $0xa8] sm:$0xff] }
  0x94   : > { %16002 = vmatprep.mubr.msk.f32.mxu0 %vm18469_vm2, %v18468_v1  ;;  %400 = vst.msk [vmem:[#allocation2 + $0xcf] sm:$0xff] %vm304_vm1, %v13946_v18  ;;  %v2758_v18 = vld [vmem:[#allocation2 + $0x6c] sm:$0xff] }
  0x96   : > { %15983 = vmatmul.mubr.msk.f32.gmra.mrb[54].mxu1 %vm304_vm1, %v1258_v22 }
  0x97   : > { %16003 = vmatmul.mubr.msk.f32.gmra.mrb[58].mxu0 %vm304_vm1, %v1257_v20  ;;  %15985 = vmatprep.mubr.msk.f32.mxu1 %vm18469_vm2, %v18468_v1  ;;  %v2284_v20 = vld [vmem:[#allocation2 + $0x72] sm:$0xff] }
  0x98   : > { %16005 = vmatprep.mubr.msk.f32.mxu0 %vm18469_vm2, %v18468_v1 }
  0x9a   : > { %15986 = vmatmul.mubr.msk.f32.gmra.mrb[56].mxu1 %vm304_vm1, %v1259_v24 }
  0x9b   : > { %16006 = vmatmul.mubr.msk.f32.gmra.mrb[60].mxu0 %vm304_vm1, %v1258_v22  ;;  %16019 = vmatprep.mubr.msk.f32.mxu1 %vm18469_vm2, %v18468_v1 }
  0x9c   : > { %16008 = vmatprep.mubr.msk.f32.mxu0 %vm18469_vm2, %v18468_v1 }
  0x9e   : > { %16020 = vmatmul.mubr.msk.f32.vlgmr.msra.gmra.mrb[58].mxu1 %vm304_vm1, %v1571_v26 }
  0x9f   : > { %16009 = vmatmul.mubr.msk.f32.gmra.mrb[62].mxu0 %vm304_vm1, %v1259_v24  ;;  %16022 = vmatprep.mubr.msk.f32.mxu1 %vm18469_vm2, %v18468_v1 }
  0xa0   : > { %16011 = vmatprep.mubr.msk.f32.mxu0 %vm18469_vm2, %v18468_v1  ;;  %16076 = vmatpush3.msk.msra.mxu1 %vm517_vm0, %v14056_v28  ;;  %v19186_v28 = vld [vmem:[#allocation2 + $0x82] sm:$0xff] }
  0xa1   : > { %16133 = vmatprep.subr.mxu1 %v18468_v1 }
  0xa2   : > { %16023 = vmatmul.mubr.msk.f32.gmra.mrb[60].mxu1 %vm304_vm1, %v1572_v29 }
  0xa3   : > { %16012 = vmatmul.mubr.msk.f32.gmra.mrb[64].mxu0 %vm304_vm1, %v18986_v31  ;;  %16025 = vmatprep.mubr.msk.f32.mxu1 %vm18469_vm2, %v18468_v1 }
  0xa4   : > { %16014 = vmatprep.mubr.msk.f32.mxu0 %vm18469_vm2, %v18468_v1 }
  0xa6   : > { %16026 = vmatmul.mubr.msk.f32.gmra.mrb[62].mxu1 %vm304_vm1, %v1573_v32 }
  0xa7   : > { %16015 = vmatmul.mubr.msk.f32.gmra.mrb[66].mxu0 %vm304_vm1, %v19000_v34  ;;  %16028 = vmatprep.mubr.msk.f32.mxu1 %vm18469_vm2, %v18468_v1 }
  0xa8   : > { %16048 = vmatprep.mubr.msk.f32.mxu0 %vm18469_vm2, %v18468_v1 }
  0xaa   : > { %16029 = vmatmul.mubr.msk.f32.gmra.mrb[64].mxu1 %vm304_vm1, %v1574_v35  ;;  %v19199_v35 = vld [vmem:[#allocation2 + $0x8a] sm:$0xff] }
  0xab   : > { %16049 = vmatmul.mubr.msk.f32.vlgmr.msra.gmra.mrb[68].mxu0 %vm304_vm1, %v1731_v36  ;;  %16031 = vmatprep.mubr.msk.f32.mxu1 %vm18469_vm2, %v18468_v1 }
  0xac   : > { %16051 = vmatprep.mubr.msk.f32.mxu0 %vm18469_vm2, %v18468_v1  ;;  %16105 = vmatpush3.msk.msra.mxu0 %vm517_vm0, %v1988_v37  ;;  %v18471_v37 = vmov -1e+30  }
  0xad   : > { %16162 = vmatprep.subr.mxu0 %v18468_v1  ;;  %429 = vst.msk [vmem:[#allocation3 + $0x10] sm:$0xff] %vm426_vm3, %v18471_v37  ;;  %430 = vst.msk [vmem:[#allocation3 + $0x18] sm:$0xff] %vm426_vm3, %v18471_v37 }
  0xae   : > { %16032 = vmatmul.mubr.msk.f32.gmra.mrb[66].mxu1 %vm304_vm1, %v1575_v38  ;;  %427 = vst.msk [vmem:[#allocation3] sm:$0xff] %vm426_vm3, %v18471_v37  ;;  %428 = vst.msk [vmem:[#allocation3 + $0x8] sm:$0xff] %vm426_vm3, %v18471_v37 }
  0xaf   : > { %16052 = vmatmul.mubr.msk.f32.gmra.mrb[70].mxu0 %vm304_vm1, %v1732_v39  ;;  %16034 = vmatprep.mubr.msk.f32.mxu1 %vm18469_vm2, %v18468_v1  ;;  %431 = vst.msk [vmem:[#allocation3 + $0x20] sm:$0xff] %vm426_vm3, %v18471_v37  ;;  %432 = vst.msk [vmem:[#allocation3 + $0x28] sm:$0xff] %vm426_vm3, %v18471_v37 }
  0xb0   : > { %16054 = vmatprep.mubr.msk.f32.mxu0 %vm18469_vm2, %v18468_v1  ;;  %433 = vst.msk [vmem:[#allocation3 + $0x30] sm:$0xff] %vm426_vm3, %v18471_v37  ;;  %434 = vst.msk [vmem:[#allocation3 + $0x38] sm:$0xff] %vm426_vm3, %v18471_v37 }
  0xb1   : > { %435 = vst.msk [vmem:[#allocation3 + $0x40] sm:$0xff] %vm426_vm3, %v18471_v37  ;;  %436 = vst.msk [vmem:[#allocation3 + $0x48] sm:$0xff] %vm426_vm3, %v18471_v37 }
  0xb2   : > { %16035 = vmatmul.mubr.msk.f32.gmra.mrb[68].mxu1 %vm304_vm1, %v1576_v40  ;;  %437 = vst.msk [vmem:[#allocation3 + $0x50] sm:$0xff] %vm426_vm3, %v18471_v37  ;;  %438 = vst.msk [vmem:[#allocation3 + $0x58] sm:$0xff] %vm426_vm3, %v18471_v37 }
  0xb3   : > { %16055 = vmatmul.mubr.msk.f32.gmra.mrb[72].mxu0 %vm304_vm1, %v1733_v42  ;;  %16037 = vmatprep.mubr.msk.f32.mxu1 %vm18469_vm2, %v18468_v1  ;;  %439 = vst.msk [vmem:[#allocation3 + $0x60] sm:$0xff] %vm426_vm3, %v18471_v37  ;;  %440 = vst.msk [vmem:[#allocation3 + $0x68] sm:$0xff] %vm426_vm3, %v18471_v37  ;;  %v2597_v42 = vld [vmem:[#allocation2 + $0x5b] sm:$0xff] }
  0xb4   : > { %16057 = vmatprep.mubr.msk.f32.mxu0 %vm18469_vm2, %v18468_v1  ;;  %441 = vst.msk [vmem:[#allocation3 + $0x70] sm:$0xff] %vm426_vm3, %v18471_v37  ;;  %442 = vst.msk [vmem:[#allocation3 + $0x78] sm:$0xff] %vm426_vm3, %v18471_v37 }
  0xb5   : > { %443 = vst.msk [vmem:[#allocation3 + $0x80] sm:$0xff] %vm426_vm3, %v18471_v37  ;;  %444 = vst.msk [vmem:[#allocation3 + $0x88] sm:$0xff] %vm426_vm3, %v18471_v37 }
  0xb6   : > { %16038 = vmatmul.mubr.msk.f32.gmra.mrb[70].mxu1 %vm304_vm1, %v1577_v43  ;;  %445 = vst.msk [vmem:[#allocation3 + $0x90] sm:$0xff] %vm426_vm3, %v18471_v37  ;;  %446 = vst.msk [vmem:[#allocation3 + $0x98] sm:$0xff] %vm426_vm3, %v18471_v37 }
  0xb7   : > { %16058 = vmatmul.mubr.msk.f32.gmra.mrb[74].mxu0 %vm304_vm1, %v1734_v44  ;;  %16040 = vmatprep.mubr.msk.f32.mxu1 %vm18469_vm2, %v18468_v1  ;;  %447 = vst.msk [vmem:[#allocation3 + $0xa0] sm:$0xff] %vm426_vm3, %v18471_v37  ;;  %448 = vst.msk [vmem:[#allocation3 + $0xa8] sm:$0xff] %vm426_vm3, %v18471_v37 }
  0xb8   : > { %16060 = vmatprep.mubr.msk.f32.mxu0 %vm18469_vm2, %v18468_v1  ;;  %449 = vst.msk [vmem:[#allocation3 + $0xb0] sm:$0xff] %vm426_vm3, %v18471_v37  ;;  %450 = vst.msk [vmem:[#allocation3 + $0xb8] sm:$0xff] %vm426_vm3, %v18471_v37 }
  0xb9   : > { %451 = vst.msk [vmem:[#allocation3 + $0xc0] sm:$0xff] %vm426_vm3, %v18471_v37  ;;  %452 = vst.msk [vmem:[#allocation3 + $0xc8] sm:$0xff] %vm426_vm3, %v18471_v37 }
  0xba   : > { %16041 = vmatmul.mubr.msk.f32.gmra.mrb[72].mxu1 %vm304_vm1, %v1578_v45  ;;  %453 = vst.msk [vmem:[#allocation3 + $0xd0] sm:$0xff] %vm426_vm3, %v18471_v37  ;;  %454 = vst.msk [vmem:[#allocation3 + $0xd8] sm:$0xff] %vm426_vm3, %v18471_v37  ;;  %v14121_v45 = vld [vmem:[%s21785_s1 + $0x18] sm:$0xf] }
  0xbb   : > { %16061 = vmatmul.mubr.msk.f32.gmra.mrb[76].mxu0 %vm304_vm1, %v1735_v46  ;;  %16043 = vmatprep.mubr.msk.f32.mxu1 %vm18469_vm2, %v18468_v1  ;;  %455 = vst.msk [vmem:[#allocation3 + $0xe0] sm:$0xff] %vm426_vm3, %v18471_v37  ;;  %456 = vst.msk [vmem:[#allocation3 + $0xe8] sm:$0xff] %vm426_vm3, %v18471_v37 }
  0xbc   : > { %16063 = vmatprep.mubr.msk.f32.mxu0 %vm18469_vm2, %v18468_v1  ;;  %457 = vst.msk [vmem:[#allocation3 + $0xf0] sm:$0xff] %vm426_vm3, %v18471_v37  ;;  %458 = vst.msk [vmem:[#allocation3 + $0xf8] sm:$0xff] %vm426_vm3, %v18471_v37 }
  0xbd   : > { %459 = vst.msk [vmem:[#allocation3 + $0x100] sm:$0xff] %vm426_vm3, %v18471_v37  ;;  %460 = vst.msk [vmem:[#allocation3 + $0x108] sm:$0xff] %vm426_vm3, %v18471_v37 }
  0xbe   : > { %16044 = vmatmul.mubr.msk.f32.gmra.mrb[74].mxu1 %vm304_vm1, %v1579_v47  ;;  %461 = vst.msk [vmem:[#allocation3 + $0x110] sm:$0xff] %vm426_vm3, %v18471_v37  ;;  %462 = vst.msk [vmem:[#allocation3 + $0x118] sm:$0xff] %vm426_vm3, %v18471_v37 }
  0xbf   : > { %16064 = vmatmul.mubr.msk.f32.gmra.mrb[78].mxu0 %vm304_vm1, %v1736_v48  ;;  %16077 = vmatprep.mubr.msk.f32.mxu1 %vm18469_vm2, %v18468_v1  ;;  %463 = vst.msk [vmem:[#allocation3 + $0x120] sm:$0xff] %vm426_vm3, %v18471_v37  ;;  %464 = vst.msk [vmem:[#allocation3 + $0x128] sm:$0xff] %vm426_vm3, %v18471_v37 }
  0xc0   : > { %16066 = vmatprep.mubr.msk.f32.mxu0 %vm18469_vm2, %v18468_v1  ;;  %465 = vst.msk [vmem:[#allocation3 + $0x130] sm:$0xff] %vm426_vm3, %v18471_v37  ;;  %466 = vst.msk [vmem:[#allocation3 + $0x138] sm:$0xff] %vm426_vm3, %v18471_v37 }
  0xc1   : > { %468 = vst.msk [vmem:[#allocation3 + $0x140] sm:$0xf] %vm467_vm5, %v18471_v37 }
  0xc2   : > { %16078 = vmatmul.mubr.msk.f32.vlgmr.msra.gmra.mrb[76].mxu1 %vm304_vm1, %v1989_v49  ;;  %v2598_v49 = vld [vmem:[#allocation2 + $0x63] sm:$0xff] }
  0xc3   : > { %16067 = vmatmul.mubr.msk.f32.gmra.mrb[80].mxu0 %vm304_vm1, %v1737_v50  ;;  %16080 = vmatprep.mubr.msk.f32.mxu1 %vm18469_vm2, %v18468_v1 }
  0xc4   : > { %16069 = vmatprep.mubr.msk.f32.mxu0 %vm18469_vm2, %v18468_v1  ;;  %16134 = vmatpush3.msk.msra.mxu1 %vm517_vm0, %v14077_v51  ;;  %v19351_v51 = vld [vmem:[#allocation2 + $0x92] sm:$0xff] }
  0xc5   : > { %16191 = vmatprep.subr.mxu1 %v18468_v1 }
  0xc6   : > { %16081 = vmatmul.mubr.msk.f32.gmra.mrb[78].mxu1 %vm304_vm1, %v1990_v54 }
  0xc7   : > { %16070 = vmatmul.mubr.msk.f32.gmra.mrb[82].mxu0 %vm304_vm1, %v1738_v56  ;;  %16083 = vmatprep.mubr.msk.f32.mxu1 %vm18469_vm2, %v18468_v1 }
  0xc8   : > { %16072 = vmatprep.mubr.msk.f32.mxu0 %vm18469_vm2, %v18468_v1 }
  0xca   : > { %16084 = vmatmul.mubr.msk.f32.gmra.mrb[80].mxu1 %vm304_vm1, %v1991_v57 }
  0xcb   : > { %16073 = vmatmul.mubr.msk.f32.gmra.mrb[84].mxu0 %vm304_vm1, %v1739_v58  ;;  %16086 = vmatprep.mubr.msk.f32.mxu1 %vm18469_vm2, %v18468_v1 }
  0xcc   : > { %16106 = vmatprep.mubr.msk.f32.mxu0 %vm18469_vm2, %v18468_v1 }
  0xce   : > { %16087 = vmatmul.mubr.msk.f32.gmra.mrb[82].mxu1 %vm304_vm1, %v1992_v59  ;;  %v2599_v59 = vld [vmem:[#allocation2 + $0x6b] sm:$0xff] }
  0xcf   : > { %16107 = vmatmul.mubr.msk.f32.vlgmr.msra.gmra.mrb[86].mxu0 %vm304_vm1, %v1979_v60  ;;  %16089 = vmatprep.mubr.msk.f32.mxu1 %vm18469_vm2, %v18468_v1  ;;  %v19363_v60 = vld [vmem:[#allocation2 + $0x9a] sm:$0xff] }
  0xd0   : > { %16109 = vmatprep.mubr.msk.f32.mxu0 %vm18469_vm2, %v18468_v1  ;;  %16163 = vmatpush3.msk.msra.mxu0 %vm517_vm0, %v14088_v61 }
  0xd1   : > { %16220 = vmatprep.subr.mxu0 %v18468_v1 }
  0xd2   : > { %16090 = vmatmul.mubr.msk.f32.gmra.mrb[84].mxu1 %vm304_vm1, %v1993_v62 }
  0xd3   : > { %16110 = vmatmul.mubr.msk.f32.gmra.mrb[88].mxu0 %vm304_vm1, %v1980_v63  ;;  %16092 = vmatprep.mubr.msk.f32.mxu1 %vm18469_vm2, %v18468_v1 }
  0xd4   : > { %16112 = vmatprep.mubr.msk.f32.mxu0 %vm18469_vm2, %v18468_v1 }
  0xd6   : > { %16093 = vmatmul.mubr.msk.f32.gmra.mrb[86].mxu1 %vm304_vm1, %v1994_v0 }
  0xd7   : > { %16113 = vmatmul.mubr.msk.f32.gmra.mrb[90].mxu0 %vm304_vm1, %v1981_v2  ;;  %16095 = vmatprep.mubr.msk.f32.mxu1 %vm18469_vm2, %v18468_v1 }
  0xd8   : > { %16115 = vmatprep.mubr.msk.f32.mxu0 %vm18469_vm2, %v18468_v1 }
  0xda   : > { %16096 = vmatmul.mubr.msk.f32.gmra.mrb[88].mxu1 %vm304_vm1, %v1995_v3 }
  0xdb   : > { %16116 = vmatmul.mubr.msk.f32.gmra.mrb[92].mxu0 %vm304_vm1, %v1982_v4  ;;  %16098 = vmatprep.mubr.msk.f32.mxu1 %vm18469_vm2, %v18468_v1  ;;  %v2600_v4 = vld [vmem:[#allocation2 + $0x73] sm:$0xff] }
  0xdc   : > { %16118 = vmatprep.mubr.msk.f32.mxu0 %vm18469_vm2, %v18468_v1 }
  0xde   : > { %16099 = vmatmul.mubr.msk.f32.gmra.mrb[90].mxu1 %vm304_vm1, %v1996_v5 }
  0xdf   : > { %16119 = vmatmul.mubr.msk.f32.gmra.mrb[94].mxu0 %vm304_vm1, %v1983_v6  ;;  %16101 = vmatprep.mubr.msk.f32.mxu1 %vm18469_vm2, %v18468_v1  ;;  %v14132_v6 = vld [vmem:[%s21785_s1 + $0x1c] sm:$0xf] }
  0xe0   : > { %16121 = vmatprep.mubr.msk.f32.mxu0 %vm18469_vm2, %v18468_v1 }
  0xe2   : > { %16102 = vmatmul.mubr.msk.f32.gmra.mrb[92].mxu1 %vm304_vm1, %v1997_v7 }
  0xe3   : > { %16122 = vmatmul.mubr.msk.f32.gmra.mrb[96].mxu0 %vm304_vm1, %v1984_v8  ;;  %16135 = vmatprep.mubr.msk.f32.mxu1 %vm18469_vm2, %v18468_v1 }
  0xe4   : > { %16124 = vmatprep.mubr.msk.f32.mxu0 %vm18469_vm2, %v18468_v1 }
  0xe6   : > { %16136 = vmatmul.mubr.msk.f32.vlgmr.msra.gmra.mrb[94].mxu1 %vm304_vm1, %v18838_v53  ;;  %v2281_v53 = vld [vmem:[#allocation2 + $0x5a] sm:$0xff] }
  0xe7   : > { %16125 = vmatmul.mubr.msk.f32.gmra.mrb[98].mxu0 %vm304_vm1, %v1985_v9  ;;  %16138 = vmatprep.mubr.msk.f32.mxu1 %vm18469_vm2, %v18468_v1 }
  0xe8   : > { %16127 = vmatprep.mubr.msk.f32.mxu0 %vm18469_vm2, %v18468_v1  ;;  %16192 = vmatpush3.msk.msra.mxu1 %vm517_vm0, %v14099_v10 }
  0xe9   : > { %16249 = vmatprep.subr.mxu1 %v18468_v1  ;;  %v19163_v19 = vpop.f32.mrb[0].mxu0 }
  0xea   : > { %16139 = vmatmul.mubr.msk.f32.gmra.mrb[96].mxu1 %vm304_vm1, %v18847_v55  ;;  %v2282_v55 = vld [vmem:[#allocation2 + $0x62] sm:$0xff]  ;;  %v15818_v21 = vpop.f32.mrb[1].mxu0 }
  0xeb   : > { %16128 = vmatmul.mubr.msk.f32.gmra.mrb[100].mxu0 %vm304_vm1, %v1986_v12  ;;  %16141 = vmatprep.mubr.msk.f32.mxu1 %vm18469_vm2, %v18468_v1  ;;  %v2601_v12 = vld [vmem:[#allocation2 + $0x7b] sm:$0xff] }
  0xec   : > { %16130 = vmatprep.mubr.msk.f32.mxu0 %vm18469_vm2, %v18468_v1 }
  0xed   : > { %v19171_v22 = vpop.f32.mrb[2].mxu0 }
  0xee   : > { %16142 = vmatmul.mubr.msk.f32.gmra.mrb[98].mxu1 %vm304_vm1, %v2281_v53  ;;  %v15821_v24 = vpop.f32.mrb[3].mxu0 }
  0xef   : > { %16131 = vmatmul.mubr.msk.f32.gmra.mrb[102].mxu0 %vm304_vm1, %v1987_v14  ;;  %16144 = vmatprep.mubr.msk.f32.mxu1 %vm18469_vm2, %v18468_v1  ;;  %v2603_v24 = vld [vmem:[#allocation2 + $0x8b] sm:$0xff] }
  0xf0   : > { %16164 = vmatprep.mubr.msk.f32.mxu0 %vm18469_vm2, %v18468_v1 }
  0xf2   : > { %16145 = vmatmul.mubr.msk.f32.gmra.mrb[100].mxu1 %vm304_vm1, %v2282_v55 }
  0xf3   : > { %16165 = vmatmul.mubr.msk.f32.vlgmr.msra.gmra.mrb[104].mxu0 %vm304_vm1, %v2281_v53  ;;  %16147 = vmatprep.mubr.msk.f32.mxu1 %vm18469_vm2, %v18468_v1 }
  0xf4   : > { %16167 = vmatprep.mubr.msk.f32.mxu0 %vm18469_vm2, %v18468_v1  ;;  %16221 = vmatpush3.msk.msra.mxu0 %vm517_vm0, %v14110_v16  ;;  %v2602_v16 = vld [vmem:[#allocation2 + $0x83] sm:$0xff] }
  0xf5   : > { %16278 = vmatprep.subr.mxu0 %v18468_v1 }
  0xf6   : > { %16148 = vmatmul.mubr.msk.f32.gmra.mrb[102].mxu1 %vm304_vm1, %v2283_v17 }
  0xf7   : > { %16168 = vmatmul.mubr.msk.f32.gmra.mrb[106].mxu0 %vm304_vm1, %v2282_v55  ;;  %16150 = vmatprep.mubr.msk.f32.mxu1 %vm18469_vm2, %v18468_v1 }
  0xf8   : > { %16170 = vmatprep.mubr.msk.f32.mxu0 %vm18469_vm2, %v18468_v1 }
  0xfa   : > { %16151 = vmatmul.mubr.msk.f32.gmra.mrb[104].mxu1 %vm304_vm1, %v2284_v20 }
  0xfb   : > { %16171 = vmatmul.mubr.msk.f32.gmra.mrb[108].mxu0 %vm304_vm1, %v2283_v17  ;;  %16153 = vmatprep.mubr.msk.f32.mxu1 %vm18469_vm2, %v18468_v1  ;;  %v13947_v17 = vld [vmem:[%s18666_s23 + $0xb0] sm:$0xff] }
  0xfc   : > { %16173 = vmatprep.mubr.msk.f32.mxu0 %vm18469_vm2, %v18468_v1  ;;  %404 = vst.msk [vmem:[#allocation2 + $0xd9] sm:$0xff] %vm304_vm1, %v13947_v17  ;;  %v14155_v17 = vld [vmem:[%s21785_s1 + $0x4] sm:$0xf] }
  0xfd   : > { %v19178_v25 = vpop.f32.mrb[0].mxu1 }
  0xfe   : > { %v15839_v26 = vpop.f32.mrb[1].mxu1  ;;  %16154 = vmatmul.mubr.msk.f32.gmra.mrb[106].mxu1 %vm304_vm1, %v2285_v23  ;;  %v19181_v27 = vpop.f32.mrb[4].mxu0 }
  0xff   : > { %16174 = vmatmul.mubr.msk.f32.gmra.mrb[110].mxu0 %vm304_vm1, %v2284_v20  ;;  %16156 = vmatprep.mubr.msk.f32.mxu1 %vm18469_vm2, %v18468_v1  ;;  %v15824_v29 = vpop.f32.mrb[5].mxu0  ;;  %v2759_v26 = vld [vmem:[#allocation2 + $0x74] sm:$0xff] }
 0x100   : > { %16176 = vmatprep.mubr.msk.f32.mxu0 %vm18469_vm2, %v18468_v1 }
 0x101   : > { %v19190_v30 = vpop.f32.mrb[2].mxu1 }
 0x102   : > { %v15842_v32 = vpop.f32.mrb[3].mxu1  ;;  %16157 = vmatmul.mubr.msk.f32.gmra.mrb[108].mxu1 %vm304_vm1, %v19186_v28  ;;  %v19194_v33 = vpop.f32.mrb[6].mxu0 }
 0x103   : > { %16177 = vmatmul.mubr.msk.f32.gmra.mrb[112].mxu0 %vm304_vm1, %v2285_v23  ;;  %16159 = vmatprep.mubr.msk.f32.mxu1 %vm18469_vm2, %v18468_v1  ;;  %v15827_v36 = vpop.f32.mrb[7].mxu0 }
 0x104   : > { %16179 = vmatprep.mubr.msk.f32.mxu0 %vm18469_vm2, %v18468_v1  ;;  %v2604_v36 = vld [vmem:[#allocation2 + $0x93] sm:$0xff] }
 0x105   : > { %v727_v38 = vpop.f32.mrb[4].mxu1 }
 0x106   : > { %v728_v39 = vadd.f32 %v727_v38, %v19163_v19  ;;  %v15847_v40 = vpop.f32.mrb[5].mxu1  ;;  %16160 = vmatmul.mubr.msk.f32.gmra.mrb[110].mxu1 %vm304_vm1, %v19199_v35  ;;  %v607_v41 = vpop.f32.mrb[8].mxu0  ;;  %v2760_v38 = vld [vmem:[#allocation2 + $0x7c] sm:$0xff] }
 0x107   : > { %16180 = vmatmul.mubr.msk.f32.gmra.mrb[114].mxu0 %vm304_vm1, %v19186_v28  ;;  %16193 = vmatprep.mubr.msk.f32.mxu1 %vm18469_vm2, %v18468_v1  ;;  %v15830_v43 = vpop.f32.mrb[9].mxu0 }
 0x108   : > { %16182 = vmatprep.mubr.msk.f32.mxu0 %vm18469_vm2, %v18468_v1 }
 0x109   : > { %v732_v44 = vpop.f32.mrb[6].mxu1 }
 0x10a   : > { %v733_v46 = vadd.f32 %v732_v44, %v19171_v22  ;;  %v15850_v47 = vpop.f32.mrb[7].mxu1  ;;  %16194 = vmatmul.mubr.msk.f32.vlgmr.msra.gmra.mrb[112].mxu1 %vm304_vm1, %v2597_v42  ;;  %v612_v48 = vpop.f32.mrb[10].mxu0  ;;  %v2605_v44 = vld [vmem:[#allocation2 + $0x9b] sm:$0xff] }
 0x10b   : > { %16183 = vmatmul.mubr.msk.f32.gmra.mrb[116].mxu0 %vm304_vm1, %v19199_v35  ;;  %16196 = vmatprep.mubr.msk.f32.mxu1 %vm18469_vm2, %v18468_v1  ;;  %v15833_v50 = vpop.f32.mrb[11].mxu0 }
 0x10c   : > { %16185 = vmatprep.mubr.msk.f32.mxu0 %vm18469_vm2, %v18468_v1  ;;  %16250 = vmatpush3.msk.msra.mxu1 %vm517_vm0, %v14121_v45  ;;  %v2761_v45 = vld [vmem:[#allocation2 + $0x84] sm:$0xff] }
 0x10d   : > { %v737_v52 = vpop.f32.mrb[8].mxu1  ;;  %16307 = vmatprep.subr.mxu1 %v18468_v1 }
 0x10e   : > { %v738_v54 = vadd.f32 %v737_v52, %v19181_v27  ;;  %v15853_v56 = vpop.f32.mrb[9].mxu1  ;;  %16197 = vmatmul.mubr.msk.f32.gmra.mrb[114].mxu1 %vm304_vm1, %v2598_v49  ;;  %v617_v57 = vpop.f32.mrb[12].mxu0 }
 0x10f   : > { %16186 = vmatmul.mubr.msk.f32.gmra.mrb[118].mxu0 %vm304_vm1, %v19351_v51  ;;  %16199 = vmatprep.mubr.msk.f32.mxu1 %vm18469_vm2, %v18468_v1  ;;  %v15836_v58 = vpop.f32.mrb[13].mxu0 }
 0x110   : > { %16188 = vmatprep.mubr.msk.f32.mxu0 %vm18469_vm2, %v18468_v1  ;;  %v3409_v58 = vld [vmem:[%s21789_s5 + $0x50] sm:$0xff] }
 0x111   : > { %v742_v61 = vpop.f32.mrb[10].mxu1 }
 0x112   : > { %v743_v62 = vadd.f32 %v742_v61, %v19194_v33  ;;  %v15856_v63 = vpop.f32.mrb[11].mxu1  ;;  %16200 = vmatmul.mubr.msk.f32.gmra.mrb[116].mxu1 %vm304_vm1, %v2599_v59  ;;  %v878_v0 = vpop.f32.mrb[14].mxu0  ;;  %v13948_v59 = vld [vmem:[%s18666_s23 + $0xb8] sm:$0xff] }
 0x113   : > { %v19367_v2 = vadd.f32 %v878_v0, %v728_v39  ;;  %16189 = vmatmul.mubr.msk.f32.gmra.mrb[120].mxu0 %vm304_vm1, %v19363_v60  ;;  %16202 = vmatprep.mubr.msk.f32.mxu1 %vm18469_vm2, %v18468_v1  ;;  %v15876_v3 = vpop.f32.mrb[15].mxu0  ;;  %405 = vst.msk [vmem:[#allocation2 + $0xe1] sm:$0xff] %vm304_vm1, %v13948_v59 }
 0x114   : > { %16222 = vmatprep.mubr.msk.f32.mxu0 %vm18469_vm2, %v18468_v1  ;;  %v2763_v3 = vld [vmem:[#allocation2 + $0x94] sm:$0xff] }
 0x115   : > { %v747_v5 = vpop.f32.mrb[12].mxu1 }
 0x116   : > { %v748_v7 = vadd.f32 %v747_v5, %v607_v41  ;;  %v15859_v8 = vpop.f32.mrb[13].mxu1  ;;  %16203 = vmatmul.mubr.msk.f32.gmra.mrb[118].mxu1 %vm304_vm1, %v2600_v4  ;;  %v883_v9 = vpop.f32.mrb[16].mxu0  ;;  %v3410_v5 = vld [vmem:[%s21789_s5 + $0x58] sm:$0xff] }
 0x117   : > { %v19379_v10 = vadd.f32 %v883_v9, %v733_v46  ;;  %16223 = vmatmul.mubr.msk.f32.vlgmr.msra.gmra.mrb[122].mxu0 %vm304_vm1, %v18986_v31  ;;  %16205 = vmatprep.mubr.msk.f32.mxu1 %vm18469_vm2, %v18468_v1  ;;  %v15879_v11 = vpop.f32.mrb[17].mxu0 }
 0x118   : > { %16225 = vmatprep.mubr.msk.f32.mxu0 %vm18469_vm2, %v18468_v1  ;;  %16279 = vmatpush3.msk.msra.mxu0 %vm517_vm0, %v14132_v6  ;;  %v2764_v11 = vld [vmem:[#allocation2 + $0x9c] sm:$0xff] }
 0x119   : > { %v752_v53 = vpop.f32.mrb[14].mxu1  ;;  %16336 = vmatprep.subr.mxu0 %v18468_v1 }
 0x11a   : > { %v753_v13 = vadd.f32 %v752_v53, %v612_v48  ;;  %v15862_v14 = vpop.f32.mrb[15].mxu1  ;;  %16206 = vmatmul.mubr.msk.f32.gmra.mrb[120].mxu1 %vm304_vm1, %v2601_v12  ;;  %v888_v55 = vpop.f32.mrb[18].mxu0 }
 0x11b   : > { %v19390_v31 = vadd.f32 %v888_v55, %v738_v54  ;;  %16226 = vmatmul.mubr.msk.f32.gmra.mrb[124].mxu0 %vm304_vm1, %v19000_v34  ;;  %16208 = vmatprep.mubr.msk.f32.mxu1 %vm18469_vm2, %v18468_v1  ;;  %v15882_v15 = vpop.f32.mrb[19].mxu0  ;;  %v2762_v54 = vld [vmem:[#allocation2 + $0x8c] sm:$0xff] }
 0x11c   : > { %16228 = vmatprep.mubr.msk.f32.mxu0 %vm18469_vm2, %v18468_v1  ;;  %v3074_v15 = vld [vmem:[#allocation2 + $0x6d] sm:$0xff] }
 0x11d   : > { %v757_v19 = vpop.f32.mrb[16].mxu1 }
 0x11e   : > { %v758_v20 = vadd.f32 %v757_v19, %v617_v57  ;;  %v15865_v21 = vpop.f32.mrb[17].mxu1  ;;  %16209 = vmatmul.mubr.msk.f32.gmra.mrb[122].mxu1 %vm304_vm1, %v2602_v16  ;;  %v893_v22 = vpop.f32.mrb[20].mxu0  ;;  %v14143_v57 = vld [vmem:[%s21785_s1 + $0x20] sm:$0xf] }
 0x11f   : > { %v19401_v23 = vadd.f32 %v893_v22, %v743_v62  ;;  %16229 = vmatmul.mubr.msk.f32.gmra.mrb[126].mxu0 %vm304_vm1, %v2758_v18  ;;  %16211 = vmatprep.mubr.msk.f32.mxu1 %vm18469_vm2, %v18468_v1  ;;  %v15885_v34 = vpop.f32.mrb[21].mxu0 }
 0x120   : > { %16231 = vmatprep.mubr.msk.f32.mxu0 %vm18469_vm2, %v18468_v1 }
 0x121   : > { %v762_v27 = vpop.f32.mrb[18].mxu1 }
 0x122   : > { %v763_v28 = vadd.f32 %v762_v27, %v19178_v25  ;;  %v15868_v29 = vpop.f32.mrb[19].mxu1  ;;  %16212 = vmatmul.mubr.msk.f32.gmra.mrb[124].mxu1 %vm304_vm1, %v2603_v24  ;;  %v898_v32 = vpop.f32.mrb[22].mxu0 }
 0x123   : > { %v19410_v33 = vadd.f32 %v898_v32, %v748_v7  ;;  %16232 = vmatmul.mubr.msk.f32.gmra.mrb[128].mxu0 %vm304_vm1, %v2759_v26  ;;  %16214 = vmatprep.mubr.msk.f32.mxu1 %vm18469_vm2, %v18468_v1  ;;  %v15888_v35 = vpop.f32.mrb[23].mxu0  ;;  %v3076_v32 = vld [vmem:[#allocation2 + $0x7d] sm:$0xff] }
 0x124   : > { %16234 = vmatprep.mubr.msk.f32.mxu0 %vm18469_vm2, %v18468_v1 }
 0x125   : > { %v767_v39 = vpop.f32.mrb[20].mxu1 }
 0x126   : > { %v768_v25 = vadd.f32 %v767_v39, %v19190_v30  ;;  %v15871_v40 = vpop.f32.mrb[21].mxu1  ;;  %16215 = vmatmul.mubr.msk.f32.gmra.mrb[126].mxu1 %vm304_vm1, %v2604_v36  ;;  %v903_v41 = vpop.f32.mrb[24].mxu0  ;;  %v3408_v30 = vld [vmem:[%s21789_s5 + $0x48] sm:$0xff] }
 0x127   : > { %v19419_v42 = vadd.f32 %v903_v41, %v753_v13  ;;  %16235 = vmatmul.mubr.msk.f32.gmra.mrb[130].mxu0 %vm304_vm1, %v2760_v38  ;;  %16217 = vmatprep.mubr.msk.f32.mxu1 %vm18469_vm2, %v18468_v1  ;;  %v15891_v43 = vpop.f32.mrb[25].mxu0  ;;  %v3077_v40 = vld [vmem:[#allocation2 + $0x85] sm:$0xff] }
 0x128   : > { %16237 = vmatprep.mubr.msk.f32.mxu0 %vm18469_vm2, %v18468_v1  ;;  %3419 = vperm.xlu1 %18402, %v3408_v30   ;;  %v2922_v30 = vld [vmem:[#allocation2 + $0xa4] sm:$0xff] }
 0x129   : > { %v1038_v46 = vpop.f32.mrb[22].mxu1 }
 0x12a   : > { %v1082_v47 = vadd.f32 %v1038_v46, %v19367_v2  ;;  %v15905_v48 = vpop.f32.mrb[23].mxu1  ;;  %16218 = vmatmul.mubr.msk.f32.gmra.mrb[128].mxu1 %vm304_vm1, %v2605_v44  ;;  %v908_v49 = vpop.f32.mrb[26].mxu0 }
 0x12b   : > { %v19431_v50 = vadd.f32 %v908_v49, %v758_v20  ;;  %16238 = vmatmul.mubr.msk.f32.gmra.mrb[132].mxu0 %vm304_vm1, %v2761_v45  ;;  %16251 = vmatprep.mubr.msk.f32.mxu1 %vm18469_vm2, %v18468_v1  ;;  %v15894_v52 = vpop.f32.mrb[27].mxu0 }
 0x12c   : > { %16240 = vmatprep.mubr.msk.f32.mxu0 %vm18469_vm2, %v18468_v1  ;;  %3424 = vperm.xlu1 %18402, %v3409_v58   ;;  %v3079_v58 = vld [vmem:[#allocation2 + $0x95] sm:$0xff] }
 0x12d   : > { %v1043_v56 = vpop.f32.mrb[24].mxu1 }
 0x12e   : > { %v1083_v61 = vadd.f32 %v1043_v56, %v19379_v10  ;;  %v15908_v62 = vpop.f32.mrb[25].mxu1  ;;  %16252 = vmatmul.mubr.msk.f32.vlgmr.msra.gmra.mrb[130].mxu1 %vm304_vm1, %v2758_v18  ;;  %v913_v63 = vpop.f32.mrb[28].mxu0 }
 0x12f   : > { %v19448_v0 = vadd.f32 %v913_v63, %v763_v28  ;;  %16241 = vmatmul.mubr.msk.f32.gmra.mrb[134].mxu0 %vm304_vm1, %v2762_v54  ;;  %16254 = vmatprep.mubr.msk.f32.mxu1 %vm18469_vm2, %v18468_v1  ;;  %v15897_v2 = vpop.f32.mrb[29].mxu0 }
 0x130   : > { %16243 = vmatprep.mubr.msk.f32.mxu0 %vm18469_vm2, %v18468_v1  ;;  %16308 = vmatpush3.msk.msra.mxu1 %vm517_vm0, %v14143_v57  ;;  %v2923_v57 = vld [vmem:[#allocation2 + $0xac] sm:$0xff] }
 0x131   : > { %v1048_v4 = vpop.f32.mrb[26].mxu1  ;;  %16365 = vmatprep.subr.mxu1 %v18468_v1  ;;  %3429 = vperm.xlu1 %18402, %v3410_v5  }
 0x132   : > { %v1084_v6 = vadd.f32 %v1048_v4, %v19390_v31  ;;  %v15911_v7 = vpop.f32.mrb[27].mxu1  ;;  %16255 = vmatmul.mubr.msk.f32.gmra.mrb[132].mxu1 %vm304_vm1, %v2759_v26  ;;  %v918_v8 = vpop.f32.mrb[30].mxu0  ;;  %v3080_v4 = vld [vmem:[#allocation2 + $0x9d] sm:$0xff] }
 0x133   : > { %v19462_v9 = vadd.f32 %v918_v8, %v768_v25  ;;  %16244 = vmatmul.mubr.msk.f32.gmra.mrb[136].mxu0 %vm304_vm1, %v2763_v3  ;;  %16257 = vmatprep.mubr.msk.f32.mxu1 %vm18469_vm2, %v18468_v1  ;;  %v15900_v10 = vpop.f32.mrb[31].mxu0 }
 0x134   : > { %16246 = vmatprep.mubr.msk.f32.mxu0 %vm18469_vm2, %v18468_v1 }
 0x135   : > { %v1053_v12 = vpop.f32.mrb[28].mxu1 }
 0x136   : > { %v1085_v53 = vadd.f32 %v1053_v12, %v19401_v23  ;;  %v15914_v13 = vpop.f32.mrb[29].mxu1  ;;  %16258 = vmatmul.mubr.msk.f32.gmra.mrb[134].mxu1 %vm304_vm1, %v2760_v38  ;;  %v1198_v14 = vpop.f32.mrb[32].mxu0  ;;  %v3075_v23 = vld [vmem:[#allocation2 + $0x75] sm:$0xff] }
 0x137   : > { %v19471_v55 = vadd.f32 %v1198_v14, %v1082_v47  ;;  %16247 = vmatmul.mubr.msk.f32.gmra.mrb[138].mxu0 %vm304_vm1, %v2764_v11  ;;  %16260 = vmatprep.mubr.msk.f32.mxu1 %vm18469_vm2, %v18468_v1  ;;  %v15934_v31 = vpop.f32.mrb[33].mxu0  ;;  %v3078_v47 = vld [vmem:[#allocation2 + $0x8d] sm:$0xff]  ;;  %v3234_v12 = vld [vmem:[#allocation2 + $0x76] sm:$0xff]  ;;  %v13949_v14 = vld [vmem:[%s18666_s23 + $0xc0] sm:$0xff] }
 0x138   : > { %16280 = vmatprep.mubr.msk.f32.mxu0 %vm18469_vm2, %v18468_v1  ;;  %409 = vst.msk [vmem:[#allocation2 + $0xeb] sm:$0xff] %vm304_vm1, %v13949_v14  ;;  %v3241_v14 = vld [vmem:[#allocation2 + $0xae] sm:$0xff] }
 0x139   : > { %v1058_v16 = vpop.f32.mrb[30].mxu1 }
 0x13a   : > { %v1086_v18 = vadd.f32 %v1058_v16, %v19410_v33  ;;  %v15917_v19 = vpop.f32.mrb[31].mxu1  ;;  %16261 = vmatmul.mubr.msk.f32.gmra.mrb[136].mxu1 %vm304_vm1, %v2761_v45  ;;  %v1203_v20 = vpop.f32.mrb[34].mxu0 }
 0x13b   : > { %v19483_v21 = vadd.f32 %v1203_v20, %v1083_v61  ;;  %16281 = vmatmul.mubr.msk.f32.vlgmr.msra.gmra.mrb[140].mxu0 %vm304_vm1, %v3074_v15  ;;  %16263 = vmatprep.mubr.msk.f32.mxu1 %vm18469_vm2, %v18468_v1  ;;  %v15937_v22 = vpop.f32.mrb[35].mxu0  ;;  %v3082_v19 = vld [vmem:[#allocation2 + $0xad] sm:$0xff] }
 0x13c   : > { %16283 = vmatprep.mubr.msk.f32.mxu0 %vm18469_vm2, %v18468_v1  ;;  %16337 = vmatpush3.msk.msra.mxu0 %vm517_vm0, %v14155_v17 }
 0x13d   : > { %v1063_v34 = vpop.f32.mrb[32].mxu1  ;;  %16394 = vmatprep.subr.mxu0 %v18468_v1 }
 0x13e   : > { %v1087_v24 = vadd.f32 %v1063_v34, %v19419_v42  ;;  %v15920_v26 = vpop.f32.mrb[33].mxu1  ;;  %16264 = vmatmul.mubr.msk.f32.gmra.mrb[138].mxu1 %vm304_vm1, %v2762_v54  ;;  %v1208_v27 = vpop.f32.mrb[36].mxu0 }
 0x13f   : > { %v19494_v28 = vadd.f32 %v1208_v27, %v1084_v6  ;;  %16284 = vmatmul.mubr.msk.f32.gmra.mrb[142].mxu0 %vm304_vm1, %v3075_v23  ;;  %16266 = vmatprep.mubr.msk.f32.mxu1 %vm18469_vm2, %v18468_v1  ;;  %v15940_v29 = vpop.f32.mrb[37].mxu0  ;;  %v3489_v6 = vld [vmem:[%s21785_s1] sm:$0xf]  ;;  %v3236_v26 = vld [vmem:[#allocation2 + $0x86] sm:$0xff]  ;;  %v3490_v27 = vld [vmem:[#allocation2 + $0x91] sm:$0xff] }
 0x140   : > { %16286 = vmatprep.mubr.msk.f32.mxu0 %vm18469_vm2, %v18468_v1  ;;  %v14176_v29 = vld [vmem:[%s21785_s1 + $0x8] sm:$0xf] }
 0x141   : > { %v1068_v33 = vpop.f32.mrb[34].mxu1 }
 0x142   : > { %v1088_v35 = vadd.f32 %v1068_v33, %v19431_v50  ;;  %v15923_v36 = vpop.f32.mrb[35].mxu1  ;;  %16267 = vmatmul.mubr.msk.f32.gmra.mrb[140].mxu1 %vm304_vm1, %v2763_v3  ;;  %v1213_v38 = vpop.f32.mrb[38].mxu0  ;;  %v3233_v3 = vld [vmem:[#allocation2 + $0x6e] sm:$0xff] }
 0x143   : > { %v19503_v39 = vadd.f32 %v1213_v38, %v1085_v53  ;;  %16287 = vmatmul.mubr.msk.f32.gmra.mrb[144].mxu0 %vm304_vm1, %v3076_v32  ;;  %16269 = vmatprep.mubr.msk.f32.mxu1 %vm18469_vm2, %v18468_v1  ;;  %v15943_v25 = vpop.f32.mrb[39].mxu0  ;;  %v3081_v53 = vld [vmem:[#allocation2 + $0xa5] sm:$0xff] }
 0x144   : > { %16289 = vmatprep.mubr.msk.f32.mxu0 %vm18469_vm2, %v18468_v1  ;;  %v13950_v25 = vld [vmem:[%s18666_s23 + $0xc8] sm:$0xff] }
 0x145   : > { %v1073_v41 = vpop.f32.mrb[36].mxu1  ;;  %410 = vst.msk [vmem:[#allocation2 + $0xf3] sm:$0xff] %vm304_vm1, %v13950_v25 }
 0x146   : > { %v1089_v42 = vadd.f32 %v1073_v41, %v19448_v0  ;;  %v15926_v43 = vpop.f32.mrb[37].mxu1  ;;  %16270 = vmatmul.mubr.msk.f32.gmra.mrb[142].mxu1 %vm304_vm1, %v2764_v11  ;;  %v1218_v44 = vpop.f32.mrb[40].mxu0 }
 0x147   : > { %v19512_v45 = vadd.f32 %v1218_v44, %v1086_v18  ;;  %16290 = vmatmul.mubr.msk.f32.gmra.mrb[146].mxu0 %vm304_vm1, %v3077_v40  ;;  %16272 = vmatprep.mubr.msk.f32.mxu1 %vm18469_vm2, %v18468_v1  ;;  %v15946_v46 = vpop.f32.mrb[41].mxu0  ;;  %v3235_v18 = vld [vmem:[#allocation2 + $0x7e] sm:$0xff] }
 0x148   : > { %16292 = vmatprep.mubr.msk.f32.mxu0 %vm18469_vm2, %v18468_v1  ;;  %v3491_v40 = vld [vmem:[#allocation2 + $0x99] sm:$0xff] }
 0x149   : > { %v1078_v48 = vpop.f32.mrb[38].mxu1 }
 0x14a   : > { %v1090_v49 = vadd.f32 %v1078_v48, %v19462_v9  ;;  %v15929_v50 = vpop.f32.mrb[39].mxu1  ;;  %16273 = vmatmul.mubr.msk.f32.gmra.mrb[144].mxu1 %vm304_vm1, %v2922_v30  ;;  %v1223_v52 = vpop.f32.mrb[42].mxu0  ;;  %v3238_v30 = vld [vmem:[#allocation2 + $0x96] sm:$0xff] }
 0x14b   : > { %v19521_v54 = vadd.f32 %v1223_v52, %v1087_v24  ;;  %16293 = vmatmul.mubr.msk.f32.gmra.mrb[148].mxu0 %vm304_vm1, %v3078_v47  ;;  %16275 = vmatprep.mubr.msk.f32.mxu1 %vm18469_vm2, %v18468_v1  ;;  %v15949_v56 = vpop.f32.mrb[43].mxu0  ;;  %v3492_v47 = vld [vmem:[#allocation2 + $0xa1] sm:$0xff] }
 0x14c   : > { %16295 = vmatprep.mubr.msk.f32.mxu0 %vm18469_vm2, %v18468_v1 }
 0x14d   : > { %v1358_v59 = vpop.f32.mrb[40].mxu1 }
 0x14e   : > { %v1402_v61 = vadd.f32 %v1358_v59, %v19471_v55  ;;  %v15963_v62 = vpop.f32.mrb[41].mxu1  ;;  %16276 = vmatmul.mubr.msk.f32.gmra.mrb[146].mxu1 %vm304_vm1, %v2923_v57  ;;  %v1228_v63 = vpop.f32.mrb[44].mxu0 }
 0x14f   : > { %v19530_v0 = vadd.f32 %v1228_v63, %v1088_v35  ;;  %16296 = vmatmul.mubr.msk.f32.gmra.mrb[150].mxu0 %vm304_vm1, %v3079_v58  ;;  %16309 = vmatprep.mubr.msk.f32.mxu1 %vm18469_vm2, %v18468_v1  ;;  %v15952_v2 = vpop.f32.mrb[45].mxu0  ;;  %v3239_v58 = vld [vmem:[#allocation2 + $0x9e] sm:$0xff]  ;;  %v19605_v59 = vpop.permute.xlu0 %3434 }
 0x150   : > { %16298 = vmatprep.mubr.msk.f32.mxu0 %vm18469_vm2, %v18468_v1 }
 0x151   : > { %v1363_v5 = vpop.f32.mrb[42].mxu1 }
 0x152   : > { %v1403_v7 = vadd.f32 %v1363_v5, %v19483_v21  ;;  %v15966_v8 = vpop.f32.mrb[43].mxu1  ;;  %16310 = vmatmul.mubr.msk.f32.vlgmr.msra.gmra.mrb[148].mxu1 %vm304_vm1, %v3233_v3  ;;  %v1233_v9 = vpop.f32.mrb[46].mxu0  ;;  %v3240_v5 = vld [vmem:[#allocation2 + $0xa6] sm:$0xff] }
 0x153   : > { %v19542_v10 = vadd.f32 %v1233_v9, %v1089_v42  ;;  %16299 = vmatmul.mubr.msk.f32.gmra.mrb[152].mxu0 %vm304_vm1, %v3080_v4  ;;  %16312 = vmatprep.mubr.msk.f32.mxu1 %vm18469_vm2, %v18468_v1  ;;  %v15955_v11 = vpop.f32.mrb[47].mxu0  ;;  %v19620_v9 = vpop.permute.xlu0 %3439 }
 0x154   : > { %16301 = vmatprep.mubr.msk.f32.mxu0 %vm18469_vm2, %v18468_v1  ;;  %16366 = vmatpush3.msk.msra.mxu1 %vm517_vm0, %v3489_v6 }
 0x155   : > { %v1368_v13 = vpop.f32.mrb[44].mxu1  ;;  %16423 = vmatprep.subr.mxu1 %v18468_v1 }
 0x156   : > { %v1404_v55 = vadd.f32 %v1368_v13, %v19494_v28  ;;  %v15969_v31 = vpop.f32.mrb[45].mxu1  ;;  %16313 = vmatmul.mubr.msk.f32.gmra.mrb[150].mxu1 %vm304_vm1, %v3234_v12  ;;  %v1238_v15 = vpop.f32.mrb[48].mxu0 }
 0x157   : > { %v19555_v16 = vadd.f32 %v1238_v15, %v1090_v49  ;;  %16302 = vmatmul.mubr.msk.f32.gmra.mrb[154].mxu0 %vm304_vm1, %v3081_v53  ;;  %16315 = vmatprep.mubr.msk.f32.mxu1 %vm18469_vm2, %v18468_v1  ;;  %v15958_v17 = vpop.f32.mrb[49].mxu0  ;;  %v19596_v49 = vpop.permute.xlu1 %3444 }
 0x158   : > { %16304 = vmatprep.mubr.msk.f32.mxu0 %vm18469_vm2, %v18468_v1 }
 0x159   : > { %v1373_v20 = vpop.f32.mrb[46].mxu1 }
 0x15a   : > { %v1405_v21 = vadd.f32 %v1373_v20, %v19503_v39  ;;  %v15972_v22 = vpop.f32.mrb[47].mxu1  ;;  %16316 = vmatmul.mubr.msk.f32.gmra.mrb[152].mxu1 %vm304_vm1, %v3235_v18  ;;  %v1518_v23 = vpop.f32.mrb[50].mxu0  ;;  %v3237_v39 = vld [vmem:[#allocation2 + $0x8e] sm:$0xff] }
 0x15b   : > { %v19564_v34 = vadd.f32 %v1518_v23, %v1402_v61  ;;  %16305 = vmatmul.mubr.msk.f32.gmra.mrb[156].mxu0 %vm304_vm1, %v3082_v19  ;;  %16318 = vmatprep.mubr.msk.f32.mxu1 %vm18469_vm2, %v18468_v1  ;;  %v15992_v24 = vpop.f32.mrb[51].mxu0  ;;  %v3493_v61 = vld [vmem:[#allocation2 + $0xa9] sm:$0xff]  ;;  %v19616_v6 = vpop.permute.xlu1 %3449  ;;  %v3496_v23 = vld [vmem:[#allocation2 + $0xc1] sm:$0xff] }
 0x15c   : > { %16338 = vmatprep.mubr.msk.f32.mxu0 %vm18469_vm2, %v18468_v1  ;;  %v19640_v22 = vpop.permute.xlu0 %3454  ;;  %v14187_v24 = vld [vmem:[%s21785_s1 + $0xc] sm:$0xf] }
 0x15d   : > { %v1378_v28 = vpop.f32.mrb[48].mxu1 }
 0x15e   : > { %v1406_v32 = vadd.f32 %v1378_v28, %v19512_v45  ;;  %v15975_v33 = vpop.f32.mrb[49].mxu1  ;;  %16319 = vmatmul.mubr.msk.f32.gmra.mrb[154].mxu1 %vm304_vm1, %v3236_v26  ;;  %v1523_v35 = vpop.f32.mrb[52].mxu0 }
 0x15f   : > { %v19576_v36 = vadd.f32 %v1523_v35, %v1403_v7  ;;  %16339 = vmatmul.mubr.msk.f32.vlgmr.msra.gmra.mrb[158].mxu0 %vm304_vm1, %v3490_v27  ;;  %16321 = vmatprep.mubr.msk.f32.mxu1 %vm18469_vm2, %v18468_v1  ;;  %v15995_v38 = vpop.f32.mrb[53].mxu0  ;;  %v3494_v7 = vld [vmem:[#allocation2 + $0xb1] sm:$0xff]  ;;  %v19631_v15 = vpop.permute.xlu1 %3459 }
 0x160   : > { %16341 = vmatprep.mubr.msk.f32.mxu0 %vm18469_vm2, %v18468_v1  ;;  %16395 = vmatpush3.msk.msra.mxu0 %vm517_vm0, %v14176_v29  ;;  %v3481_v33 = vld [vmem:[#allocation2 + $0x98] sm:$0xff]  ;;  %v3497_v38 = vld [vmem:[#allocation2 + $0xc9] sm:$0xff] }
 0x161   : > { %v1383_v41 = vpop.f32.mrb[50].mxu1  ;;  %16452 = vmatprep.subr.mxu0 %v18468_v1 }
 0x162   : > { %v1407_v42 = vadd.f32 %v1383_v41, %v19521_v54  ;;  %v15978_v43 = vpop.f32.mrb[51].mxu1  ;;  %16322 = vmatmul.mubr.msk.f32.gmra.mrb[156].mxu1 %vm304_vm1, %v3237_v39  ;;  %v1528_v44 = vpop.f32.mrb[54].mxu0 }
 0x163   : > { %v19589_v45 = vadd.f32 %v1528_v44, %v1404_v55  ;;  %16342 = vmatmul.mubr.msk.f32.gmra.mrb[160].mxu0 %vm304_vm1, %v3491_v40  ;;  %16324 = vmatprep.mubr.msk.f32.mxu1 %vm18469_vm2, %v18468_v1  ;;  %v15998_v46 = vpop.f32.mrb[55].mxu0  ;;  %v3495_v55 = vld [vmem:[#allocation2 + $0xb9] sm:$0xff]  ;;  %v1924_v35 = vpop.permute.xlu1 %1923 }
 0x164   : > { %16344 = vmatprep.mubr.msk.f32.mxu0 %vm18469_vm2, %v18468_v1  ;;  %v1919_v39 = vpop.permute.xlu0 %1918  ;;  %v3482_v44 = vld [vmem:[#allocation2 + $0xa0] sm:$0xff]  ;;  %v3498_v46 = vld [vmem:[#allocation2 + $0xd1] sm:$0xff] }
 0x165   : > { %v1388_v48 = vpop.f32.mrb[52].mxu1 }
 0x166   : > { %v1408_v50 = vadd.f32 %v1388_v48, %v19530_v0  ;;  %v15981_v52 = vpop.f32.mrb[53].mxu1  ;;  %16325 = vmatmul.mubr.msk.f32.gmra.mrb[158].mxu1 %vm304_vm1, %v3238_v30  ;;  %v1533_v54 = vpop.f32.mrb[56].mxu0 }
 0x167   : > { %v19600_v56 = vadd.f32 %v1533_v54, %v1405_v21  ;;  %16345 = vmatmul.mubr.msk.f32.gmra.mrb[162].mxu0 %vm304_vm1, %v3492_v47  ;;  %16327 = vmatprep.mubr.msk.f32.mxu1 %vm18469_vm2, %v18468_v1  ;;  %v16001_v57 = vpop.f32.mrb[57].mxu0  ;;  %v3480_v21 = vld [vmem:[#allocation2 + $0x90] sm:$0xff]  ;;  %v19667_v47 = vpop.permute.xlu1 %4925  ;;  %v19674_v52 = vld [vmem:[%s21786_s2] ss:$0 sm:$0xff] }
 0x168   : > { %16347 = vmatprep.mubr.msk.f32.mxu0 %vm18469_vm2, %v18468_v1 }
 0x169   : > { %v1393_v62 = vpop.f32.mrb[54].mxu1 }
 0x16a   : > { %v1409_v63 = vadd.f32 %v1393_v62, %v19542_v10  ;;  %v15984_v0 = vpop.f32.mrb[55].mxu1  ;;  %16328 = vmatmul.mubr.msk.f32.gmra.mrb[160].mxu1 %vm304_vm1, %v3239_v58  ;;  %v1538_v2 = vpop.f32.mrb[58].mxu0  ;;  %v3483_v58 = vld [vmem:[#allocation2 + $0xa8] sm:$0xff] }
 0x16b   : > { %v19611_v3 = vadd.f32 %v1538_v2, %v1406_v32  ;;  %16348 = vmatmul.mubr.msk.f32.gmra.mrb[164].mxu0 %vm304_vm1, %v3493_v61  ;;  %16330 = vmatprep.mubr.msk.f32.mxu1 %vm18469_vm2, %v18468_v1  ;;  %v16004_v4 = vpop.f32.mrb[59].mxu0  ;;  %v19679_v61 = vpop.permute.xlu0 %4920 }
 0x16c   : > { %16350 = vmatprep.mubr.msk.f32.mxu0 %vm18469_vm2, %v18468_v1 }
 0x16d   : > { %v1398_v8 = vpop.f32.mrb[56].mxu1 }
 0x16e   : > { %v1410_v10 = vadd.f32 %v1398_v8, %v19555_v16  ;;  %v15987_v11 = vpop.f32.mrb[57].mxu1  ;;  %16331 = vmatmul.mubr.msk.f32.gmra.mrb[162].mxu1 %vm304_vm1, %v3240_v5  ;;  %v1543_v12 = vpop.f32.mrb[60].mxu0 }
 0x16f   : > { %v19624_v53 = vadd.f32 %v1543_v12, %v1407_v42  ;;  %16351 = vmatmul.mubr.msk.f32.gmra.mrb[166].mxu0 %vm304_vm1, %v3494_v7  ;;  %16333 = vmatprep.mubr.msk.f32.mxu1 %vm18469_vm2, %v18468_v1  ;;  %v16007_v13 = vpop.f32.mrb[61].mxu0  ;;  %v1929_v11 = vpop.permute.xlu1 %1928 }
 0x170   : > { %16353 = vmatprep.mubr.msk.f32.mxu0 %vm18469_vm2, %v18468_v1  ;;  %v19698_v13 = vpop.permute.xlu0 %4930 }
 0x171   : > { %v1678_v31 = vpop.f32.mrb[58].mxu1 }
 0x172   : > { %v1722_v16 = vadd.f32 %v1678_v31, %v19564_v34  ;;  %v16021_v17 = vpop.f32.mrb[59].mxu1  ;;  %16334 = vmatmul.mubr.msk.f32.gmra.mrb[164].mxu1 %vm304_vm1, %v3241_v14  ;;  %v1548_v18 = vpop.f32.mrb[62].mxu0 }
 0x173   : > { %v19635_v19 = vadd.f32 %v1548_v18, %v1408_v50  ;;  %16354 = vmatmul.mubr.msk.f32.gmra.mrb[168].mxu0 %vm304_vm1, %v3495_v55  ;;  %16367 = vmatprep.mubr.msk.f32.mxu1 %vm18469_vm2, %v18468_v1  ;;  %v16010_v20 = vpop.f32.mrb[63].mxu0  ;;  %v3485_v18 = vld [vmem:[#allocation2 + $0xb8] sm:$0xff] }
 0x174   : > { %16356 = vmatprep.mubr.msk.f32.mxu0 %vm18469_vm2, %v18468_v1  ;;  %v1939_v20 = vpop.permute.xlu1 %1938 }
 0x175   : > { %v1683_v34 = vpop.f32.mrb[60].mxu1 }
 0x176   : > { %v1723_v26 = vadd.f32 %v1683_v34, %v19576_v36  ;;  %v16024_v27 = vpop.f32.mrb[61].mxu1  ;;  %16368 = vmatmul.mubr.msk.f32.vlgmr.msra.gmra.mrb[166].mxu1 %vm304_vm1, %v3480_v21  ;;  %v1553_v28 = vpop.f32.mrb[64].mxu0  ;;  %v13951_v21 = vld [vmem:[%s18666_s23 + $0xd0] sm:$0xff] }
 0x177   : > { %v19649_v29 = vadd.f32 %v1553_v28, %v1409_v63  ;;  %16357 = vmatmul.mubr.msk.f32.gmra.mrb[170].mxu0 %vm304_vm1, %v3496_v23  ;;  %16370 = vmatprep.mubr.msk.f32.mxu1 %vm18469_vm2, %v18468_v1  ;;  %v16013_v32 = vpop.f32.mrb[65].mxu0  ;;  %v14198_v63 = vld [vmem:[%s21785_s1 + $0x10] sm:$0xf]  ;;  %414 = vst.msk [vmem:[#allocation2 + $0xfd] sm:$0xff] %vm304_vm1, %v13951_v21 }
 0x178   : > { %16359 = vmatprep.mubr.msk.f32.mxu0 %vm18469_vm2, %v18468_v1  ;;  %16424 = vmatpush3.msk.msra.mxu1 %vm517_vm0, %v14187_v24 }
 0x179   : > { %v1688_v36 = vpop.f32.mrb[62].mxu1  ;;  %16481 = vmatprep.subr.mxu1 %v18468_v1 }
 0x17a   : > { %v1724_v25 = vadd.f32 %v1688_v36, %v19589_v45  ;;  %v16027_v40 = vpop.f32.mrb[63].mxu1  ;;  %16371 = vmatmul.mubr.msk.f32.gmra.mrb[168].mxu1 %vm304_vm1, %v3481_v33  ;;  %v1558_v41 = vpop.f32.mrb[66].mxu0  ;;  %v3486_v33 = vld [vmem:[#allocation2 + $0xc0] sm:$0xff] }
 0x17b   : > { %v19660_v42 = vadd.f32 %v1558_v41, %v1410_v10  ;;  %16360 = vmatmul.mubr.msk.f32.gmra.mrb[172].mxu0 %vm304_vm1, %v3497_v38  ;;  %16373 = vmatprep.mubr.msk.f32.mxu1 %vm18469_vm2, %v18468_v1  ;;  %v16016_v43 = vpop.f32.mrb[67].mxu0  ;;  %v3484_v10 = vld [vmem:[#allocation2 + $0xb0] sm:$0xff]  ;;  %v1934_v36 = vpop.permute.xlu0 %1933 }
 0x17c   : > { %16362 = vmatprep.mubr.msk.f32.mxu0 %vm18469_vm2, %v18468_v1  ;;  %v1944_v40 = vpop.permute.xlu1 %1943 }
 0x17d   : > { %v1693_v30 = vpop.f32.mrb[64].mxu1 }
 0x17e   : > { %v1725_v45 = vadd.f32 %v1693_v30, %v19600_v56  ;;  %v16030_v48 = vpop.f32.mrb[65].mxu1  ;;  %16374 = vmatmul.mubr.msk.f32.gmra.mrb[170].mxu1 %vm304_vm1, %v3482_v44  ;;  %v1838_v50 = vpop.f32.mrb[68].mxu0 }
 0x17f   : > { %v1882_v54 = vadd.f32 %v1838_v50, %v1722_v16  ;;  %16363 = vmatmul.mubr.msk.f32.gmra.mrb[174].mxu0 %vm304_vm1, %v3498_v46  ;;  %16376 = vmatprep.mubr.msk.f32.mxu1 %vm18469_vm2, %v18468_v1  ;;  %v16050_v57 = vpop.f32.mrb[69].mxu0  ;;  %v3487_v50 = vld [vmem:[#allocation2 + $0xc8] sm:$0xff] }
 0x180   : > { %16396 = vmatprep.mubr.msk.f32.mxu0 %vm18469_vm2, %v18468_v1 }
 0x181   : > { %v1698_v56 = vpop.f32.mrb[66].mxu1  ;;  %v1898_v62 = vadd.f32 %v19674_v52, %v1882_v54  ;;  %v19739_v54 = vld [vmem:[#allocation2 + $0xb2] sm:$0xff] }
 0x182   : > { %v1726_v0 = vadd.f32 %v1698_v56, %v19611_v3  ;;  %v16033_v2 = vpop.f32.mrb[67].mxu1  ;;  %16377 = vmatmul.mubr.msk.f32.gmra.mrb[172].mxu1 %vm304_vm1, %v3483_v58  ;;  %v1843_v4 = vpop.f32.mrb[70].mxu0 }
 0x183   : > { %v1961_v5 = vadd.f32 %v1919_v39, %v1898_v62  ;;  %v1883_v7 = vadd.f32 %v1843_v4, %v1723_v26  ;;  %16397 = vmatmul.mubr.msk.f32.vlgmr.msra.gmra.mrb[176].mxu0 %vm304_vm1, %v19351_v51  ;;  %16379 = vmatprep.mubr.msk.f32.mxu1 %vm18469_vm2, %v18468_v1  ;;  %v16053_v8 = vpop.f32.mrb[71].mxu0 }
 0x184   : > { %16399 = vmatprep.mubr.msk.f32.mxu0 %vm18469_vm2, %v18468_v1  ;;  %16453 = vmatpush3.msk.msra.mxu0 %vm517_vm0, %v14198_v63 }
 0x185   : > { %1970 = vst.msk [vmem:[#allocation3 + $0x12] sm:$0xff] %vm426_vm3, %v1961_v5  ;;  %v1899_v3 = vadd.f32 %v19674_v52, %v1883_v7  ;;  %v1703_v12 = vpop.f32.mrb[68].mxu1  ;;  %16510 = vmatprep.subr.mxu0 %v18468_v1 }
 0x186   : > { %v19702_v51 = vadd.f32 %v1703_v12, %v19624_v53  ;;  %v16036_v14 = vpop.f32.mrb[69].mxu1  ;;  %16380 = vmatmul.mubr.msk.f32.gmra.mrb[174].mxu1 %vm304_vm1, %v3484_v10  ;;  %v1848_v55 = vpop.f32.mrb[72].mxu0  ;;  %v19712_v53 = vld [vmem:[#allocation2 + $0xa2] sm:$0xff] }
 0x187   : > { %v1962_v31 = vadd.f32 %v1924_v35, %v1899_v3  ;;  %v1884_v16 = vadd.f32 %v1848_v55, %v1724_v25  ;;  %16400 = vmatmul.mubr.msk.f32.gmra.mrb[178].mxu0 %vm304_vm1, %v19363_v60  ;;  %16382 = vmatprep.mubr.msk.f32.mxu1 %vm18469_vm2, %v18468_v1  ;;  %v16056_v17 = vpop.f32.mrb[73].mxu0  ;;  %v19757_v3 = vld [vmem:[#allocation2 + $0xba] sm:$0xff]  ;;  %v1949_v12 = vpop.permute.xlu1 %1948 }
 0x188   : > { %16402 = vmatprep.mubr.msk.f32.mxu0 %vm18469_vm2, %v18468_v1 }
 0x189   : > { %1971 = vst.msk [vmem:[#allocation3 + $0x1a] sm:$0xff] %vm426_vm3, %v1962_v31  ;;  %v1708_v23 = vpop.f32.mrb[70].mxu1  ;;  %v1900_v34 = vadd.f32 %v19674_v52, %v1884_v16 }
 0x18a   : > { %v19718_v60 = vadd.f32 %v1708_v23, %v19635_v19  ;;  %v16039_v24 = vpop.f32.mrb[71].mxu1  ;;  %16383 = vmatmul.mubr.msk.f32.gmra.mrb[176].mxu1 %vm304_vm1, %v3485_v18  ;;  %v1853_v26 = vpop.f32.mrb[74].mxu0  ;;  %v19727_v19 = vld [vmem:[#allocation2 + $0xaa] sm:$0xff]  ;;  %v13953_v18 = vld [vmem:[%s18666_s23 + $0xe0] sm:$0xff] }
 0x18b   : > { %v1963_v27 = vadd.f32 %v1929_v11, %v1900_v34  ;;  %v1885_v28 = vadd.f32 %v1853_v26, %v1725_v45  ;;  %16403 = vmatmul.mubr.msk.f32.gmra.mrb[180].mxu0 %vm304_vm1, %v19712_v53  ;;  %16385 = vmatprep.mubr.msk.f32.mxu1 %vm18469_vm2, %v18468_v1  ;;  %v16059_v32 = vpop.f32.mrb[75].mxu0  ;;  %v3488_v11 = vld [vmem:[#allocation2 + $0xd0] sm:$0xff]  ;;  %419 = vst.msk [vmem:[#allocation2 + $0x10f] sm:$0xff] %vm304_vm1, %v13953_v18  ;;  %v4098_v18 = vld [vmem:[#allocation2 + $0xa3] sm:$0xff] }
 0x18c   : > { %v6482_v35 = vld [vmem:[#allocation3 + $0x12] sm:$0xff]  ;;  %16405 = vmatprep.mubr.msk.f32.mxu0 %vm18469_vm2, %v18468_v1 }
 0x18d   : > { %v6518_v38 = vld [vmem:[#allocation3 + $0x11] sm:$0xff]  ;;  %1972 = vst.msk [vmem:[#allocation3 + $0x22] sm:$0xff] %vm426_vm3, %v1963_v27  ;;  %v1713_v39 = vpop.f32.mrb[72].mxu1  ;;  %v1901_v25 = vadd.f32 %v19674_v52, %v1885_v28  ;;  %v19774_v27 = vld [vmem:[#allocation2 + $0xc2] sm:$0xff] }
 0x18e   : > { %v19732_v41 = vadd.f32 %v1713_v39, %v19649_v29  ;;  %v16042_v43 = vpop.f32.mrb[73].mxu1  ;;  %16386 = vmatmul.mubr.msk.f32.gmra.mrb[178].mxu1 %vm304_vm1, %v3486_v33  ;;  %v1858_v44 = vpop.f32.mrb[76].mxu0  ;;  %v6554_v46 = vmax.f32 %v6482_v35, %v6518_v38 }
 0x18f   : > { %v1964_v30 = vadd.f32 %v1934_v36, %v1901_v25  ;;  %v1886_v45 = vadd.f32 %v1858_v44, %v1726_v0  ;;  %16406 = vmatmul.mubr.msk.f32.gmra.mrb[182].mxu0 %vm304_vm1, %v19727_v19  ;;  %16388 = vmatprep.mubr.msk.f32.mxu1 %vm18469_vm2, %v18468_v1  ;;  %v16062_v48 = vpop.f32.mrb[77].mxu0  ;;  %v13952_v0 = vld [vmem:[%s18666_s23 + $0xd8] sm:$0xff]  ;;  %v1954_v39 = vpop.permute.xlu1 %1953  ;;  %v13954_v25 = vld [vmem:[%s18666_s23 + $0xe8] sm:$0xff] }
 0x190   : > { %v6483_v29 = vld [vmem:[#allocation3 + $0x1a] sm:$0xff]  ;;  %16408 = vmatprep.mubr.msk.f32.mxu0 %vm18469_vm2, %v18468_v1  ;;  %415 = vst.msk [vmem:[#allocation2 + $0x105] sm:$0xff] %vm304_vm1, %v13952_v0  ;;  %420 = vst.msk [vmem:[#allocation2 + $0x117] sm:$0xff] %vm304_vm1, %v13954_v25  ;;  %v19795_v48 = vld [vmem:[#allocation2 + $0xca] sm:$0xff] }
 0x191   : > { %v6519_v57 = vld [vmem:[#allocation3 + $0x19] sm:$0xff]  ;;  %1973 = vst.msk [vmem:[#allocation3 + $0x2a] sm:$0xff] %vm426_vm3, %v1964_v30  ;;  %v1718_v62 = vpop.f32.mrb[74].mxu1  ;;  %v1902_v63 = vadd.f32 %v19674_v52, %v1886_v45 }
 0x192   : > { %v6590_v58 = vld [vmem:[#allocation3 + $0x13] sm:$0xff]  ;;  %v19747_v2 = vadd.f32 %v1718_v62, %v19660_v42  ;;  %v16045_v4 = vpop.f32.mrb[75].mxu1  ;;  %16389 = vmatmul.mubr.msk.f32.gmra.mrb[180].mxu1 %vm304_vm1, %v3487_v50  ;;  %v1863_v5 = vpop.f32.mrb[78].mxu0  ;;  %v6555_v7 = vmax.f32 %v6483_v29, %v6519_v57 }
 0x193   : > { %v6626_v56 = vmax.f32 %v6554_v46, %v6590_v58  ;;  %v1965_v8 = vadd.f32 %v1939_v20, %v1902_v63  ;;  %v1887_v10 = vadd.f32 %v1863_v5, %v19702_v51  ;;  %16409 = vmatmul.mubr.msk.f32.gmra.mrb[184].mxu0 %vm304_vm1, %v19739_v54  ;;  %16391 = vmatprep.mubr.msk.f32.mxu1 %vm18469_vm2, %v18468_v1  ;;  %v16065_v42 = vpop.f32.mrb[79].mxu0 }
 0x194   : > { %v6484_v14 = vld [vmem:[#allocation3 + $0x22] sm:$0xff]  ;;  %16411 = vmatprep.mubr.msk.f32.mxu0 %vm18469_vm2, %v18468_v1 }
 0x195   : > { %6662 = vst.msk [vmem:[#allocation3 + $0x12] sm:$0xff] %vm426_vm3, %v6626_v56  ;;  %v6520_v55 = vld [vmem:[#allocation3 + $0x21] sm:$0xff]  ;;  %1974 = vst.msk [vmem:[#allocation3 + $0x32] sm:$0xff] %vm426_vm3, %v1965_v8  ;;  %v19762_v51 = vpop.f32.mrb[76].mxu1  ;;  %v1903_v17 = vadd.f32 %v19674_v52, %v1887_v10 }
 0x196   : > { %v6591_v31 = vld [vmem:[#allocation3 + $0x1b] sm:$0xff]  ;;  %v16079_v20 = vpop.f32.mrb[77].mxu1  ;;  %16392 = vmatmul.mubr.msk.f32.gmra.mrb[182].mxu1 %vm304_vm1, %v3488_v11  ;;  %v1868_v21 = vpop.f32.mrb[80].mxu0  ;;  %v6556_v23 = vmax.f32 %v6484_v14, %v6520_v55 }
 0x197   : > { %v6627_v16 = vmax.f32 %v6555_v7, %v6591_v31  ;;  %v1966_v34 = vadd.f32 %v1944_v40, %v1903_v17  ;;  %16412 = vmatmul.mubr.msk.f32.gmra.mrb[186].mxu0 %vm304_vm1, %v19757_v3  ;;  %16425 = vmatprep.mubr.msk.f32.mxu1 %vm18469_vm2, %v18468_v1  ;;  %v16068_v24 = vpop.f32.mrb[81].mxu0  ;;  %v1888_v26 = vadd.f32 %v1868_v21, %v19718_v60  ;;  %v14209_v60 = vld [vmem:[%s21785_s1 + $0x14] sm:$0xf] }
 0x198   : > { %v6485_v28 = vld [vmem:[#allocation3 + $0x2a] sm:$0xff]  ;;  %16414 = vmatprep.mubr.msk.f32.mxu0 %vm18469_vm2, %v18468_v1 }
 0x199   : > { %6663 = vst.msk [vmem:[#allocation3 + $0x1a] sm:$0xff] %vm426_vm3, %v6627_v16  ;;  %v6521_v32 = vld [vmem:[#allocation3 + $0x29] sm:$0xff]  ;;  %1975 = vst.msk [vmem:[#allocation3 + $0x3a] sm:$0xff] %vm426_vm3, %v1966_v34  ;;  %v19779_v38 = vpop.f32.mrb[78].mxu1  ;;  %v1904_v36 = vadd.f32 %v19674_v52, %v1888_v26 }
 0x19a   : > { %v6592_v33 = vld [vmem:[#allocation3 + $0x23] sm:$0xff]  ;;  %v16082_v40 = vpop.f32.mrb[79].mxu1  ;;  %16426 = vmatmul.mubr.msk.f32.vlgmr.msra.gmra.mrb[184].mxu1 %vm304_vm1, %v19712_v53  ;;  %v1873_v43 = vpop.f32.mrb[82].mxu0  ;;  %v6557_v44 = vmax.f32 %v6485_v28, %v6521_v32  ;;  %v14220_v24 = vld [vmem:[%s21785_s1 + $0x18] sm:$0xf] }
 0x19b   : > { %v6628_v35 = vmax.f32 %v6556_v23, %v6592_v33  ;;  %v1967_v46 = vadd.f32 %v1949_v12, %v1904_v36  ;;  %16415 = vmatmul.mubr.msk.f32.gmra.mrb[188].mxu0 %vm304_vm1, %v19774_v27  ;;  %16428 = vmatprep.mubr.msk.f32.mxu1 %vm18469_vm2, %v18468_v1  ;;  %v16071_v30 = vpop.f32.mrb[83].mxu0  ;;  %v1889_v45 = vadd.f32 %v1873_v43, %v19732_v41  ;;  %v19813_v7 = vld [vmem:[#allocation2 + $0xd2] sm:$0xff] }
 0x19c   : > { %v6486_v50 = vld [vmem:[#allocation3 + $0x32] sm:$0xff]  ;;  %16417 = vmatprep.mubr.msk.f32.mxu0 %vm18469_vm2, %v18468_v1  ;;  %16482 = vmatpush3.msk.msra.mxu1 %vm517_vm0, %v14209_v60  ;;  %v4099_v33 = vld [vmem:[#allocation2 + $0xab] sm:$0xff] }
 0x19d   : > { %6664 = vst.msk [vmem:[#allocation3 + $0x22] sm:$0xff] %vm426_vm3, %v6628_v35  ;;  %v6522_v53 = vld [vmem:[#allocation3 + $0x31] sm:$0xff]  ;;  %1976 = vst.msk [vmem:[#allocation3 + $0x42] sm:$0xff] %vm426_vm3, %v1967_v46  ;;  %v19801_v58 = vpop.f32.mrb[80].mxu1  ;;  %v1905_v56 = vadd.f32 %v19674_v52, %v1889_v45  ;;  %16539 = vmatprep.subr.mxu1 %v18468_v1 }
 0x19e   : > { %v6593_v29 = vld [vmem:[#allocation3 + $0x2b] sm:$0xff]  ;;  %v16085_v41 = vpop.f32.mrb[81].mxu1  ;;  %16429 = vmatmul.mubr.msk.f32.gmra.mrb[186].mxu1 %vm304_vm1, %v19727_v19  ;;  %v1878_v62 = vpop.f32.mrb[84].mxu0  ;;  %v6558_v63 = vmax.f32 %v6486_v50, %v6522_v53 }
 0x19f   : > { %v6629_v57 = vmax.f32 %v6557_v44, %v6593_v29  ;;  %v1968_v0 = vadd.f32 %v1954_v39, %v1905_v56  ;;  %16418 = vmatmul.mubr.msk.f32.gmra.mrb[190].mxu0 %vm304_vm1, %v19795_v48  ;;  %16431 = vmatprep.mubr.msk.f32.mxu1 %vm18469_vm2, %v18468_v1  ;;  %v16074_v4 = vpop.f32.mrb[85].mxu0  ;;  %v1890_v5 = vadd.f32 %v1878_v62, %v19747_v2  ;;  %v1959_v19 = vpop.permute.xlu1 %1958  ;;  %v4100_v45 = vld [vmem:[#allocation2 + $0xb3] sm:$0xff]  ;;  %v4101_v41 = vld [vmem:[#allocation2 + $0xbb] sm:$0xff] }
 0x1a0   : > { %v6487_v8 = vld [vmem:[#allocation3 + $0x3a] sm:$0xff]  ;;  %16420 = vmatprep.mubr.msk.f32.mxu0 %vm18469_vm2, %v18468_v1  ;;  %v19876_v4 = vld [vmem:[#allocation2 + $0xda] sm:$0xff] }
 0x1a1   : > { %6665 = vst.msk [vmem:[#allocation3 + $0x2a] sm:$0xff] %vm426_vm3, %v6629_v57  ;;  %v6523_v10 = vld [vmem:[#allocation3 + $0x39] sm:$0xff]  ;;  %1977 = vst.msk [vmem:[#allocation3 + $0x4a] sm:$0xff] %vm426_vm3, %v1968_v0  ;;  %v2110_v12 = vpop.f32.mrb[82].mxu1  ;;  %v1906_v14 = vadd.f32 %v19674_v52, %v1890_v5 }
 0x1a2   : > { %v6594_v42 = vld [vmem:[#allocation3 + $0x33] sm:$0xff]  ;;  %v16088_v55 = vpop.f32.mrb[83].mxu1  ;;  %16432 = vmatmul.mubr.msk.f32.gmra.mrb[188].mxu1 %vm304_vm1, %v19739_v54  ;;  %v2235_v2 = vpop.f32.mrb[86].mxu0  ;;  %v6559_v31 = vmax.f32 %v6487_v8, %v6523_v10  ;;  %v4102_v8 = vld [vmem:[#allocation2 + $0xc3] sm:$0xff] }
 0x1a3   : > { %v6630_v11 = vmax.f32 %v6558_v63, %v6594_v42  ;;  %v1969_v16 = vadd.f32 %v1959_v19, %v1906_v14  ;;  %16421 = vmatmul.mubr.msk.f32.gmra.mrb[192].mxu0 %vm304_vm1, %v19813_v7  ;;  %16434 = vmatprep.mubr.msk.f32.mxu1 %vm18469_vm2, %v18468_v1  ;;  %v16108_v17 = vpop.f32.mrb[87].mxu0  ;;  %v19827_v20 = vadd.f32 %v2235_v2, %v19762_v51  ;;  %v4103_v14 = vld [vmem:[#allocation2 + $0xcb] sm:$0xff] }
 0x1a4   : > { %v6488_v52 = vld [vmem:[#allocation3 + $0x42] sm:$0xff]  ;;  %16454 = vmatprep.mubr.msk.f32.mxu0 %vm18469_vm2, %v18468_v1 }
 0x1a5   : > { %6666 = vst.msk [vmem:[#allocation3 + $0x32] sm:$0xff] %vm426_vm3, %v6630_v11  ;;  %v6524_v21 = vld [vmem:[#allocation3 + $0x41] sm:$0xff]  ;;  %1978 = vst.msk [vmem:[#allocation3 + $0x52] sm:$0xff] %vm426_vm3, %v1969_v16  ;;  %v2115_v34 = vpop.f32.mrb[84].mxu1 }
 0x1a6   : > { %v6595_v23 = vld [vmem:[#allocation3 + $0x3b] sm:$0xff]  ;;  %v16091_v26 = vpop.f32.mrb[85].mxu1  ;;  %16435 = vmatmul.mubr.msk.f32.gmra.mrb[190].mxu1 %vm304_vm1, %v19757_v3  ;;  %v2240_v51 = vpop.f32.mrb[88].mxu0  ;;  %v6560_v28 = vmax.f32 %v6488_v52, %v6524_v21  ;;  %v4104_v21 = vld [vmem:[#allocation2 + $0xd3] sm:$0xff] }
 0x1a7   : > { %v6631_v54 = vmax.f32 %v6559_v31, %v6595_v23  ;;  %16455 = vmatmul.mubr.msk.f32.vlgmr.msra.gmra.mrb[194].mxu0 %vm304_vm1, %v4098_v18  ;;  %16437 = vmatprep.mubr.msk.f32.mxu1 %vm18469_vm2, %v18468_v1  ;;  %v16111_v32 = vpop.f32.mrb[89].mxu0  ;;  %v19842_v35 = vadd.f32 %v2240_v51, %v19779_v38  ;;  %v19887_v11 = vld [vmem:[#allocation2 + $0xe2] sm:$0xff] }
 0x1a8   : > { %v6489_v36 = vld [vmem:[#allocation3 + $0x4a] sm:$0xff]  ;;  %16457 = vmatprep.mubr.msk.f32.mxu0 %vm18469_vm2, %v18468_v1  ;;  %16511 = vmatpush3.msk.msra.mxu0 %vm517_vm0, %v14220_v24  ;;  %v4257_v18 = vld [vmem:[#allocation2 + $0xa4] sm:$0xff]  ;;  %v4105_v32 = vld [vmem:[#allocation2 + $0xdb] sm:$0xff] }
 0x1a9   : > { %6667 = vst.msk [vmem:[#allocation3 + $0x3a] sm:$0xff] %vm426_vm3, %v6631_v54  ;;  %v6525_v39 = vld [vmem:[#allocation3 + $0x49] sm:$0xff]  ;;  %v2120_v25 = vpop.f32.mrb[86].mxu1  ;;  %16568 = vmatprep.subr.mxu0 %v18468_v1  ;;  %v14231_v54 = vld [vmem:[%s21785_s1 + $0x1c] sm:$0xf] }
 0x1aa   : > { %v6596_v60 = vld [vmem:[#allocation3 + $0x43] sm:$0xff]  ;;  %v16094_v40 = vpop.f32.mrb[87].mxu1  ;;  %16438 = vmatmul.mubr.msk.f32.gmra.mrb[192].mxu1 %vm304_vm1, %v19774_v27  ;;  %v2245_v43 = vpop.f32.mrb[90].mxu0  ;;  %v6561_v44 = vmax.f32 %v6489_v36, %v6525_v39 }
 0x1ab   : > { %v6632_v3 = vmax.f32 %v6560_v28, %v6596_v60  ;;  %16458 = vmatmul.mubr.msk.f32.gmra.mrb[196].mxu0 %vm304_vm1, %v4099_v33  ;;  %16440 = vmatprep.mubr.msk.f32.mxu1 %vm18469_vm2, %v18468_v1  ;;  %v16114_v38 = vpop.f32.mrb[91].mxu0  ;;  %v19855_v46 = vadd.f32 %v2245_v43, %v19801_v58  ;;  %v4258_v28 = vld [vmem:[#allocation2 + $0xac] sm:$0xff]  ;;  %v4259_v40 = vld [vmem:[#allocation2 + $0xb4] sm:$0xff]  ;;  %v4106_v43 = vld [vmem:[#allocation2 + $0xe3] sm:$0xff] }
 0x1ac   : > { %v6597_v30 = vld [vmem:[#allocation3 + $0x4b] sm:$0xff]  ;;  %16460 = vmatprep.mubr.msk.f32.mxu0 %vm18469_vm2, %v18468_v1 }
 0x1ad   : > { %6668 = vst.msk [vmem:[#allocation3 + $0x42] sm:$0xff] %vm426_vm3, %v6632_v3  ;;  %v6633_v50 = vmax.f32 %v6561_v44, %v6597_v30  ;;  %v2125_v27 = vpop.f32.mrb[88].mxu1  ;;  %v19859_v53 = vld [vmem:[#allocation3 + $0x51] sm:$0xff]  ;;  %v13955_v36 = vld [vmem:[%s18666_s23 + $0xf0] sm:$0xff] }
 0x1ae   : > { %v16097_v29 = vpop.f32.mrb[89].mxu1  ;;  %16441 = vmatmul.mubr.msk.f32.gmra.mrb[194].mxu1 %vm304_vm1, %v19795_v48  ;;  %v2250_v57 = vpop.f32.mrb[92].mxu0  ;;  %424 = vst.msk [vmem:[#allocation2 + $0x121] sm:$0xff] %vm304_vm1, %v13955_v36 }
 0x1af   : > { %6669 = vst.msk [vmem:[#allocation3 + $0x4a] sm:$0xff] %vm426_vm3, %v6633_v50  ;;  %16461 = vmatmul.mubr.msk.f32.gmra.mrb[198].mxu0 %vm304_vm1, %v4100_v45  ;;  %16443 = vmatprep.mubr.msk.f32.mxu1 %vm18469_vm2, %v18468_v1  ;;  %v16117_v58 = vpop.f32.mrb[93].mxu0  ;;  %v19867_v56 = vadd.f32 %v2250_v57, %v2110_v12  ;;  %v14242_v57 = vld [vmem:[%s21785_s1 + $0x20] sm:$0xf] }
 0x1b0   : > { %16463 = vmatprep.mubr.msk.f32.mxu0 %vm18469_vm2, %v18468_v1 }
 0x1b1   : > { %v2130_v62 = vpop.f32.mrb[90].mxu1 }
 0x1b2   : > { %v16100_v63 = vpop.f32.mrb[91].mxu1  ;;  %16444 = vmatmul.mubr.msk.f32.gmra.mrb[196].mxu1 %vm304_vm1, %v19813_v7  ;;  %v2255_v48 = vpop.f32.mrb[94].mxu0 }
 0x1b3   : > { %16464 = vmatmul.mubr.msk.f32.gmra.mrb[200].mxu0 %vm304_vm1, %v4101_v41  ;;  %16446 = vmatprep.mubr.msk.f32.mxu1 %vm18469_vm2, %v18468_v1  ;;  %v16120_v0 = vpop.f32.mrb[95].mxu0  ;;  %v19878_v5 = vadd.f32 %v2255_v48, %v2115_v34  ;;  %v4261_v48 = vld [vmem:[#allocation2 + $0xc4] sm:$0xff] }
 0x1b4   : > { %16466 = vmatprep.mubr.msk.f32.mxu0 %vm18469_vm2, %v18468_v1  ;;  %v13956_v0 = vld [vmem:[%s18666_s23 + $0xf8] sm:$0xff]  ;;  %s18410_s23 = scalar_lea.vmem %s18409_s22, 2048 }
 0x1b5   : > { %v2135_v10 = vpop.f32.mrb[92].mxu1  ;;  %425 = vst.msk [vmem:[#allocation2 + $0x129] sm:$0xff] %vm304_vm1, %v13956_v0  ;;  %p18412_p1 = scmp.lt.s32.totalorder %s18410_s23, %s18404_s20 }
 0x1b6   : > { %v16103_v42 = vpop.f32.mrb[93].mxu1  ;;  %16447 = vmatmul.mubr.msk.f32.gmra.mrb[198].mxu1 %vm304_vm1, %v19876_v4  ;;  %v2260_v7 = vpop.f32.mrb[96].mxu0 }
 0x1b7   : > { %16467 = vmatmul.mubr.msk.f32.gmra.mrb[202].mxu0 %vm304_vm1, %v4102_v8  ;;  %16449 = vmatprep.mubr.msk.f32.mxu1 %vm18469_vm2, %v18468_v1  ;;  %v16123_v19 = vpop.f32.mrb[97].mxu0  ;;  %v19889_v12 = vadd.f32 %v2260_v7, %v2120_v25  ;;  %p18413_p2 = por %p18412_p1, %p18411_p0 }
 0x1b8   : > { %16469 = vmatprep.mubr.msk.f32.mxu0 %vm18469_vm2, %v18468_v1 }
 0x1b9   : > { %v2385_v55 = vpop.f32.mrb[94].mxu1  ;;  %p18414_p3 = pnand %p18413_p2, %p18407_p13 }
 0x1ba   : > { %v16137_v2 = vpop.f32.mrb[95].mxu1  ;;  %16450 = vmatmul.mubr.msk.f32.gmra.mrb[200].mxu1 %vm304_vm1, %v19887_v11  ;;  %v2265_v31 = vpop.f32.mrb[98].mxu0  ;;  %v2429_v16 = vadd.f32 %v2385_v55, %v19827_v20 }
 0x1bb   : > { %16470 = vmatmul.mubr.msk.f32.gmra.mrb[204].mxu0 %vm304_vm1, %v4103_v14  ;;  %16483 = vmatprep.mubr.msk.f32.mxu1 %vm18469_vm2, %v18468_v1  ;;  %v16126_v17 = vpop.f32.mrb[99].mxu0  ;;  %v19899_v52 = vadd.f32 %v2265_v31, %v2125_v27  ;;  %v4260_v27 = vld [vmem:[#allocation2 + $0xbc] sm:$0xff]  ;;  %v4262_v14 = vld [vmem:[#allocation2 + $0xcc] sm:$0xff] }
 0x1bc   : > { %16472 = vmatprep.mubr.msk.f32.mxu0 %vm18469_vm2, %v18468_v1 }
 0x1bd   : > { %v2390_v23 = vpop.f32.mrb[96].mxu1 }
 0x1be   : > { %v16140_v20 = vpop.f32.mrb[97].mxu1  ;;  %16484 = vmatmul.mubr.msk.f32.vlgmr.msra.gmra.mrb[202].mxu1 %vm304_vm1, %v4257_v18  ;;  %v2270_v34 = vpop.f32.mrb[100].mxu0  ;;  %v2430_v24 = vadd.f32 %v2390_v23, %v19842_v35  ;;  %v4263_v18 = vld [vmem:[#allocation2 + $0xd4] sm:$0xff] }
 0x1bf   : > { %v19908_v26 = vadd.f32 %v2270_v34, %v2130_v62  ;;  %16473 = vmatmul.mubr.msk.f32.gmra.mrb[206].mxu0 %vm304_vm1, %v4104_v21  ;;  %16486 = vmatprep.mubr.msk.f32.mxu1 %vm18469_vm2, %v18468_v1  ;;  %v16129_v51 = vpop.f32.mrb[101].mxu0  ;;  %v4912_v21 = vld [vmem:[%s21789_s5 + $0xa8] sm:$0xff] }
 0x1c0   : > { %16475 = vmatprep.mubr.msk.f32.mxu0 %vm18469_vm2, %v18468_v1  ;;  %16540 = vmatpush3.msk.msra.mxu1 %vm517_vm0, %v14231_v54  ;;  %v4264_v51 = vld [vmem:[#allocation2 + $0xdc] sm:$0xff] }
 0x1c1   : > { %v2395_v33 = vpop.f32.mrb[98].mxu1  ;;  %16597 = vmatprep.subr.mxu1 %v18468_v1  ;;  %4935 = vperm.xlu0 %18401, %v4912_v21  }
 0x1c2   : > { %v16143_v35 = vpop.f32.mrb[99].mxu1  ;;  %16487 = vmatmul.mubr.msk.f32.gmra.mrb[204].mxu1 %vm304_vm1, %v4258_v28  ;;  %v2275_v39 = vpop.f32.mrb[102].mxu0  ;;  %v2431_v60 = vadd.f32 %v2395_v33, %v19855_v46  ;;  %v4913_v28 = vld [vmem:[%s21789_s5 + $0xb0] sm:$0xff] }
 0x1c3   : > { %v19921_v3 = vadd.f32 %v2275_v39, %v2135_v10  ;;  %16476 = vmatmul.mubr.msk.f32.gmra.mrb[208].mxu0 %vm304_vm1, %v4105_v32  ;;  %16489 = vmatprep.mubr.msk.f32.mxu1 %vm18469_vm2, %v18468_v1  ;;  %v16132_v25 = vpop.f32.mrb[103].mxu0 }
 0x1c4   : > { %16478 = vmatprep.mubr.msk.f32.mxu0 %vm18469_vm2, %v18468_v1  ;;  %v4914_v25 = vld [vmem:[%s21789_s5 + $0xb8] sm:$0xff] }
 0x1c5   : > { %v2400_v44 = vpop.f32.mrb[100].mxu1  ;;  %4940 = vperm.xlu0 %18401, %v4913_v28  }
 0x1c6   : > { %v2432_v38 = vadd.f32 %v2400_v44, %v19867_v56  ;;  %v16146_v30 = vpop.f32.mrb[101].mxu1  ;;  %16490 = vmatmul.mubr.msk.f32.gmra.mrb[206].mxu1 %vm304_vm1, %v4259_v40  ;;  %v2544_v46 = vpop.f32.mrb[104].mxu0 }
 0x1c7   : > { %v19930_v45 = vadd.f32 %v2544_v46, %v2429_v16  ;;  %16479 = vmatmul.mubr.msk.f32.gmra.mrb[210].mxu0 %vm304_vm1, %v4106_v43  ;;  %16492 = vmatprep.mubr.msk.f32.mxu1 %vm18469_vm2, %v18468_v1  ;;  %v16166_v50 = vpop.f32.mrb[105].mxu0  ;;  %v4575_v46 = vld [vmem:[#allocation2 + $0xb5] sm:$0xff] }
 0x1c8   : > { %16512 = vmatprep.mubr.msk.f32.mxu0 %vm18469_vm2, %v18468_v1  ;;  %v4915_v50 = vld [vmem:[%s21789_s5 + $0xc0] sm:$0xff] }
 0x1c9   : > { %v2405_v29 = vpop.f32.mrb[102].mxu1  ;;  %4945 = vperm.xlu0 %18401, %v4914_v25  }
 0x1ca   : > { %v2433_v58 = vadd.f32 %v2405_v29, %v19878_v5  ;;  %v16149_v56 = vpop.f32.mrb[103].mxu1  ;;  %16493 = vmatmul.mubr.msk.f32.gmra.mrb[208].mxu1 %vm304_vm1, %v4260_v27  ;;  %v2549_v41 = vpop.f32.mrb[106].mxu0 }
 0x1cb   : > { %v19942_v62 = vadd.f32 %v2549_v41, %v2430_v24  ;;  %16513 = vmatmul.mubr.msk.f32.vlgmr.msra.gmra.mrb[212].mxu0 %vm304_vm1, %v4259_v40  ;;  %16495 = vmatprep.mubr.msk.f32.mxu1 %vm18469_vm2, %v18468_v1  ;;  %v16169_v63 = vpop.f32.mrb[107].mxu0 }
 0x1cc   : > { %16515 = vmatprep.mubr.msk.f32.mxu0 %vm18469_vm2, %v18468_v1  ;;  %16569 = vmatpush3.msk.msra.mxu0 %vm517_vm0, %v14242_v57  ;;  %v4576_v63 = vld [vmem:[#allocation2 + $0xbd] sm:$0xff] }
 0x1cd   : > { %v2410_v5 = vpop.f32.mrb[104].mxu1  ;;  %16626 = vmatprep.subr.mxu0 %v18468_v1  ;;  %4950 = vperm.xlu0 %18401, %v4915_v50  }
 0x1ce   : > { %v2434_v8 = vadd.f32 %v2410_v5, %v19889_v12  ;;  %v16152_v10 = vpop.f32.mrb[105].mxu1  ;;  %16496 = vmatmul.mubr.msk.f32.gmra.mrb[210].mxu1 %vm304_vm1, %v4261_v48  ;;  %v2554_v42 = vpop.f32.mrb[108].mxu0 }
 0x1cf   : > { %v19955_v7 = vadd.f32 %v2554_v42, %v2431_v60  ;;  %16516 = vmatmul.mubr.msk.f32.gmra.mrb[214].mxu0 %vm304_vm1, %v4260_v27  ;;  %16498 = vmatprep.mubr.msk.f32.mxu1 %vm18469_vm2, %v18468_v1  ;;  %v16172_v19 = vpop.f32.mrb[109].mxu0  ;;  %v4265_v60 = vld [vmem:[#allocation2 + $0xe4] sm:$0xff] }
 0x1d0   : > { %16518 = vmatprep.mubr.msk.f32.mxu0 %vm18469_vm2, %v18468_v1  ;;  %v14254_v27 = vld [vmem:[%s21785_s1 + $0x4] sm:$0xf] }
 0x1d1   : > { %v2415_v55 = vpop.f32.mrb[106].mxu1 }
 0x1d2   : > { %v2435_v2 = vadd.f32 %v2415_v55, %v19899_v52  ;;  %v16155_v12 = vpop.f32.mrb[107].mxu1  ;;  %16499 = vmatmul.mubr.msk.f32.gmra.mrb[212].mxu1 %vm304_vm1, %v4262_v14  ;;  %v2559_v31 = vpop.f32.mrb[110].mxu0  ;;  %v4917_v55 = vld [vmem:[%s21789_s5 + $0xd0] sm:$0xff] }
 0x1d3   : > { %v19964_v16 = vadd.f32 %v2559_v31, %v2432_v38  ;;  %16519 = vmatmul.mubr.msk.f32.gmra.mrb[216].mxu0 %vm304_vm1, %v4261_v48  ;;  %16501 = vmatprep.mubr.msk.f32.mxu1 %vm18469_vm2, %v18468_v1  ;;  %v16175_v17 = vpop.f32.mrb[111].mxu0  ;;  %v4916_v48 = vld [vmem:[%s21789_s5 + $0xc8] sm:$0xff] }
 0x1d4   : > { %16521 = vmatprep.mubr.msk.f32.mxu0 %vm18469_vm2, %v18468_v1  ;;  %4955 = vperm.xlu0 %18401, %v4916_v48  }
 0x1d5   : > { %v2420_v52 = vpop.f32.mrb[108].mxu1 }
 0x1d6   : > { %v2436_v23 = vadd.f32 %v2420_v52, %v19908_v26  ;;  %v16158_v54 = vpop.f32.mrb[109].mxu1  ;;  %16502 = vmatmul.mubr.msk.f32.gmra.mrb[214].mxu1 %vm304_vm1, %v4263_v18  ;;  %v2564_v20 = vpop.f32.mrb[112].mxu0  ;;  %v4578_v52 = vld [vmem:[#allocation2 + $0xcd] sm:$0xff] }
 0x1d7   : > { %v19976_v34 = vadd.f32 %v2564_v20, %v2433_v58  ;;  %16522 = vmatmul.mubr.msk.f32.gmra.mrb[218].mxu0 %vm304_vm1, %v4262_v14  ;;  %16504 = vmatprep.mubr.msk.f32.mxu1 %vm18469_vm2, %v18468_v1  ;;  %v16178_v24 = vpop.f32.mrb[113].mxu0  ;;  %v4577_v14 = vld [vmem:[#allocation2 + $0xc5] sm:$0xff] }
 0x1d8   : > { %16524 = vmatprep.mubr.msk.f32.mxu0 %vm18469_vm2, %v18468_v1  ;;  %4960 = vperm.xlu0 %18401, %v4917_v55  }
 0x1d9   : > { %v2425_v26 = vpop.f32.mrb[110].mxu1 }
 0x1da   : > { %v2437_v32 = vadd.f32 %v2425_v26, %v19921_v3  ;;  %v16161_v33 = vpop.f32.mrb[111].mxu1  ;;  %16505 = vmatmul.mubr.msk.f32.gmra.mrb[216].mxu1 %vm304_vm1, %v4264_v51  ;;  %v2569_v36 = vpop.f32.mrb[114].mxu0 }
 0x1db   : > { %v19988_v35 = vadd.f32 %v2569_v36, %v2434_v8  ;;  %16525 = vmatmul.mubr.msk.f32.gmra.mrb[220].mxu0 %vm304_vm1, %v4263_v18  ;;  %16507 = vmatprep.mubr.msk.f32.mxu1 %vm18469_vm2, %v18468_v1  ;;  %v16181_v39 = vpop.f32.mrb[115].mxu0  ;;  %v4735_v33 = vld [vmem:[#allocation2 + $0xbe] sm:$0xff] }
 0x1dc   : > { %16527 = vmatprep.mubr.msk.f32.mxu0 %vm18469_vm2, %v18468_v1 }
 0x1dd   : > { %v2703_v3 = vpop.f32.mrb[112].mxu1 }
 0x1de   : > { %v2747_v40 = vadd.f32 %v2703_v3, %v19930_v45  ;;  %v16195_v43 = vpop.f32.mrb[113].mxu1  ;;  %16508 = vmatmul.mubr.msk.f32.gmra.mrb[218].mxu1 %vm304_vm1, %v4265_v60  ;;  %v2574_v44 = vpop.f32.mrb[116].mxu0 }
 0x1df   : > { %v20000_v38 = vadd.f32 %v2574_v44, %v2435_v2  ;;  %16528 = vmatmul.mubr.msk.f32.gmra.mrb[222].mxu0 %vm304_vm1, %v4264_v51  ;;  %16541 = vmatprep.mubr.msk.f32.mxu1 %vm18469_vm2, %v18468_v1  ;;  %v16184_v30 = vpop.f32.mrb[117].mxu0  ;;  %v4736_v43 = vld [vmem:[#allocation2 + $0xc6] sm:$0xff] }
 0x1e0   : > { %16530 = vmatprep.mubr.msk.f32.mxu0 %vm18469_vm2, %v18468_v1 }
 0x1e1   : > { %v2708_v45 = vpop.f32.mrb[114].mxu1 }
 0x1e2   : > { %v2748_v29 = vadd.f32 %v2708_v45, %v19942_v62  ;;  %v16198_v57 = vpop.f32.mrb[115].mxu1  ;;  %16542 = vmatmul.mubr.msk.f32.vlgmr.msra.gmra.mrb[220].mxu1 %vm304_vm1, %v4575_v46  ;;  %v2579_v58 = vpop.f32.mrb[118].mxu0  ;;  %v20025_v62 = vld [vmem:[#allocation2 + $0xec] sm:$0xff] }
 0x1e3   : > { %v20015_v56 = vadd.f32 %v2579_v58, %v2436_v23  ;;  %16531 = vmatmul.mubr.msk.f32.gmra.mrb[224].mxu0 %vm304_vm1, %v4265_v60  ;;  %16544 = vmatprep.mubr.msk.f32.mxu1 %vm18469_vm2, %v18468_v1  ;;  %v16187_v41 = vpop.f32.mrb[119].mxu0  ;;  %v4734_v23 = vld [vmem:[#allocation2 + $0xb6] sm:$0xff] }
 0x1e4   : > { %16533 = vmatprep.mubr.msk.f32.mxu0 %vm18469_vm2, %v18468_v1  ;;  %16598 = vmatpush3.msk.msra.mxu1 %vm517_vm0, %v14254_v27  ;;  %v4581_v27 = vld [vmem:[#allocation2 + $0xe5] sm:$0xff] }
 0x1e5   : > { %v2713_v0 = vpop.f32.mrb[116].mxu1  ;;  %16655 = vmatprep.subr.mxu1 %v18468_v1 }
 0x1e6   : > { %v2749_v5 = vadd.f32 %v2713_v0, %v19955_v7  ;;  %v16201_v8 = vpop.f32.mrb[117].mxu1  ;;  %16545 = vmatmul.mubr.msk.f32.gmra.mrb[222].mxu1 %vm304_vm1, %v4576_v63  ;;  %v2584_v10 = vpop.f32.mrb[120].mxu0  ;;  %v20042_v7 = vld [vmem:[#allocation2 + $0xf4] sm:$0xff] }
 0x1e7   : > { %v20031_v42 = vadd.f32 %v2584_v10, %v2437_v32  ;;  %16534 = vmatmul.mubr.msk.f32.gmra.mrb[226].mxu0 %vm304_vm1, %v20025_v62  ;;  %16547 = vmatprep.mubr.msk.f32.mxu1 %vm18469_vm2, %v18468_v1  ;;  %v16190_v19 = vpop.f32.mrb[121].mxu0  ;;  %v4579_v32 = vld [vmem:[#allocation2 + $0xd5] sm:$0xff]  ;;  %v4582_v0 = vld [vmem:[#allocation2 + $0xed] sm:$0xff] }
 0x1e8   : > { %16536 = vmatprep.mubr.msk.f32.mxu0 %vm18469_vm2, %v18468_v1 }
 0x1e9   : > { %v2718_v2 = vpop.f32.mrb[118].mxu1 }
 0x1ea   : > { %v2750_v12 = vadd.f32 %v2718_v2, %v19964_v16  ;;  %v16204_v31 = vpop.f32.mrb[119].mxu1  ;;  %16548 = vmatmul.mubr.msk.f32.gmra.mrb[224].mxu1 %vm304_vm1, %v4577_v14  ;;  %v2862_v17 = vpop.f32.mrb[122].mxu0  ;;  %v4990_v16 = vld [vmem:[%s21785_s1] sm:$0xf]  ;;  %v4583_v2 = vld [vmem:[#allocation2 + $0xf5] sm:$0xff] }
 0x1eb   : > { %v20046_v18 = vadd.f32 %v2862_v17, %v2747_v40  ;;  %16537 = vmatmul.mubr.msk.f32.gmra.mrb[228].mxu0 %vm304_vm1, %v20042_v7  ;;  %16550 = vmatprep.mubr.msk.f32.mxu1 %vm18469_vm2, %v18468_v1  ;;  %v16224_v21 = vpop.f32.mrb[123].mxu0  ;;  %v4580_v40 = vld [vmem:[#allocation2 + $0xdd] sm:$0xff] }
 0x1ec   : > { %16570 = vmatprep.mubr.msk.f32.mxu0 %vm18469_vm2, %v18468_v1 }
 0x1ed   : > { %v2723_v54 = vpop.f32.mrb[120].mxu1 }
 0x1ee   : > { %v2751_v20 = vadd.f32 %v2723_v54, %v19976_v34  ;;  %v16207_v24 = vpop.f32.mrb[121].mxu1  ;;  %16551 = vmatmul.mubr.msk.f32.gmra.mrb[226].mxu1 %vm304_vm1, %v4578_v52  ;;  %v2867_v51 = vpop.f32.mrb[124].mxu0  ;;  %v4991_v54 = vld [vmem:[#allocation2 + $0xd9] sm:$0xff] }
 0x1ef   : > { %v20059_v28 = vadd.f32 %v2867_v51, %v2748_v29  ;;  %16571 = vmatmul.mubr.msk.f32.vlgmr.msra.gmra.mrb[230].mxu0 %vm304_vm1, %v4734_v23  ;;  %16553 = vmatprep.mubr.msk.f32.mxu1 %vm18469_vm2, %v18468_v1  ;;  %v16227_v26 = vpop.f32.mrb[125].mxu0  ;;  %v4737_v29 = vld [vmem:[#allocation2 + $0xce] sm:$0xff] }
 0x1f0   : > { %16573 = vmatprep.mubr.msk.f32.mxu0 %vm18469_vm2, %v18468_v1  ;;  %16627 = vmatpush3.msk.msra.mxu0 %vm517_vm0, %v4990_v16  ;;  %v4740_v16 = vld [vmem:[#allocation2 + $0xe6] sm:$0xff] }
 0x1f1   : > { %v2728_v34 = vpop.f32.mrb[122].mxu1  ;;  %16684 = vmatprep.subr.mxu0 %v18468_v1 }
 0x1f2   : > { %v2752_v36 = vadd.f32 %v2728_v34, %v19988_v35  ;;  %v16210_v39 = vpop.f32.mrb[123].mxu1  ;;  %16554 = vmatmul.mubr.msk.f32.gmra.mrb[228].mxu1 %vm304_vm1, %v4579_v32  ;;  %v2872_v60 = vpop.f32.mrb[126].mxu0  ;;  %v4992_v34 = vld [vmem:[#allocation2 + $0xe1] sm:$0xff] }
 0x1f3   : > { %v20070_v25 = vadd.f32 %v2872_v60, %v2749_v5  ;;  %16574 = vmatmul.mubr.msk.f32.gmra.mrb[232].mxu0 %vm304_vm1, %v4735_v33  ;;  %16556 = vmatprep.mubr.msk.f32.mxu1 %vm18469_vm2, %v18468_v1  ;;  %v16230_v3 = vpop.f32.mrb[127].mxu0  ;;  %v4738_v5 = vld [vmem:[#allocation2 + $0xd6] sm:$0xff] }
 0x1f4   : > { %16576 = vmatprep.mubr.msk.f32.mxu0 %vm18469_vm2, %v18468_v1 }
 0x1f5   : > { %v2733_v44 = vpop.f32.mrb[124].mxu1 }
 0x1f6   : > { %v2753_v35 = vadd.f32 %v2733_v44, %v20000_v38  ;;  %v16213_v30 = vpop.f32.mrb[125].mxu1  ;;  %16557 = vmatmul.mubr.msk.f32.gmra.mrb[230].mxu1 %vm304_vm1, %v4580_v40  ;;  %v2877_v46 = vpop.f32.mrb[128].mxu0  ;;  %v4993_v44 = vld [vmem:[#allocation2 + $0xe9] sm:$0xff] }
 0x1f7   : > { %v20079_v50 = vadd.f32 %v2877_v46, %v2750_v12  ;;  %16577 = vmatmul.mubr.msk.f32.gmra.mrb[234].mxu0 %vm304_vm1, %v4736_v43  ;;  %16559 = vmatprep.mubr.msk.f32.mxu1 %vm18469_vm2, %v18468_v1  ;;  %v16233_v45 = vpop.f32.mrb[129].mxu0  ;;  %v4739_v12 = vld [vmem:[#allocation2 + $0xde] sm:$0xff] }
 0x1f8   : > { %16579 = vmatprep.mubr.msk.f32.mxu0 %vm18469_vm2, %v18468_v1 }
 0x1f9   : > { %v2738_v57 = vpop.f32.mrb[126].mxu1 }
 0x1fa   : > { %v2754_v38 = vadd.f32 %v2738_v57, %v20015_v56  ;;  %v16216_v58 = vpop.f32.mrb[127].mxu1  ;;  %16560 = vmatmul.mubr.msk.f32.gmra.mrb[232].mxu1 %vm304_vm1, %v4581_v27  ;;  %v2882_v41 = vpop.f32.mrb[130].mxu0  ;;  %v4994_v57 = vld [vmem:[#allocation2 + $0xf1] sm:$0xff] }
 0x1fb   : > { %v20088_v63 = vadd.f32 %v2882_v41, %v2751_v20  ;;  %16580 = vmatmul.mubr.msk.f32.gmra.mrb[236].mxu0 %vm304_vm1, %v4737_v29  ;;  %16562 = vmatprep.mubr.msk.f32.mxu1 %vm18469_vm2, %v18468_v1  ;;  %v16236_v48 = vpop.f32.mrb[131].mxu0 }
 0x1fc   : > { %16582 = vmatprep.mubr.msk.f32.mxu0 %vm18469_vm2, %v18468_v1 }
 0x1fd   : > { %v2743_v8 = vpop.f32.mrb[128].mxu1 }
 0x1fe   : > { %v2755_v56 = vadd.f32 %v2743_v8, %v20031_v42  ;;  %v16219_v10 = vpop.f32.mrb[129].mxu1  ;;  %16563 = vmatmul.mubr.msk.f32.gmra.mrb[234].mxu1 %vm304_vm1, %v4582_v0  ;;  %v2887_v19 = vpop.f32.mrb[132].mxu0 }
 0x1ff   : > { %v20097_v14 = vadd.f32 %v2887_v19, %v2752_v36  ;;  %16583 = vmatmul.mubr.msk.f32.gmra.mrb[238].mxu0 %vm304_vm1, %v4738_v5  ;;  %16565 = vmatprep.mubr.msk.f32.mxu1 %vm18469_vm2, %v18468_v1  ;;  %v16239_v55 = vpop.f32.mrb[133].mxu0  ;;  %v4741_v36 = vld [vmem:[#allocation2 + $0xee] sm:$0xff]  ;;  %v4982_v10 = vld [vmem:[#allocation2 + $0xe0] sm:$0xff] }
 0x200   : > { %16585 = vmatprep.mubr.msk.f32.mxu0 %vm18469_vm2, %v18468_v1 }
 0x201   : > { %v3021_v31 = vpop.f32.mrb[130].mxu1 }
 0x202   : > { %v3065_v42 = vadd.f32 %v3021_v31, %v20046_v18  ;;  %v16253_v17 = vpop.f32.mrb[131].mxu1  ;;  %16566 = vmatmul.mubr.msk.f32.gmra.mrb[236].mxu1 %vm304_vm1, %v4583_v2  ;;  %v2892_v21 = vpop.f32.mrb[134].mxu0  ;;  %v14275_v18 = vld [vmem:[%s21785_s1 + $0x8] sm:$0xf] }
 0x203   : > { %v20106_v52 = vadd.f32 %v2892_v21, %v2753_v35  ;;  %16586 = vmatmul.mubr.msk.f32.gmra.mrb[240].mxu0 %vm304_vm1, %v4739_v12  ;;  %16599 = vmatprep.mubr.msk.f32.mxu1 %vm18469_vm2, %v18468_v1  ;;  %v16242_v23 = vpop.f32.mrb[135].mxu0  ;;  %v4742_v35 = vld [vmem:[#allocation2 + $0xf6] sm:$0xff]  ;;  %v4983_v17 = vld [vmem:[#allocation2 + $0xe8] sm:$0xff] }
 0x204   : > { %16588 = vmatprep.mubr.msk.f32.mxu0 %vm18469_vm2, %v18468_v1 }
 0x205   : > { %v3026_v20 = vpop.f32.mrb[132].mxu1 }
 0x206   : > { %v3066_v24 = vadd.f32 %v3026_v20, %v20059_v28  ;;  %v16256_v51 = vpop.f32.mrb[133].mxu1  ;;  %16600 = vmatmul.mubr.msk.f32.vlgmr.msra.gmra.mrb[238].mxu1 %vm304_vm1, %v4991_v54  ;;  %v2897_v26 = vpop.f32.mrb[136].mxu0 }
 0x207   : > { %v20118_v32 = vadd.f32 %v2897_v26, %v2754_v38  ;;  %16589 = vmatmul.mubr.msk.f32.gmra.mrb[242].mxu0 %vm304_vm1, %v4740_v16  ;;  %16602 = vmatprep.mubr.msk.f32.mxu1 %vm18469_vm2, %v18468_v1  ;;  %v16245_v33 = vpop.f32.mrb[137].mxu0  ;;  %v4981_v38 = vld [vmem:[#allocation2 + $0xd8] sm:$0xff] }
 0x208   : > { %16591 = vmatprep.mubr.msk.f32.mxu0 %vm18469_vm2, %v18468_v1  ;;  %16656 = vmatpush3.msk.msra.mxu1 %vm517_vm0, %v14275_v18  ;;  %v4997_v18 = vld [vmem:[#allocation2 + $0x109] sm:$0xff] }
 0x209   : > { %v3031_v28 = vpop.f32.mrb[134].mxu1  ;;  %16713 = vmatprep.subr.mxu1 %v18468_v1 }
 0x20a   : > { %v3067_v39 = vadd.f32 %v3031_v28, %v20070_v25  ;;  %v16259_v60 = vpop.f32.mrb[135].mxu1  ;;  %16603 = vmatmul.mubr.msk.f32.gmra.mrb[240].mxu1 %vm304_vm1, %v4992_v34  ;;  %v2902_v3 = vpop.f32.mrb[138].mxu0  ;;  %v4998_v28 = vld [vmem:[#allocation2 + $0x111] sm:$0xff] }
 0x20b   : > { %v20130_v40 = vadd.f32 %v2902_v3, %v2755_v56  ;;  %16592 = vmatmul.mubr.msk.f32.gmra.mrb[244].mxu0 %vm304_vm1, %v4741_v36  ;;  %16605 = vmatprep.mubr.msk.f32.mxu1 %vm18469_vm2, %v18468_v1  ;;  %v16248_v43 = vpop.f32.mrb[139].mxu0  ;;  %v4995_v56 = vld [vmem:[#allocation2 + $0xf9] sm:$0xff] }
 0x20c   : > { %16594 = vmatprep.mubr.msk.f32.mxu0 %vm18469_vm2, %v18468_v1 }
 0x20d   : > { %v3036_v25 = vpop.f32.mrb[136].mxu1 }
 0x20e   : > { %v3068_v30 = vadd.f32 %v3036_v25, %v20079_v50  ;;  %v16262_v46 = vpop.f32.mrb[137].mxu1  ;;  %16606 = vmatmul.mubr.msk.f32.gmra.mrb[242].mxu1 %vm304_vm1, %v4993_v44  ;;  %v3180_v45 = vpop.f32.mrb[140].mxu0  ;;  %v14286_v50 = vld [vmem:[%s21785_s1 + $0xc] sm:$0xf]  ;;  %v4999_v25 = vld [vmem:[#allocation2 + $0x119] sm:$0xff] }
 0x20f   : > { %v20139_v27 = vadd.f32 %v3180_v45, %v3065_v42  ;;  %16595 = vmatmul.mubr.msk.f32.gmra.mrb[246].mxu0 %vm304_vm1, %v4742_v35  ;;  %16608 = vmatprep.mubr.msk.f32.mxu1 %vm18469_vm2, %v18468_v1  ;;  %v16282_v29 = vpop.f32.mrb[141].mxu0  ;;  %v4996_v42 = vld [vmem:[#allocation2 + $0x101] sm:$0xff]  ;;  %v6410_v46 = vld [vmem:[%s21789_s5 + $0xd8] sm:$0xff] }
 0x210   : > { %16628 = vmatprep.mubr.msk.f32.mxu0 %vm18469_vm2, %v18468_v1  ;;  %6421 = vperm.xlu0 %18401, %v6410_v46   ;;  %v20202_v29 = vld [vmem:[%s21786_s2] ss:$0 sm:$0xff] }
 0x211   : > { %v3041_v58 = vpop.f32.mrb[138].mxu1 }
 0x212   : > { %v3069_v41 = vadd.f32 %v3041_v58, %v20088_v63  ;;  %v16265_v48 = vpop.f32.mrb[139].mxu1  ;;  %16609 = vmatmul.mubr.msk.f32.gmra.mrb[244].mxu1 %vm304_vm1, %v4994_v57  ;;  %v3185_v0 = vpop.f32.mrb[142].mxu0 }
 0x213   : > { %v20151_v5 = vadd.f32 %v3185_v0, %v3066_v24  ;;  %16629 = vmatmul.mubr.msk.f32.vlgmr.msra.gmra.mrb[248].mxu0 %vm304_vm1, %v4981_v38  ;;  %16611 = vmatprep.mubr.msk.f32.mxu1 %vm18469_vm2, %v18468_v1  ;;  %v16285_v8 = vpop.f32.mrb[143].mxu0  ;;  %v4984_v24 = vld [vmem:[#allocation2 + $0xf0] sm:$0xff]  ;;  %v6411_v48 = vld [vmem:[%s21789_s5 + $0xe0] sm:$0xff] }
 0x214   : > { %16631 = vmatprep.mubr.msk.f32.mxu0 %vm18469_vm2, %v18468_v1  ;;  %16685 = vmatpush3.msk.msra.mxu0 %vm517_vm0, %v14286_v50 }
 0x215   : > { %v3046_v63 = vpop.f32.mrb[140].mxu1  ;;  %16742 = vmatprep.subr.mxu0 %v18468_v1  ;;  %6426 = vperm.xlu0 %18401, %v6411_v48   ;;  %v6418_v48 = vld [vmem:[%s21789_s5 + $0x118] sm:$0xff] }
 0x216   : > { %v3070_v19 = vadd.f32 %v3046_v63, %v20097_v14  ;;  %v16268_v55 = vpop.f32.mrb[141].mxu1  ;;  %16612 = vmatmul.mubr.msk.f32.gmra.mrb[246].mxu1 %vm304_vm1, %v4995_v56  ;;  %v3190_v2 = vpop.f32.mrb[144].mxu0  ;;  %v6412_v63 = vld [vmem:[%s21789_s5 + $0xe8] sm:$0xff] }
 0x217   : > { %v20162_v12 = vadd.f32 %v3190_v2, %v3067_v39  ;;  %16632 = vmatmul.mubr.msk.f32.gmra.mrb[250].mxu0 %vm304_vm1, %v4982_v10  ;;  %16614 = vmatprep.mubr.msk.f32.mxu1 %vm18469_vm2, %v18468_v1  ;;  %v16288_v31 = vpop.f32.mrb[145].mxu0  ;;  %v4985_v39 = vld [vmem:[#allocation2 + $0xf8] sm:$0xff]  ;;  %v14297_v10 = vld [vmem:[%s21785_s1 + $0x10] sm:$0xf] }
 0x218   : > { %16634 = vmatprep.mubr.msk.f32.mxu0 %vm18469_vm2, %v18468_v1  ;;  %6431 = vperm.xlu1 %18402, %v6412_v63  }
 0x219   : > { %v3051_v21 = vpop.f32.mrb[142].mxu1 }
 0x21a   : > { %v3071_v14 = vadd.f32 %v3051_v21, %v20106_v52  ;;  %v16271_v23 = vpop.f32.mrb[143].mxu1  ;;  %16615 = vmatmul.mubr.msk.f32.gmra.mrb[248].mxu1 %vm304_vm1, %v4996_v42  ;;  %v3195_v54 = vpop.f32.mrb[146].mxu0  ;;  %v6413_v21 = vld [vmem:[%s21789_s5 + $0xf0] sm:$0xff] }
 0x21b   : > { %v20171_v16 = vadd.f32 %v3195_v54, %v3068_v30  ;;  %16635 = vmatmul.mubr.msk.f32.gmra.mrb[252].mxu0 %vm304_vm1, %v4983_v17  ;;  %16617 = vmatprep.mubr.msk.f32.mxu1 %vm18469_vm2, %v18468_v1  ;;  %v16291_v20 = vpop.f32.mrb[147].mxu0  ;;  %v3420_v30 = vpop.permute.xlu1 %3419  ;;  %v6414_v23 = vld [vmem:[%s21789_s5 + $0xf8] sm:$0xff] }
 0x21c   : > { %16637 = vmatprep.mubr.msk.f32.mxu0 %vm18469_vm2, %v18468_v1  ;;  %6436 = vperm.xlu0 %18401, %v6413_v21  }
 0x21d   : > { %v3056_v51 = vpop.f32.mrb[144].mxu1  ;;  %6441 = vperm.xlu1 %18402, %v6414_v23  }
 0x21e   : > { %v3072_v52 = vadd.f32 %v3056_v51, %v20118_v32  ;;  %v16274_v26 = vpop.f32.mrb[145].mxu1  ;;  %16618 = vmatmul.mubr.msk.f32.gmra.mrb[250].mxu1 %vm304_vm1, %v4997_v18  ;;  %v3200_v33 = vpop.f32.mrb[148].mxu0  ;;  %v6490_v51 = vld [vmem:[#allocation3 + $0x52] sm:$0xff] }
 0x21f   : > { %v20180_v34 = vadd.f32 %v3200_v33, %v3069_v41  ;;  %16638 = vmatmul.mubr.msk.f32.gmra.mrb[254].mxu0 %vm304_vm1, %v4984_v24  ;;  %16620 = vmatprep.mubr.msk.f32.mxu1 %vm18469_vm2, %v18468_v1  ;;  %v16294_v36 = vpop.f32.mrb[149].mxu0  ;;  %v3425_v56 = vpop.permute.xlu1 %3424  ;;  %v5283_v33 = vld [vmem:[#allocation2 + $0xea] sm:$0xff] }
 0x220   : > { %16640 = vmatprep.mubr.msk.f32.mxu0 %vm18469_vm2, %v18468_v1 }
 0x221   : > { %v3061_v60 = vpop.f32.mrb[146].mxu1 }
 0x222   : > { %v3073_v32 = vadd.f32 %v3061_v60, %v20130_v40  ;;  %v16277_v3 = vpop.f32.mrb[147].mxu1  ;;  %16621 = vmatmul.mubr.msk.f32.gmra.mrb[252].mxu1 %vm304_vm1, %v4998_v28  ;;  %v3205_v43 = vpop.f32.mrb[150].mxu0  ;;  %v4986_v40 = vld [vmem:[#allocation2 + $0x100] sm:$0xff]  ;;  %v4989_v28 = vld [vmem:[#allocation2 + $0x118] sm:$0xff]  ;;  %v6416_v60 = vld [vmem:[%s21789_s5 + $0x108] sm:$0xff] }
 0x223   : > { %v20189_v44 = vadd.f32 %v3205_v43, %v3070_v19  ;;  %16641 = vmatmul.mubr.msk.f32.gmra.mrb[0].mxu0 %vm304_vm1, %v4985_v39  ;;  %16623 = vmatprep.mubr.msk.f32.mxu1 %vm18469_vm2, %v18468_v1  ;;  %v16297_v35 = vpop.f32.mrb[151].mxu0  ;;  %v3430_v26 = vpop.permute.xlu1 %3429 }
 0x224   : > { %16643 = vmatprep.mubr.msk.f32.mxu0 %vm18469_vm2, %v18468_v1  ;;  %6451 = vperm.xlu1 %18402, %v6416_v60  }
 0x225   : > { %v3339_v45 = vpop.f32.mrb[148].mxu1 }
 0x226   : > { %v3383_v57 = vadd.f32 %v3339_v45, %v20139_v27  ;;  %v16311_v38 = vpop.f32.mrb[149].mxu1  ;;  %16624 = vmatmul.mubr.msk.f32.gmra.mrb[254].mxu1 %vm304_vm1, %v4999_v25  ;;  %v3210_v58 = vpop.f32.mrb[152].mxu0  ;;  %v4987_v27 = vld [vmem:[#allocation2 + $0x108] sm:$0xff]  ;;  %v5284_v25 = vld [vmem:[#allocation2 + $0xf2] sm:$0xff] }
 0x227   : > { %v20206_v50 = vadd.f32 %v3210_v58, %v3071_v14  ;;  %16644 = vmatmul.mubr.msk.f32.gmra.mrb[2].mxu0 %vm304_vm1, %v4986_v40  ;;  %16657 = vmatprep.mubr.msk.f32.mxu1 %vm18469_vm2, %v18468_v1  ;;  %v16300_v41 = vpop.f32.mrb[153].mxu0  ;;  %v6417_v38 = vld [vmem:[%s21789_s5 + $0x110] sm:$0xff] }
 0x228   : > { %v3399_v0 = vadd.f32 %v20202_v29, %v3383_v57  ;;  %16646 = vmatprep.mubr.msk.f32.mxu0 %vm18469_vm2, %v18468_v1  ;;  %v14308_v41 = vld [vmem:[%s21785_s1 + $0x14] sm:$0xf]  ;;  %6461 = vperm.xlu1 %18402, %v6418_v48  }
 0x229   : > { %v3344_v8 = vpop.f32.mrb[150].mxu1  ;;  %v5288_v48 = vld [vmem:[#allocation2 + $0x112] sm:$0xff] }
 0x22a   : > { %v3462_v19 = vadd.f32 %v3420_v30, %v3399_v0  ;;  %v3384_v55 = vadd.f32 %v3344_v8, %v20151_v5  ;;  %v16314_v2 = vpop.f32.mrb[151].mxu1  ;;  %16658 = vmatmul.mubr.msk.f32.vlgmr.msra.gmra.mrb[0].mxu1 %vm304_vm1, %v19876_v4  ;;  %v3215_v31 = vpop.f32.mrb[154].mxu0  ;;  %v4988_v4 = vld [vmem:[#allocation2 + $0x110] sm:$0xff] }
 0x22b   : > { %v20226_v42 = vadd.f32 %v3215_v31, %v3072_v52  ;;  %16647 = vmatmul.mubr.msk.f32.gmra.mrb[4].mxu0 %vm304_vm1, %v4987_v27  ;;  %16660 = vmatprep.mubr.msk.f32.mxu1 %vm18469_vm2, %v18468_v1  ;;  %v16303_v17 = vpop.f32.mrb[155].mxu0 }
 0x22c   : > { %3471 = vst.msk [vmem:[#allocation3 + $0x5a] sm:$0xff] %vm426_vm3, %v3462_v19  ;;  %v3400_v5 = vadd.f32 %v20202_v29, %v3384_v55  ;;  %16649 = vmatprep.mubr.msk.f32.mxu0 %vm18469_vm2, %v18468_v1  ;;  %16714 = vmatpush3.msk.msra.mxu1 %vm517_vm0, %v14297_v10  ;;  %v5285_v10 = vld [vmem:[#allocation2 + $0xfa] sm:$0xff] }
 0x22d   : > { %v3349_v14 = vpop.f32.mrb[152].mxu1  ;;  %16771 = vmatprep.subr.mxu1 %v18468_v1 }
 0x22e   : > { %v3463_v54 = vadd.f32 %v3425_v56, %v3400_v5  ;;  %v3385_v20 = vadd.f32 %v3349_v14, %v20162_v12  ;;  %v16317_v18 = vpop.f32.mrb[153].mxu1  ;;  %16661 = vmatmul.mubr.msk.f32.gmra.mrb[2].mxu1 %vm304_vm1, %v19887_v11  ;;  %v3220_v24 = vpop.f32.mrb[156].mxu0  ;;  %v6415_v12 = vld [vmem:[%s21789_s5 + $0x100] sm:$0xff]  ;;  %v7172_v5 = vld [vmem:[%s21791_s7 + $0x8] sm:$0xff] }
 0x22f   : > { %v20246_v52 = vadd.f32 %v3220_v24, %v3073_v32  ;;  %16650 = vmatmul.mubr.msk.f32.gmra.mrb[6].mxu0 %vm304_vm1, %v4988_v4  ;;  %16663 = vmatprep.mubr.msk.f32.mxu1 %vm18469_vm2, %v18468_v1  ;;  %v16306_v36 = vpop.f32.mrb[157].mxu0  ;;  %v6562_v32 = vmax.f32 %v6490_v51, %v19859_v53 }
 0x230   : > { %3472 = vst.msk [vmem:[#allocation3 + $0x62] sm:$0xff] %vm426_vm3, %v3463_v54  ;;  %v3401_v11 = vadd.f32 %v20202_v29, %v3385_v20  ;;  %16652 = vmatprep.mubr.msk.f32.mxu0 %vm18469_vm2, %v18468_v1  ;;  %6446 = vperm.xlu0 %18401, %v6415_v12   ;;  %v5286_v20 = vld [vmem:[#allocation2 + $0x102] sm:$0xff] }
 0x231   : > { %v3354_v39 = vpop.f32.mrb[154].mxu1  ;;  %8804 = vperm.xlu1 %18402, %v7172_v5  }
 0x232   : > { %v3464_v3 = vadd.f32 %v3430_v26, %v3401_v11  ;;  %v3386_v43 = vadd.f32 %v3354_v39, %v20171_v16  ;;  %v16320_v35 = vpop.f32.mrb[155].mxu1  ;;  %16664 = vmatmul.mubr.msk.f32.gmra.mrb[4].mxu1 %vm304_vm1, %v5283_v33  ;;  %v20264_v30 = vpop.f32.mrb[158].mxu0  ;;  %v7174_v11 = vld [vmem:[%s21791_s7 + $0x18] sm:$0xff] }
 0x233   : > { %v6491_v46 = vld [vmem:[#allocation3 + $0x5a] sm:$0xff]  ;;  %16653 = vmatmul.mubr.msk.f32.gmra.mrb[8].mxu0 %vm304_vm1, %v4989_v28  ;;  %16666 = vmatprep.mubr.msk.f32.mxu1 %vm18469_vm2, %v18468_v1  ;;  %v16340_v57 = vpop.f32.mrb[159].mxu0 }
 0x234   : > { %v6527_v40 = vld [vmem:[#allocation3 + $0x59] sm:$0xff]  ;;  %3473 = vst.msk [vmem:[#allocation3 + $0x6a] sm:$0xff] %vm426_vm3, %v3464_v3  ;;  %v3402_v16 = vadd.f32 %v20202_v29, %v3386_v43  ;;  %16686 = vmatprep.mubr.msk.f32.mxu0 %vm18469_vm2, %v18468_v1  ;;  %6456 = vperm.xlu0 %18401, %v6417_v38   ;;  %v5287_v3 = vld [vmem:[#allocation2 + $0x10a] sm:$0xff] }
 0x235   : > { %v6598_v45 = vld [vmem:[#allocation3 + $0x53] sm:$0xff]  ;;  %v3359_v58 = vpop.f32.mrb[156].mxu1  ;;  %v6563_v0 = vmax.f32 %v6491_v46, %v6527_v40  ;;  %8814 = vperm.xlu1 %18402, %v7174_v11  }
 0x236   : > { %v6634_v53 = vmax.f32 %v6562_v32, %v6598_v45  ;;  %v3465_v27 = vadd.f32 %v19605_v59, %v3402_v16  ;;  %v3387_v8 = vadd.f32 %v3359_v58, %v20180_v34  ;;  %v16323_v56 = vpop.f32.mrb[157].mxu1  ;;  %16667 = vmatmul.mubr.msk.f32.gmra.mrb[6].mxu1 %vm304_vm1, %v5284_v25  ;;  %v20286_v63 = vpop.f32.mrb[160].mxu0  ;;  %v7171_v34 = vld [vmem:[%s21791_s7] sm:$0xff] }
 0x237   : > { %v6492_v19 = vld [vmem:[#allocation3 + $0x62] sm:$0xff]  ;;  %16687 = vmatmul.mubr.msk.f32.vlgmr.msra.gmra.mrb[10].mxu0 %vm304_vm1, %v5283_v33  ;;  %16669 = vmatprep.mubr.msk.f32.mxu1 %vm18469_vm2, %v18468_v1  ;;  %v16343_v31 = vpop.f32.mrb[161].mxu0 }
 0x238   : > { %6670 = vst.msk [vmem:[#allocation3 + $0x52] sm:$0xff] %vm426_vm3, %v6634_v53  ;;  %v6528_v55 = vld [vmem:[#allocation3 + $0x61] sm:$0xff]  ;;  %3474 = vst.msk [vmem:[#allocation3 + $0x72] sm:$0xff] %vm426_vm3, %v3465_v27  ;;  %v3403_v59 = vadd.f32 %v20202_v29, %v3387_v8  ;;  %16689 = vmatprep.mubr.msk.f32.mxu0 %vm18469_vm2, %v18468_v1  ;;  %16743 = vmatpush3.msk.msra.mxu0 %vm517_vm0, %v14308_v41 }
 0x239   : > { %v6599_v2 = vld [vmem:[#allocation3 + $0x5b] sm:$0xff]  ;;  %v3364_v21 = vpop.f32.mrb[158].mxu1  ;;  %16800 = vmatprep.subr.mxu0 %v18468_v1  ;;  %8799 = vperm.xlu0 %18401, %v7171_v34   ;;  %v6564_v4 = vmax.f32 %v6492_v19, %v6528_v55 }
 0x23a   : > { %v6635_v17 = vmax.f32 %v6563_v0, %v6599_v2  ;;  %v3466_v14 = vadd.f32 %v19620_v9, %v3403_v59  ;;  %v3388_v23 = vadd.f32 %v3364_v21, %v20189_v44  ;;  %v16326_v54 = vpop.f32.mrb[159].mxu1  ;;  %16670 = vmatmul.mubr.msk.f32.gmra.mrb[8].mxu1 %vm304_vm1, %v5285_v10  ;;  %v20307_v18 = vpop.f32.mrb[162].mxu0  ;;  %v7173_v44 = vld [vmem:[%s21791_s7 + $0x10] sm:$0xff]  ;;  %v7176_v53 = vld [vmem:[%s21791_s7 + $0x28] sm:$0xff]  ;;  %v7178_v2 = vld [vmem:[%s21791_s7 + $0x38] sm:$0xff] }
 0x23b   : > { %v6493_v24 = vld [vmem:[#allocation3 + $0x6a] sm:$0xff]  ;;  %16690 = vmatmul.mubr.msk.f32.gmra.mrb[12].mxu0 %vm304_vm1, %v5284_v25  ;;  %16672 = vmatprep.mubr.msk.f32.mxu1 %vm18469_vm2, %v18468_v1  ;;  %v16346_v33 = vpop.f32.mrb[163].mxu0  ;;  %v5289_v21 = vld [vmem:[#allocation2 + $0x11a] sm:$0xff] }
 0x23c   : > { %6671 = vst.msk [vmem:[#allocation3 + $0x5a] sm:$0xff] %vm426_vm3, %v6635_v17  ;;  %v6529_v51 = vld [vmem:[#allocation3 + $0x69] sm:$0xff]  ;;  %3475 = vst.msk [vmem:[#allocation3 + $0x7a] sm:$0xff] %vm426_vm3, %v3466_v14  ;;  %v3404_v9 = vadd.f32 %v20202_v29, %v3388_v23  ;;  %16692 = vmatprep.mubr.msk.f32.mxu0 %vm18469_vm2, %v18468_v1  ;;  %8824 = vperm.xlu1 %18402, %v7176_v53  }
 0x23d   : > { %v6600_v26 = vld [vmem:[#allocation3 + $0x63] sm:$0xff]  ;;  %v3369_v12 = vpop.f32.mrb[160].mxu1  ;;  %8809 = vperm.xlu0 %18401, %v7173_v44   ;;  %v6565_v28 = vmax.f32 %v6493_v24, %v6529_v51 }
 0x23e   : > { %v6636_v36 = vmax.f32 %v6564_v4, %v6600_v26  ;;  %v3467_v39 = vadd.f32 %v19596_v49, %v3404_v9  ;;  %v3389_v60 = vadd.f32 %v3369_v12, %v20206_v50  ;;  %v16329_v32 = vpop.f32.mrb[161].mxu1  ;;  %16673 = vmatmul.mubr.msk.f32.gmra.mrb[10].mxu1 %vm304_vm1, %v5286_v20  ;;  %v20326_v43 = vpop.f32.mrb[164].mxu0  ;;  %v7175_v50 = vld [vmem:[%s21791_s7 + $0x20] sm:$0xff]  ;;  %v7180_v51 = vld [vmem:[%s21791_s7 + $0x48] sm:$0xff] }
 0x23f   : > { %v6494_v35 = vld [vmem:[#allocation3 + $0x72] sm:$0xff]  ;;  %16693 = vmatmul.mubr.msk.f32.gmra.mrb[14].mxu0 %vm304_vm1, %v5285_v10  ;;  %16675 = vmatprep.mubr.msk.f32.mxu1 %vm18469_vm2, %v18468_v1  ;;  %v16349_v40 = vpop.f32.mrb[165].mxu0  ;;  %v5599_v9 = vld [vmem:[#allocation2 + $0xeb] sm:$0xff] }
 0x240   : > { %6672 = vst.msk [vmem:[#allocation3 + $0x62] sm:$0xff] %vm426_vm3, %v6636_v36  ;;  %v6530_v25 = vld [vmem:[#allocation3 + $0x71] sm:$0xff]  ;;  %3476 = vst.msk [vmem:[#allocation3 + $0x82] sm:$0xff] %vm426_vm3, %v3467_v39  ;;  %v3405_v49 = vadd.f32 %v20202_v29, %v3389_v60  ;;  %16695 = vmatprep.mubr.msk.f32.mxu0 %vm18469_vm2, %v18468_v1  ;;  %8834 = vperm.xlu1 %18402, %v7178_v2  }
 0x241   : > { %v6601_v46 = vld [vmem:[#allocation3 + $0x6b] sm:$0xff]  ;;  %v3374_v57 = vpop.f32.mrb[162].mxu1  ;;  %8819 = vperm.xlu0 %18401, %v7175_v50   ;;  %v6566_v16 = vmax.f32 %v6494_v35, %v6530_v25 }
 0x242   : > { %v6637_v45 = vmax.f32 %v6565_v28, %v6601_v46  ;;  %v3468_v38 = vadd.f32 %v19616_v6, %v3405_v49  ;;  %v3390_v58 = vadd.f32 %v3374_v57, %v20226_v42  ;;  %v16332_v41 = vpop.f32.mrb[163].mxu1  ;;  %16676 = vmatmul.mubr.msk.f32.gmra.mrb[12].mxu1 %vm304_vm1, %v5287_v3  ;;  %v20345_v0 = vpop.f32.mrb[166].mxu0  ;;  %v7177_v42 = vld [vmem:[%s21791_s7 + $0x30] sm:$0xff] }
 0x243   : > { %v6495_v27 = vld [vmem:[#allocation3 + $0x7a] sm:$0xff]  ;;  %16696 = vmatmul.mubr.msk.f32.gmra.mrb[16].mxu0 %vm304_vm1, %v5286_v20  ;;  %16678 = vmatprep.mubr.msk.f32.mxu1 %vm18469_vm2, %v18468_v1  ;;  %v16352_v10 = vpop.f32.mrb[167].mxu0  ;;  %v5600_v25 = vld [vmem:[#allocation2 + $0xf3] sm:$0xff] }
 0x244   : > { %6673 = vst.msk [vmem:[#allocation3 + $0x6a] sm:$0xff] %vm426_vm3, %v6637_v45  ;;  %v6531_v8 = vld [vmem:[#allocation3 + $0x79] sm:$0xff]  ;;  %3477 = vst.msk [vmem:[#allocation3 + $0x8a] sm:$0xff] %vm426_vm3, %v3468_v38  ;;  %v3406_v6 = vadd.f32 %v20202_v29, %v3390_v58  ;;  %16698 = vmatprep.mubr.msk.f32.mxu0 %vm18469_vm2, %v18468_v1  ;;  %8844 = vperm.xlu1 %18402, %v7180_v51   ;;  %v5448_v10 = vld [vmem:[#allocation2 + $0x12a] sm:$0xff] }
 0x245   : > { %v6602_v56 = vld [vmem:[#allocation3 + $0x73] sm:$0xff]  ;;  %v3379_v55 = vpop.f32.mrb[164].mxu1  ;;  %8829 = vperm.xlu0 %18401, %v7177_v42   ;;  %v6567_v31 = vmax.f32 %v6495_v27, %v6531_v8  ;;  %v5604_v51 = vld [vmem:[#allocation2 + $0x113] sm:$0xff] }
 0x246   : > { %v6638_v19 = vmax.f32 %v6566_v16, %v6602_v56  ;;  %v3469_v17 = vadd.f32 %v19640_v22, %v3406_v6  ;;  %v3391_v59 = vadd.f32 %v3379_v55, %v20246_v52  ;;  %v16335_v34 = vpop.f32.mrb[165].mxu1  ;;  %16679 = vmatmul.mubr.msk.f32.gmra.mrb[14].mxu1 %vm304_vm1, %v5288_v48  ;;  %v20364_v5 = vpop.f32.mrb[168].mxu0  ;;  %v7179_v52 = vld [vmem:[%s21791_s7 + $0x40] sm:$0xff] }
 0x247   : > { %v6496_v4 = vld [vmem:[#allocation3 + $0x82] sm:$0xff]  ;;  %16699 = vmatmul.mubr.msk.f32.gmra.mrb[18].mxu0 %vm304_vm1, %v5287_v3  ;;  %16681 = vmatprep.mubr.msk.f32.mxu1 %vm18469_vm2, %v18468_v1  ;;  %v16355_v54 = vpop.f32.mrb[169].mxu0  ;;  %v5601_v8 = vld [vmem:[#allocation2 + $0xfb] sm:$0xff] }
 0x248   : > { %6674 = vst.msk [vmem:[#allocation3 + $0x72] sm:$0xff] %vm426_vm3, %v6638_v19  ;;  %v6532_v14 = vld [vmem:[#allocation3 + $0x81] sm:$0xff]  ;;  %3478 = vst.msk [vmem:[#allocation3 + $0x92] sm:$0xff] %vm426_vm3, %v3469_v17  ;;  %v3407_v22 = vadd.f32 %v20202_v29, %v3391_v59  ;;  %16701 = vmatprep.mubr.msk.f32.mxu0 %vm18469_vm2, %v18468_v1 }
 0x249   : > { %v6603_v23 = vld [vmem:[#allocation3 + $0x7b] sm:$0xff]  ;;  %v3736_v24 = vpop.f32.mrb[166].mxu1  ;;  %8839 = vperm.xlu0 %18401, %v7179_v52   ;;  %v6568_v26 = vmax.f32 %v6496_v4, %v6532_v14  ;;  %v5603_v54 = vld [vmem:[#allocation2 + $0x10b] sm:$0xff] }
 0x24a   : > { %v6639_v20 = vmax.f32 %v6567_v31, %v6603_v23  ;;  %v3470_v33 = vadd.f32 %v19631_v15, %v3407_v22  ;;  %v3737_v29 = vadd.f32 %v3736_v24, %v20264_v30  ;;  %v16369_v36 = vpop.f32.mrb[167].mxu1  ;;  %16682 = vmatmul.mubr.msk.f32.gmra.mrb[16].mxu1 %vm304_vm1, %v5289_v21  ;;  %v20383_v44 = vpop.f32.mrb[170].mxu0  ;;  %v14319_v30 = vld [vmem:[%s21785_s1 + $0x18] sm:$0xf]  ;;  %v5602_v17 = vld [vmem:[#allocation2 + $0x103] sm:$0xff] }
 0x24b   : > { %v6497_v12 = vld [vmem:[#allocation3 + $0x8a] sm:$0xff]  ;;  %16702 = vmatmul.mubr.msk.f32.gmra.mrb[20].mxu0 %vm304_vm1, %v5288_v48  ;;  %16715 = vmatprep.mubr.msk.f32.mxu1 %vm18469_vm2, %v18468_v1  ;;  %v16358_v39 = vpop.f32.mrb[171].mxu0 }
 0x24c   : > { %6675 = vst.msk [vmem:[#allocation3 + $0x7a] sm:$0xff] %vm426_vm3, %v6639_v20  ;;  %v6533_v11 = vld [vmem:[#allocation3 + $0x89] sm:$0xff]  ;;  %3479 = vst.msk [vmem:[#allocation3 + $0x9a] sm:$0xff] %vm426_vm3, %v3470_v33  ;;  %16704 = vmatprep.mubr.msk.f32.mxu0 %vm18469_vm2, %v18468_v1 }
 0x24d   : > { %v6604_v28 = vld [vmem:[#allocation3 + $0x83] sm:$0xff]  ;;  %v3741_v15 = vpop.f32.mrb[168].mxu1  ;;  %v6569_v32 = vmax.f32 %v6497_v12, %v6533_v11  ;;  %v5605_v12 = vld [vmem:[#allocation2 + $0x11b] sm:$0xff] }
 0x24e   : > { %v6640_v60 = vmax.f32 %v6568_v26, %v6604_v28  ;;  %v3742_v3 = vadd.f32 %v3741_v15, %v20286_v63  ;;  %v16372_v35 = vpop.f32.mrb[169].mxu1  ;;  %16716 = vmatmul.mubr.msk.f32.vlgmr.msra.gmra.mrb[18].mxu1 %vm304_vm1, %v5599_v9  ;;  %v20397_v46 = vpop.f32.mrb[172].mxu0  ;;  %v5447_v63 = vld [vmem:[#allocation2 + $0x122] sm:$0xff] }
 0x24f   : > { %v6498_v40 = vld [vmem:[#allocation3 + $0x92] sm:$0xff]  ;;  %16705 = vmatmul.mubr.msk.f32.gmra.mrb[22].mxu0 %vm304_vm1, %v5289_v21  ;;  %16718 = vmatprep.mubr.msk.f32.mxu1 %vm18469_vm2, %v18468_v1  ;;  %v16361_v50 = vpop.f32.mrb[173].mxu0  ;;  %v5761_v11 = vld [vmem:[#allocation2 + $0x104] sm:$0xff] }
 0x250   : > { %6676 = vst.msk [vmem:[#allocation3 + $0x82] sm:$0xff] %vm426_vm3, %v6640_v60  ;;  %v6534_v45 = vld [vmem:[#allocation3 + $0x91] sm:$0xff]  ;;  %16707 = vmatprep.mubr.msk.f32.mxu0 %vm18469_vm2, %v18468_v1  ;;  %16772 = vmatpush3.msk.msra.mxu1 %vm517_vm0, %v14319_v30  ;;  %v5607_v50 = vld [vmem:[#allocation2 + $0x12b] sm:$0xff] }
 0x251   : > { %v6605_v49 = vld [vmem:[#allocation3 + $0x8b] sm:$0xff]  ;;  %v3746_v53 = vpop.f32.mrb[170].mxu1  ;;  %16829 = vmatprep.subr.mxu1 %v18468_v1  ;;  %v6570_v16 = vmax.f32 %v6498_v40, %v6534_v45  ;;  %v5760_v26 = vld [vmem:[#allocation2 + $0xfc] sm:$0xff] }
 0x252   : > { %v6641_v57 = vmax.f32 %v6569_v32, %v6605_v49  ;;  %v3747_v38 = vadd.f32 %v3746_v53, %v20307_v18  ;;  %v16375_v58 = vpop.f32.mrb[171].mxu1  ;;  %16719 = vmatmul.mubr.msk.f32.gmra.mrb[20].mxu1 %vm304_vm1, %v5600_v25  ;;  %v20409_v41 = vpop.f32.mrb[174].mxu0  ;;  %v5606_v32 = vld [vmem:[#allocation2 + $0x123] sm:$0xff] }
 0x253   : > { %v6606_v48 = vld [vmem:[#allocation3 + $0x93] sm:$0xff]  ;;  %16708 = vmatmul.mubr.msk.f32.gmra.mrb[24].mxu0 %vm304_vm1, %v5447_v63  ;;  %16721 = vmatprep.mubr.msk.f32.mxu1 %vm18469_vm2, %v18468_v1  ;;  %v16364_v27 = vpop.f32.mrb[175].mxu0 }
 0x254   : > { %6677 = vst.msk [vmem:[#allocation3 + $0x8a] sm:$0xff] %vm426_vm3, %v6641_v57  ;;  %v6642_v56 = vmax.f32 %v6570_v16, %v6606_v48  ;;  %16710 = vmatprep.mubr.msk.f32.mxu0 %vm18469_vm2, %v18468_v1  ;;  %v20416_v19 = vld [vmem:[#allocation3 + $0x99] sm:$0xff]  ;;  %v5763_v57 = vld [vmem:[#allocation2 + $0x114] sm:$0xff] }
 0x255   : > { %v3751_v18 = vpop.f32.mrb[172].mxu1  ;;  %v5764_v48 = vld [vmem:[#allocation2 + $0x11c] sm:$0xff] }
 0x256   : > { %6678 = vst.msk [vmem:[#allocation3 + $0x92] sm:$0xff] %vm426_vm3, %v6642_v56  ;;  %v3752_v6 = vadd.f32 %v3751_v18, %v20326_v43  ;;  %v16378_v42 = vpop.f32.mrb[173].mxu1  ;;  %16722 = vmatmul.mubr.msk.f32.gmra.mrb[22].mxu1 %vm304_vm1, %v5601_v8  ;;  %v3886_v55 = vpop.f32.mrb[176].mxu0  ;;  %v14330_v43 = vld [vmem:[%s21785_s1 + $0x1c] sm:$0xf] }
 0x257   : > { %v20421_v2 = vadd.f32 %v3886_v55, %v3737_v29  ;;  %16711 = vmatmul.mubr.msk.f32.gmra.mrb[26].mxu0 %vm304_vm1, %v5448_v10  ;;  %16724 = vmatprep.mubr.msk.f32.mxu1 %vm18469_vm2, %v18468_v1  ;;  %v16398_v31 = vpop.f32.mrb[177].mxu0  ;;  %v14341_v8 = vld [vmem:[%s21785_s1 + $0x20] sm:$0xf]  ;;  %v5765_v55 = vld [vmem:[#allocation2 + $0x124] sm:$0xff] }
 0x258   : > { %16744 = vmatprep.mubr.msk.f32.mxu0 %vm18469_vm2, %v18468_v1 }
 0x259   : > { %v3756_v59 = vpop.f32.mrb[174].mxu1 }
 0x25a   : > { %v3757_v34 = vadd.f32 %v3756_v59, %v20345_v0  ;;  %v16381_v21 = vpop.f32.mrb[175].mxu1  ;;  %16725 = vmatmul.mubr.msk.f32.gmra.mrb[24].mxu1 %vm304_vm1, %v5602_v17  ;;  %v3891_v4 = vpop.f32.mrb[178].mxu0 }
 0x25b   : > { %v20433_v14 = vadd.f32 %v3891_v4, %v3742_v3  ;;  %16745 = vmatmul.mubr.msk.f32.vlgmr.msra.gmra.mrb[28].mxu0 %vm304_vm1, %v20025_v62  ;;  %16727 = vmatprep.mubr.msk.f32.mxu1 %vm18469_vm2, %v18468_v1  ;;  %v16401_v23 = vpop.f32.mrb[179].mxu0  ;;  %v5762_v3 = vld [vmem:[#allocation2 + $0x10c] sm:$0xff] }
 0x25c   : > { %16747 = vmatprep.mubr.msk.f32.mxu0 %vm18469_vm2, %v18468_v1  ;;  %16801 = vmatpush3.msk.msra.mxu0 %vm517_vm0, %v14330_v43  ;;  %v5766_v21 = vld [vmem:[#allocation2 + $0x12c] sm:$0xff] }
 0x25d   : > { %v3761_v0 = vpop.f32.mrb[176].mxu1 }
 0x25e   : > { %v3762_v20 = vadd.f32 %v3761_v0, %v20364_v5  ;;  %v16384_v22 = vpop.f32.mrb[177].mxu1  ;;  %16728 = vmatmul.mubr.msk.f32.gmra.mrb[26].mxu1 %vm304_vm1, %v5603_v54  ;;  %v3896_v52 = vpop.f32.mrb[180].mxu0 }
 0x25f   : > { %v20444_v24 = vadd.f32 %v3896_v52, %v3747_v38  ;;  %16748 = vmatmul.mubr.msk.f32.gmra.mrb[30].mxu0 %vm304_vm1, %v20042_v7  ;;  %16730 = vmatprep.mubr.msk.f32.mxu1 %vm18469_vm2, %v18468_v1  ;;  %v16404_v62 = vpop.f32.mrb[181].mxu0  ;;  %v6076_v22 = vld [vmem:[#allocation2 + $0xfd] sm:$0xff] }
 0x260   : > { %16750 = vmatprep.mubr.msk.f32.mxu0 %vm18469_vm2, %v18468_v1 }
 0x261   : > { %v3766_v33 = vpop.f32.mrb[178].mxu1 }
 0x262   : > { %v3767_v5 = vadd.f32 %v3766_v33, %v20383_v44  ;;  %v16387_v29 = vpop.f32.mrb[179].mxu1  ;;  %16731 = vmatmul.mubr.msk.f32.gmra.mrb[28].mxu1 %vm304_vm1, %v5604_v51  ;;  %v3901_v36 = vpop.f32.mrb[182].mxu0 }
 0x263   : > { %v20454_v9 = vadd.f32 %v3901_v36, %v3752_v6  ;;  %16751 = vmatmul.mubr.msk.f32.gmra.mrb[32].mxu0 %vm304_vm1, %v5760_v26  ;;  %16733 = vmatprep.mubr.msk.f32.mxu1 %vm18469_vm2, %v18468_v1  ;;  %v16407_v7 = vpop.f32.mrb[183].mxu0 }
 0x264   : > { %16753 = vmatprep.mubr.msk.f32.mxu0 %vm18469_vm2, %v18468_v1 }
 0x265   : > { %v3771_v28 = vpop.f32.mrb[180].mxu1 }
 0x266   : > { %v3772_v44 = vadd.f32 %v3771_v28, %v20397_v46  ;;  %v16390_v39 = vpop.f32.mrb[181].mxu1  ;;  %16734 = vmatmul.mubr.msk.f32.gmra.mrb[30].mxu1 %vm304_vm1, %v5605_v12  ;;  %v3906_v60 = vpop.f32.mrb[184].mxu0  ;;  %v6078_v28 = vld [vmem:[#allocation2 + $0x10d] sm:$0xff] }
 0x267   : > { %v20463_v15 = vadd.f32 %v3906_v60, %v3757_v34  ;;  %16754 = vmatmul.mubr.msk.f32.gmra.mrb[34].mxu0 %vm304_vm1, %v5761_v11  ;;  %16736 = vmatprep.mubr.msk.f32.mxu1 %vm18469_vm2, %v18468_v1  ;;  %v16410_v30 = vpop.f32.mrb[185].mxu0 }
 0x268   : > { %16756 = vmatprep.mubr.msk.f32.mxu0 %vm18469_vm2, %v18468_v1 }
 0x269   : > { %v3776_v35 = vpop.f32.mrb[182].mxu1 }
 0x26a   : > { %v3777_v25 = vadd.f32 %v3776_v35, %v20409_v41  ;;  %v16393_v46 = vpop.f32.mrb[183].mxu1  ;;  %16737 = vmatmul.mubr.msk.f32.gmra.mrb[32].mxu1 %vm304_vm1, %v5606_v32  ;;  %v3911_v40 = vpop.f32.mrb[186].mxu0 }
 0x26b   : > { %v20472_v45 = vadd.f32 %v3911_v40, %v3762_v20  ;;  %16757 = vmatmul.mubr.msk.f32.gmra.mrb[36].mxu0 %vm304_vm1, %v5762_v3  ;;  %16739 = vmatprep.mubr.msk.f32.mxu1 %vm18469_vm2, %v18468_v1  ;;  %v16413_v49 = vpop.f32.mrb[187].mxu0 }
 0x26c   : > { %16759 = vmatprep.mubr.msk.f32.mxu0 %vm18469_vm2, %v18468_v1 }
 0x26d   : > { %v4045_v63 = vpop.f32.mrb[184].mxu1 }
 0x26e   : > { %v4089_v53 = vadd.f32 %v4045_v63, %v20421_v2  ;;  %v16427_v16 = vpop.f32.mrb[185].mxu1  ;;  %16740 = vmatmul.mubr.msk.f32.gmra.mrb[34].mxu1 %vm304_vm1, %v5607_v50  ;;  %v3916_v38 = vpop.f32.mrb[188].mxu0  ;;  %v5924_v50 = vld [vmem:[#allocation2 + $0x134] sm:$0xff] }
 0x26f   : > { %v20481_v58 = vadd.f32 %v3916_v38, %v3767_v5  ;;  %16760 = vmatmul.mubr.msk.f32.gmra.mrb[38].mxu0 %vm304_vm1, %v5763_v57  ;;  %16773 = vmatprep.mubr.msk.f32.mxu1 %vm18469_vm2, %v18468_v1  ;;  %v16416_v41 = vpop.f32.mrb[189].mxu0  ;;  %v6077_v5 = vld [vmem:[#allocation2 + $0x105] sm:$0xff] }
 0x270   : > { %16762 = vmatprep.mubr.msk.f32.mxu0 %vm18469_vm2, %v18468_v1 }
 0x271   : > { %v4050_v27 = vpop.f32.mrb[186].mxu1 }
 0x272   : > { %v4090_v56 = vadd.f32 %v4050_v27, %v20433_v14  ;;  %v16430_v10 = vpop.f32.mrb[187].mxu1  ;;  %16774 = vmatmul.mubr.msk.f32.vlgmr.msra.gmra.mrb[36].mxu1 %vm304_vm1, %v5760_v26  ;;  %v3921_v18 = vpop.f32.mrb[190].mxu0  ;;  %v6081_v27 = vld [vmem:[#allocation2 + $0x125] sm:$0xff] }
 0x273   : > { %v20493_v6 = vadd.f32 %v3921_v18, %v3772_v44  ;;  %16763 = vmatmul.mubr.msk.f32.gmra.mrb[40].mxu0 %vm304_vm1, %v5764_v48  ;;  %16776 = vmatprep.mubr.msk.f32.mxu1 %vm18469_vm2, %v18468_v1  ;;  %v16419_v42 = vpop.f32.mrb[191].mxu0 }
 0x274   : > { %16765 = vmatprep.mubr.msk.f32.mxu0 %vm18469_vm2, %v18468_v1  ;;  %16830 = vmatpush3.msk.msra.mxu1 %vm517_vm0, %v14341_v8 }
 0x275   : > { %v4055_v2 = vpop.f32.mrb[188].mxu1 }
 0x276   : > { %v4091_v31 = vadd.f32 %v4055_v2, %v20444_v24  ;;  %v16433_v17 = vpop.f32.mrb[189].mxu1  ;;  %16777 = vmatmul.mubr.msk.f32.gmra.mrb[38].mxu1 %vm304_vm1, %v5761_v11  ;;  %v3926_v59 = vpop.f32.mrb[192].mxu0  ;;  %v6082_v2 = vld [vmem:[#allocation2 + $0x12d] sm:$0xff] }
 0x277   : > { %v20503_v43 = vadd.f32 %v3926_v59, %v3777_v25  ;;  %16766 = vmatmul.mubr.msk.f32.gmra.mrb[42].mxu0 %vm304_vm1, %v5765_v55  ;;  %16779 = vmatprep.mubr.msk.f32.mxu1 %vm18469_vm2, %v18468_v1  ;;  %v16422_v34 = vpop.f32.mrb[193].mxu0 }
 0x278   : > { %16768 = vmatprep.mubr.msk.f32.mxu0 %vm18469_vm2, %v18468_v1 }
 0x279   : > { %v4060_v4 = vpop.f32.mrb[190].mxu1 }
 0x27a   : > { %v4092_v14 = vadd.f32 %v4060_v4, %v20454_v9  ;;  %v16436_v23 = vpop.f32.mrb[191].mxu1  ;;  %16780 = vmatmul.mubr.msk.f32.gmra.mrb[40].mxu1 %vm304_vm1, %v5762_v3  ;;  %v4204_v54 = vpop.f32.mrb[194].mxu0  ;;  %v6079_v3 = vld [vmem:[#allocation2 + $0x115] sm:$0xff]  ;;  %v6236_v4 = vld [vmem:[#allocation2 + $0x106] sm:$0xff] }
 0x27b   : > { %v20512_v0 = vadd.f32 %v4204_v54, %v4089_v53  ;;  %16769 = vmatmul.mubr.msk.f32.gmra.mrb[44].mxu0 %vm304_vm1, %v5766_v21  ;;  %16782 = vmatprep.mubr.msk.f32.mxu1 %vm18469_vm2, %v18468_v1  ;;  %v16456_v20 = vpop.f32.mrb[195].mxu0 }
 0x27c   : > { %16802 = vmatprep.mubr.msk.f32.mxu0 %vm18469_vm2, %v18468_v1 }
 0x27d   : > { %v4065_v52 = vpop.f32.mrb[192].mxu1 }
 0x27e   : > { %v4093_v24 = vadd.f32 %v4065_v52, %v20463_v15  ;;  %v16439_v62 = vpop.f32.mrb[193].mxu1  ;;  %16783 = vmatmul.mubr.msk.f32.gmra.mrb[42].mxu1 %vm304_vm1, %v5763_v57  ;;  %v4209_v51 = vpop.f32.mrb[196].mxu0  ;;  %v6080_v57 = vld [vmem:[#allocation2 + $0x11d] sm:$0xff] }
 0x27f   : > { %v20521_v26 = vadd.f32 %v4209_v51, %v4090_v56  ;;  %16803 = vmatmul.mubr.msk.f32.vlgmr.msra.gmra.mrb[46].mxu0 %vm304_vm1, %v6076_v22  ;;  %16785 = vmatprep.mubr.msk.f32.mxu1 %vm18469_vm2, %v18468_v1  ;;  %v16459_v33 = vpop.f32.mrb[197].mxu0  ;;  %v6084_v62 = vld [vmem:[#allocation2 + $0x13d] sm:$0xff] }
 0x280   : > { %16805 = vmatprep.mubr.msk.f32.mxu0 %vm18469_vm2, %v18468_v1 }
 0x281   : > { %v4070_v29 = vpop.f32.mrb[194].mxu1 }
 0x282   : > { %v4094_v36 = vadd.f32 %v4070_v29, %v20472_v45  ;;  %v16442_v9 = vpop.f32.mrb[195].mxu1  ;;  %16786 = vmatmul.mubr.msk.f32.gmra.mrb[44].mxu1 %vm304_vm1, %v5764_v48  ;;  %v4214_v7 = vpop.f32.mrb[198].mxu0  ;;  %v5925_v48 = vld [vmem:[#allocation2 + $0x13c] sm:$0xff] }
 0x283   : > { %v20530_v12 = vadd.f32 %v4214_v7, %v4091_v31  ;;  %16806 = vmatmul.mubr.msk.f32.gmra.mrb[48].mxu0 %vm304_vm1, %v6077_v5  ;;  %16788 = vmatprep.mubr.msk.f32.mxu1 %vm18469_vm2, %v18468_v1  ;;  %v16462_v11 = vpop.f32.mrb[199].mxu0  ;;  %v6238_v9 = vld [vmem:[#allocation2 + $0x116] sm:$0xff] }
 0x284   : > { %16808 = vmatprep.mubr.msk.f32.mxu0 %vm18469_vm2, %v18468_v1 }
 0x285   : > { %v4075_v44 = vpop.f32.mrb[196].mxu1 }
 0x286   : > { %v4095_v39 = vadd.f32 %v4075_v44, %v20481_v58  ;;  %v16445_v60 = vpop.f32.mrb[197].mxu1  ;;  %16789 = vmatmul.mubr.msk.f32.gmra.mrb[46].mxu1 %vm304_vm1, %v5765_v55  ;;  %v4219_v15 = vpop.f32.mrb[200].mxu0  ;;  %v6235_v55 = vld [vmem:[#allocation2 + $0xfe] sm:$0xff] }
 0x287   : > { %v20539_v30 = vadd.f32 %v4219_v15, %v4092_v14  ;;  %16809 = vmatmul.mubr.msk.f32.gmra.mrb[50].mxu0 %vm304_vm1, %v6078_v28  ;;  %16791 = vmatprep.mubr.msk.f32.mxu1 %vm18469_vm2, %v18468_v1  ;;  %v16465_v32 = vpop.f32.mrb[201].mxu0  ;;  %v6083_v14 = vld [vmem:[#allocation2 + $0x135] sm:$0xff]  ;;  %v6239_v60 = vld [vmem:[#allocation2 + $0x11e] sm:$0xff] }
 0x288   : > { %16811 = vmatprep.mubr.msk.f32.mxu0 %vm18469_vm2, %v18468_v1 }
 0x289   : > { %v4080_v35 = vpop.f32.mrb[198].mxu1 }
 0x28a   : > { %v4096_v25 = vadd.f32 %v4080_v35, %v20493_v6  ;;  %v16448_v46 = vpop.f32.mrb[199].mxu1  ;;  %16792 = vmatmul.mubr.msk.f32.gmra.mrb[48].mxu1 %vm304_vm1, %v5766_v21  ;;  %v4224_v40 = vpop.f32.mrb[202].mxu0 }
 0x28b   : > { %v20548_v45 = vadd.f32 %v4224_v40, %v4093_v24  ;;  %16812 = vmatmul.mubr.msk.f32.gmra.mrb[52].mxu0 %vm304_vm1, %v6079_v3  ;;  %16794 = vmatprep.mubr.msk.f32.mxu1 %vm18469_vm2, %v18468_v1  ;;  %v16468_v49 = vpop.f32.mrb[203].mxu0  ;;  %v6237_v24 = vld [vmem:[#allocation2 + $0x10e] sm:$0xff]  ;;  %v6240_v46 = vld [vmem:[#allocation2 + $0x126] sm:$0xff] }
 0x28c   : > { %16814 = vmatprep.mubr.msk.f32.mxu0 %vm18469_vm2, %v18468_v1 }
 0x28d   : > { %v4085_v63 = vpop.f32.mrb[200].mxu1 }
 0x28e   : > { %v4097_v53 = vadd.f32 %v4085_v63, %v20503_v43  ;;  %v16451_v16 = vpop.f32.mrb[201].mxu1  ;;  %16795 = vmatmul.mubr.msk.f32.gmra.mrb[50].mxu1 %vm304_vm1, %v5924_v50  ;;  %v4229_v38 = vpop.f32.mrb[204].mxu0 }
 0x28f   : > { %v20557_v58 = vadd.f32 %v4229_v38, %v4094_v36  ;;  %16815 = vmatmul.mubr.msk.f32.gmra.mrb[54].mxu0 %vm304_vm1, %v6080_v57  ;;  %16797 = vmatprep.mubr.msk.f32.mxu1 %vm18469_vm2, %v18468_v1  ;;  %v16471_v41 = vpop.f32.mrb[205].mxu0 }
 0x290   : > { %16817 = vmatprep.mubr.msk.f32.mxu0 %vm18469_vm2, %v18468_v1 }
 0x291   : > { %v4363_v8 = vpop.f32.mrb[202].mxu1 }
 0x292   : > { %v4407_v56 = vadd.f32 %v4363_v8, %v20512_v0  ;;  %v16485_v10 = vpop.f32.mrb[203].mxu1  ;;  %16798 = vmatmul.mubr.msk.f32.gmra.mrb[52].mxu1 %vm304_vm1, %v5925_v48  ;;  %v4234_v18 = vpop.f32.mrb[206].mxu0  ;;  %v6242_v8 = vld [vmem:[#allocation2 + $0x136] sm:$0xff] }
 0x293   : > { %v4254_v6 = vadd.f32 %v4234_v18, %v4095_v39  ;;  %16818 = vmatmul.mubr.msk.f32.gmra.mrb[56].mxu0 %vm304_vm1, %v6081_v27  ;;  %16831 = vmatprep.mubr.msk.f32.mxu1 %vm18469_vm2, %v18468_v1  ;;  %v16474_v42 = vpop.f32.mrb[207].mxu0 }
 0x294   : > { %16820 = vmatprep.mubr.msk.f32.mxu0 %vm18469_vm2, %v18468_v1 }
 0x295   : > { %v4368_v31 = vpop.f32.mrb[204].mxu1 }
 0x296   : > { %v4408_v17 = vadd.f32 %v4368_v31, %v20521_v26  ;;  %v16488_v59 = vpop.f32.mrb[205].mxu1  ;;  %16832 = vmatmul.mubr.msk.f32.vlgmr.msra.gmra.mrb[54].mxu1 %vm304_vm1, %v6235_v55  ;;  %v4239_v43 = vpop.f32.mrb[208].mxu0 }
 0x297   : > { %v4255_v34 = vadd.f32 %v4239_v43, %v4096_v25  ;;  %16821 = vmatmul.mubr.msk.f32.gmra.mrb[58].mxu0 %vm304_vm1, %v6082_v2  ;;  %16834 = vmatprep.mubr.msk.f32.mxu1 %vm18469_vm2, %v18468_v1  ;;  %v16477_v21 = vpop.f32.mrb[209].mxu0  ;;  %v6243_v2 = vld [vmem:[#allocation2 + $0x13e] sm:$0xff] }
 0x298   : > { %16823 = vmatprep.mubr.msk.f32.mxu0 %vm18469_vm2, %v18468_v1 }
 0x299   : > { %v4373_v23 = vpop.f32.mrb[206].mxu1 }
 0x29a   : > { %v4409_v54 = vadd.f32 %v4373_v23, %v20530_v12  ;;  %v16491_v0 = vpop.f32.mrb[207].mxu1  ;;  %16835 = vmatmul.mubr.msk.f32.gmra.mrb[56].mxu1 %vm304_vm1, %v6236_v4  ;;  %v4244_v20 = vpop.f32.mrb[210].mxu0 }
 0x29b   : > { %v4256_v22 = vadd.f32 %v4244_v20, %v4097_v53  ;;  %16824 = vmatmul.mubr.msk.f32.gmra.mrb[60].mxu0 %vm304_vm1, %v6083_v14  ;;  %16837 = vmatprep.mubr.msk.f32.mxu1 %vm18469_vm2, %v18468_v1  ;;  %v16480_v52 = vpop.f32.mrb[211].mxu0  ;;  %v6241_v53 = vld [vmem:[#allocation2 + $0x12e] sm:$0xff] }
 0x29c   : > { %16826 = vmatprep.mubr.msk.f32.mxu0 %vm18469_vm2, %v18468_v1 }
 0x29d   : > { %v4378_v51 = vpop.f32.mrb[208].mxu1 }
 0x29e   : > { %v4410_v26 = vadd.f32 %v4378_v51, %v20539_v30  ;;  %v16494_v33 = vpop.f32.mrb[209].mxu1  ;;  %16838 = vmatmul.mubr.msk.f32.gmra.mrb[58].mxu1 %vm304_vm1, %v6237_v24  ;;  %v4522_v5 = vpop.f32.mrb[212].mxu0 }
 0x29f   : > { %v4566_v29 = vadd.f32 %v4522_v5, %v4407_v56  ;;  %16827 = vmatmul.mubr.msk.f32.gmra.mrb[62].mxu0 %vm304_vm1, %v6084_v62  ;;  %16840 = vmatprep.mubr.msk.f32.mxu1 %vm18469_vm2, %v18468_v1  ;;  %v16514_v36 = vpop.f32.mrb[213].mxu0 }
 0x2a1   : > { %v4383_v7 = vpop.f32.mrb[210].mxu1 }
 0x2a2   : > { %v4411_v12 = vadd.f32 %v4383_v7, %v20548_v45  ;;  %v16497_v11 = vpop.f32.mrb[211].mxu1  ;;  %16841 = vmatmul.mubr.msk.f32.gmra.mrb[60].mxu1 %vm304_vm1, %v6238_v9  ;;  %v4527_v28 = vpop.f32.mrb[214].mxu0  ;;  %v20611_v9 = vld [vmem:[%s21786_s2] ss:$0 sm:$0xff] }
 0x2a3   : > { %v4567_v44 = vadd.f32 %v4527_v28, %v4408_v17  ;;  %16843 = vmatprep.mubr.msk.f32.mxu1 %vm18469_vm2, %v18468_v1  ;;  %v16517_v39 = vpop.f32.mrb[215].mxu0 }
 0x2a5   : > { %v4388_v15 = vpop.f32.mrb[212].mxu1 }
 0x2a6   : > { %v4412_v30 = vadd.f32 %v4388_v15, %v20557_v58  ;;  %v16500_v32 = vpop.f32.mrb[213].mxu1  ;;  %16844 = vmatmul.mubr.msk.f32.gmra.mrb[62].mxu1 %vm304_vm1, %v6239_v60  ;;  %v4532_v3 = vpop.f32.mrb[216].mxu0 }
 0x2a7   : > { %v4568_v35 = vadd.f32 %v4532_v3, %v4409_v54  ;;  %16846 = vmatprep.mubr.msk.f32.mxu1 %vm18469_vm2, %v18468_v1  ;;  %v16520_v25 = vpop.f32.mrb[217].mxu0 }
 0x2a9   : > { %v4393_v40 = vpop.f32.mrb[214].mxu1 }
 0x2aa   : > { %v4413_v45 = vadd.f32 %v4393_v40, %v4254_v6  ;;  %v16503_v49 = vpop.f32.mrb[215].mxu1  ;;  %16847 = vmatmul.mubr.msk.f32.gmra.mrb[64].mxu1 %vm304_vm1, %v6240_v46  ;;  %v4537_v50 = vpop.f32.mrb[218].mxu0 }
 0x2ab   : > { %v4569_v57 = vadd.f32 %v4537_v50, %v4410_v26  ;;  %16849 = vmatprep.mubr.msk.f32.mxu1 %vm18469_vm2, %v18468_v1  ;;  %v16523_v63 = vpop.f32.mrb[219].mxu0 }
 0x2ad   : > { %v4398_v16 = vpop.f32.mrb[216].mxu1 }
 0x2ae   : > { %v4414_v38 = vadd.f32 %v4398_v16, %v4255_v34  ;;  %v16506_v58 = vpop.f32.mrb[217].mxu1  ;;  %16850 = vmatmul.mubr.msk.f32.gmra.mrb[66].mxu1 %vm304_vm1, %v6241_v53  ;;  %v4542_v41 = vpop.f32.mrb[220].mxu0  ;;  %v6499_v53 = vld [vmem:[#allocation3 + $0x9a] sm:$0xff] }
 0x2af   : > { %v4570_v48 = vadd.f32 %v4542_v41, %v4411_v12  ;;  %16852 = vmatprep.mubr.msk.f32.mxu1 %vm18469_vm2, %v18468_v1  ;;  %v16526_v27 = vpop.f32.mrb[221].mxu0 }
 0x2b1   : > { %v4403_v56 = vpop.f32.mrb[218].mxu1 }
 0x2b2   : > { %v4415_v10 = vadd.f32 %v4403_v56, %v4256_v22  ;;  %v16509_v18 = vpop.f32.mrb[219].mxu1  ;;  %16853 = vmatmul.mubr.msk.f32.gmra.mrb[68].mxu1 %vm304_vm1, %v6242_v8  ;;  %v4547_v6 = vpop.f32.mrb[222].mxu0 }
 0x2b3   : > { %v4571_v42 = vadd.f32 %v4547_v6, %v4412_v30  ;;  %16855 = vmatprep.mubr.msk.f32.mxu1 %vm18469_vm2, %v18468_v1  ;;  %v16529_v55 = vpop.f32.mrb[223].mxu0 }
 0x2b5   : > { %v4681_v31 = vpop.f32.mrb[220].mxu1 }
 0x2b6   : > { %v4725_v17 = vadd.f32 %v4681_v31, %v4566_v29  ;;  %v16543_v59 = vpop.f32.mrb[221].mxu1  ;;  %16856 = vmatmul.mubr.msk.f32.gmra.mrb[70].mxu1 %vm304_vm1, %v6243_v2  ;;  %v4552_v43 = vpop.f32.mrb[224].mxu0 }
 0x2b7   : > { %v4572_v34 = vadd.f32 %v4552_v43, %v4413_v45  ;;  %v16532_v21 = vpop.f32.mrb[225].mxu0 }
 0x2b9   : > { %v4686_v4 = vpop.f32.mrb[222].mxu1 }
 0x2ba   : > { %v4726_v14 = vadd.f32 %v4686_v4, %v4567_v44  ;;  %v16546_v23 = vpop.f32.mrb[223].mxu1  ;;  %v4557_v54 = vpop.f32.mrb[226].mxu0 }
 0x2bb   : > { %v4573_v0 = vadd.f32 %v4557_v54, %v4414_v38  ;;  %v16535_v20 = vpop.f32.mrb[227].mxu0  ;;  %v4936_v44 = vpop.permute.xlu0 %4935 }
 0x2bd   : > { %v4691_v22 = vpop.f32.mrb[224].mxu1 }
 0x2be   : > { %v4727_v52 = vadd.f32 %v4691_v22, %v4568_v35  ;;  %v16549_v24 = vpop.f32.mrb[225].mxu1  ;;  %v4562_v62 = vpop.f32.mrb[228].mxu0 }
 0x2bf   : > { %v4574_v51 = vadd.f32 %v4562_v62, %v4415_v10  ;;  %v16538_v26 = vpop.f32.mrb[229].mxu0  ;;  %v4941_v63 = vpop.permute.xlu0 %4940 }
 0x2c1   : > { %v4696_v33 = vpop.f32.mrb[226].mxu1 }
 0x2c2   : > { %v4728_v5 = vadd.f32 %v4696_v33, %v4569_v57  ;;  %v16552_v29 = vpop.f32.mrb[227].mxu1  ;;  %v4840_v36 = vpop.f32.mrb[230].mxu0 }
 0x2c3   : > { %v4884_v7 = vadd.f32 %v4840_v36, %v4725_v17  ;;  %v16572_v12 = vpop.f32.mrb[231].mxu0  ;;  %v4946_v2 = vpop.permute.xlu0 %4945 }
 0x2c5   : > { %v4900_v11 = vadd.f32 %v20611_v9, %v4884_v7  ;;  %v4701_v28 = vpop.f32.mrb[228].mxu1 }
 0x2c6   : > { %v4729_v39 = vadd.f32 %v4701_v28, %v4570_v48  ;;  %v16555_v60 = vpop.f32.mrb[229].mxu1  ;;  %v4845_v15 = vpop.f32.mrb[232].mxu0  ;;  %v6571_v48 = vmax.f32 %v6499_v53, %v20416_v19 }
 0x2c7   : > { %v4963_v30 = vadd.f32 %v19679_v61, %v4900_v11  ;;  %v4885_v32 = vadd.f32 %v4845_v15, %v4726_v14  ;;  %v16575_v3 = vpop.f32.mrb[233].mxu0 }
 0x2c9   : > { %4972 = vst.msk [vmem:[#allocation3 + $0xa2] sm:$0xff] %vm426_vm3, %v4963_v30  ;;  %v4901_v35 = vadd.f32 %v20611_v9, %v4885_v32  ;;  %v4706_v25 = vpop.f32.mrb[230].mxu1 }
 0x2ca   : > { %v4730_v46 = vadd.f32 %v4706_v25, %v4571_v42  ;;  %v16558_v40 = vpop.f32.mrb[231].mxu1  ;;  %v4850_v45 = vpop.f32.mrb[234].mxu0 }
 0x2cb   : > { %v4964_v49 = vadd.f32 %v19667_v47, %v4901_v35  ;;  %v4886_v50 = vadd.f32 %v4850_v45, %v4727_v52  ;;  %v16578_v57 = vpop.f32.mrb[235].mxu0 }
 0x2cd   : > { %4973 = vst.msk [vmem:[#allocation3 + $0xaa] sm:$0xff] %vm426_vm3, %v4964_v49  ;;  %v4902_v61 = vadd.f32 %v20611_v9, %v4886_v50  ;;  %v4711_v16 = vpop.f32.mrb[232].mxu1 }
 0x2ce   : > { %v4731_v38 = vadd.f32 %v4711_v16, %v4572_v34  ;;  %v16561_v58 = vpop.f32.mrb[233].mxu1  ;;  %v4855_v41 = vpop.f32.mrb[236].mxu0 }
 0x2cf   : > { %v4965_v27 = vadd.f32 %v19698_v13, %v4902_v61  ;;  %v4887_v8 = vadd.f32 %v4855_v41, %v4728_v5  ;;  %v16581_v56 = vpop.f32.mrb[237].mxu0  ;;  %v4951_v5 = vpop.permute.xlu0 %4950 }
 0x2d0   : > { %v6500_v10 = vld [vmem:[#allocation3 + $0xa2] sm:$0xff]  ;;  %v6699_v56 = vld [vmem:[#allocation3 + $0x1a] sm:$0xff] }
 0x2d1   : > { %v6536_v47 = vld [vmem:[#allocation3 + $0xa1] sm:$0xff]  ;;  %4974 = vst.msk [vmem:[#allocation3 + $0xb2] sm:$0xff] %vm426_vm3, %v4965_v27  ;;  %v4716_v42 = vpop.f32.mrb[234].mxu1  ;;  %v4903_v55 = vadd.f32 %v20611_v9, %v4887_v8  ;;  %v6714_v8 = vld [vmem:[#allocation3 + $0x92] sm:$0xff] }
 0x2d2   : > { %v6607_v18 = vld [vmem:[#allocation3 + $0x9b] sm:$0xff]  ;;  %v4732_v31 = vadd.f32 %v4716_v42, %v4573_v0  ;;  %v16564_v17 = vpop.f32.mrb[235].mxu1  ;;  %v4860_v59 = vpop.f32.mrb[238].mxu0  ;;  %v6572_v43 = vmax.f32 %v6500_v10, %v6536_v47  ;;  %v6735_v47 = vld [vmem:[#allocation3 + $0x8] sm:$0xff] }
 0x2d3   : > { %v6643_v6 = vmax.f32 %v6571_v48, %v6607_v18  ;;  %v4966_v19 = vadd.f32 %v4936_v44, %v4903_v55  ;;  %v4888_v13 = vadd.f32 %v4860_v59, %v4729_v39  ;;  %v16584_v34 = vpop.f32.mrb[239].mxu0  ;;  %v4956_v45 = vpop.permute.xlu0 %4955  ;;  %v6734_v10 = vld [vmem:[#allocation3] sm:$0xff]  ;;  %v6698_v55 = vld [vmem:[#allocation3 + $0x12] sm:$0xff] }
 0x2d4   : > { %v6501_v21 = vld [vmem:[#allocation3 + $0xaa] sm:$0xff] }
 0x2d5   : > { %6679 = vst.msk [vmem:[#allocation3 + $0x9a] sm:$0xff] %vm426_vm3, %v6643_v6  ;;  %v6537_v4 = vld [vmem:[#allocation3 + $0xa9] sm:$0xff]  ;;  %4975 = vst.msk [vmem:[#allocation3 + $0xba] sm:$0xff] %vm426_vm3, %v4966_v19  ;;  %v4721_v54 = vpop.f32.mrb[236].mxu1  ;;  %v4904_v20 = vadd.f32 %v20611_v9, %v4888_v13  ;;  %v6750_v19 = vld [vmem:[#allocation3 + $0x80] sm:$0xff] }
 0x2d6   : > { %v6608_v14 = vld [vmem:[#allocation3 + $0xa3] sm:$0xff]  ;;  %v4733_v22 = vadd.f32 %v4721_v54, %v4574_v51  ;;  %v16567_v52 = vpop.f32.mrb[237].mxu1  ;;  %v4865_v0 = vpop.f32.mrb[240].mxu0  ;;  %v6573_v24 = vmax.f32 %v6501_v21, %v6537_v4  ;;  %v6786_v54 = vmax.f32 %v6714_v8, %v6750_v19 }
 0x2d7   : > { %v6644_v23 = vmax.f32 %v6572_v43, %v6608_v14  ;;  %v4967_v62 = vadd.f32 %v4941_v63, %v4904_v20  ;;  %v4889_v26 = vadd.f32 %v4865_v0, %v4730_v46  ;;  %v16587_v33 = vpop.f32.mrb[241].mxu0  ;;  %v6751_v13 = vld [vmem:[#allocation3 + $0x88] sm:$0xff]  ;;  %v6771_v20 = vmax.f32 %v6699_v56, %v6735_v47 }
 0x2d8   : > { %v6502_v29 = vld [vmem:[#allocation3 + $0xb2] sm:$0xff] }
 0x2d9   : > { %6680 = vst.msk [vmem:[#allocation3 + $0xa2] sm:$0xff] %vm426_vm3, %v6644_v23  ;;  %v6538_v36 = vld [vmem:[#allocation3 + $0xb1] sm:$0xff]  ;;  %4976 = vst.msk [vmem:[#allocation3 + $0xc2] sm:$0xff] %vm426_vm3, %v4967_v62  ;;  %v20629_v11 = vpop.f32.mrb[238].mxu1  ;;  %v4905_v28 = vadd.f32 %v20611_v9, %v4889_v26  ;;  %v4961_v23 = vpop.permute.xlu0 %4960  ;;  %v6806_v26 = vld [vmem:[#allocation3 + $0x24] sm:$0xff] }
 0x2da   : > { %v6609_v7 = vld [vmem:[#allocation3 + $0xab] sm:$0xff]  ;;  %v16601_v51 = vpop.f32.mrb[239].mxu1  ;;  %v4870_v44 = vpop.f32.mrb[242].mxu0  ;;  %v6574_v39 = vmax.f32 %v6502_v29, %v6538_v36  ;;  %v6770_v36 = vmax.f32 %v6698_v55, %v6734_v10 }
 0x2db   : > { %v6645_v12 = vmax.f32 %v6573_v24, %v6609_v7  ;;  %v4968_v60 = vadd.f32 %v4946_v2, %v4905_v28  ;;  %v4890_v15 = vadd.f32 %v4870_v44, %v4731_v38  ;;  %v16590_v30 = vpop.f32.mrb[243].mxu0  ;;  %v6807_v2 = vld [vmem:[#allocation3 + $0x2c] sm:$0xff] }
 0x2dc   : > { %v6503_v32 = vld [vmem:[#allocation3 + $0xba] sm:$0xff]  ;;  %v6843_v7 = vmax.f32 %v6771_v20, %v6807_v2 }
 0x2dd   : > { %6681 = vst.msk [vmem:[#allocation3 + $0xaa] sm:$0xff] %vm426_vm3, %v6645_v12  ;;  %v6539_v3 = vld [vmem:[#allocation3 + $0xb9] sm:$0xff]  ;;  %4977 = vst.msk [vmem:[#allocation3 + $0xca] sm:$0xff] %vm426_vm3, %v4968_v60  ;;  %v20634_v46 = vpop.f32.mrb[240].mxu1  ;;  %v4906_v40 = vadd.f32 %v20611_v9, %v4890_v15 }
 0x2de   : > { %v6610_v35 = vld [vmem:[#allocation3 + $0xb3] sm:$0xff]  ;;  %v16604_v49 = vpop.f32.mrb[241].mxu1  ;;  %v4875_v50 = vpop.f32.mrb[244].mxu0  ;;  %v6575_v57 = vmax.f32 %v6503_v32, %v6539_v3  ;;  %v6842_v32 = vmax.f32 %v6770_v36, %v6806_v26 }
 0x2df   : > { %v6646_v25 = vmax.f32 %v6574_v39, %v6610_v35  ;;  %v4969_v63 = vadd.f32 %v4951_v5, %v4906_v40  ;;  %v4891_v53 = vadd.f32 %v4875_v50, %v4732_v31  ;;  %v16593_v61 = vpop.f32.mrb[245].mxu0  ;;  %v6715_v42 = vld [vmem:[#allocation3 + $0x9a] sm:$0xff]  ;;  %v6700_v40 = vld [vmem:[#allocation3 + $0x22] sm:$0xff] }
 0x2e0   : > { %v6504_v16 = vld [vmem:[#allocation3 + $0xc2] sm:$0xff]  ;;  %v6787_v62 = vmax.f32 %v6715_v42, %v6751_v13  ;;  %v6737_v49 = vld [vmem:[#allocation3 + $0x18] sm:$0xff] }
 0x2e1   : > { %6682 = vst.msk [vmem:[#allocation3 + $0xb2] sm:$0xff] %vm426_vm3, %v6646_v25  ;;  %v6540_v38 = vld [vmem:[#allocation3 + $0xc1] sm:$0xff]  ;;  %4978 = vst.msk [vmem:[#allocation3 + $0xd2] sm:$0xff] %vm426_vm3, %v4969_v63  ;;  %v20639_v48 = vpop.f32.mrb[242].mxu1  ;;  %v4907_v27 = vadd.f32 %v20611_v9, %v4891_v53  ;;  %v17708_v63 = vpack.c.bf16 %v6843_v7, %v6842_v32 }
 0x2e2   : > { %v6611_v58 = vld [vmem:[#allocation3 + $0xbb] sm:$0xff]  ;;  %v16607_v18 = vpop.f32.mrb[243].mxu1  ;;  %v4880_v6 = vpop.f32.mrb[246].mxu0  ;;  %v6576_v31 = vmax.f32 %v6504_v16, %v6540_v38 }
 0x2e3   : > { %v6647_v41 = vmax.f32 %v6575_v57, %v6611_v58  ;;  %v4970_v17 = vadd.f32 %v4956_v45, %v4907_v27  ;;  %v4892_v59 = vadd.f32 %v4880_v6, %v4733_v22  ;;  %v16596_v43 = vpop.f32.mrb[247].mxu0  ;;  %v6701_v45 = vld [vmem:[#allocation3 + $0x2a] sm:$0xff]  ;;  %v6809_v61 = vld [vmem:[#allocation3 + $0x3c] sm:$0xff] }
 0x2e4   : > { %v6822_v34 = vld [vmem:[#allocation3 + $0xa4] sm:$0xff]  ;;  %v6753_v27 = vld [vmem:[#allocation3 + $0x98] sm:$0xff]  ;;  %v6773_v18 = vmax.f32 %v6701_v45, %v6737_v49 }
 0x2e5   : > { %6683 = vst.msk [vmem:[#allocation3 + $0xba] sm:$0xff] %vm426_vm3, %v6647_v41  ;;  %v6505_v21 = vld [vmem:[#allocation3 + $0xca] sm:$0xff]  ;;  %4979 = vst.msk [vmem:[#allocation3 + $0xda] sm:$0xff] %vm426_vm3, %v4970_v17  ;;  %v20644_v0 = vpop.f32.mrb[244].mxu1  ;;  %v4908_v24 = vadd.f32 %v20611_v9, %v4892_v59  ;;  %v6858_v29 = vmax.f32 %v6786_v54, %v6822_v34  ;;  %v6808_v17 = vld [vmem:[#allocation3 + $0x34] sm:$0xff] }
 0x2e6   : > { %v6541_v4 = vld [vmem:[#allocation3 + $0xc9] sm:$0xff]  ;;  %v16610_v22 = vpop.f32.mrb[245].mxu1  ;;  %v5237_v33 = vpop.f32.mrb[248].mxu0  ;;  %v6845_v13 = vmax.f32 %v6773_v18, %v6809_v61  ;;  %v6703_v26 = vld [vmem:[#allocation3 + $0x3a] sm:$0xff] }
 0x2e7   : > { %v6612_v14 = vld [vmem:[#allocation3 + $0xc3] sm:$0xff]  ;;  %v6577_v12 = vmax.f32 %v6505_v21, %v6541_v4  ;;  %v4971_v28 = vadd.f32 %v4961_v23, %v4908_v24  ;;  %v20649_v51 = vadd.f32 %v5237_v33, %v20629_v11  ;;  %v16630_v44 = vpop.f32.mrb[249].mxu0  ;;  %v6752_v41 = vld [vmem:[#allocation3 + $0x90] sm:$0xff] }
 0x2e8   : > { %v6648_v52 = vmax.f32 %v6576_v31, %v6612_v14  ;;  %v6823_v5 = vld [vmem:[#allocation3 + $0xac] sm:$0xff]  ;;  %v6716_v11 = vld [vmem:[#allocation3 + $0xa2] sm:$0xff] }
 0x2e9   : > { %v6859_v39 = vmax.f32 %v6787_v62, %v6823_v5  ;;  %v6506_v60 = vld [vmem:[#allocation3 + $0xd2] sm:$0xff]  ;;  %4980 = vst.msk [vmem:[#allocation3 + $0xe2] sm:$0xff] %vm426_vm3, %v4971_v28  ;;  %v20652_v35 = vpop.f32.mrb[246].mxu1  ;;  %v6717_v53 = vld [vmem:[#allocation3 + $0xaa] sm:$0xff]  ;;  %v6788_v55 = vmax.f32 %v6716_v11, %v6752_v41  ;;  %v6738_v45 = vld [vmem:[#allocation3 + $0x20] sm:$0xff] }
 0x2ea   : > { %6684 = vst.msk [vmem:[#allocation3 + $0xc2] sm:$0xff] %vm426_vm3, %v6648_v52  ;;  %v6542_v15 = vld [vmem:[#allocation3 + $0xd1] sm:$0xff]  ;;  %v16613_v50 = vpop.f32.mrb[247].mxu1  ;;  %v5242_v57 = vpop.f32.mrb[250].mxu0  ;;  %v6789_v2 = vmax.f32 %v6717_v53, %v6753_v27  ;;  %v6739_v44 = vld [vmem:[#allocation3 + $0x28] sm:$0xff] }
 0x2eb   : > { %v6613_v30 = vld [vmem:[#allocation3 + $0xcb] sm:$0xff]  ;;  %v17706_v25 = vpack.c.bf16 %v6859_v39, %v6858_v29  ;;  %v6578_v16 = vmax.f32 %v6506_v60, %v6542_v15  ;;  %v20656_v38 = vadd.f32 %v5242_v57, %v20634_v46  ;;  %v16633_v58 = vpop.f32.mrb[251].mxu0  ;;  %v6754_v60 = vld [vmem:[#allocation3 + $0xa0] sm:$0xff]  ;;  %v6775_v32 = vmax.f32 %v6703_v26, %v6739_v44 }
 0x2ec   : > { %v6649_v3 = vmax.f32 %v6577_v12, %v6613_v30  ;;  %v6824_v8 = vld [vmem:[#allocation3 + $0xb4] sm:$0xff]  ;;  %v6811_v39 = vld [vmem:[#allocation3 + $0x4c] sm:$0xff]  ;;  %v6810_v49 = vld [vmem:[#allocation3 + $0x44] sm:$0xff] }
 0x2ed   : > { %17707 = vmatprep.subr.bf16.mxu0 %v17706_v25  ;;  %v6507_v56 = vld [vmem:[#allocation3 + $0xda] sm:$0xff]  ;;  %v5122_v42 = vpop.f32.mrb[248].mxu1  ;;  %v6736_v31 = vld [vmem:[#allocation3 + $0x10] sm:$0xff]  ;;  %v6860_v14 = vmax.f32 %v6788_v55, %v6824_v8  ;;  %v6755_v15 = vld [vmem:[#allocation3 + $0xa8] sm:$0xff] }
 0x2ee   : > { %6685 = vst.msk [vmem:[#allocation3 + $0xca] sm:$0xff] %vm426_vm3, %v6649_v3  ;;  %v6543_v10 = vld [vmem:[#allocation3 + $0xd9] sm:$0xff]  ;;  %17709 = vmatpush3.bf16.msra.mxu0 %v17708_v63  ;;  %v16616_v59 = vpop.f32.mrb[249].mxu1  ;;  %v5247_v43 = vpop.f32.mrb[252].mxu0  ;;  %v6772_v19 = vmax.f32 %v6700_v40, %v6736_v31 }
 0x2ef   : > { %v6614_v47 = vld [vmem:[#allocation3 + $0xd3] sm:$0xff]  ;;  %v6579_v34 = vmax.f32 %v6507_v56, %v6543_v10  ;;  %v20660_v21 = vadd.f32 %v5247_v43, %v20639_v48  ;;  %v16636_v4 = vpop.f32.mrb[253].mxu0 }
 0x2f0   : > { %v6650_v6 = vmax.f32 %v6578_v16, %v6614_v47  ;;  %v6615_v54 = vld [vmem:[#allocation3 + $0xdb] sm:$0xff]  ;;  %v6844_v20 = vmax.f32 %v6772_v19, %v6808_v17  ;;  %v6718_v36 = vld [vmem:[#allocation3 + $0xb2] sm:$0xff] }
 0x2f1   : > { %v6825_v46 = vld [vmem:[#allocation3 + $0xbc] sm:$0xff]  ;;  %v6651_v52 = vmax.f32 %v6579_v34, %v6615_v54  ;;  %v5127_v24 = vpop.f32.mrb[250].mxu1  ;;  %v6702_v28 = vld [vmem:[#allocation3 + $0x32] sm:$0xff]  ;;  %v6790_v25 = vmax.f32 %v6718_v36, %v6754_v60 }
 0x2f2   : > { %6686 = vst.msk [vmem:[#allocation3 + $0xd2] sm:$0xff] %vm426_vm3, %v6650_v6  ;;  %v6861_v23 = vmax.f32 %v6789_v2, %v6825_v46  ;;  %v20662_v22 = vld [vmem:[#allocation3 + $0xe1] sm:$0xff]  ;;  %v16619_v33 = vpop.f32.mrb[251].mxu1  ;;  %v5252_v5 = vpop.f32.mrb[254].mxu0  ;;  %v17712_v29 = vpack.c.bf16 %v6845_v13, %v6844_v20  ;;  %v6774_v11 = vmax.f32 %v6702_v28, %v6738_v45 }
 0x2f3   : > { %v6719_v7 = vld [vmem:[#allocation3 + $0xba] sm:$0xff]  ;;  %6687 = vst.msk [vmem:[#allocation3 + $0xda] sm:$0xff] %vm426_vm3, %v6651_v52  ;;  %v5253_v48 = vadd.f32 %v5252_v5, %v20644_v0  ;;  %v16639_v12 = vpop.f32.mrb[255].mxu0  ;;  %v6847_v0 = vmax.f32 %v6775_v32, %v6811_v39 }
 0x2f4   : > { %v17710_v62 = vpack.c.bf16 %v6861_v23, %v6860_v14  ;;  %v6791_v40 = vmax.f32 %v6719_v7, %v6755_v15  ;;  %v6846_v41 = vmax.f32 %v6774_v11, %v6810_v49 }
 0x2f5   : > { %v6826_v30 = vld [vmem:[#allocation3 + $0xc4] sm:$0xff]  ;;  %v5132_v3 = vpop.f32.mrb[252].mxu1 }
 0x2f6   : > { %17711 = vmatprep.subr.bf16.mxu0 %v17710_v62  ;;  %v16622_v50 = vpop.f32.mrb[253].mxu1  ;;  %v5257_v57 = vpop.f32.mrb[0].mxu0  ;;  %v6862_v16 = vmax.f32 %v6790_v25, %v6826_v30  ;;  %v17716_v47 = vpack.c.bf16 %v6847_v0, %v6846_v41 }
 0x2f7   : > { %17713 = vmatpush3.bf16.msra.mxu0 %v17712_v29  ;;  %v5258_v53 = vadd.f32 %v5257_v57, %v20652_v35  ;;  %v16642_v61 = vpop.f32.mrb[1].mxu0 }
 0x2f9   : > { %v6827_v63 = vld [vmem:[#allocation3 + $0xcc] sm:$0xff]  ;;  %v5137_v27 = vpop.f32.mrb[254].mxu1 }
 0x2fa   : > { %v6863_v58 = vmax.f32 %v6791_v40, %v6827_v63  ;;  %v16625_v56 = vpop.f32.mrb[255].mxu1  ;;  %v5262_v10 = vpop.f32.mrb[2].mxu0 }
 0x2fb   : > { %v5263_v18 = vadd.f32 %v5262_v10, %v5122_v42  ;;  %v16645_v6 = vpop.f32.mrb[3].mxu0 }
 0x2fc   : > { %v17714_v8 = vpack.c.bf16 %v6863_v58, %v6862_v16 }
 0x2fd   : > { %v5387_v55 = vpop.f32.mrb[0].mxu1 }
 0x2fe   : > { %17715 = vmatprep.subr.bf16.mxu0 %v17714_v8  ;;  %v5431_v2 = vadd.f32 %v5387_v55, %v20649_v51  ;;  %v16659_v31 = vpop.f32.mrb[1].mxu1  ;;  %v5267_v17 = vpop.f32.mrb[4].mxu0 }
 0x2ff   : > { %17717 = vmatpush3.bf16.msra.mxu0 %v17716_v47  ;;  %v5268_v59 = vadd.f32 %v5267_v17, %v5127_v24  ;;  %v16648_v35 = vpop.f32.mrb[5].mxu0 }
 0x301   : > { %v5392_v43 = vpop.f32.mrb[2].mxu1 }
 0x302   : > { %v5432_v46 = vadd.f32 %v5392_v43, %v20656_v38  ;;  %v16662_v19 = vpop.f32.mrb[3].mxu1  ;;  %v5272_v13 = vpop.f32.mrb[6].mxu0  ;;  %v6879_v43 = vld [vmem:[%s21790_s6 + $0x8] sm:$0xff] }
 0x303   : > { %v5273_v34 = vadd.f32 %v5272_v13, %v5132_v3  ;;  %v16651_v4 = vpop.f32.mrb[7].mxu0  ;;  %6990 = vmatprep.mubr.f32.mxu0 %v6879_v43 }
 0x305   : > { %v5397_v14 = vpop.f32.mrb[4].mxu1 }
 0x306   : > { %v5433_v42 = vadd.f32 %v5397_v14, %v20660_v21  ;;  %v16665_v23 = vpop.f32.mrb[5].mxu1  ;;  %v5277_v54 = vpop.f32.mrb[8].mxu0 }
 0x307   : > { %v5278_v20 = vadd.f32 %v5277_v54, %v5137_v27  ;;  %v16654_v52 = vpop.f32.mrb[9].mxu0 }
 0x309   : > { %v5402_v62 = vpop.f32.mrb[6].mxu1 }
 0x30a   : > { %v5434_v51 = vadd.f32 %v5402_v62, %v5253_v48  ;;  %v16668_v26 = vpop.f32.mrb[7].mxu1  ;;  %v5546_v33 = vpop.f32.mrb[10].mxu0  ;;  %v6880_v62 = vld [vmem:[%s21790_s6 + $0x10] sm:$0xff] }
 0x30b   : > { %v5590_v24 = vadd.f32 %v5546_v33, %v5431_v2  ;;  %v16688_v5 = vpop.f32.mrb[11].mxu0  ;;  %16866 = vmatprep.mubr.msk.f32.mxu1 %vm426_vm3, %v6880_v62 }
 0x30d   : > { %v5407_v29 = vpop.f32.mrb[8].mxu1 }
 0x30e   : > { %v5435_v36 = vadd.f32 %v5407_v29, %v5258_v53  ;;  %v16671_v38 = vpop.f32.mrb[9].mxu1  ;;  %v5551_v7 = vpop.f32.mrb[12].mxu0 }
 0x30f   : > { %v5591_v12 = vadd.f32 %v5551_v7, %v5432_v46  ;;  %v16691_v28 = vpop.f32.mrb[13].mxu0 }
 0x311   : > { %v5412_v44 = vpop.f32.mrb[10].mxu1 }
 0x312   : > { %v5436_v39 = vadd.f32 %v5412_v44, %v5263_v18  ;;  %v16674_v60 = vpop.f32.mrb[11].mxu1  ;;  %v5556_v21 = vpop.f32.mrb[14].mxu0 }
 0x313   : > { %v5592_v15 = vadd.f32 %v5556_v21, %v5433_v42  ;;  %v16694_v30 = vpop.f32.mrb[15].mxu0 }
 0x315   : > { %v5417_v32 = vpop.f32.mrb[12].mxu1 }
 0x316   : > { %v5437_v3 = vadd.f32 %v5417_v32, %v5268_v59  ;;  %v16677_v25 = vpop.f32.mrb[13].mxu1  ;;  %v5561_v48 = vpop.f32.mrb[16].mxu0 }
 0x317   : > { %v5593_v40 = vadd.f32 %v5561_v48, %v5434_v51  ;;  %v16697_v45 = vpop.f32.mrb[17].mxu0 }
 0x319   : > { %v5422_v49 = vpop.f32.mrb[14].mxu1 }
 0x31a   : > { %v5438_v50 = vadd.f32 %v5422_v49, %v5273_v34  ;;  %v16680_v57 = vpop.f32.mrb[15].mxu1  ;;  %v5566_v63 = vpop.f32.mrb[18].mxu0 }
 0x31b   : > { %v5594_v11 = vadd.f32 %v5566_v63, %v5435_v36  ;;  %v16700_v0 = vpop.f32.mrb[19].mxu0 }
 0x31d   : > { %v5427_v53 = vpop.f32.mrb[16].mxu1 }
 0x31e   : > { %v5439_v61 = vadd.f32 %v5427_v53, %v5278_v20  ;;  %v16683_v16 = vpop.f32.mrb[17].mxu1  ;;  %v5571_v58 = vpop.f32.mrb[20].mxu0 }
 0x31f   : > { %v5595_v41 = vadd.f32 %v5571_v58, %v5436_v39  ;;  %v16703_v27 = vpop.f32.mrb[21].mxu0 }
 0x321   : > { %v5705_v8 = vpop.f32.mrb[18].mxu1 }
 0x322   : > { %v5749_v56 = vadd.f32 %v5705_v8, %v5590_v24  ;;  %v16717_v10 = vpop.f32.mrb[19].mxu1  ;;  %v5576_v47 = vpop.f32.mrb[22].mxu0 }
 0x323   : > { %v5596_v18 = vadd.f32 %v5576_v47, %v5437_v3  ;;  %v16706_v6 = vpop.f32.mrb[23].mxu0 }
 0x325   : > { %v5710_v55 = vpop.f32.mrb[20].mxu1 }
 0x326   : > { %v5750_v2 = vadd.f32 %v5710_v55, %v5591_v12  ;;  %v16720_v31 = vpop.f32.mrb[21].mxu1  ;;  %v5581_v17 = vpop.f32.mrb[24].mxu0 }
 0x327   : > { %v5597_v59 = vadd.f32 %v5581_v17, %v5438_v50  ;;  %v16709_v35 = vpop.f32.mrb[25].mxu0 }
 0x329   : > { %v5715_v46 = vpop.f32.mrb[22].mxu1 }
 0x32a   : > { %v5751_v19 = vadd.f32 %v5715_v46, %v5592_v15  ;;  %v16723_v37 = vpop.f32.mrb[23].mxu1  ;;  %v5586_v13 = vpop.f32.mrb[26].mxu0 }
 0x32b   : > { %v5598_v34 = vadd.f32 %v5586_v13, %v5439_v61  ;;  %v16712_v4 = vpop.f32.mrb[27].mxu0 }
 0x32d   : > { %v5720_v14 = vpop.f32.mrb[24].mxu1 }
 0x32e   : > { %v5752_v42 = vadd.f32 %v5720_v14, %v5593_v40  ;;  %v16726_v23 = vpop.f32.mrb[25].mxu1  ;;  %v5864_v54 = vpop.f32.mrb[28].mxu0 }
 0x32f   : > { %v5908_v20 = vadd.f32 %v5864_v54, %v5749_v56  ;;  %v16746_v52 = vpop.f32.mrb[29].mxu0 }
 0x331   : > { %v5725_v51 = vpop.f32.mrb[26].mxu1 }
 0x332   : > { %v5753_v26 = vadd.f32 %v5725_v51, %v5594_v11  ;;  %v16729_v33 = vpop.f32.mrb[27].mxu1  ;;  %v5869_v24 = vpop.f32.mrb[30].mxu0 }
 0x333   : > { %v5909_v5 = vadd.f32 %v5869_v24, %v5750_v2  ;;  %v16749_v29 = vpop.f32.mrb[31].mxu0 }
 0x335   : > { %v5730_v36 = vpop.f32.mrb[28].mxu1 }
 0x336   : > { %v5754_v38 = vadd.f32 %v5730_v36, %v5595_v41  ;;  %v16732_v7 = vpop.f32.mrb[29].mxu1  ;;  %v5874_v12 = vpop.f32.mrb[32].mxu0 }
 0x337   : > { %v5910_v28 = vadd.f32 %v5874_v12, %v5751_v19  ;;  %v16752_v44 = vpop.f32.mrb[33].mxu0 }
 0x339   : > { %v5735_v39 = vpop.f32.mrb[30].mxu1 }
 0x33a   : > { %v5755_v60 = vadd.f32 %v5735_v39, %v5596_v18  ;;  %v16735_v21 = vpop.f32.mrb[31].mxu1  ;;  %v5879_v15 = vpop.f32.mrb[34].mxu0 }
 0x33b   : > { %v5911_v30 = vadd.f32 %v5879_v15, %v5752_v42  ;;  %v16755_v32 = vpop.f32.mrb[35].mxu0 }
 0x33d   : > { %v5740_v3 = vpop.f32.mrb[32].mxu1 }
 0x33e   : > { %v5756_v25 = vadd.f32 %v5740_v3, %v5597_v59  ;;  %v16738_v48 = vpop.f32.mrb[33].mxu1  ;;  %v5884_v40 = vpop.f32.mrb[36].mxu0 }
 0x33f   : > { %v5912_v45 = vadd.f32 %v5884_v40, %v5753_v26  ;;  %v16758_v49 = vpop.f32.mrb[37].mxu0 }
 0x341   : > { %v5745_v50 = vpop.f32.mrb[34].mxu1 }
 0x342   : > { %v5757_v57 = vadd.f32 %v5745_v50, %v5598_v34  ;;  %v16741_v63 = vpop.f32.mrb[35].mxu1  ;;  %v5889_v11 = vpop.f32.mrb[38].mxu0 }
 0x343   : > { %v5913_v0 = vadd.f32 %v5889_v11, %v5754_v38  ;;  %v16761_v53 = vpop.f32.mrb[39].mxu0  ;;  %v6422_v11 = vpop.permute.xlu0 %6421 }
 0x345   : > { %v6023_v61 = vpop.f32.mrb[36].mxu1 }
 0x346   : > { %v6067_v16 = vadd.f32 %v6023_v61, %v5908_v20  ;;  %v16775_v58 = vpop.f32.mrb[37].mxu1  ;;  %v5894_v41 = vpop.f32.mrb[40].mxu0 }
 0x347   : > { %v5914_v27 = vadd.f32 %v5894_v41, %v5755_v60  ;;  %v16764_v8 = vpop.f32.mrb[41].mxu0 }
 0x349   : > { %v6028_v56 = vpop.f32.mrb[38].mxu1 }
 0x34a   : > { %v6068_v10 = vadd.f32 %v6028_v56, %v5909_v5  ;;  %v16778_v47 = vpop.f32.mrb[39].mxu1  ;;  %v5899_v18 = vpop.f32.mrb[42].mxu0 }
 0x34b   : > { %v5915_v6 = vadd.f32 %v5899_v18, %v5756_v25  ;;  %v16767_v55 = vpop.f32.mrb[43].mxu0  ;;  %v6427_v18 = vpop.permute.xlu0 %6426 }
 0x34d   : > { %v6033_v2 = vpop.f32.mrb[40].mxu1 }
 0x34e   : > { %v6069_v31 = vadd.f32 %v6033_v2, %v5910_v28  ;;  %v16781_v17 = vpop.f32.mrb[41].mxu1  ;;  %v5904_v59 = vpop.f32.mrb[44].mxu0 }
 0x34f   : > { %v5916_v35 = vadd.f32 %v5904_v59, %v5757_v57  ;;  %v16770_v43 = vpop.f32.mrb[45].mxu0  ;;  %v6508_v59 = vld [vmem:[#allocation3 + $0xe2] sm:$0xff] }
 0x351   : > { %v6038_v46 = vpop.f32.mrb[42].mxu1 }
 0x352   : > { %v6070_v19 = vadd.f32 %v6038_v46, %v5911_v30  ;;  %v16784_v37 = vpop.f32.mrb[43].mxu1  ;;  %v6182_v13 = vpop.f32.mrb[46].mxu0 }
 0x353   : > { %v6226_v34 = vadd.f32 %v6182_v13, %v6067_v16  ;;  %v16804_v4 = vpop.f32.mrb[47].mxu0  ;;  %v6580_v13 = vmax.f32 %v6508_v59, %v20662_v22 }
 0x355   : > { %v6043_v14 = vpop.f32.mrb[44].mxu1 }
 0x356   : > { %v6071_v42 = vadd.f32 %v6043_v14, %v5912_v45  ;;  %v16787_v23 = vpop.f32.mrb[45].mxu1  ;;  %v6187_v54 = vpop.f32.mrb[48].mxu0 }
 0x357   : > { %v6227_v20 = vadd.f32 %v6187_v54, %v6068_v10  ;;  %v16807_v52 = vpop.f32.mrb[49].mxu0 }
 0x359   : > { %v6048_v62 = vpop.f32.mrb[46].mxu1 }
 0x35a   : > { %v6072_v51 = vadd.f32 %v6048_v62, %v5913_v0  ;;  %v16790_v26 = vpop.f32.mrb[47].mxu1  ;;  %v6192_v33 = vpop.f32.mrb[50].mxu0 }
 0x35b   : > { %v6228_v24 = vadd.f32 %v6192_v33, %v6069_v31  ;;  %v16810_v5 = vpop.f32.mrb[51].mxu0  ;;  %v6437_v62 = vpop.permute.xlu0 %6436 }
 0x35d   : > { %v6053_v29 = vpop.f32.mrb[48].mxu1 }
 0x35e   : > { %v6073_v36 = vadd.f32 %v6053_v29, %v5914_v27  ;;  %v16793_v38 = vpop.f32.mrb[49].mxu1  ;;  %v6197_v7 = vpop.f32.mrb[52].mxu0 }
 0x35f   : > { %v6229_v12 = vadd.f32 %v6197_v7, %v6070_v19  ;;  %v16813_v28 = vpop.f32.mrb[53].mxu0  ;;  %v6432_v19 = vpop.permute.xlu1 %6431 }
 0x360   : > { %v6705_v28 = vld [vmem:[#allocation3 + $0x4a] sm:$0xff] }
 0x361   : > { %v6058_v44 = vpop.f32.mrb[50].mxu1 }
 0x362   : > { %v6074_v39 = vadd.f32 %v6058_v44, %v5915_v6  ;;  %v16796_v60 = vpop.f32.mrb[51].mxu1  ;;  %v6202_v21 = vpop.f32.mrb[54].mxu0  ;;  %v6741_v44 = vld [vmem:[#allocation3 + $0x38] sm:$0xff] }
 0x363   : > { %v6230_v15 = vadd.f32 %v6202_v21, %v6071_v42  ;;  %v16816_v30 = vpop.f32.mrb[55].mxu0  ;;  %v6721_v21 = vld [vmem:[#allocation3 + $0xca] sm:$0xff] }
 0x364   : > { %v6704_v30 = vld [vmem:[#allocation3 + $0x42] sm:$0xff] }
 0x365   : > { %v6063_v32 = vpop.f32.mrb[52].mxu1 }
 0x366   : > { %v6075_v3 = vadd.f32 %v6063_v32, %v5916_v35  ;;  %v16799_v25 = vpop.f32.mrb[53].mxu1  ;;  %v6207_v48 = vpop.f32.mrb[56].mxu0  ;;  %v6813_v32 = vld [vmem:[#allocation3 + $0x5c] sm:$0xff] }
 0x367   : > { %v20678_v40 = vadd.f32 %v6207_v48, %v6072_v51  ;;  %v16819_v45 = vpop.f32.mrb[57].mxu0 }
 0x368   : > { %v6756_v45 = vld [vmem:[#allocation3 + $0xb0] sm:$0xff] }
 0x369   : > { %v6341_v49 = vpop.f32.mrb[54].mxu1 }
 0x36a   : > { %v6385_v50 = vadd.f32 %v6341_v49, %v6226_v34  ;;  %v16833_v57 = vpop.f32.mrb[55].mxu1  ;;  %v6212_v63 = vpop.f32.mrb[58].mxu0  ;;  %v6757_v49 = vld [vmem:[#allocation3 + $0xb8] sm:$0xff] }
 0x36b   : > { %v20680_v0 = vadd.f32 %v6212_v63, %v6073_v36  ;;  %v16822_v53 = vpop.f32.mrb[59].mxu0 }
 0x36c   : > { %v6401_v61 = vadd.f32 %v20611_v9, %v6385_v50  ;;  %v6828_v50 = vld [vmem:[#allocation3 + $0xd4] sm:$0xff] }
 0x36d   : > { %v6346_v16 = vpop.f32.mrb[56].mxu1 }
 0x36e   : > { %v6464_v58 = vadd.f32 %v6422_v11, %v6401_v61  ;;  %v6386_v41 = vadd.f32 %v6346_v16, %v6227_v20  ;;  %v16836_v27 = vpop.f32.mrb[57].mxu1  ;;  %v6217_v8 = vpop.f32.mrb[60].mxu0  ;;  %v6777_v61 = vmax.f32 %v6705_v28, %v6741_v44 }
 0x36f   : > { %v20683_v56 = vadd.f32 %v6217_v8, %v6074_v39  ;;  %v16825_v10 = vpop.f32.mrb[61].mxu0  ;;  %v6442_v39 = vpop.permute.xlu1 %6441  ;;  %v6740_v27 = vld [vmem:[#allocation3 + $0x30] sm:$0xff] }
 0x370   : > { %6473 = vst.msk [vmem:[#allocation3 + $0xea] sm:$0xff] %vm426_vm3, %v6464_v58  ;;  %v6402_v47 = vadd.f32 %v20611_v9, %v6386_v41  ;;  %v6793_v41 = vmax.f32 %v6721_v21, %v6757_v49  ;;  %v6812_v8 = vld [vmem:[#allocation3 + $0x54] sm:$0xff]  ;;  %v6447_v10 = vpop.permute.xlu0 %6446 }
 0x371   : > { %v6351_v6 = vpop.f32.mrb[58].mxu1 }
 0x372   : > { %v6465_v55 = vadd.f32 %v6427_v18, %v6402_v47  ;;  %v6387_v2 = vadd.f32 %v6351_v6, %v6228_v24  ;;  %v16839_v31 = vpop.f32.mrb[59].mxu1  ;;  %v6222_v17 = vpop.f32.mrb[62].mxu0  ;;  %v6776_v6 = vmax.f32 %v6704_v30, %v6740_v27  ;;  %v6742_v30 = vld [vmem:[#allocation3 + $0x40] sm:$0xff] }
 0x373   : > { %v20687_v35 = vadd.f32 %v6222_v17, %v6075_v3  ;;  %v16828_v43 = vpop.f32.mrb[63].mxu0 }
 0x374   : > { %6474 = vst.msk [vmem:[#allocation3 + $0xf2] sm:$0xff] %vm426_vm3, %v6465_v55  ;;  %v6403_v46 = vadd.f32 %v20611_v9, %v6387_v2  ;;  %v6849_v55 = vmax.f32 %v6777_v61, %v6813_v32  ;;  %v6814_v32 = vld [vmem:[#allocation3 + $0x64] sm:$0xff] }
 0x375   : > { %v6356_v37 = vpop.f32.mrb[60].mxu1 }
 0x376   : > { %v6466_v34 = vadd.f32 %v6432_v19, %v6403_v46  ;;  %v6388_v4 = vadd.f32 %v6356_v37, %v6229_v12  ;;  %v16842_v14 = vpop.f32.mrb[61].mxu1  ;;  %v6720_v12 = vld [vmem:[#allocation3 + $0xc2] sm:$0xff] }
 0x377   : > { %v6509_v42 = vld [vmem:[#allocation3 + $0xea] sm:$0xff]  ;;  %v6792_v53 = vmax.f32 %v6720_v12, %v6756_v45 }
 0x378   : > { %v6545_v23 = vld [vmem:[#allocation3 + $0xe9] sm:$0xff]  ;;  %6475 = vst.msk [vmem:[#allocation3 + $0xfa] sm:$0xff] %vm426_vm3, %v6466_v34  ;;  %v6404_v52 = vadd.f32 %v20611_v9, %v6388_v4 }
 0x379   : > { %v6616_v54 = vld [vmem:[#allocation3 + $0xe3] sm:$0xff]  ;;  %v6361_v51 = vpop.f32.mrb[62].mxu1  ;;  %v6581_v26 = vmax.f32 %v6509_v42, %v6545_v23  ;;  %v6864_v18 = vmax.f32 %v6792_v53, %v6828_v50  ;;  %v6722_v42 = vld [vmem:[#allocation3 + $0xd2] sm:$0xff]  ;;  %v6707_v23 = vld [vmem:[#allocation3 + $0x5a] sm:$0xff] }
 0x37a   : > { %v6652_v20 = vmax.f32 %v6580_v13, %v6616_v54  ;;  %v6467_v33 = vadd.f32 %v6437_v62, %v6404_v52  ;;  %v6389_v24 = vadd.f32 %v6361_v51, %v6230_v15  ;;  %v16845_v5 = vpop.f32.mrb[63].mxu1  ;;  %v6848_v13 = vmax.f32 %v6776_v6, %v6812_v8  ;;  %v6743_v54 = vld [vmem:[#allocation3 + $0x48] sm:$0xff]  ;;  %v6723_v51 = vld [vmem:[#allocation3 + $0xda] sm:$0xff] }
 0x37b   : > { %v6510_v22 = vld [vmem:[#allocation3 + $0xf2] sm:$0xff]  ;;  %v6779_v44 = vmax.f32 %v6707_v23, %v6743_v54 }
 0x37c   : > { %6688 = vst.msk [vmem:[#allocation3 + $0xe2] sm:$0xff] %vm426_vm3, %v6652_v20  ;;  %v6546_v29 = vld [vmem:[#allocation3 + $0xf1] sm:$0xff]  ;;  %6476 = vst.msk [vmem:[#allocation3 + $0x102] sm:$0xff] %vm426_vm3, %v6467_v33  ;;  %v6405_v7 = vadd.f32 %v20611_v9, %v6389_v24  ;;  %v6452_v20 = vpop.permute.xlu1 %6451  ;;  %v17720_v62 = vpack.c.bf16 %v6849_v55, %v6848_v13 }
 0x37d   : > { %v6617_v36 = vld [vmem:[#allocation3 + $0xeb] sm:$0xff]  ;;  %v6366_v60 = vpop.f32.mrb[64].mxu1  ;;  %v6582_v3 = vmax.f32 %v6510_v22, %v6546_v29  ;;  %v6758_v29 = vld [vmem:[#allocation3 + $0xc0] sm:$0xff] }
 0x37e   : > { %v6653_v38 = vmax.f32 %v6581_v26, %v6617_v36  ;;  %v6468_v15 = vadd.f32 %v6442_v39, %v6405_v7  ;;  %v6390_v25 = vadd.f32 %v6366_v60, %v20678_v40  ;;  %v16848_v48 = vpop.f32.mrb[65].mxu1  ;;  %v6815_v26 = vld [vmem:[#allocation3 + $0x6c] sm:$0xff]  ;;  %v6794_v28 = vmax.f32 %v6722_v42, %v6758_v29  ;;  %v18403_v60 = vld [vmem:[%s21786_s2] ss:$0 sm:$0xff] }
 0x37f   : > { %v6511_v57 = vld [vmem:[#allocation3 + $0xfa] sm:$0xff]  ;;  %v6851_v49 = vmax.f32 %v6779_v44, %v6815_v26  ;;  %v6744_v54 = vld [vmem:[#allocation3 + $0x50] sm:$0xff] }
 0x380   : > { %6689 = vst.msk [vmem:[#allocation3 + $0xea] sm:$0xff] %vm426_vm3, %v6653_v38  ;;  %v6547_v63 = vld [vmem:[#allocation3 + $0xf9] sm:$0xff]  ;;  %6477 = vst.msk [vmem:[#allocation3 + $0x10a] sm:$0xff] %vm426_vm3, %v6468_v15  ;;  %v6406_v58 = vadd.f32 %v20611_v9, %v6390_v25  ;;  %v6462_v6 = vpop.permute.xlu1 %6461 }
 0x381   : > { %v6618_v11 = vld [vmem:[#allocation3 + $0xf3] sm:$0xff]  ;;  %v6371_v47 = vpop.f32.mrb[66].mxu1  ;;  %v6583_v2 = vmax.f32 %v6511_v57, %v6547_v63 }
 0x382   : > { %v6654_v16 = vmax.f32 %v6582_v3, %v6618_v11  ;;  %v6469_v31 = vadd.f32 %v6447_v10, %v6406_v58  ;;  %v6391_v17 = vadd.f32 %v6371_v47, %v20680_v0  ;;  %v16851_v59 = vpop.f32.mrb[67].mxu1  ;;  %v6706_v0 = vld [vmem:[#allocation3 + $0x52] sm:$0xff]  ;;  %v6457_v3 = vpop.permute.xlu0 %6456  ;;  %v6708_v47 = vld [vmem:[#allocation3 + $0x62] sm:$0xff] }
 0x383   : > { %v6829_v40 = vld [vmem:[#allocation3 + $0xdc] sm:$0xff]  ;;  %v6778_v45 = vmax.f32 %v6706_v0, %v6742_v30 }
 0x384   : > { %6690 = vst.msk [vmem:[#allocation3 + $0xf2] sm:$0xff] %vm426_vm3, %v6654_v16  ;;  %v6865_v43 = vmax.f32 %v6793_v41, %v6829_v40  ;;  %v6512_v46 = vld [vmem:[#allocation3 + $0x102] sm:$0xff]  ;;  %6478 = vst.msk [vmem:[#allocation3 + $0x112] sm:$0xff] %vm426_vm3, %v6469_v31  ;;  %v6407_v4 = vadd.f32 %v20611_v9, %v6391_v17  ;;  %v6709_v40 = vld [vmem:[#allocation3 + $0x6a] sm:$0xff] }
 0x385   : > { %v6548_v19 = vld [vmem:[#allocation3 + $0x101] sm:$0xff]  ;;  %v6376_v52 = vpop.f32.mrb[68].mxu1  ;;  %v6850_v41 = vmax.f32 %v6778_v45, %v6814_v32 }
 0x386   : > { %v6619_v37 = vld [vmem:[#allocation3 + $0xfb] sm:$0xff]  ;;  %v17718_v14 = vpack.c.bf16 %v6865_v43, %v6864_v18  ;;  %v6584_v33 = vmax.f32 %v6512_v46, %v6548_v19  ;;  %v6470_v24 = vadd.f32 %v6452_v20, %v6407_v4  ;;  %v6392_v5 = vadd.f32 %v6376_v52, %v20683_v56  ;;  %v16854_v22 = vpop.f32.mrb[69].mxu1  ;;  %v6759_v9 = vld [vmem:[#allocation3 + $0xc8] sm:$0xff]  ;;  %v6760_v43 = vld [vmem:[#allocation3 + $0xd0] sm:$0xff] }
 0x387   : > { %v6655_v34 = vmax.f32 %v6583_v2, %v6619_v37  ;;  %v6830_v36 = vld [vmem:[#allocation3 + $0xe4] sm:$0xff]  ;;  %v6795_v56 = vmax.f32 %v6723_v51, %v6759_v9  ;;  %v6745_v18 = vld [vmem:[#allocation3 + $0x58] sm:$0xff]  ;;  %v17724_v55 = vpack.c.bf16 %v6851_v49, %v6850_v41 }
 0x388   : > { %17719 = vmatprep.subr.bf16.mxu0 %v17718_v14  ;;  %v6513_v38 = vld [vmem:[#allocation3 + $0x10a] sm:$0xff]  ;;  %6479 = vst.msk [vmem:[#allocation3 + $0x11a] sm:$0xff] %vm426_vm3, %v6470_v24  ;;  %v6408_v21 = vadd.f32 %v18403_v60, %v6392_v5  ;;  %v6866_v48 = vmax.f32 %v6794_v28, %v6830_v36  ;;  %v6724_v2 = vld [vmem:[#allocation3 + $0xe2] sm:$0xff]  ;;  %v6761_v46 = vld [vmem:[#allocation3 + $0xd8] sm:$0xff]  ;;  %v6781_v4 = vmax.f32 %v6709_v40, %v6745_v18 }
 0x389   : > { %6691 = vst.msk [vmem:[#allocation3 + $0xfa] sm:$0xff] %vm426_vm3, %v6655_v34  ;;  %v6549_v7 = vld [vmem:[#allocation3 + $0x109] sm:$0xff]  ;;  %17721 = vmatpush3.bf16.msra.mxu0 %v17720_v62  ;;  %v6381_v15 = vpop.f32.mrb[70].mxu1  ;;  %v6817_v17 = vld [vmem:[#allocation3 + $0x7c] sm:$0xff]  ;;  %v6796_v42 = vmax.f32 %v6724_v2, %v6760_v43  ;;  %v6816_v20 = vld [vmem:[#allocation3 + $0x74] sm:$0xff]  ;;  %v6780_v62 = vmax.f32 %v6708_v47, %v6744_v54 }
 0x38a   : > { %v6620_v12 = vld [vmem:[#allocation3 + $0x103] sm:$0xff]  ;;  %v6585_v50 = vmax.f32 %v6513_v38, %v6549_v7  ;;  %v6471_v57 = vadd.f32 %v6457_v3, %v6408_v21  ;;  %v6393_v63 = vadd.f32 %v6381_v15, %v20687_v35  ;;  %v16857_v11 = vpop.f32.mrb[71].mxu1  ;;  %v6853_v51 = vmax.f32 %v6781_v4, %v6817_v17  ;;  %v6710_v38 = vld [vmem:[#allocation3 + $0x72] sm:$0xff]  ;;  %v6711_v7 = vld [vmem:[#allocation3 + $0x7a] sm:$0xff] }
 0x38b   : > { %v6656_v39 = vmax.f32 %v6584_v33, %v6620_v12  ;;  %v6831_v25 = vld [vmem:[#allocation3 + $0xec] sm:$0xff]  ;;  %v6852_v29 = vmax.f32 %v6780_v62, %v6816_v20  ;;  %v6818_v11 = vld [vmem:[#allocation3 + $0x84] sm:$0xff]  ;;  %v6749_v18 = vld [vmem:[#allocation3 + $0x78] sm:$0xff] }
 0x38c   : > { %v6867_v53 = vmax.f32 %v6795_v56, %v6831_v25  ;;  %v6514_v61 = vld [vmem:[#allocation3 + $0x112] sm:$0xff]  ;;  %6480 = vst.msk [vmem:[#allocation3 + $0x122] sm:$0xff] %vm426_vm3, %v6471_v57  ;;  %v6409_v8 = vadd.f32 %v18403_v60, %v6393_v63  ;;  %v6725_v31 = vld [vmem:[#allocation3 + $0xea] sm:$0xff]  ;;  %v6762_v56 = vld [vmem:[#allocation3 + $0xe0] sm:$0xff] }
 0x38d   : > { %6692 = vst.msk [vmem:[#allocation3 + $0x102] sm:$0xff] %vm426_vm3, %v6656_v39  ;;  %v6550_v16 = vld [vmem:[#allocation3 + $0x111] sm:$0xff]  ;;  %v6797_v23 = vmax.f32 %v6725_v31, %v6761_v46  ;;  %v6747_v12 = vld [vmem:[#allocation3 + $0x68] sm:$0xff]  ;;  %v17728_v28 = vpack.c.bf16 %v6853_v51, %v6852_v29  ;;  %v6746_v63 = vld [vmem:[#allocation3 + $0x60] sm:$0xff] }
 0x38e   : > { %v6621_v58 = vld [vmem:[#allocation3 + $0x10b] sm:$0xff]  ;;  %v17722_v10 = vpack.c.bf16 %v6867_v53, %v6866_v48  ;;  %v6586_v35 = vmax.f32 %v6514_v61, %v6550_v16  ;;  %v6472_v59 = vadd.f32 %v6462_v6, %v6409_v8  ;;  %v6783_v48 = vmax.f32 %v6711_v7, %v6747_v12  ;;  %v6712_v31 = vld [vmem:[#allocation3 + $0x82] sm:$0xff]  ;;  %v6840_v29 = vld [vmem:[#allocation3 + $0x134] sm:$0xff] }
 0x38f   : > { %v6657_v27 = vmax.f32 %v6585_v50, %v6621_v58  ;;  %v6515_v37 = vld [vmem:[#allocation3 + $0x11a] sm:$0xff]  ;;  %v6726_v44 = vld [vmem:[#allocation3 + $0xf2] sm:$0xff]  ;;  %v6763_v30 = vld [vmem:[#allocation3 + $0xe8] sm:$0xff]  ;;  %v6782_v16 = vmax.f32 %v6710_v38, %v6746_v63 }
 0x390   : > { %17723 = vmatprep.subr.bf16.mxu0 %v17722_v10  ;;  %v6832_v19 = vld [vmem:[#allocation3 + $0xf4] sm:$0xff]  ;;  %6481 = vst.msk [vmem:[#allocation3 + $0x12a] sm:$0xff] %vm426_vm3, %v6472_v59  ;;  %v6819_v60 = vld [vmem:[#allocation3 + $0x8c] sm:$0xff]  ;;  %v6798_v50 = vmax.f32 %v6726_v44, %v6762_v56  ;;  %v6821_v59 = vld [vmem:[#allocation3 + $0x9c] sm:$0xff] }
 0x391   : > { %6693 = vst.msk [vmem:[#allocation3 + $0x10a] sm:$0xff] %vm426_vm3, %v6657_v27  ;;  %v6551_v13 = vld [vmem:[#allocation3 + $0x119] sm:$0xff]  ;;  %17725 = vmatpush3.bf16.msra.mxu0 %v17724_v55  ;;  %v6868_v26 = vmax.f32 %v6796_v42, %v6832_v19  ;;  %v6855_v58 = vmax.f32 %v6783_v48, %v6819_v60  ;;  %v6854_v10 = vmax.f32 %v6782_v16, %v6818_v11  ;;  %v6713_v40 = vld [vmem:[#allocation3 + $0x8a] sm:$0xff] }
 0x392   : > { %v6622_v34 = vld [vmem:[#allocation3 + $0x113] sm:$0xff]  ;;  %v6587_v0 = vmax.f32 %v6515_v37, %v6551_v13  ;;  %v6785_v37 = vmax.f32 %v6713_v40, %v6749_v18  ;;  %v6888_v63 = vld [vmem:[%s21790_s6 + $0x50] sm:$0xff]  ;;  %v6891_v16 = vld [vmem:[%s21790_s6 + $0x68] sm:$0xff] }
 0x393   : > { %v6658_v14 = vmax.f32 %v6586_v35, %v6622_v34  ;;  %v6623_v24 = vld [vmem:[#allocation3 + $0x11b] sm:$0xff]  ;;  %v17732_v6 = vpack.c.bf16 %v6855_v58, %v6854_v10  ;;  %v6764_v17 = vld [vmem:[#allocation3 + $0xf0] sm:$0xff]  ;;  %v6896_v18 = vld [vmem:[%s21790_s6 + $0x90] sm:$0xff] }
 0x394   : > { %v6833_v52 = vld [vmem:[#allocation3 + $0xfc] sm:$0xff]  ;;  %v6659_v9 = vmax.f32 %v6587_v0, %v6623_v24  ;;  %v6748_v35 = vld [vmem:[#allocation3 + $0x70] sm:$0xff] }
 0x395   : > { %6694 = vst.msk [vmem:[#allocation3 + $0x112] sm:$0xff] %vm426_vm3, %v6658_v14  ;;  %v6869_v33 = vmax.f32 %v6797_v23, %v6833_v52  ;;  %v6516_v5 = vld [vmem:[#allocation3 + $0x122] sm:$0xff]  ;;  %v6727_v39 = vld [vmem:[#allocation3 + $0xfa] sm:$0xff]  ;;  %v6784_v20 = vmax.f32 %v6712_v31, %v6748_v35  ;;  %v6857_v52 = vmax.f32 %v6785_v37, %v6821_v59  ;;  %v6881_v48 = vld [vmem:[%s21790_s6 + $0x18] sm:$0xff] }
 0x396   : > { %v6552_v22 = vld [vmem:[#allocation3 + $0x121] sm:$0xff]  ;;  %v6799_v57 = vmax.f32 %v6727_v39, %v6763_v30  ;;  %v6765_v46 = vld [vmem:[#allocation3 + $0xf8] sm:$0xff]  ;;  %v6889_v11 = vld [vmem:[%s21790_s6 + $0x58] sm:$0xff] }
 0x397   : > { %v17726_v36 = vpack.c.bf16 %v6869_v33, %v6868_v26  ;;  %v6588_v21 = vmax.f32 %v6516_v5, %v6552_v22  ;;  %6695 = vst.msk [vmem:[#allocation3 + $0x11a] sm:$0xff] %vm426_vm3, %v6659_v9  ;;  %v6517_v3 = vld [vmem:[#allocation3 + $0x12a] sm:$0xff]  ;;  %v6728_v55 = vld [vmem:[#allocation3 + $0x102] sm:$0xff]  ;;  %v6820_v14 = vld [vmem:[#allocation3 + $0x94] sm:$0xff] }
 0x398   : > { %v6834_v32 = vld [vmem:[#allocation3 + $0x104] sm:$0xff]  ;;  %v6800_v34 = vmax.f32 %v6728_v55, %v6764_v17  ;;  %v6841_v9 = vld [vmem:[#allocation3 + $0x13c] sm:$0xff]  ;;  %v6901_v10 = vld [vmem:[%s21790_s6 + $0xb8] sm:$0xff] }
 0x399   : > { %17727 = vmatprep.subr.bf16.mxu0 %v17726_v36  ;;  %v6553_v15 = vld [vmem:[#allocation3 + $0x129] sm:$0xff]  ;;  %v6870_v27 = vmax.f32 %v6798_v50, %v6834_v32  ;;  %v6766_v42 = vld [vmem:[#allocation3 + $0x100] sm:$0xff]  ;;  %v6856_v36 = vmax.f32 %v6784_v20, %v6820_v14  ;;  %v6886_v50 = vld [vmem:[%s21790_s6 + $0x40] sm:$0xff] }
 0x39a   : > { %v6624_v25 = vld [vmem:[#allocation3 + $0x123] sm:$0xff]  ;;  %17729 = vmatpush3.bf16.msra.mxu0 %v17728_v28  ;;  %v6589_v45 = vmax.f32 %v6517_v3, %v6553_v15  ;;  %v6625_v53 = vld [vmem:[#allocation3 + $0x12b] sm:$0xff]  ;;  %v6878_v3 = vld [vmem:[%s21790_s6] sm:$0xff] }
 0x39b   : > { %v6660_v49 = vmax.f32 %v6588_v21, %v6624_v25  ;;  %v6729_v2 = vld [vmem:[#allocation3 + $0x10a] sm:$0xff]  ;;  %v17736_v21 = vpack.c.bf16 %v6857_v52, %v6856_v36  ;;  %v6882_v25 = vld [vmem:[%s21790_s6 + $0x20] sm:$0xff]  ;;  %v6895_v58 = vld [vmem:[%s21790_s6 + $0x88] sm:$0xff] }
 0x39c   : > { %v6835_v61 = vld [vmem:[#allocation3 + $0x10c] sm:$0xff]  ;;  %v6661_v41 = vmax.f32 %v6589_v45, %v6625_v53  ;;  %v6801_v4 = vmax.f32 %v6729_v2, %v6765_v46  ;;  %v6899_v55 = vld [vmem:[%s21790_s6 + $0xa8] sm:$0xff]  ;;  %v14361_v2 = vld [vmem:[%s21787_s3 + $0x20] sm:$0xff] }
 0x39d   : > { %6696 = vst.msk [vmem:[#allocation3 + $0x122] sm:$0xff] %vm426_vm3, %v6660_v49  ;;  %v6871_v8 = vmax.f32 %v6799_v57, %v6835_v61  ;;  %v6730_v43 = vld [vmem:[#allocation3 + $0x112] sm:$0xff]  ;;  %v6767_v23 = vld [vmem:[#allocation3 + $0x108] sm:$0xff]  ;;  %v6883_v49 = vld [vmem:[%s21790_s6 + $0x28] sm:$0xff] }
 0x39e   : > { %6697 = vst.msk [vmem:[#allocation3 + $0x12a] sm:$0xff] %vm426_vm3, %v6661_v41  ;;  %v6836_v19 = vld [vmem:[#allocation3 + $0x114] sm:$0xff]  ;;  %v6802_v62 = vmax.f32 %v6730_v43, %v6766_v42  ;;  %v6884_v57 = vld [vmem:[%s21790_s6 + $0x30] sm:$0xff]  ;;  %v6887_v61 = vld [vmem:[%s21790_s6 + $0x48] sm:$0xff] }
 0x39f   : > { %v17730_v47 = vpack.c.bf16 %v6871_v8, %v6870_v27  ;;  %v6731_v13 = vld [vmem:[#allocation3 + $0x11a] sm:$0xff]  ;;  %v6768_v0 = vld [vmem:[#allocation3 + $0x110] sm:$0xff]  ;;  %v6872_v26 = vmax.f32 %v6800_v34, %v6836_v19  ;;  %v6892_v53 = vld [vmem:[%s21790_s6 + $0x70] sm:$0xff] }
 0x3a0   : > { %v6803_v24 = vmax.f32 %v6731_v13, %v6767_v23  ;;  %v6769_v5 = vld [vmem:[#allocation3 + $0x118] sm:$0xff]  ;;  %v6885_v45 = vld [vmem:[%s21790_s6 + $0x38] sm:$0xff]  ;;  %v14362_v31 = vld [vmem:[%s21787_s3 + $0x28] sm:$0xff] }
 0x3a1   : > { %17731 = vmatprep.subr.bf16.mxu0 %v17730_v47  ;;  %v6898_v41 = vld [vmem:[%s21790_s6 + $0xa0] sm:$0xff]  ;;  %v6893_v47 = vld [vmem:[%s21790_s6 + $0x78] sm:$0xff]  ;;  %v17746_v17 = vpack.c.bf16 %v14362_v31, %v14361_v2  ;;  %v14363_v35 = vld [vmem:[%s21787_s3 + $0x30] sm:$0xff] }
 0x3a2   : > { %17733 = vmatpush3.bf16.msra.mxu0 %v17732_v6  ;;  %v6890_v27 = vld [vmem:[%s21790_s6 + $0x60] sm:$0xff]  ;;  %v6897_v40 = vld [vmem:[%s21790_s6 + $0x98] sm:$0xff]  ;;  %v6900_v6 = vld [vmem:[%s21790_s6 + $0xb0] sm:$0xff] }
 0x3a3   : > { %v6894_v8 = vld [vmem:[%s21790_s6 + $0x80] sm:$0xff]  ;;  %v14364_v59 = vld [vmem:[%s21787_s3 + $0x38] sm:$0xff]  ;;  %v7202_v13 = vld [vmem:[%s21787_s3 + $0x8] sm:$0xff] }
 0x3a4   : > { %v6837_v54 = vld [vmem:[#allocation3 + $0x11c] sm:$0xff]  ;;  %v17750_v43 = vpack.c.bf16 %v14364_v59, %v14363_v35  ;;  %v7205_v46 = vld [vmem:[#allocation4 + $0x1] sm:$0xff] }
 0x3a5   : > { %v6732_v51 = vld [vmem:[#allocation3 + $0x122] sm:$0xff]  ;;  %v6873_v33 = vmax.f32 %v6801_v4, %v6837_v54  ;;  %v6839_v7 = vld [vmem:[#allocation3 + $0x12c] sm:$0xff]  ;;  %v7215_v19 = vmax.f32 %v7205_v46, 0.0  ;;  %v7201_v37 = vld [vmem:[%s21787_s3] sm:$0xff] }
 0x3a6   : > { %v6804_v22 = vmax.f32 %v6732_v51, %v6768_v0  ;;  %v6838_v38 = vld [vmem:[#allocation3 + $0x124] sm:$0xff]  ;;  %v6875_v39 = vmax.f32 %v6803_v24, %v6839_v7  ;;  %v17754_v34 = vpack.c.bf16 %v7202_v13, %v7201_v37 }
 0x3a7   : > { %v6733_v12 = vld [vmem:[#allocation3 + $0x12a] sm:$0xff]  ;;  %v17734_v28 = vpack.c.bf16 %v6873_v33, %v6872_v26  ;;  %v6874_v44 = vmax.f32 %v6802_v62, %v6838_v38 }
 0x3a8   : > { %v6805_v60 = vmax.f32 %v6733_v12, %v6769_v5  ;;  %v6876_v30 = vmax.f32 %v6804_v22, %v6840_v29  ;;  %v7181_v37 = vld [vmem:[#allocation4] sm:$0xff] }
 0x3a9   : > { %17735 = vmatprep.subr.bf16.mxu0 %v17734_v28  ;;  %v17738_v56 = vpack.c.bf16 %v6875_v39, %v6874_v44  ;;  %v7203_v28 = vld [vmem:[%s21787_s3 + $0x10] sm:$0xff]  ;;  %v7204_v44 = vld [vmem:[%s21787_s3 + $0x18] sm:$0xff] }
 0x3aa   : > { %v6877_v32 = vmax.f32 %v6805_v60, %v6841_v9  ;;  %17737 = vmatpush3.bf16.msra.mxu0 %v17736_v21 }
 0x3ab   : > { %17739 = vmatprep.subr.bf16.mxu1 %v17738_v56 }
 0x3ac   : > { %v17742_v15 = vpack.c.bf16 %v6877_v32, %v6876_v30  ;;  %17741 = vmatpush3.bf16.msra.mxu1 %v17738_v56 }
 0x3ad   : > { %6991 = vmatmul.mubr.f32.vlgmr.msra.gmra.mrb[64].mxu0 %v6878_v3 }
 0x3ae   : > { %17743 = vmatprep.subr.bf16.mxu1 %v17742_v15  ;;  %6995 = vmatprep.mubr.f32.mxu0 %v6882_v25 }
 0x3b0   : > { %17745 = vmatpush3.bf16.msra.mxu1 %v17742_v15 }
 0x3b1   : > { %6996 = vmatmul.mubr.f32.gmra.mrb[66].mxu0 %v6881_v48  ;;  %17747 = vmatprep.subr.bf16.mxu1 %v17746_v17  ;;  %v17758_v48 = vpack.c.bf16 %v7204_v44, %v7203_v28 }
 0x3b2   : > { %7000 = vmatprep.mubr.f32.mxu0 %v6885_v45 }
 0x3b3   : > { %16867 = vmatmul.mubr.msk.f32.vlgmr.msra.gmra.mrb[72].mxu1 %vm426_vm3, %v6883_v49  ;;  %v14385_v49 = vld [vmem:[%s21787_s3 + $0x40] sm:$0xff] }
 0x3b4   : > { %16869 = vmatprep.mubr.msk.f32.mxu1 %vm426_vm3, %v6886_v50  ;;  %17749 = vmatpush3.bf16.msra.mxu1 %v17746_v17  ;;  %v14386_v50 = vld [vmem:[%s21787_s3 + $0x48] sm:$0xff] }
 0x3b5   : > { %7001 = vmatmul.mubr.f32.gmra.mrb[68].mxu0 %v6884_v57  ;;  %17751 = vmatprep.subr.bf16.mxu1 %v17750_v43 }
 0x3b6   : > { %7005 = vmatprep.mubr.f32.mxu0 %v6888_v63 }
 0x3b7   : > { %16870 = vmatmul.mubr.msk.f32.gmra.mrb[74].mxu1 %vm426_vm3, %v6889_v11 }
 0x3b8   : > { %16872 = vmatprep.mubr.msk.f32.mxu1 %vm426_vm3, %v6892_v53  ;;  %17753 = vmatpush3.bf16.msra.mxu1 %v17750_v43 }
 0x3b9   : > { %7006 = vmatmul.mubr.f32.gmra.mrb[70].mxu0 %v6887_v61  ;;  %17755 = vmatprep.subr.bf16.mxu1 %v17754_v34 }
 0x3ba   : > { %7010 = vmatprep.mubr.f32.mxu0 %v6891_v16 }
 0x3bb   : > { %16873 = vmatmul.mubr.msk.f32.gmra.mrb[76].mxu1 %vm426_vm3, %v6895_v58 }
 0x3bc   : > { %16875 = vmatprep.mubr.msk.f32.mxu1 %vm426_vm3, %v6898_v41 }
 0x3bd   : > { %7011 = vmatmul.mubr.f32.gmra.mrb[72].mxu0 %v6890_v27  ;;  %v17762_v27 = vpack.c.bf16 %v14386_v50, %v14385_v49 }
 0x3be   : > { %7015 = vmatprep.mubr.f32.mxu0 %v6894_v8 }
 0x3bf   : > { %16876 = vmatmul.mubr.msk.f32.gmra.mrb[78].mxu1 %vm426_vm3, %v6901_v10 }
 0x3c0   : > { %16886 = vmatprep.mubr.msk.f32.mxu1 %vm426_vm3, %v7215_v19 }
 0x3c1   : > { %7016 = vmatmul.mubr.f32.gmra.mrb[74].mxu0 %v6893_v47 }
 0x3c2   : > { %7020 = vmatprep.mubr.f32.mxu0 %v6897_v40 }
 0x3c5   : > { %7021 = vmatmul.mubr.f32.gmra.mrb[76].mxu0 %v6896_v18 }
 0x3c6   : > { %7025 = vmatprep.mubr.f32.mxu0 %v6900_v6 }
 0x3c9   : > { %7026 = vmatmul.mubr.f32.gmra.mrb[78].mxu0 %v6899_v55 }
 0x480   : > { %v15274_v4 = vpop.f32.mrb[64].mxu0 }
 0x481   : > { %v15275_v14 = vpop.f32.mrb[65].mxu0 }
 0x482   : > { %v15276_v42 = vadd.f32 %v15275_v14, %v15274_v4  ;;  %v7191_v14 = vmax.f32 %v7181_v37, 0.0 }
 0x484   : > { %v15277_v23 = vpop.f32.mrb[66].mxu0 }
 0x485   : > { %v15278_v54 = vpop.f32.mrb[67].mxu0 }
 0x486   : > { %v16868_v20 = vpop.f32.mrb[72].mxu1  ;;  %v15279_v52 = vadd.f32 %v15278_v54, %v15277_v23  ;;  %v14387_v23 = vld [vmem:[%s21787_s3 + $0x50] sm:$0xff]  ;;  %v14388_v54 = vld [vmem:[%s21787_s3 + $0x58] sm:$0xff] }
 0x487   : > { %v7097_v62 = vpop.f32.mrb[73].mxu1 }
 0x488   : > { %v7103_v51 = vadd.f32 %v16868_v20, %v15279_v52  ;;  %v7098_v0 = vadd.f32 %v15276_v42, %v7097_v62  ;;  %v15280_v26 = vpop.f32.mrb[68].mxu0  ;;  %v17766_v62 = vpack.c.bf16 %v14388_v54, %v14387_v23 }
 0x489   : > { %v15281_v33 = vpop.f32.mrb[69].mxu0 }
 0x48a   : > { %7164 = vst.msk [vmem:[#allocation4 + $0x15] sm:$0xff] %vm426_vm3, %v7103_v51  ;;  %7163 = vst.msk [vmem:[#allocation4 + $0xb] sm:$0xff] %vm426_vm3, %v7098_v0  ;;  %v15282_v24 = vadd.f32 %v15281_v33, %v15280_v26  ;;  %v16871_v5 = vpop.f32.mrb[74].mxu1  ;;  %v14399_v26 = vld [vmem:[%s21787_s3 + $0x60] sm:$0xff]  ;;  %v14400_v33 = vld [vmem:[%s21787_s3 + $0x68] sm:$0xff] }
 0x48b   : > { %v7107_v22 = vpop.f32.mrb[75].mxu1 }
 0x48c   : > { %v7108_v29 = vadd.f32 %v15282_v24, %v7107_v22  ;;  %v15283_v9 = vpop.f32.mrb[70].mxu0  ;;  %v17770_v22 = vpack.c.bf16 %v14400_v33, %v14399_v26 }
 0x48d   : > { %v15284_v36 = vpop.f32.mrb[71].mxu0 }
 0x48e   : > { %7165 = vst.msk [vmem:[#allocation4 + $0x1f] sm:$0xff] %vm426_vm3, %v7108_v29  ;;  %v15285_v38 = vadd.f32 %v15284_v36, %v15283_v9  ;;  %v16874_v7 = vpop.f32.mrb[76].mxu1 }
 0x48f   : > { %v7117_v12 = vpop.f32.mrb[77].mxu1 }
 0x490   : > { %v7113_v39 = vadd.f32 %v16871_v5, %v15285_v38  ;;  %v15286_v60 = vpop.f32.mrb[72].mxu0 }
 0x491   : > { %v15287_v21 = vpop.f32.mrb[73].mxu0  ;;  %v7206_v56 = vld [vmem:[#allocation4 + $0x9] sm:$0xff]  ;;  %v7207_v30 = vld [vmem:[#allocation4 + $0x11] sm:$0xff] }
 0x492   : > { %7166 = vst.msk [vmem:[#allocation4 + $0x29] sm:$0xff] %vm426_vm3, %v7113_v39  ;;  %v15288_v32 = vadd.f32 %v15287_v21, %v15286_v60  ;;  %v7216_v3 = vmax.f32 %v7206_v56, 0.0  ;;  %v16877_v15 = vpop.f32.mrb[78].mxu1  ;;  %v7217_v25 = vmax.f32 %v7207_v30, 0.0  ;;  %v7182_v42 = vld [vmem:[#allocation4 + $0x8] sm:$0xff]  ;;  %v7183_v20 = vld [vmem:[#allocation4 + $0x10] sm:$0xff] }
 0x493   : > { %v7127_v45 = vpop.f32.mrb[79].mxu1  ;;  %v7192_v52 = vmax.f32 %v7182_v42, 0.0  ;;  %v7193_v51 = vmax.f32 %v7183_v20, 0.0  ;;  %v7520_v39 = vld [vmem:[#allocation4 + $0x2] sm:$0xff] }
 0x494   : > { %v15289_v57 = vpop.f32.mrb[74].mxu0  ;;  %v7118_v63 = vadd.f32 %v15288_v32, %v7117_v12  ;;  %16887 = vmatmul.mubr.msk.f32.vlgmr.msra.gmra.mrb[80].mxu1 %vm426_vm3, %v7216_v3  ;;  %v7530_v56 = vmax.f32 %v7520_v39, 0.0  ;;  %v7521_v32 = vld [vmem:[#allocation4 + $0xa] sm:$0xff]  ;;  %v14401_v3 = vld [vmem:[%s21787_s3 + $0x70] sm:$0xff] }
 0x495   : > { %v15290_v11 = vpop.f32.mrb[75].mxu0  ;;  %16889 = vmatprep.mubr.msk.f32.mxu1 %vm426_vm3, %v7217_v25  ;;  %v7208_v53 = vld [vmem:[#allocation4 + $0x19] sm:$0xff]  ;;  %v7209_v61 = vld [vmem:[#allocation4 + $0x21] sm:$0xff]  ;;  %17757 = vmatpush3.bf16.msra.mxu1 %v17754_v34 }
 0x496   : > { %v15291_v16 = vadd.f32 %v15290_v11, %v15289_v57  ;;  %7167 = vst.msk [vmem:[#allocation4 + $0x33] sm:$0xff] %vm426_vm3, %v7118_v63  ;;  %v7218_v58 = vmax.f32 %v7208_v53, 0.0  ;;  %v7219_v41 = vmax.f32 %v7209_v61, 0.0  ;;  %17759 = vmatprep.subr.bf16.mxu1 %v17758_v48  ;;  %v7184_v0 = vld [vmem:[#allocation4 + $0x18] sm:$0xff]  ;;  %v7185_v24 = vld [vmem:[#allocation4 + $0x20] sm:$0xff]  ;;  %v14413_v57 = vld [vmem:[%s21787_s3 + $0x80] sm:$0xff] }
 0x497   : > { %v7194_v5 = vmax.f32 %v7184_v0, 0.0  ;;  %v7195_v29 = vmax.f32 %v7185_v24, 0.0  ;;  %v7522_v25 = vld [vmem:[#allocation4 + $0x12] sm:$0xff]  ;;  %v7523_v50 = vld [vmem:[#allocation4 + $0x1a] sm:$0xff] }
 0x498   : > { %v7123_v8 = vadd.f32 %v16874_v7, %v15291_v16  ;;  %v15292_v10 = vpop.f32.mrb[76].mxu0  ;;  %16890 = vmatmul.mubr.msk.f32.gmra.mrb[82].mxu1 %vm426_vm3, %v7218_v58  ;;  %v7532_v49 = vmax.f32 %v7522_v25, 0.0  ;;  %v14414_v63 = vld [vmem:[%s21787_s3 + $0x88] sm:$0xff]  ;;  %v7533_v53 = vmax.f32 %v7523_v50, 0.0 }
 0x499   : > { %v15293_v47 = vpop.f32.mrb[77].mxu0  ;;  %16892 = vmatprep.mubr.msk.f32.mxu1 %vm426_vm3, %v7219_v41  ;;  %v7210_v40 = vld [vmem:[#allocation4 + $0x29] sm:$0xff]  ;;  %17761 = vmatpush3.bf16.msra.mxu1 %v17758_v48  ;;  %v7531_v48 = vmax.f32 %v7521_v32, 0.0  ;;  %v17778_v61 = vpack.c.bf16 %v14414_v63, %v14413_v57 }
 0x49a   : > { %7168 = vst.msk [vmem:[#allocation4 + $0x3d] sm:$0xff] %vm426_vm3, %v7123_v8  ;;  %v15294_v18 = vadd.f32 %v15293_v47, %v15292_v10  ;;  %v7220_v6 = vmax.f32 %v7210_v40, 0.0  ;;  %17763 = vmatprep.subr.bf16.mxu1 %v17762_v27  ;;  %v7186_v9 = vld [vmem:[#allocation4 + $0x28] sm:$0xff] }
 0x49b   : > { %v7196_v38 = vmax.f32 %v7186_v9, 0.0  ;;  %v7524_v11 = vld [vmem:[#allocation4 + $0x22] sm:$0xff]  ;;  %v7525_v58 = vld [vmem:[#allocation4 + $0x2a] sm:$0xff] }
 0x49c   : > { %v7128_v55 = vadd.f32 %v15294_v18, %v7127_v45  ;;  %16893 = vmatmul.mubr.msk.f32.gmra.mrb[84].mxu1 %vm426_vm3, %v7220_v6  ;;  %v15295_v2 = vpop.f32.mrb[78].mxu0  ;;  %v7534_v16 = vmax.f32 %v7524_v11, 0.0  ;;  %v7883_v20 = vld [vmem:[#allocation4 + $0x23] sm:$0xff] }
 0x49d   : > { %v7211_v31 = vld [vmem:[#allocation4 + $0x31] sm:$0xff]  ;;  %v15296_v17 = vpop.f32.mrb[79].mxu0  ;;  %v7893_v0 = vmax.f32 %v7883_v20, 0.0  ;;  %v8063_v25 = vld [vmem:[#allocation4 + $0x24] sm:$0xff] }
 0x49e   : > { %7169 = vst.msk [vmem:[#allocation4 + $0x47] sm:$0xff] %vm426_vm3, %v7128_v55  ;;  %v7221_v35 = vmax.f32 %v7211_v31, 0.0  ;;  %v15297_v59 = vadd.f32 %v15296_v17, %v15295_v2  ;;  %v7187_v36 = vld [vmem:[#allocation4 + $0x30] sm:$0xff]  ;;  %v14415_v2 = vld [vmem:[%s21787_s3 + $0x90] sm:$0xff]  ;;  %v14416_v31 = vld [vmem:[%s21787_s3 + $0x98] sm:$0xff]  ;;  %v8073_v50 = vmax.f32 %v8063_v25, 0.0 }
 0x49f   : > { %v7197_v7 = vmax.f32 %v7187_v36, 0.0  ;;  %v7526_v41 = vld [vmem:[#allocation4 + $0x32] sm:$0xff]  ;;  %v17782_v17 = vpack.c.bf16 %v14416_v31, %v14415_v2  ;;  %v8609_v25 = vld [vmem:[#allocation4 + $0x5e] sm:$0xff] }
 0x4a0   : > { %16895 = vmatprep.mubr.msk.f32.mxu1 %vm426_vm3, %v7221_v35  ;;  %v7133_v43 = vadd.f32 %v16877_v15, %v15297_v59  ;;  %v14402_v15 = vld [vmem:[%s21787_s3 + $0x78] sm:$0xff]  ;;  %v7536_v8 = vmax.f32 %v7526_v41, 0.0  ;;  %v14427_v35 = vld [vmem:[%s21787_s3 + $0xa0] sm:$0xff]  ;;  %v14428_v59 = vld [vmem:[%s21787_s3 + $0xa8] sm:$0xff] }
 0x4a1   : > { %v7212_v46 = vld [vmem:[#allocation4 + $0x39] sm:$0xff]  ;;  %v17774_v45 = vpack.c.bf16 %v14402_v15, %v14401_v3 }
 0x4a2   : > { %v7222_v19 = vmax.f32 %v7212_v46, 0.0  ;;  %7170 = vst.msk [vmem:[#allocation4 + $0x51] sm:$0xff] %vm426_vm3, %v7133_v43  ;;  %v7188_v12 = vld [vmem:[#allocation4 + $0x38] sm:$0xff]  ;;  %v17786_v43 = vpack.c.bf16 %v14428_v59, %v14427_v35 }
 0x4a3   : > { %v7198_v44 = vmax.f32 %v7188_v12, 0.0  ;;  %v7527_v10 = vld [vmem:[#allocation4 + $0x3a] sm:$0xff] }
 0x4a4   : > { %16896 = vmatmul.mubr.msk.f32.gmra.mrb[86].mxu1 %vm426_vm3, %v7222_v19  ;;  %v7537_v40 = vmax.f32 %v7527_v10, 0.0  ;;  %v7880_v19 = vld [vmem:[#allocation4 + $0xb] sm:$0xff]  ;;  %v7885_v24 = vld [vmem:[#allocation4 + $0x33] sm:$0xff]  ;;  %v8425_v20 = vld [vmem:[#allocation4 + $0x3d] sm:$0xff] }
 0x4a5   : > { %v7213_v1 = vld [vmem:[#allocation4 + $0x41] sm:$0xff]  ;;  %v7214_v13 = vld [vmem:[#allocation4 + $0x49] sm:$0xff]  ;;  %v8065_v11 = vld [vmem:[#allocation4 + $0x34] sm:$0xff] }
 0x4a6   : > { %v7223_v34 = vmax.f32 %v7213_v1, 0.0  ;;  %v7224_v4 = vmax.f32 %v7214_v13, 0.0  ;;  %v7189_v28 = vld [vmem:[#allocation4 + $0x40] sm:$0xff]  ;;  %v7190_v21 = vld [vmem:[#allocation4 + $0x48] sm:$0xff]  ;;  %v7890_v1 = vmax.f32 %v7880_v19, 0.0  ;;  %v7881_v13 = vld [vmem:[#allocation4 + $0x13] sm:$0xff] }
 0x4a7   : > { %v7199_v60 = vmax.f32 %v7189_v28, 0.0  ;;  %v7200_v30 = vmax.f32 %v7190_v21, 0.0  ;;  %v7528_v47 = vld [vmem:[#allocation4 + $0x42] sm:$0xff]  ;;  %v7891_v42 = vmax.f32 %v7881_v13, 0.0  ;;  %v8060_v28 = vld [vmem:[#allocation4 + $0xc] sm:$0xff]  ;;  %v14470_v2 = vld [vmem:[%s21787_s3 + $0x108] sm:$0xff] }
 0x4a8   : > { %16898 = vmatprep.mubr.msk.f32.mxu1 %vm426_vm3, %v7223_v34  ;;  %v7538_v18 = vmax.f32 %v7528_v47, 0.0  ;;  %v14429_v34 = vld [vmem:[%s21787_s3 + $0xb0] sm:$0xff]  ;;  %v8070_v39 = vmax.f32 %v8060_v28, 0.0  ;;  %v8420_v59 = vld [vmem:[#allocation4 + $0x15] sm:$0xff] }
 0x4a9   : > { %16899 = vmatmul.mubr.msk.f32.gmra.mrb[88].mxu1 %vm426_vm3, %v7224_v4  ;;  %v7529_v6 = vld [vmem:[#allocation4 + $0x4a] sm:$0xff]  ;;  %v7709_v46 = vld [vmem:[#allocation4 + $0x52] sm:$0xff]  ;;  %v14443_v21 = vld [vmem:[%s21787_s3 + $0xd0] sm:$0xff] }
 0x4aa   : > { %16909 = vmatprep.mubr.msk.f32.mxu1 %vm426_vm3, %v7191_v14  ;;  %v7539_v55 = vmax.f32 %v7529_v6, 0.0  ;;  %v7719_v37 = vmax.f32 %v7709_v46, 0.0  ;;  %v14430_v4 = vld [vmem:[%s21787_s3 + $0xb8] sm:$0xff]  ;;  %v7882_v14 = vld [vmem:[#allocation4 + $0x1b] sm:$0xff]  ;;  %v7889_v12 = vld [vmem:[#allocation4 + $0x53] sm:$0xff] }
 0x4ab   : > { %v17790_v23 = vpack.c.bf16 %v14430_v4, %v14429_v34  ;;  %v7892_v54 = vmax.f32 %v7882_v14, 0.0  ;;  %v7887_v9 = vld [vmem:[#allocation4 + $0x43] sm:$0xff]  ;;  %v7888_v36 = vld [vmem:[#allocation4 + $0x4b] sm:$0xff]  ;;  %v8069_v10 = vld [vmem:[#allocation4 + $0x54] sm:$0xff] }
 0x4ac   : > { %v8068_v41 = vld [vmem:[#allocation4 + $0x4c] sm:$0xff]  ;;  %v8079_v47 = vmax.f32 %v8069_v10, 0.0  ;;  %v8421_v46 = vld [vmem:[#allocation4 + $0x1d] sm:$0xff]  ;;  %v21020_v10 = vpop.permute.xlu1 %8804 }
 0x4ad   : > { %16910 = vmatmul.mubr.msk.f32.vlgmr.msra.gmra.mrb[80].mxu1 %vm426_vm3, %v7192_v52  ;;  %v14441_v52 = vld [vmem:[%s21787_s3 + $0xc0] sm:$0xff]  ;;  %v14471_v19 = vld [vmem:[%s21787_s3 + $0x110] sm:$0xff]  ;;  %v8431_v13 = vmax.f32 %v8421_v46, 0.0 }
 0x4ae   : > { %16912 = vmatprep.mubr.msk.f32.mxu1 %vm426_vm3, %v7193_v51  ;;  %17765 = vmatpush3.bf16.msra.mxu1 %v17762_v27  ;;  %v7535_v27 = vmax.f32 %v7525_v58, 0.0  ;;  %v7884_v51 = vld [vmem:[#allocation4 + $0x2b] sm:$0xff] }
 0x4af   : > { %17767 = vmatprep.subr.bf16.mxu1 %v17766_v62  ;;  %v7894_v33 = vmax.f32 %v7884_v51, 0.0  ;;  %v8067_v58 = vld [vmem:[#allocation4 + $0x44] sm:$0xff]  ;;  %v8423_v14 = vld [vmem:[#allocation4 + $0x2d] sm:$0xff] }
 0x4b0   : > { %v8603_v28 = vld [vmem:[#allocation4 + $0x2e] sm:$0xff] }
 0x4b1   : > { %16913 = vmatmul.mubr.msk.f32.gmra.mrb[82].mxu1 %vm426_vm3, %v7194_v5  ;;  %v7886_v5 = vld [vmem:[#allocation4 + $0x3b] sm:$0xff] }
 0x4b2   : > { %16915 = vmatprep.mubr.msk.f32.mxu1 %vm426_vm3, %v7195_v29  ;;  %17769 = vmatpush3.bf16.msra.mxu1 %v17766_v62  ;;  %v14442_v62 = vld [vmem:[%s21787_s3 + $0xc8] sm:$0xff]  ;;  %v7896_v29 = vmax.f32 %v7886_v5, 0.0 }
 0x4b3   : > { %17771 = vmatprep.subr.bf16.mxu1 %v17770_v22  ;;  %v17794_v26 = vpack.c.bf16 %v14442_v62, %v14441_v52  ;;  %v8426_v52 = vld [vmem:[#allocation4 + $0x45] sm:$0xff]  ;;  %v8435_v62 = vmax.f32 %v8425_v20, 0.0 }
 0x4b4   : > { %v8436_v51 = vmax.f32 %v8426_v52, 0.0  ;;  %v14486_v52 = vld [vmem:[%s21787_s3 + $0x130] sm:$0xff] }
 0x4b5   : > { %16916 = vmatmul.mubr.msk.f32.gmra.mrb[84].mxu1 %vm426_vm3, %v7196_v38  ;;  %v7897_v38 = vmax.f32 %v7887_v9, 0.0 }
 0x4b6   : > { %16918 = vmatprep.mubr.msk.f32.mxu1 %vm426_vm3, %v7197_v7  ;;  %v7898_v7 = vmax.f32 %v7888_v36, 0.0  ;;  %v8601_v36 = vld [vmem:[#allocation4 + $0x1e] sm:$0xff] }
 0x4b9   : > { %16919 = vmatmul.mubr.msk.f32.gmra.mrb[86].mxu1 %vm426_vm3, %v7198_v44  ;;  %v7899_v44 = vmax.f32 %v7889_v12, 0.0 }
 0x4ba   : > { %16921 = vmatprep.mubr.msk.f32.mxu1 %vm426_vm3, %v7199_v60  ;;  %v8061_v60 = vld [vmem:[#allocation4 + $0x14] sm:$0xff] }
 0x4bb   : > { %v8071_v32 = vmax.f32 %v8061_v60, 0.0 }
 0x4bd   : > { %16922 = vmatmul.mubr.msk.f32.gmra.mrb[88].mxu1 %vm426_vm3, %v7200_v30  ;;  %v8062_v30 = vld [vmem:[#allocation4 + $0x1c] sm:$0xff] }
 0x4be   : > { %16932 = vmatprep.mubr.msk.f32.mxu1 %vm426_vm3, %v7530_v56  ;;  %v14444_v56 = vld [vmem:[%s21787_s3 + $0xd8] sm:$0xff]  ;;  %v8072_v15 = vmax.f32 %v8062_v30, 0.0 }
 0x4bf   : > { %v17798_v3 = vpack.c.bf16 %v14444_v56, %v14443_v21  ;;  %v8605_v21 = vld [vmem:[#allocation4 + $0x3e] sm:$0xff]  ;;  %v8606_v56 = vld [vmem:[#allocation4 + $0x46] sm:$0xff] }
 0x4c0   : > { %v8615_v30 = vmax.f32 %v8605_v21, 0.0 }
 0x4c1   : > { %16933 = vmatmul.mubr.msk.f32.vlgmr.msra.gmra.mrb[80].mxu1 %vm426_vm3, %v7531_v48 }
 0x4c2   : > { %16935 = vmatprep.mubr.msk.f32.mxu1 %vm426_vm3, %v7532_v49  ;;  %17773 = vmatpush3.bf16.msra.mxu1 %v17770_v22  ;;  %v7895_v22 = vmax.f32 %v7885_v24, 0.0 }
 0x4c3   : > { %17775 = vmatprep.subr.bf16.mxu1 %v17774_v45 }
 0x4c5   : > { %16936 = vmatmul.mubr.msk.f32.gmra.mrb[82].mxu1 %vm426_vm3, %v7533_v53 }
 0x4c6   : > { %16938 = vmatprep.mubr.msk.f32.mxu1 %vm426_vm3, %v7534_v16  ;;  %17777 = vmatpush3.bf16.msra.mxu1 %v17774_v45  ;;  %v14456_v45 = vld [vmem:[%s21787_s3 + $0xe8] sm:$0xff] }
 0x4c7   : > { %17779 = vmatprep.subr.bf16.mxu1 %v17778_v61 }
 0x4c9   : > { %16939 = vmatmul.mubr.msk.f32.gmra.mrb[84].mxu1 %vm426_vm3, %v7535_v27 }
 0x4ca   : > { %16941 = vmatprep.mubr.msk.f32.mxu1 %vm426_vm3, %v7536_v8 }
 0x4cd   : > { %16942 = vmatmul.mubr.msk.f32.gmra.mrb[86].mxu1 %vm426_vm3, %v7537_v40 }
 0x4ce   : > { %16944 = vmatprep.mubr.msk.f32.mxu1 %vm426_vm3, %v7538_v18 }
 0x4d1   : > { %16945 = vmatmul.mubr.msk.f32.gmra.mrb[88].mxu1 %vm426_vm3, %v7539_v55 }
 0x4d2   : > { %16955 = vmatprep.mubr.msk.f32.mxu1 %vm426_vm3, %v7531_v48  ;;  %v14455_v48 = vld [vmem:[%s21787_s3 + $0xe0] sm:$0xff] }
 0x4d3   : > { %v17802_v57 = vpack.c.bf16 %v14456_v45, %v14455_v48 }
 0x4d5   : > { %16956 = vmatmul.mubr.msk.f32.vlgmr.msra.gmra.mrb[80].mxu1 %vm426_vm3, %v7532_v49  ;;  %v8064_v49 = vld [vmem:[#allocation4 + $0x2c] sm:$0xff] }
 0x4d6   : > { %16958 = vmatprep.mubr.msk.f32.mxu1 %vm426_vm3, %v7533_v53  ;;  %17781 = vmatpush3.bf16.msra.mxu1 %v17778_v61  ;;  %v8074_v63 = vmax.f32 %v8064_v49, 0.0  ;;  %v8066_v53 = vld [vmem:[#allocation4 + $0x3c] sm:$0xff]  ;;  %v8075_v61 = vmax.f32 %v8065_v11, 0.0  ;;  %v8619_v49 = vmax.f32 %v8609_v25, 0.0 }
 0x4d7   : > { %17783 = vmatprep.subr.bf16.mxu1 %v17782_v17  ;;  %v14490_v11 = vld [vmem:[%s21787_s3 + $0x150] sm:$0xff] }
 0x4d9   : > { %16959 = vmatmul.mubr.msk.f32.gmra.mrb[82].mxu1 %vm426_vm3, %v7534_v16  ;;  %v8076_v16 = vmax.f32 %v8066_v53, 0.0  ;;  %v14491_v53 = vld [vmem:[%s21787_s3 + $0x158] sm:$0xff] }
 0x4da   : > { %16961 = vmatprep.mubr.msk.f32.mxu1 %vm426_vm3, %v7535_v27  ;;  %17785 = vmatpush3.bf16.msra.mxu1 %v17782_v17  ;;  %v8077_v27 = vmax.f32 %v8067_v58, 0.0  ;;  %v8249_v17 = vld [vmem:[#allocation4 + $0x5c] sm:$0xff] }
 0x4db   : > { %17787 = vmatprep.subr.bf16.mxu1 %v17786_v43  ;;  %v8259_v35 = vmax.f32 %v8249_v17, 0.0 }
 0x4dd   : > { %16962 = vmatmul.mubr.msk.f32.gmra.mrb[84].mxu1 %vm426_vm3, %v7536_v8  ;;  %v8078_v8 = vmax.f32 %v8068_v41, 0.0  ;;  %v14484_v41 = vld [vmem:[%s21787_s3 + $0x120] sm:$0xff] }
 0x4de   : > { %16964 = vmatprep.mubr.msk.f32.mxu1 %vm426_vm3, %v7537_v40  ;;  %v14457_v40 = vld [vmem:[%s21787_s3 + $0xf0] sm:$0xff] }
 0x4e1   : > { %16965 = vmatmul.mubr.msk.f32.gmra.mrb[86].mxu1 %vm426_vm3, %v7538_v18  ;;  %v14458_v18 = vld [vmem:[%s21787_s3 + $0xf8] sm:$0xff] }
 0x4e2   : > { %16967 = vmatprep.mubr.msk.f32.mxu1 %vm426_vm3, %v7539_v55  ;;  %v17806_v6 = vpack.c.bf16 %v14458_v18, %v14457_v40  ;;  %v14469_v55 = vld [vmem:[%s21787_s3 + $0x100] sm:$0xff]  ;;  %v21027_v18 = vpop.permute.xlu1 %8814 }
 0x4e3   : > { %v17810_v31 = vpack.c.bf16 %v14470_v2, %v14469_v55  ;;  %v14483_v40 = vld [vmem:[%s21788_s4] ss:$0 sm:$0xff] }
 0x4e5   : > { %16968 = vmatmul.mubr.msk.f32.gmra.mrb[88].mxu1 %vm426_vm3, %v7719_v37  ;;  %v14472_v37 = vld [vmem:[%s21787_s3 + $0x118] sm:$0xff] }
 0x4e6   : > { %16978 = vmatprep.mubr.msk.f32.mxu1 %vm426_vm3, %v7890_v1  ;;  %v8422_v1 = vld [vmem:[#allocation4 + $0x25] sm:$0xff]  ;;  %v17814_v34 = vpack.c.bf16 %v14472_v37, %v14471_v19  ;;  %v21034_v37 = vpop.permute.xlu1 %8824 }
 0x4e7   : > { %v8432_v4 = vmax.f32 %v8422_v1, 0.0 }
 0x4e9   : > { %16979 = vmatmul.mubr.msk.f32.vlgmr.msra.gmra.mrb[80].mxu1 %vm426_vm3, %v7891_v42  ;;  %v8424_v42 = vld [vmem:[#allocation4 + $0x35] sm:$0xff] }
 0x4ea   : > { %16981 = vmatprep.mubr.msk.f32.mxu1 %vm426_vm3, %v7892_v54  ;;  %17789 = vmatpush3.bf16.msra.mxu1 %v17786_v43  ;;  %v8430_v43 = vmax.f32 %v8420_v59, 0.0  ;;  %v8434_v54 = vmax.f32 %v8424_v42, 0.0 }
 0x4eb   : > { %17791 = vmatprep.subr.bf16.mxu1 %v17790_v23 }
 0x4ed   : > { %16982 = vmatmul.mubr.msk.f32.gmra.mrb[82].mxu1 %vm426_vm3, %v7893_v0  ;;  %v8427_v0 = vld [vmem:[#allocation4 + $0x4d] sm:$0xff] }
 0x4ee   : > { %16984 = vmatprep.mubr.msk.f32.mxu1 %vm426_vm3, %v7894_v33  ;;  %17793 = vmatpush3.bf16.msra.mxu1 %v17790_v23  ;;  %v8433_v23 = vmax.f32 %v8423_v14, 0.0  ;;  %v8429_v33 = vld [vmem:[#allocation4 + $0x5d] sm:$0xff]  ;;  %v8437_v24 = vmax.f32 %v8427_v0, 0.0 }
 0x4ef   : > { %17795 = vmatprep.subr.bf16.mxu1 %v17794_v26 }
 0x4f1   : > { %16985 = vmatmul.mubr.msk.f32.gmra.mrb[84].mxu1 %vm426_vm3, %v7895_v22  ;;  %v8439_v22 = vmax.f32 %v8429_v33, 0.0 }
 0x4f2   : > { %16987 = vmatprep.mubr.msk.f32.mxu1 %vm426_vm3, %v7896_v29  ;;  %v8600_v29 = vld [vmem:[#allocation4 + $0x16] sm:$0xff] }
 0x4f3   : > { %v8610_v9 = vmax.f32 %v8600_v29, 0.0 }
 0x4f5   : > { %16988 = vmatmul.mubr.msk.f32.gmra.mrb[86].mxu1 %vm426_vm3, %v7897_v38  ;;  %v8602_v38 = vld [vmem:[#allocation4 + $0x26] sm:$0xff] }
 0x4f6   : > { %16990 = vmatprep.mubr.msk.f32.mxu1 %vm426_vm3, %v7898_v7  ;;  %v8611_v7 = vmax.f32 %v8601_v36, 0.0  ;;  %v8612_v12 = vmax.f32 %v8602_v38, 0.0 }
 0x4f9   : > { %16991 = vmatmul.mubr.msk.f32.gmra.mrb[88].mxu1 %vm426_vm3, %v7899_v44  ;;  %v8604_v44 = vld [vmem:[#allocation4 + $0x36] sm:$0xff] }
 0x4fa   : > { %17001 = vmatprep.mubr.msk.f32.mxu1 %vm426_vm3, %v8070_v39  ;;  %v8613_v39 = vmax.f32 %v8603_v28, 0.0  ;;  %v8614_v60 = vmax.f32 %v8604_v44, 0.0  ;;  %v14512_v28 = vld [vmem:[%s21787_s3 + $0x160] sm:$0xff]  ;;  %v14513_v44 = vld [vmem:[%s21787_s3 + $0x168] sm:$0xff] }
 0x4fd   : > { %17002 = vmatmul.mubr.msk.f32.vlgmr.msra.gmra.mrb[80].mxu1 %vm426_vm3, %v8071_v32 }
 0x4fe   : > { %17004 = vmatprep.mubr.msk.f32.mxu1 %vm426_vm3, %v8072_v15  ;;  %17797 = vmatpush3.bf16.msra.mxu1 %v17794_v26  ;;  %v8428_v26 = vld [vmem:[#allocation4 + $0x55] sm:$0xff] }
 0x4ff   : > { %17799 = vmatprep.subr.bf16.mxu1 %v17798_v3  ;;  %v8438_v5 = vmax.f32 %v8428_v26, 0.0 }
 0x501   : > { %17005 = vmatmul.mubr.msk.f32.gmra.mrb[82].mxu1 %vm426_vm3, %v8073_v50 }
 0x502   : > { %17007 = vmatprep.mubr.msk.f32.mxu1 %vm426_vm3, %v8074_v63  ;;  %17801 = vmatpush3.bf16.msra.mxu1 %v17798_v3  ;;  %v8607_v3 = vld [vmem:[#allocation4 + $0x4e] sm:$0xff] }
 0x503   : > { %17803 = vmatprep.subr.bf16.mxu1 %v17802_v57  ;;  %v8617_v48 = vmax.f32 %v8607_v3, 0.0 }
 0x505   : > { %17008 = vmatmul.mubr.msk.f32.gmra.mrb[84].mxu1 %vm426_vm3, %v8075_v61 }
 0x506   : > { %17010 = vmatprep.mubr.msk.f32.mxu1 %vm426_vm3, %v8076_v16 }
 0x509   : > { %17011 = vmatmul.mubr.msk.f32.gmra.mrb[86].mxu1 %vm426_vm3, %v8077_v27 }
 0x50a   : > { %17013 = vmatprep.mubr.msk.f32.mxu1 %vm426_vm3, %v8078_v8 }
 0x50d   : > { %17014 = vmatmul.mubr.msk.f32.gmra.mrb[88].mxu1 %vm426_vm3, %v8079_v47 }
 0x50e   : > { %17024 = vmatprep.mubr.msk.f32.mxu1 %vm426_vm3, %v8071_v32  ;;  %v8616_v32 = vmax.f32 %v8606_v56, 0.0 }
 0x511   : > { %17025 = vmatmul.mubr.msk.f32.vlgmr.msra.gmra.mrb[80].mxu1 %vm426_vm3, %v8072_v15  ;;  %v8608_v15 = vld [vmem:[#allocation4 + $0x56] sm:$0xff] }
 0x512   : > { %17027 = vmatprep.mubr.msk.f32.mxu1 %vm426_vm3, %v8073_v50  ;;  %17805 = vmatpush3.bf16.msra.mxu1 %v17802_v57  ;;  %v8618_v45 = vmax.f32 %v8608_v15, 0.0  ;;  %v14488_v50 = vld [vmem:[%s21787_s3 + $0x140] sm:$0xff]  ;;  %v14489_v57 = vld [vmem:[%s21787_s3 + $0x148] sm:$0xff] }
 0x513   : > { %17807 = vmatprep.subr.bf16.mxu1 %v17806_v6 }
 0x515   : > { %17028 = vmatmul.mubr.msk.f32.gmra.mrb[82].mxu1 %vm426_vm3, %v8074_v63  ;;  %v17818_v63 = vpack.c.bf16 %v14489_v57, %v14488_v50 }
 0x516   : > { %17030 = vmatprep.mubr.msk.f32.mxu1 %vm426_vm3, %v8075_v61  ;;  %17809 = vmatpush3.bf16.msra.mxu1 %v17806_v6  ;;  %v17822_v61 = vpack.c.bf16 %v14491_v53, %v14490_v11 }
 0x517   : > { %17811 = vmatprep.subr.bf16.mxu1 %v17810_v31  ;;  %17819 = vmatprep.subr.bf16.mxu0 %v17818_v63 }
 0x518   : > { %17821 = vmatpush3.bf16.msra.mxu0 %v17818_v63 }
 0x519   : > { %17031 = vmatmul.mubr.msk.f32.gmra.mrb[84].mxu1 %vm426_vm3, %v8076_v16  ;;  %v8892_v16 = vld [vmem:[#allocation5 + $0x1] sm:$0xff]  ;;  %17823 = vmatprep.subr.bf16.mxu0 %v17822_v61 }
 0x51a   : > { %17033 = vmatprep.mubr.msk.f32.mxu1 %vm426_vm3, %v8077_v27  ;;  %v8902_v58 = vmax.f32 %v8892_v16, 0.0  ;;  %v14485_v27 = vld [vmem:[%s21787_s3 + $0x128] sm:$0xff] }
 0x51c   : > { %17825 = vmatpush3.bf16.msra.mxu0 %v17822_v61  ;;  %17093 = vmatprep.mubr.msk.f32.mxu0 %vm426_vm3, %v8902_v58 }
 0x51d   : > { %17034 = vmatmul.mubr.msk.f32.gmra.mrb[86].mxu1 %vm426_vm3, %v8078_v8  ;;  %v17826_v8 = vpack.c.bf16 %v14485_v27, %v14484_v41 }
 0x51e   : > { %17036 = vmatprep.mubr.msk.f32.mxu1 %vm426_vm3, %v8079_v47  ;;  %v21022_v47 = vpop.permute.xlu0 %8799 }
 0x51f   : > { %17827 = vmatprep.subr.bf16.mxu0 %v17826_v8 }
 0x521   : > { %17037 = vmatmul.mubr.msk.f32.gmra.mrb[88].mxu1 %vm426_vm3, %v8259_v35 }
 0x522   : > { %17047 = vmatprep.mubr.msk.f32.mxu1 %vm426_vm3, %v8430_v43  ;;  %v21029_v55 = vpop.permute.xlu0 %8809 }
 0x525   : > { %17048 = vmatmul.mubr.msk.f32.vlgmr.msra.gmra.mrb[80].mxu1 %vm426_vm3, %v8431_v13 }
 0x526   : > { %17050 = vmatprep.mubr.msk.f32.mxu1 %vm426_vm3, %v8432_v4  ;;  %17813 = vmatpush3.bf16.msra.mxu1 %v17810_v31  ;;  %v21037_v13 = vpop.permute.xlu0 %8819 }
 0x527   : > { %17815 = vmatprep.subr.bf16.mxu1 %v17814_v34 }
 0x529   : > { %17051 = vmatmul.mubr.msk.f32.gmra.mrb[82].mxu1 %vm426_vm3, %v8433_v23 }
 0x52a   : > { %17053 = vmatprep.mubr.msk.f32.mxu1 %vm426_vm3, %v8434_v54  ;;  %17817 = vmatpush3.bf16.msra.mxu1 %v17814_v34  ;;  %v21053_v33 = vpop.permute.xlu0 %8829 }
 0x52d   : > { %17054 = vmatmul.mubr.msk.f32.gmra.mrb[84].mxu1 %vm426_vm3, %v8435_v62  ;;  %v14487_v62 = vld [vmem:[%s21787_s3 + $0x138] sm:$0xff] }
 0x52e   : > { %17056 = vmatprep.mubr.msk.f32.mxu1 %vm426_vm3, %v8436_v51  ;;  %v21050_v51 = vpop.permute.xlu1 %8834 }
 0x531   : > { %17057 = vmatmul.mubr.msk.f32.gmra.mrb[86].mxu1 %vm426_vm3, %v8437_v24 }
 0x532   : > { %17059 = vmatprep.mubr.msk.f32.mxu1 %vm426_vm3, %v8438_v5  ;;  %v21068_v3 = vpop.permute.xlu1 %8844 }
 0x535   : > { %17060 = vmatmul.mubr.msk.f32.gmra.mrb[88].mxu1 %vm426_vm3, %v8439_v22 }
 0x536   : > { %17070 = vmatprep.mubr.msk.f32.mxu1 %vm426_vm3, %v8610_v9 }
 0x539   : > { %17071 = vmatmul.mubr.msk.f32.vlgmr.msra.gmra.mrb[80].mxu1 %vm426_vm3, %v8611_v7  ;;  %v17830_v7 = vpack.c.bf16 %v14487_v62, %v14486_v52 }
 0x53a   : > { %17073 = vmatprep.mubr.msk.f32.mxu1 %vm426_vm3, %v8612_v12 }
 0x53d   : > { %17074 = vmatmul.mubr.msk.f32.gmra.mrb[82].mxu1 %vm426_vm3, %v8613_v39 }
 0x53e   : > { %17076 = vmatprep.mubr.msk.f32.mxu1 %vm426_vm3, %v8614_v60 }
 0x541   : > { %17077 = vmatmul.mubr.msk.f32.gmra.mrb[84].mxu1 %vm426_vm3, %v8615_v30 }
 0x542   : > { %17079 = vmatprep.mubr.msk.f32.mxu1 %vm426_vm3, %v8616_v32 }
 0x545   : > { %17080 = vmatmul.mubr.msk.f32.gmra.mrb[86].mxu1 %vm426_vm3, %v8617_v48 }
 0x546   : > { %17082 = vmatprep.mubr.msk.f32.mxu1 %vm426_vm3, %v8618_v45  ;;  %v17834_v45 = vpack.c.bf16 %v14513_v44, %v14512_v28  ;;  %v14529_v28 = vld [vmem:[%s21787_s3 + $0x198] sm:$0xff] }
 0x549   : > { %17083 = vmatmul.mubr.msk.f32.gmra.mrb[88].mxu1 %vm426_vm3, %v8619_v49  ;;  %v21071_v49 = vpop.permute.xlu0 %8839 }
 0x60c   : > { %v17072_v6 = vpop.f32.mrb[80].mxu1 }
 0x60d   : > { %v8788_v2 = vadd.f32 %v17072_v6, %v14483_v40  ;;  %v8721_v31 = vpop.f32.mrb[81].mxu1 }
 0x60e   : > { %v8787_v17 = vadd.f32 %v14483_v40, %v8721_v31 }
 0x60f   : > { %v8848_v35 = vmul.f32 %v21020_v10, %v8788_v2 }
 0x610   : > { %v8847_v59 = vmul.f32 %v21022_v47, %v8787_v17  ;;  %v17075_v43 = vpop.f32.mrb[82].mxu1  ;;  %v14514_v17 = vld [vmem:[%s21787_s3 + $0x170] sm:$0xff] }
 0x611   : > { %8858 = vst.msk [vmem:[#allocation5 + $0x13] sm:$0xff] %vm426_vm3, %v8848_v35  ;;  %v8790_v46 = vadd.f32 %v17075_v43, %v14483_v40  ;;  %v8731_v19 = vpop.f32.mrb[83].mxu1  ;;  %v14515_v35 = vld [vmem:[%s21787_s3 + $0x178] sm:$0xff] }
 0x612   : > { %8857 = vst.msk [vmem:[#allocation5 + $0xb] sm:$0xff] %vm426_vm3, %v8847_v59  ;;  %v8789_v1 = vadd.f32 %v14483_v40, %v8731_v19 }
 0x613   : > { %v8850_v34 = vmul.f32 %v21027_v18, %v8790_v46  ;;  %v17838_v46 = vpack.c.bf16 %v14515_v35, %v14514_v17 }
 0x614   : > { %v8849_v4 = vmul.f32 %v21029_v55, %v8789_v1  ;;  %v17078_v14 = vpop.f32.mrb[84].mxu1 }
 0x615   : > { %8860 = vst.msk [vmem:[#allocation5 + $0x23] sm:$0xff] %vm426_vm3, %v8850_v34  ;;  %v8792_v42 = vadd.f32 %v17078_v14, %v14483_v40  ;;  %v8741_v23 = vpop.f32.mrb[85].mxu1  ;;  %v14526_v34 = vld [vmem:[%s21787_s3 + $0x180] sm:$0xff] }
 0x616   : > { %8859 = vst.msk [vmem:[#allocation5 + $0x1b] sm:$0xff] %vm426_vm3, %v8849_v4  ;;  %v8791_v54 = vadd.f32 %v14483_v40, %v8741_v23  ;;  %v14527_v4 = vld [vmem:[%s21787_s3 + $0x188] sm:$0xff] }
 0x617   : > { %v8852_v20 = vmul.f32 %v21034_v37, %v8792_v42  ;;  %v17842_v23 = vpack.c.bf16 %v14527_v4, %v14526_v34  ;;  %v14557_v34 = vld [vmem:[%s21787_s3 + $0x1d8] sm:$0xff] }
 0x618   : > { %v8851_v0 = vmul.f32 %v21037_v13, %v8791_v54  ;;  %v17081_v26 = vpop.f32.mrb[86].mxu1 }
 0x619   : > { %8862 = vst.msk [vmem:[#allocation5 + $0x33] sm:$0xff] %vm426_vm3, %v8852_v20  ;;  %v8794_v24 = vadd.f32 %v17081_v26, %v14483_v40  ;;  %v8751_v5 = vpop.f32.mrb[87].mxu1  ;;  %v8893_v22 = vld [vmem:[#allocation5 + $0x9] sm:$0xff]  ;;  %v8894_v29 = vld [vmem:[#allocation5 + $0x11] sm:$0xff] }
 0x61a   : > { %8861 = vst.msk [vmem:[#allocation5 + $0x2b] sm:$0xff] %vm426_vm3, %v8851_v0  ;;  %v8793_v9 = vadd.f32 %v14483_v40, %v8751_v5  ;;  %v8903_v36 = vmax.f32 %v8893_v22, 0.0  ;;  %v8904_v38 = vmax.f32 %v8894_v29, 0.0  ;;  %v8868_v31 = vld [vmem:[#allocation5 + $0x8] sm:$0xff]  ;;  %v8869_v59 = vld [vmem:[#allocation5 + $0x10] sm:$0xff] }
 0x61b   : > { %v8854_v12 = vmul.f32 %v21050_v51, %v8794_v24  ;;  %v8878_v43 = vmax.f32 %v8868_v31, 0.0  ;;  %v8879_v19 = vmax.f32 %v8869_v59, 0.0  ;;  %v9207_v22 = vld [vmem:[#allocation5 + $0x2] sm:$0xff]  ;;  %v9209_v44 = vld [vmem:[#allocation5 + $0x12] sm:$0xff] }
 0x61c   : > { %v8853_v39 = vmul.f32 %v21053_v33, %v8793_v9  ;;  %v17084_v60 = vpop.f32.mrb[88].mxu1  ;;  %17094 = vmatmul.mubr.msk.f32.vlgmr.msra.gmra.mrb[80].mxu0 %vm426_vm3, %v8903_v36  ;;  %v9217_v36 = vmax.f32 %v9207_v22, 0.0  ;;  %v14555_v31 = vld [vmem:[%s21787_s3 + $0x1c8] sm:$0xff] }
 0x61d   : > { %8864 = vst.msk [vmem:[#allocation5 + $0x43] sm:$0xff] %vm426_vm3, %v8854_v12  ;;  %v8796_v21 = vadd.f32 %v17084_v60, %v14483_v40  ;;  %v8761_v56 = vpop.f32.mrb[89].mxu1  ;;  %17096 = vmatprep.mubr.msk.f32.mxu0 %vm426_vm3, %v8904_v38  ;;  %v8895_v30 = vld [vmem:[#allocation5 + $0x19] sm:$0xff]  ;;  %v8896_v32 = vld [vmem:[#allocation5 + $0x21] sm:$0xff]  ;;  %17829 = vmatpush3.bf16.msra.mxu0 %v17826_v8  ;;  %v9567_v59 = vld [vmem:[#allocation5 + $0xb] sm:$0xff] }
 0x61e   : > { %8863 = vst.msk [vmem:[#allocation5 + $0x3b] sm:$0xff] %vm426_vm3, %v8853_v39  ;;  %v8795_v15 = vadd.f32 %v14483_v40, %v8761_v56  ;;  %v8905_v25 = vmax.f32 %v8895_v30, 0.0  ;;  %v8906_v48 = vmax.f32 %v8896_v32, 0.0  ;;  %17831 = vmatprep.subr.bf16.mxu0 %v17830_v7  ;;  %v8867_v8 = vld [vmem:[#allocation5] sm:$0xff]  ;;  %v8870_v1 = vld [vmem:[#allocation5 + $0x18] sm:$0xff]  ;;  %v14540_v30 = vld [vmem:[%s21787_s3 + $0x1a0] sm:$0xff] }
 0x61f   : > { %v8856_v50 = vmul.f32 %v21068_v3, %v8796_v21  ;;  %v8877_v6 = vmax.f32 %v8867_v8, 0.0  ;;  %v8871_v14 = vld [vmem:[#allocation5 + $0x20] sm:$0xff]  ;;  %v8880_v42 = vmax.f32 %v8870_v1, 0.0  ;;  %v14528_v12 = vld [vmem:[%s21787_s3 + $0x190] sm:$0xff]  ;;  %v9219_v21 = vmax.f32 %v9209_v44, 0.0  ;;  %v14541_v32 = vld [vmem:[%s21787_s3 + $0x1a8] sm:$0xff] }
 0x620   : > { %v8855_v57 = vmul.f32 %v21071_v49, %v8795_v15  ;;  %17097 = vmatmul.mubr.msk.f32.gmra.mrb[82].mxu0 %vm426_vm3, %v8905_v25  ;;  %v8881_v54 = vmax.f32 %v8871_v14, 0.0  ;;  %v17846_v60 = vpack.c.bf16 %v14529_v28, %v14528_v12  ;;  %v9210_v56 = vld [vmem:[#allocation5 + $0x1a] sm:$0xff]  ;;  %v9211_v15 = vld [vmem:[#allocation5 + $0x22] sm:$0xff]  ;;  %v9747_v44 = vld [vmem:[#allocation5 + $0xc] sm:$0xff] }
 0x621   : > { %8866 = vst.msk [vmem:[#allocation5 + $0x53] sm:$0xff] %vm426_vm3, %v8856_v50  ;;  %17099 = vmatprep.mubr.msk.f32.mxu0 %vm426_vm3, %v8906_v48  ;;  %v8897_v63 = vld [vmem:[#allocation5 + $0x29] sm:$0xff]  ;;  %v8898_v11 = vld [vmem:[#allocation5 + $0x31] sm:$0xff]  ;;  %17833 = vmatpush3.bf16.msra.mxu0 %v17830_v7  ;;  %v9220_v25 = vmax.f32 %v9210_v56, 0.0  ;;  %v17850_v48 = vpack.c.bf16 %v14541_v32, %v14540_v30  ;;  %v9569_v4 = vld [vmem:[#allocation5 + $0x1b] sm:$0xff] }
 0x622   : > { %8865 = vst.msk [vmem:[#allocation5 + $0x4b] sm:$0xff] %vm426_vm3, %v8855_v57  ;;  %v8907_v53 = vmax.f32 %v8897_v63, 0.0  ;;  %v8908_v61 = vmax.f32 %v8898_v11, 0.0  ;;  %17835 = vmatprep.subr.bf16.mxu0 %v17834_v45  ;;  %v8872_v20 = vld [vmem:[#allocation5 + $0x28] sm:$0xff]  ;;  %v8873_v52 = vld [vmem:[#allocation5 + $0x30] sm:$0xff]  ;;  %v14542_v8 = vld [vmem:[%s21787_s3 + $0x1b0] sm:$0xff] }
 0x623   : > { %v8882_v62 = vmax.f32 %v8872_v20, 0.0  ;;  %v8883_v0 = vmax.f32 %v8873_v52, 0.0  ;;  %v9208_v7 = vld [vmem:[#allocation5 + $0xa] sm:$0xff]  ;;  %v9213_v57 = vld [vmem:[#allocation5 + $0x32] sm:$0xff]  ;;  %v14571_v30 = vld [vmem:[%s21787_s3 + $0x1f8] sm:$0xff] }
 0x624   : > { %17100 = vmatmul.mubr.msk.f32.gmra.mrb[84].mxu0 %vm426_vm3, %v8907_v53  ;;  %v9218_v39 = vmax.f32 %v9208_v7, 0.0  ;;  %v9212_v50 = vld [vmem:[#allocation5 + $0x2a] sm:$0xff]  ;;  %v9223_v11 = vmax.f32 %v9213_v57, 0.0  ;;  %v14556_v1 = vld [vmem:[%s21787_s3 + $0x1d0] sm:$0xff] }
 0x625   : > { %17102 = vmatprep.mubr.msk.f32.mxu0 %vm426_vm3, %v8908_v61  ;;  %v8899_v16 = vld [vmem:[#allocation5 + $0x39] sm:$0xff]  ;;  %v8900_v58 = vld [vmem:[#allocation5 + $0x41] sm:$0xff]  ;;  %v9222_v63 = vmax.f32 %v9212_v50, 0.0  ;;  %v14569_v52 = vld [vmem:[%s21787_s3 + $0x1e8] sm:$0xff] }
 0x626   : > { %v8909_v41 = vmax.f32 %v8899_v16, 0.0  ;;  %v8910_v27 = vmax.f32 %v8900_v58, 0.0  ;;  %v8874_v26 = vld [vmem:[#allocation5 + $0x38] sm:$0xff]  ;;  %v8875_v24 = vld [vmem:[#allocation5 + $0x40] sm:$0xff]  ;;  %v14568_v20 = vld [vmem:[%s21787_s3 + $0x1e0] sm:$0xff] }
 0x627   : > { %v8884_v5 = vmax.f32 %v8874_v26, 0.0  ;;  %v8885_v29 = vmax.f32 %v8875_v24, 0.0  ;;  %v9214_v53 = vld [vmem:[#allocation5 + $0x3a] sm:$0xff]  ;;  %v9215_v61 = vld [vmem:[#allocation5 + $0x42] sm:$0xff]  ;;  %v17866_v26 = vpack.c.bf16 %v14569_v52, %v14568_v20  ;;  %v14583_v57 = vld [vmem:[%s21787_s3 + $0x208] sm:$0xff] }
 0x628   : > { %17103 = vmatmul.mubr.msk.f32.gmra.mrb[86].mxu0 %vm426_vm3, %v8909_v41  ;;  %v9224_v16 = vmax.f32 %v9214_v53, 0.0  ;;  %v9225_v58 = vmax.f32 %v9215_v61, 0.0  ;;  %v9573_v22 = vld [vmem:[#allocation5 + $0x3b] sm:$0xff]  ;;  %v9576_v28 = vld [vmem:[#allocation5 + $0x53] sm:$0xff]  ;;  %v14582_v50 = vld [vmem:[%s21787_s3 + $0x200] sm:$0xff] }
 0x629   : > { %17105 = vmatprep.mubr.msk.f32.mxu0 %vm426_vm3, %v8910_v27  ;;  %v8901_v40 = vld [vmem:[#allocation5 + $0x49] sm:$0xff]  ;;  %v9396_v35 = vld [vmem:[#allocation5 + $0x52] sm:$0xff]  ;;  %v9749_v32 = vld [vmem:[#allocation5 + $0x1c] sm:$0xff]  ;;  %v17874_v53 = vpack.c.bf16 %v14583_v57, %v14582_v50 }
 0x62a   : > { %v8911_v2 = vmax.f32 %v8901_v40, 0.0  ;;  %v8876_v9 = vld [vmem:[#allocation5 + $0x48] sm:$0xff]  ;;  %v14543_v40 = vld [vmem:[%s21787_s3 + $0x1b8] sm:$0xff]  ;;  %v14570_v56 = vld [vmem:[%s21787_s3 + $0x1f0] sm:$0xff] }
 0x62b   : > { %v8886_v38 = vmax.f32 %v8876_v9, 0.0  ;;  %v9216_v41 = vld [vmem:[#allocation5 + $0x4a] sm:$0xff]  ;;  %v9583_v9 = vmax.f32 %v9573_v22, 0.0  ;;  %v14599_v20 = vld [vmem:[%s21787_s3 + $0x238] sm:$0xff]  ;;  %v10291_v50 = vld [vmem:[#allocation5 + $0x36] sm:$0xff] }
 0x62c   : > { %17106 = vmatmul.mubr.msk.f32.gmra.mrb[88].mxu0 %vm426_vm3, %v8911_v2  ;;  %v9226_v27 = vmax.f32 %v9216_v41, 0.0  ;;  %v14554_v2 = vld [vmem:[%s21787_s3 + $0x1c0] sm:$0xff] }
 0x62d   : > { %17116 = vmatprep.mubr.msk.f32.mxu0 %vm426_vm3, %v8877_v6  ;;  %v17854_v6 = vpack.c.bf16 %v14543_v40, %v14542_v8  ;;  %v17858_v17 = vpack.c.bf16 %v14555_v31, %v14554_v2  ;;  %v9754_v8 = vld [vmem:[#allocation5 + $0x44] sm:$0xff]  ;;  %v9755_v40 = vld [vmem:[#allocation5 + $0x4c] sm:$0xff]  ;;  %v9756_v31 = vld [vmem:[#allocation5 + $0x54] sm:$0xff] }
 0x62e   : > { %v9765_v2 = vmax.f32 %v9755_v40, 0.0  ;;  %v10109_v52 = vld [vmem:[#allocation5 + $0x25] sm:$0xff] }
 0x630   : > { %17117 = vmatmul.mubr.msk.f32.vlgmr.msra.gmra.mrb[80].mxu0 %vm426_vm3, %v8878_v43  ;;  %v9406_v43 = vmax.f32 %v9396_v35, 0.0  ;;  %v14584_v35 = vld [vmem:[%s21787_s3 + $0x210] sm:$0xff] }
 0x631   : > { %17119 = vmatprep.mubr.msk.f32.mxu0 %vm426_vm3, %v8879_v19  ;;  %17837 = vmatpush3.bf16.msra.mxu0 %v17834_v45  ;;  %v9221_v45 = vmax.f32 %v9211_v15, 0.0  ;;  %v9568_v19 = vld [vmem:[#allocation5 + $0x13] sm:$0xff] }
 0x632   : > { %17839 = vmatprep.subr.bf16.mxu0 %v17838_v46  ;;  %v9578_v14 = vmax.f32 %v9568_v19, 0.0  ;;  %v14597_v19 = vld [vmem:[%s21787_s3 + $0x228] sm:$0xff] }
 0x634   : > { %17120 = vmatmul.mubr.msk.f32.gmra.mrb[82].mxu0 %vm426_vm3, %v8880_v42  ;;  %v17862_v42 = vpack.c.bf16 %v14557_v34, %v14556_v1  ;;  %v9936_v34 = vld [vmem:[#allocation5 + $0x5c] sm:$0xff] }
 0x635   : > { %17122 = vmatprep.mubr.msk.f32.mxu0 %vm426_vm3, %v8881_v54  ;;  %17841 = vmatpush3.bf16.msra.mxu0 %v17838_v46  ;;  %v9577_v46 = vmax.f32 %v9567_v59, 0.0  ;;  %v9570_v54 = vld [vmem:[#allocation5 + $0x23] sm:$0xff] }
 0x636   : > { %17843 = vmatprep.subr.bf16.mxu0 %v17842_v23  ;;  %v14585_v59 = vld [vmem:[%s21787_s3 + $0x218] sm:$0xff] }
 0x638   : > { %17123 = vmatmul.mubr.msk.f32.gmra.mrb[84].mxu0 %vm426_vm3, %v8882_v62  ;;  %v9571_v62 = vld [vmem:[#allocation5 + $0x2b] sm:$0xff] }
 0x639   : > { %17125 = vmatprep.mubr.msk.f32.mxu0 %vm426_vm3, %v8883_v0  ;;  %v9580_v0 = vmax.f32 %v9570_v54, 0.0  ;;  %v9581_v24 = vmax.f32 %v9571_v62, 0.0  ;;  %v14598_v54 = vld [vmem:[%s21787_s3 + $0x230] sm:$0xff] }
 0x63c   : > { %17126 = vmatmul.mubr.msk.f32.gmra.mrb[86].mxu0 %vm426_vm3, %v8884_v5  ;;  %v9572_v5 = vld [vmem:[#allocation5 + $0x33] sm:$0xff] }
 0x63d   : > { %17128 = vmatprep.mubr.msk.f32.mxu0 %vm426_vm3, %v8885_v29  ;;  %v9582_v29 = vmax.f32 %v9572_v5, 0.0  ;;  %v10111_v5 = vld [vmem:[#allocation5 + $0x35] sm:$0xff] }
 0x640   : > { %17129 = vmatmul.mubr.msk.f32.gmra.mrb[88].mxu0 %vm426_vm3, %v8886_v38  ;;  %v9575_v38 = vld [vmem:[#allocation5 + $0x4b] sm:$0xff] }
 0x641   : > { %17139 = vmatprep.mubr.msk.f32.mxu0 %vm426_vm3, %v9217_v36  ;;  %v9574_v36 = vld [vmem:[#allocation5 + $0x43] sm:$0xff]  ;;  %v9585_v12 = vmax.f32 %v9575_v38, 0.0 }
 0x642   : > { %v9584_v7 = vmax.f32 %v9574_v36, 0.0  ;;  %v10113_v36 = vld [vmem:[#allocation5 + $0x45] sm:$0xff] }
 0x644   : > { %17140 = vmatmul.mubr.msk.f32.vlgmr.msra.gmra.mrb[80].mxu0 %vm426_vm3, %v9218_v39 }
 0x645   : > { %17142 = vmatprep.mubr.msk.f32.mxu0 %vm426_vm3, %v9219_v21  ;;  %17845 = vmatpush3.bf16.msra.mxu0 %v17842_v23  ;;  %v9579_v23 = vmax.f32 %v9569_v4, 0.0  ;;  %v9946_v4 = vmax.f32 %v9936_v34, 0.0  ;;  %v14613_v34 = vld [vmem:[%s21787_s3 + $0x248] sm:$0xff] }
 0x646   : > { %17847 = vmatprep.subr.bf16.mxu0 %v17846_v60 }
 0x648   : > { %17143 = vmatmul.mubr.msk.f32.gmra.mrb[82].mxu0 %vm426_vm3, %v9220_v25 }
 0x649   : > { %17145 = vmatprep.mubr.msk.f32.mxu0 %vm426_vm3, %v9221_v45  ;;  %17849 = vmatpush3.bf16.msra.mxu0 %v17846_v60  ;;  %v9757_v60 = vmax.f32 %v9747_v44, 0.0  ;;  %v10116_v44 = vld [vmem:[#allocation5 + $0x5d] sm:$0xff] }
 0x64a   : > { %17851 = vmatprep.subr.bf16.mxu0 %v17850_v48 }
 0x64c   : > { %17146 = vmatmul.mubr.msk.f32.gmra.mrb[84].mxu0 %vm426_vm3, %v9222_v63 }
 0x64d   : > { %17148 = vmatprep.mubr.msk.f32.mxu0 %vm426_vm3, %v9223_v11 }
 0x650   : > { %17149 = vmatmul.mubr.msk.f32.gmra.mrb[86].mxu0 %vm426_vm3, %v9224_v16 }
 0x651   : > { %17151 = vmatprep.mubr.msk.f32.mxu0 %vm426_vm3, %v9225_v58 }
 0x654   : > { %17152 = vmatmul.mubr.msk.f32.gmra.mrb[88].mxu0 %vm426_vm3, %v9226_v27 }
 0x655   : > { %17162 = vmatprep.mubr.msk.f32.mxu0 %vm426_vm3, %v9218_v39  ;;  %v9586_v39 = vmax.f32 %v9576_v28, 0.0  ;;  %v10115_v28 = vld [vmem:[#allocation5 + $0x55] sm:$0xff] }
 0x658   : > { %17163 = vmatmul.mubr.msk.f32.vlgmr.msra.gmra.mrb[80].mxu0 %vm426_vm3, %v9219_v21  ;;  %v9748_v21 = vld [vmem:[#allocation5 + $0x14] sm:$0xff] }
 0x659   : > { %17165 = vmatprep.mubr.msk.f32.mxu0 %vm426_vm3, %v9220_v25  ;;  %17853 = vmatpush3.bf16.msra.mxu0 %v17850_v48  ;;  %v9758_v15 = vmax.f32 %v9748_v21, 0.0  ;;  %v17870_v25 = vpack.c.bf16 %v14571_v30, %v14570_v56  ;;  %v9759_v48 = vmax.f32 %v9749_v32, 0.0  ;;  %v10126_v21 = vmax.f32 %v10116_v44, 0.0  ;;  %v10287_v56 = vld [vmem:[#allocation5 + $0x16] sm:$0xff]  ;;  %v10288_v32 = vld [vmem:[#allocation5 + $0x1e] sm:$0xff] }
 0x65a   : > { %17855 = vmatprep.subr.bf16.mxu0 %v17854_v6  ;;  %v10297_v30 = vmax.f32 %v10287_v56, 0.0 }
 0x65c   : > { %17166 = vmatmul.mubr.msk.f32.gmra.mrb[82].mxu0 %vm426_vm3, %v9221_v45  ;;  %v9750_v45 = vld [vmem:[#allocation5 + $0x24] sm:$0xff] }
 0x65d   : > { %17168 = vmatprep.mubr.msk.f32.mxu0 %vm426_vm3, %v9222_v63  ;;  %17857 = vmatpush3.bf16.msra.mxu0 %v17854_v6  ;;  %v9751_v63 = vld [vmem:[#allocation5 + $0x2c] sm:$0xff]  ;;  %v9764_v6 = vmax.f32 %v9754_v8, 0.0 }
 0x65e   : > { %17859 = vmatprep.subr.bf16.mxu0 %v17858_v17  ;;  %v9761_v61 = vmax.f32 %v9751_v63, 0.0  ;;  %v10301_v63 = vmax.f32 %v10291_v50, 0.0  ;;  %v10499_v50 = vld [vmem:[#allocation4 + $0x2b] sm:$0xff] }
 0x660   : > { %17169 = vmatmul.mubr.msk.f32.gmra.mrb[84].mxu0 %vm426_vm3, %v9223_v11  ;;  %v9760_v11 = vmax.f32 %v9750_v45, 0.0  ;;  %v10290_v45 = vld [vmem:[#allocation5 + $0x2e] sm:$0xff] }
 0x661   : > { %17171 = vmatprep.mubr.msk.f32.mxu0 %vm426_vm3, %v9224_v16  ;;  %v9752_v16 = vld [vmem:[#allocation5 + $0x34] sm:$0xff]  ;;  %v10300_v57 = vmax.f32 %v10290_v45, 0.0 }
 0x662   : > { %v9762_v41 = vmax.f32 %v9752_v16, 0.0 }
 0x664   : > { %17172 = vmatmul.mubr.msk.f32.gmra.mrb[86].mxu0 %vm426_vm3, %v9225_v58  ;;  %v9753_v58 = vld [vmem:[#allocation5 + $0x3c] sm:$0xff] }
 0x665   : > { %17174 = vmatprep.mubr.msk.f32.mxu0 %vm426_vm3, %v9226_v27  ;;  %v9763_v27 = vmax.f32 %v9753_v58, 0.0  ;;  %v10294_v58 = vld [vmem:[#allocation5 + $0x4e] sm:$0xff] }
 0x666   : > { %v10304_v8 = vmax.f32 %v10294_v58, 0.0 }
 0x668   : > { %17175 = vmatmul.mubr.msk.f32.gmra.mrb[88].mxu0 %vm426_vm3, %v9406_v43  ;;  %v17878_v43 = vpack.c.bf16 %v14585_v59, %v14584_v35  ;;  %v14618_v35 = vld [vmem:[%s21787_s3 + $0x270] sm:$0xff]  ;;  %v14619_v59 = vld [vmem:[%s21787_s3 + $0x278] sm:$0xff] }
 0x669   : > { %17185 = vmatprep.mubr.msk.f32.mxu0 %vm426_vm3, %v9577_v46  ;;  %v14596_v46 = vld [vmem:[%s21787_s3 + $0x220] sm:$0xff] }
 0x66a   : > { %v17882_v1 = vpack.c.bf16 %v14597_v19, %v14596_v46  ;;  %v10550_v46 = vld [vmem:[#allocation4 + $0x1] sm:$0xff] }
 0x66b   : > { %v10560_v19 = vmax.f32 %v10550_v46, 0.0 }
 0x66c   : > { %17186 = vmatmul.mubr.msk.f32.vlgmr.msra.gmra.mrb[80].mxu0 %vm426_vm3, %v9578_v14  ;;  %v10107_v14 = vld [vmem:[#allocation5 + $0x15] sm:$0xff] }
 0x66d   : > { %17188 = vmatprep.mubr.msk.f32.mxu0 %vm426_vm3, %v9579_v23  ;;  %17861 = vmatpush3.bf16.msra.mxu0 %v17858_v17  ;;  %v9766_v17 = vmax.f32 %v9756_v31, 0.0  ;;  %v10108_v23 = vld [vmem:[#allocation5 + $0x1d] sm:$0xff]  ;;  %v14617_v31 = vld [vmem:[%s21787_s3 + $0x268] sm:$0xff] }
 0x66e   : > { %17863 = vmatprep.subr.bf16.mxu0 %v17862_v42  ;;  %v10118_v62 = vmax.f32 %v10108_v23, 0.0  ;;  %17300 = vmatprep.mubr.msk.f32.mxu1 %vm426_vm3, %v10560_v19  ;;  %v14640_v19 = vld [vmem:[%s21787_s3 + $0x280] sm:$0xff] }
 0x670   : > { %17189 = vmatmul.mubr.msk.f32.gmra.mrb[82].mxu0 %vm426_vm3, %v9580_v0  ;;  %v17886_v0 = vpack.c.bf16 %v14599_v20, %v14598_v54 }
 0x671   : > { %17191 = vmatprep.mubr.msk.f32.mxu0 %vm426_vm3, %v9581_v24  ;;  %17865 = vmatpush3.bf16.msra.mxu0 %v17862_v42  ;;  %v10117_v42 = vmax.f32 %v10107_v14, 0.0  ;;  %v10110_v24 = vld [vmem:[#allocation5 + $0x2d] sm:$0xff]  ;;  %v14611_v14 = vld [vmem:[%s21788_s4 + $0x1] ss:$0 sm:$0xff] }
 0x672   : > { %17867 = vmatprep.subr.bf16.mxu0 %v17866_v26  ;;  %v10120_v22 = vmax.f32 %v10110_v24, 0.0 }
 0x674   : > { %17192 = vmatmul.mubr.msk.f32.gmra.mrb[84].mxu0 %vm426_vm3, %v9582_v29  ;;  %v10121_v29 = vmax.f32 %v10111_v5, 0.0  ;;  %v10495_v5 = vld [vmem:[#allocation4 + $0xb] sm:$0xff] }
 0x675   : > { %17194 = vmatprep.mubr.msk.f32.mxu0 %vm426_vm3, %v9583_v9  ;;  %v10112_v9 = vld [vmem:[#allocation5 + $0x3d] sm:$0xff] }
 0x676   : > { %v10122_v38 = vmax.f32 %v10112_v9, 0.0 }
 0x678   : > { %17195 = vmatmul.mubr.msk.f32.gmra.mrb[86].mxu0 %vm426_vm3, %v9584_v7  ;;  %v10123_v7 = vmax.f32 %v10113_v36, 0.0 }
 0x679   : > { %17197 = vmatprep.mubr.msk.f32.mxu0 %vm426_vm3, %v9585_v12  ;;  %v10114_v12 = vld [vmem:[#allocation5 + $0x4d] sm:$0xff] }
 0x67c   : > { %17198 = vmatmul.mubr.msk.f32.gmra.mrb[88].mxu0 %vm426_vm3, %v9586_v39  ;;  %v10124_v39 = vmax.f32 %v10114_v12, 0.0 }
 0x67d   : > { %17208 = vmatprep.mubr.msk.f32.mxu0 %vm426_vm3, %v9757_v60  ;;  %v10125_v60 = vmax.f32 %v10115_v28, 0.0 }
 0x680   : > { %17209 = vmatmul.mubr.msk.f32.vlgmr.msra.gmra.mrb[80].mxu0 %vm426_vm3, %v9758_v15 }
 0x681   : > { %17211 = vmatprep.mubr.msk.f32.mxu0 %vm426_vm3, %v9759_v48  ;;  %17869 = vmatpush3.bf16.msra.mxu0 %v17866_v26  ;;  %v10119_v26 = vmax.f32 %v10109_v52, 0.0 }
 0x682   : > { %17871 = vmatprep.subr.bf16.mxu0 %v17870_v25 }
 0x684   : > { %17212 = vmatmul.mubr.msk.f32.gmra.mrb[82].mxu0 %vm426_vm3, %v9760_v11 }
 0x685   : > { %17214 = vmatprep.mubr.msk.f32.mxu0 %vm426_vm3, %v9761_v61  ;;  %17873 = vmatpush3.bf16.msra.mxu0 %v17870_v25  ;;  %v10298_v25 = vmax.f32 %v10288_v32, 0.0 }
 0x686   : > { %17875 = vmatprep.subr.bf16.mxu0 %v17874_v53 }
 0x688   : > { %17215 = vmatmul.mubr.msk.f32.gmra.mrb[84].mxu0 %vm426_vm3, %v9762_v41 }
 0x689   : > { %17217 = vmatprep.mubr.msk.f32.mxu0 %vm426_vm3, %v9763_v27 }
 0x68c   : > { %17218 = vmatmul.mubr.msk.f32.gmra.mrb[86].mxu0 %vm426_vm3, %v9764_v6 }
 0x68d   : > { %17220 = vmatprep.mubr.msk.f32.mxu0 %vm426_vm3, %v9765_v2 }
 0x690   : > { %17221 = vmatmul.mubr.msk.f32.gmra.mrb[88].mxu0 %vm426_vm3, %v9766_v17 }
 0x691   : > { %17231 = vmatprep.mubr.msk.f32.mxu0 %vm426_vm3, %v9758_v15  ;;  %v10289_v15 = vld [vmem:[#allocation5 + $0x26] sm:$0xff] }
 0x694   : > { %17232 = vmatmul.mubr.msk.f32.vlgmr.msra.gmra.mrb[80].mxu0 %vm426_vm3, %v9759_v48  ;;  %v10299_v48 = vmax.f32 %v10289_v15, 0.0  ;;  %v10500_v15 = vld [vmem:[#allocation4 + $0x33] sm:$0xff] }
 0x695   : > { %17234 = vmatprep.mubr.msk.f32.mxu0 %vm426_vm3, %v9760_v11  ;;  %17877 = vmatpush3.bf16.msra.mxu0 %v17874_v53  ;;  %v10292_v11 = vld [vmem:[#allocation5 + $0x3e] sm:$0xff]  ;;  %v10293_v53 = vld [vmem:[#allocation5 + $0x46] sm:$0xff] }
 0x696   : > { %17879 = vmatprep.subr.bf16.mxu0 %v17878_v43  ;;  %v10303_v16 = vmax.f32 %v10293_v53, 0.0  ;;  %v14615_v53 = vld [vmem:[%s21787_s3 + $0x258] sm:$0xff] }
 0x698   : > { %17235 = vmatmul.mubr.msk.f32.gmra.mrb[82].mxu0 %vm426_vm3, %v9761_v61  ;;  %v10302_v61 = vmax.f32 %v10292_v11, 0.0  ;;  %v14614_v11 = vld [vmem:[%s21787_s3 + $0x250] sm:$0xff] }
 0x699   : > { %17237 = vmatprep.mubr.msk.f32.mxu0 %vm426_vm3, %v9762_v41  ;;  %17881 = vmatpush3.bf16.msra.mxu0 %v17878_v43  ;;  %v10295_v41 = vld [vmem:[#allocation5 + $0x56] sm:$0xff]  ;;  %v17894_v43 = vpack.c.bf16 %v14619_v59, %v14618_v35 }
 0x69a   : > { %17883 = vmatprep.subr.bf16.mxu0 %v17882_v1  ;;  %v10305_v40 = vmax.f32 %v10295_v41, 0.0  ;;  %v10501_v59 = vld [vmem:[#allocation4 + $0x3b] sm:$0xff] }
 0x69c   : > { %17238 = vmatmul.mubr.msk.f32.gmra.mrb[84].mxu0 %vm426_vm3, %v9763_v27  ;;  %v10296_v27 = vld [vmem:[#allocation5 + $0x5e] sm:$0xff] }
 0x69d   : > { %17240 = vmatprep.mubr.msk.f32.mxu0 %vm426_vm3, %v9764_v6  ;;  %v10306_v6 = vmax.f32 %v10296_v27, 0.0 }
 0x6a0   : > { %17241 = vmatmul.mubr.msk.f32.gmra.mrb[86].mxu0 %vm426_vm3, %v9765_v2  ;;  %v14616_v2 = vld [vmem:[%s21787_s3 + $0x260] sm:$0xff] }
 0x6a1   : > { %17243 = vmatprep.mubr.msk.f32.mxu0 %vm426_vm3, %v9766_v17  ;;  %v17890_v17 = vpack.c.bf16 %v14617_v31, %v14616_v2 }
 0x6a3   : > { %17891 = vmatprep.subr.bf16.mxu1 %v17890_v17 }
 0x6a4   : > { %17244 = vmatmul.mubr.msk.f32.gmra.mrb[88].mxu0 %vm426_vm3, %v9946_v4  ;;  %17893 = vmatpush3.bf16.msra.mxu1 %v17890_v17  ;;  %v17902_v17 = vpack.c.bf16 %v14615_v53, %v14614_v11 }
 0x6a5   : > { %17254 = vmatprep.mubr.msk.f32.mxu0 %vm426_vm3, %v10117_v42  ;;  %17895 = vmatprep.subr.bf16.mxu1 %v17894_v43 }
 0x6a8   : > { %17255 = vmatmul.mubr.msk.f32.vlgmr.msra.gmra.mrb[80].mxu0 %vm426_vm3, %v10118_v62  ;;  %17897 = vmatpush3.bf16.msra.mxu1 %v17894_v43  ;;  %v10496_v62 = vld [vmem:[#allocation4 + $0x13] sm:$0xff] }
 0x6a9   : > { %17257 = vmatprep.mubr.msk.f32.mxu0 %vm426_vm3, %v10119_v26  ;;  %17885 = vmatpush3.bf16.msra.mxu0 %v17882_v1  ;;  %v14612_v1 = vld [vmem:[%s21787_s3 + $0x240] sm:$0xff] }
 0x6aa   : > { %17887 = vmatprep.subr.bf16.mxu0 %v17886_v0  ;;  %v21261_v4 = vpack.c.bf16 %v14613_v34, %v14612_v1  ;;  %v14641_v1 = vld [vmem:[%s21787_s3 + $0x288] sm:$0xff] }
 0x6ac   : > { %17258 = vmatmul.mubr.msk.f32.gmra.mrb[82].mxu0 %vm426_vm3, %v10120_v22  ;;  %17899 = vmatprep.subr.bf16.mxu1 %v21261_v4 }
 0x6ad   : > { %17260 = vmatprep.mubr.msk.f32.mxu0 %vm426_vm3, %v10121_v29  ;;  %17889 = vmatpush3.bf16.msra.mxu0 %v17886_v0 }
 0x6b0   : > { %17261 = vmatmul.mubr.msk.f32.gmra.mrb[84].mxu0 %vm426_vm3, %v10122_v38 }
 0x6b1   : > { %17263 = vmatprep.mubr.msk.f32.mxu0 %vm426_vm3, %v10123_v7  ;;  %v10498_v7 = vld [vmem:[#allocation4 + $0x23] sm:$0xff] }
 0x6b4   : > { %17264 = vmatmul.mubr.msk.f32.gmra.mrb[86].mxu0 %vm426_vm3, %v10124_v39  ;;  %v10497_v39 = vld [vmem:[#allocation4 + $0x1b] sm:$0xff] }
 0x6b5   : > { %17266 = vmatprep.mubr.msk.f32.mxu0 %vm426_vm3, %v10125_v60 }
 0x6b8   : > { %17267 = vmatmul.mubr.msk.f32.gmra.mrb[88].mxu0 %vm426_vm3, %v10126_v21 }
 0x6b9   : > { %17277 = vmatprep.mubr.msk.f32.mxu0 %vm426_vm3, %v10297_v30 }
 0x6bc   : > { %17278 = vmatmul.mubr.msk.f32.vlgmr.msra.gmra.mrb[80].mxu0 %vm426_vm3, %v10298_v25 }
 0x6bd   : > { %17280 = vmatprep.mubr.msk.f32.mxu0 %vm426_vm3, %v10299_v48 }
 0x6c0   : > { %17281 = vmatmul.mubr.msk.f32.gmra.mrb[82].mxu0 %vm426_vm3, %v10300_v57 }
 0x6c1   : > { %17283 = vmatprep.mubr.msk.f32.mxu0 %vm426_vm3, %v10301_v63 }
 0x6c4   : > { %17284 = vmatmul.mubr.msk.f32.gmra.mrb[84].mxu0 %vm426_vm3, %v10302_v61 }
 0x6c5   : > { %17286 = vmatprep.mubr.msk.f32.mxu0 %vm426_vm3, %v10303_v16 }
 0x6c8   : > { %17287 = vmatmul.mubr.msk.f32.gmra.mrb[86].mxu0 %vm426_vm3, %v10304_v8  ;;  %v10502_v8 = vld [vmem:[#allocation4 + $0x43] sm:$0xff] }
 0x6c9   : > { %17289 = vmatprep.mubr.msk.f32.mxu0 %vm426_vm3, %v10305_v40 }
 0x6cc   : > { %17290 = vmatmul.mubr.msk.f32.gmra.mrb[88].mxu0 %vm426_vm3, %v10306_v6 }
 0x78f   : > { %v17279_v42 = vpop.f32.mrb[80].mxu0 }
 0x790   : > { %v10476_v23 = vadd.f32 %v17279_v42, %v14611_v14  ;;  %v10408_v54 = vpop.f32.mrb[81].mxu0 }
 0x791   : > { %v10475_v20 = vadd.f32 %v14611_v14, %v10408_v54 }
 0x792   : > { %v10486_v52 = vmul.f32 %v10476_v23, %v21020_v10 }
 0x793   : > { %v10485_v0 = vmul.f32 %v10475_v20, %v21022_v47  ;;  %v17282_v26 = vpop.f32.mrb[82].mxu0 }
 0x794   : > { %v10506_v24 = vadd.f32 %v10496_v62, %v10486_v52  ;;  %v10478_v22 = vadd.f32 %v17282_v26, %v14611_v14  ;;  %v10418_v29 = vpop.f32.mrb[83].mxu0  ;;  %v10504_v52 = vld [vmem:[#allocation4 + $0x53] sm:$0xff] }
 0x795   : > { %v10505_v9 = vadd.f32 %v10495_v5, %v10485_v0  ;;  %v10477_v36 = vadd.f32 %v14611_v14, %v10418_v29  ;;  %v10503_v5 = vld [vmem:[#allocation4 + $0x4b] sm:$0xff] }
 0x796   : > { %10516 = vst.msk [vmem:[#allocation4 + $0x13] sm:$0xff] %vm426_vm3, %v10506_v24  ;;  %v10488_v38 = vmul.f32 %v10478_v22, %v21027_v18 }
 0x797   : > { %10515 = vst.msk [vmem:[#allocation4 + $0xb] sm:$0xff] %vm426_vm3, %v10505_v9  ;;  %v10487_v12 = vmul.f32 %v10477_v36, %v21029_v55  ;;  %v17285_v28 = vpop.f32.mrb[84].mxu0 }
 0x798   : > { %v10508_v44 = vadd.f32 %v10498_v7, %v10488_v38  ;;  %v10480_v60 = vadd.f32 %v17285_v28, %v14611_v14  ;;  %v10428_v21 = vpop.f32.mrb[85].mxu0 }
 0x799   : > { %v10507_v56 = vadd.f32 %v10497_v39, %v10487_v12  ;;  %v10479_v30 = vadd.f32 %v14611_v14, %v10428_v21 }
 0x79a   : > { %10518 = vst.msk [vmem:[#allocation4 + $0x23] sm:$0xff] %vm426_vm3, %v10508_v44  ;;  %v10490_v32 = vmul.f32 %v10480_v60, %v21034_v37  ;;  %v10525_v44 = vld [vmem:[#allocation4] sm:$0xff] }
 0x79b   : > { %10517 = vst.msk [vmem:[#allocation4 + $0x1b] sm:$0xff] %vm426_vm3, %v10507_v56  ;;  %v10489_v25 = vmul.f32 %v10479_v30, %v21037_v13  ;;  %v17288_v48 = vpop.f32.mrb[86].mxu0  ;;  %v10535_v60 = vmax.f32 %v10525_v44, 0.0  ;;  %v14642_v30 = vld [vmem:[%s21787_s3 + $0x290] sm:$0xff] }
 0x79c   : > { %v10510_v45 = vadd.f32 %v10500_v15, %v10490_v32  ;;  %v10482_v57 = vadd.f32 %v17288_v48, %v14611_v14  ;;  %v10438_v63 = vpop.f32.mrb[87].mxu0  ;;  %v14643_v32 = vld [vmem:[%s21787_s3 + $0x298] sm:$0xff]  ;;  %v14670_v44 = vld [vmem:[%s21787_s3 + $0x2d0] sm:$0xff] }
 0x79d   : > { %v10509_v61 = vadd.f32 %v10499_v50, %v10489_v25  ;;  %v10481_v16 = vadd.f32 %v14611_v14, %v10438_v63  ;;  %v17910_v48 = vpack.c.bf16 %v14643_v32, %v14642_v30  ;;  %v14655_v63 = vld [vmem:[%s21787_s3 + $0x2a8] sm:$0xff] }
 0x79e   : > { %10520 = vst.msk [vmem:[#allocation4 + $0x33] sm:$0xff] %vm426_vm3, %v10510_v45  ;;  %v10492_v58 = vmul.f32 %v10482_v57, %v21050_v51  ;;  %v10551_v41 = vld [vmem:[#allocation4 + $0x9] sm:$0xff]  ;;  %v10552_v27 = vld [vmem:[#allocation4 + $0x11] sm:$0xff] }
 0x79f   : > { %10519 = vst.msk [vmem:[#allocation4 + $0x2b] sm:$0xff] %vm426_vm3, %v10509_v61  ;;  %v10491_v40 = vmul.f32 %v10481_v16, %v21053_v33  ;;  %v17291_v6 = vpop.f32.mrb[88].mxu0  ;;  %v10561_v2 = vmax.f32 %v10551_v41, 0.0  ;;  %v10562_v31 = vmax.f32 %v10552_v27, 0.0  ;;  %v10526_v56 = vld [vmem:[#allocation4 + $0x8] sm:$0xff]  ;;  %v10527_v15 = vld [vmem:[#allocation4 + $0x10] sm:$0xff] }
 0x7a0   : > { %v10512_v35 = vadd.f32 %v10502_v8, %v10492_v58  ;;  %v10484_v43 = vadd.f32 %v17291_v6, %v14611_v14  ;;  %v10448_v46 = vpop.f32.mrb[89].mxu0  ;;  %v10536_v25 = vmax.f32 %v10526_v56, 0.0  ;;  %v10537_v45 = vmax.f32 %v10527_v15, 0.0  ;;  %v14654_v57 = vld [vmem:[%s21787_s3 + $0x2a0] sm:$0xff]  ;;  %v14683_v56 = vld [vmem:[%s21787_s3 + $0x2e8] sm:$0xff] }
 0x7a1   : > { %v10511_v34 = vadd.f32 %v10501_v59, %v10491_v40  ;;  %v10483_v42 = vadd.f32 %v14611_v14, %v10448_v46  ;;  %17301 = vmatmul.mubr.msk.f32.vlgmr.msra.gmra.mrb[90].mxu1 %vm426_vm3, %v10561_v2  ;;  %v17906_v14 = vpack.c.bf16 %v14641_v1, %v14640_v19  ;;  %v17914_v61 = vpack.c.bf16 %v14655_v63, %v14654_v57  ;;  %v10866_v46 = vld [vmem:[#allocation4 + $0xa] sm:$0xff]  ;;  %v14656_v19 = vld [vmem:[%s21787_s3 + $0x2b0] sm:$0xff] }
 0x7a2   : > { %10522 = vst.msk [vmem:[#allocation4 + $0x43] sm:$0xff] %vm426_vm3, %v10512_v35  ;;  %v10494_v23 = vmul.f32 %v10484_v43, %v21068_v3  ;;  %17303 = vmatprep.mubr.msk.f32.mxu1 %vm426_vm3, %v10562_v31  ;;  %v10553_v54 = vld [vmem:[#allocation4 + $0x19] sm:$0xff]  ;;  %v10554_v20 = vld [vmem:[#allocation4 + $0x21] sm:$0xff]  ;;  %17901 = vmatpush3.bf16.msra.mxu1 %v21261_v4  ;;  %v11225_v15 = vld [vmem:[#allocation4 + $0xb] sm:$0xff] }
 0x7a3   : > { %10521 = vst.msk [vmem:[#allocation4 + $0x3b] sm:$0xff] %vm426_vm3, %v10511_v34  ;;  %v10493_v62 = vmul.f32 %v10483_v42, %v21071_v49  ;;  %v10563_v0 = vmax.f32 %v10553_v54, 0.0  ;;  %v10564_v26 = vmax.f32 %v10554_v20, 0.0  ;;  %17903 = vmatprep.subr.bf16.mxu1 %v17902_v17  ;;  %v10528_v50 = vld [vmem:[#allocation4 + $0x18] sm:$0xff]  ;;  %v10529_v11 = vld [vmem:[#allocation4 + $0x20] sm:$0xff]  ;;  %v14657_v1 = vld [vmem:[%s21787_s3 + $0x2b8] sm:$0xff] }
 0x7a4   : > { %v10514_v24 = vadd.f32 %v10504_v52, %v10494_v23  ;;  %v10538_v53 = vmax.f32 %v10528_v50, 0.0  ;;  %v10539_v16 = vmax.f32 %v10529_v11, 0.0  ;;  %v10865_v31 = vld [vmem:[#allocation4 + $0x2] sm:$0xff]  ;;  %v10867_v34 = vld [vmem:[#allocation4 + $0x12] sm:$0xff]  ;;  %v10876_v42 = vmax.f32 %v10866_v46, 0.0  ;;  %v10868_v20 = vld [vmem:[#allocation4 + $0x1a] sm:$0xff] }
 0x7a5   : > { %v10513_v22 = vadd.f32 %v10503_v5, %v10493_v62  ;;  %17304 = vmatmul.mubr.msk.f32.gmra.mrb[92].mxu1 %vm426_vm3, %v10563_v0  ;;  %v10875_v59 = vmax.f32 %v10865_v31, 0.0  ;;  %v17918_v23 = vpack.c.bf16 %v14657_v1, %v14656_v19  ;;  %v10877_v54 = vmax.f32 %v10867_v34, 0.0  ;;  %v14668_v52 = vld [vmem:[%s21787_s3 + $0x2c0] sm:$0xff]  ;;  %v14669_v62 = vld [vmem:[%s21787_s3 + $0x2c8] sm:$0xff]  ;;  %v10869_v0 = vld [vmem:[#allocation4 + $0x22] sm:$0xff] }
 0x7a6   : > { %10524 = vst.msk [vmem:[#allocation4 + $0x53] sm:$0xff] %vm426_vm3, %v10514_v24  ;;  %17306 = vmatprep.mubr.msk.f32.mxu1 %vm426_vm3, %v10564_v26  ;;  %v10555_v29 = vld [vmem:[#allocation4 + $0x29] sm:$0xff]  ;;  %v10556_v4 = vld [vmem:[#allocation4 + $0x31] sm:$0xff]  ;;  %17905 = vmatpush3.bf16.msra.mxu1 %v17902_v17  ;;  %v10878_v26 = vmax.f32 %v10868_v20, 0.0  ;;  %v10879_v24 = vmax.f32 %v10869_v0, 0.0  ;;  %v14684_v50 = vld [vmem:[%s21787_s3 + $0x2f0] sm:$0xff] }
 0x7a7   : > { %10523 = vst.msk [vmem:[#allocation4 + $0x4b] sm:$0xff] %vm426_vm3, %v10513_v22  ;;  %v10565_v9 = vmax.f32 %v10555_v29, 0.0  ;;  %v10566_v36 = vmax.f32 %v10556_v4, 0.0  ;;  %17907 = vmatprep.subr.bf16.mxu1 %v17906_v14  ;;  %v10530_v58 = vld [vmem:[#allocation4 + $0x28] sm:$0xff]  ;;  %v10531_v41 = vld [vmem:[#allocation4 + $0x30] sm:$0xff]  ;;  %v11227_v63 = vld [vmem:[#allocation4 + $0x1b] sm:$0xff] }
 0x7a8   : > { %v10540_v27 = vmax.f32 %v10530_v58, 0.0  ;;  %v10541_v8 = vmax.f32 %v10531_v41, 0.0  ;;  %v10870_v5 = vld [vmem:[#allocation4 + $0x2a] sm:$0xff]  ;;  %v10871_v22 = vld [vmem:[#allocation4 + $0x32] sm:$0xff]  ;;  %v14698_v20 = vld [vmem:[%s21787_s3 + $0x310] sm:$0xff] }
 0x7a9   : > { %17307 = vmatmul.mubr.msk.f32.gmra.mrb[94].mxu1 %vm426_vm3, %v10565_v9  ;;  %v10880_v29 = vmax.f32 %v10870_v5, 0.0  ;;  %v10881_v4 = vmax.f32 %v10871_v22, 0.0  ;;  %v14685_v57 = vld [vmem:[%s21787_s3 + $0x2f8] sm:$0xff]  ;;  %v14696_v58 = vld [vmem:[%s21787_s3 + $0x300] sm:$0xff]  ;;  %v14697_v41 = vld [vmem:[%s21787_s3 + $0x308] sm:$0xff] }
 0x7aa   : > { %17309 = vmatprep.mubr.msk.f32.mxu1 %vm426_vm3, %v10566_v36  ;;  %v10557_v38 = vld [vmem:[#allocation4 + $0x39] sm:$0xff]  ;;  %v10558_v7 = vld [vmem:[#allocation4 + $0x41] sm:$0xff]  ;;  %v11405_v34 = vld [vmem:[#allocation4 + $0xc] sm:$0xff] }
 0x7ab   : > { %v10567_v12 = vmax.f32 %v10557_v38, 0.0  ;;  %v10568_v28 = vmax.f32 %v10558_v7, 0.0  ;;  %v10532_v40 = vld [vmem:[#allocation4 + $0x38] sm:$0xff]  ;;  %v10533_v6 = vld [vmem:[#allocation4 + $0x40] sm:$0xff]  ;;  %v14710_v5 = vld [vmem:[%s21787_s3 + $0x320] sm:$0xff] }
 0x7ac   : > { %v10542_v2 = vmax.f32 %v10532_v40, 0.0  ;;  %v10543_v17 = vmax.f32 %v10533_v6, 0.0  ;;  %v10872_v9 = vld [vmem:[#allocation4 + $0x3a] sm:$0xff]  ;;  %v10873_v36 = vld [vmem:[#allocation4 + $0x42] sm:$0xff]  ;;  %v17938_v40 = vpack.c.bf16 %v14697_v41, %v14696_v58 }
 0x7ad   : > { %17310 = vmatmul.mubr.msk.f32.gmra.mrb[96].mxu1 %vm426_vm3, %v10567_v12  ;;  %v10882_v38 = vmax.f32 %v10872_v9, 0.0  ;;  %v10883_v7 = vmax.f32 %v10873_v36, 0.0  ;;  %v11231_v31 = vld [vmem:[#allocation4 + $0x3b] sm:$0xff]  ;;  %v11234_v1 = vld [vmem:[#allocation4 + $0x53] sm:$0xff]  ;;  %v14727_v58 = vld [vmem:[%s21787_s3 + $0x358] sm:$0xff] }
 0x7ae   : > { %17312 = vmatprep.mubr.msk.f32.mxu1 %vm426_vm3, %v10568_v28  ;;  %v10559_v39 = vld [vmem:[#allocation4 + $0x49] sm:$0xff]  ;;  %v11054_v32 = vld [vmem:[#allocation4 + $0x52] sm:$0xff] }
 0x7af   : > { %v10569_v21 = vmax.f32 %v10559_v39, 0.0  ;;  %v10534_v35 = vld [vmem:[#allocation4 + $0x48] sm:$0xff]  ;;  %v14711_v22 = vld [vmem:[%s21787_s3 + $0x328] sm:$0xff] }
 0x7b0   : > { %v10544_v43 = vmax.f32 %v10534_v35, 0.0  ;;  %v10874_v12 = vld [vmem:[#allocation4 + $0x4a] sm:$0xff]  ;;  %v11241_v35 = vmax.f32 %v11231_v31, 0.0  ;;  %v17946_v9 = vpack.c.bf16 %v14711_v22, %v14710_v5  ;;  %v11949_v5 = vld [vmem:[#allocation4 + $0x36] sm:$0xff] }
 0x7b1   : > { %17313 = vmatmul.mubr.msk.f32.gmra.mrb[98].mxu1 %vm426_vm3, %v10569_v21  ;;  %v10884_v28 = vmax.f32 %v10874_v12, 0.0  ;;  %v14671_v39 = vld [vmem:[%s21787_s3 + $0x2d8] sm:$0xff]  ;;  %v14682_v21 = vld [vmem:[%s21787_s3 + $0x2e0] sm:$0xff] }
 0x7b2   : > { %17323 = vmatprep.mubr.msk.f32.mxu1 %vm426_vm3, %v10535_v60  ;;  %v17926_v60 = vpack.c.bf16 %v14671_v39, %v14670_v44  ;;  %v17930_v30 = vpack.c.bf16 %v14683_v56, %v14682_v21  ;;  %v11412_v44 = vld [vmem:[#allocation4 + $0x44] sm:$0xff]  ;;  %v11413_v39 = vld [vmem:[#allocation4 + $0x4c] sm:$0xff]  ;;  %v11414_v56 = vld [vmem:[#allocation4 + $0x54] sm:$0xff] }
 0x7b3   : > { %v11423_v21 = vmax.f32 %v11413_v39, 0.0  ;;  %v11767_v41 = vld [vmem:[#allocation4 + $0x25] sm:$0xff] }
 0x7b5   : > { %17324 = vmatmul.mubr.msk.f32.vlgmr.msra.gmra.mrb[90].mxu1 %vm426_vm3, %v10536_v25  ;;  %v11064_v25 = vmax.f32 %v11054_v32, 0.0  ;;  %v14712_v32 = vld [vmem:[%s21787_s3 + $0x330] sm:$0xff] }
 0x7b6   : > { %17326 = vmatprep.mubr.msk.f32.mxu1 %vm426_vm3, %v10537_v45  ;;  %17909 = vmatpush3.bf16.msra.mxu1 %v17906_v14  ;;  %v17922_v14 = vpack.c.bf16 %v14669_v62, %v14668_v52  ;;  %v11226_v45 = vld [vmem:[#allocation4 + $0x13] sm:$0xff]  ;;  %v14699_v52 = vld [vmem:[%s21787_s3 + $0x318] sm:$0xff]  ;;  %v11407_v62 = vld [vmem:[#allocation4 + $0x1c] sm:$0xff] }
 0x7b7   : > { %17911 = vmatprep.subr.bf16.mxu1 %v17910_v48  ;;  %v11236_v11 = vmax.f32 %v11226_v45, 0.0  ;;  %v14725_v45 = vld [vmem:[%s21787_s3 + $0x348] sm:$0xff] }
 0x7b9   : > { %17327 = vmatmul.mubr.msk.f32.gmra.mrb[92].mxu1 %vm426_vm3, %v10538_v53  ;;  %v17934_v53 = vpack.c.bf16 %v14685_v57, %v14684_v50  ;;  %v11594_v57 = vld [vmem:[#allocation4 + $0x5c] sm:$0xff] }
 0x7ba   : > { %17329 = vmatprep.mubr.msk.f32.mxu1 %vm426_vm3, %v10539_v16  ;;  %17913 = vmatpush3.bf16.msra.mxu1 %v17910_v48  ;;  %v11235_v48 = vmax.f32 %v11225_v15, 0.0  ;;  %v11228_v16 = vld [vmem:[#allocation4 + $0x23] sm:$0xff] }
 0x7bb   : > { %17915 = vmatprep.subr.bf16.mxu1 %v17914_v61  ;;  %v14713_v15 = vld [vmem:[%s21787_s3 + $0x338] sm:$0xff] }
 0x7bd   : > { %17330 = vmatmul.mubr.msk.f32.gmra.mrb[94].mxu1 %vm426_vm3, %v10540_v27  ;;  %v11229_v27 = vld [vmem:[#allocation4 + $0x2b] sm:$0xff] }
 0x7be   : > { %17332 = vmatprep.mubr.msk.f32.mxu1 %vm426_vm3, %v10541_v8  ;;  %v11238_v8 = vmax.f32 %v11228_v16, 0.0  ;;  %v11239_v6 = vmax.f32 %v11229_v27, 0.0  ;;  %v14726_v16 = vld [vmem:[%s21787_s3 + $0x350] sm:$0xff] }
 0x7c1   : > { %17333 = vmatmul.mubr.msk.f32.gmra.mrb[96].mxu1 %vm426_vm3, %v10542_v2  ;;  %v11230_v2 = vld [vmem:[#allocation4 + $0x33] sm:$0xff] }
 0x7c2   : > { %17335 = vmatprep.mubr.msk.f32.mxu1 %vm426_vm3, %v10543_v17  ;;  %v11240_v17 = vmax.f32 %v11230_v2, 0.0  ;;  %v11769_v2 = vld [vmem:[#allocation4 + $0x35] sm:$0xff] }
 0x7c5   : > { %17336 = vmatmul.mubr.msk.f32.gmra.mrb[98].mxu1 %vm426_vm3, %v10544_v43  ;;  %v11233_v43 = vld [vmem:[#allocation4 + $0x4b] sm:$0xff] }
 0x7c6   : > { %17346 = vmatprep.mubr.msk.f32.mxu1 %vm426_vm3, %v10875_v59  ;;  %v11232_v59 = vld [vmem:[#allocation4 + $0x43] sm:$0xff]  ;;  %v11243_v19 = vmax.f32 %v11233_v43, 0.0 }
 0x7c7   : > { %v11242_v46 = vmax.f32 %v11232_v59, 0.0  ;;  %v11771_v59 = vld [vmem:[#allocation4 + $0x45] sm:$0xff] }
 0x7c9   : > { %17347 = vmatmul.mubr.msk.f32.vlgmr.msra.gmra.mrb[90].mxu1 %vm426_vm3, %v10876_v42 }
 0x7ca   : > { %17349 = vmatprep.mubr.msk.f32.mxu1 %vm426_vm3, %v10877_v54  ;;  %17917 = vmatpush3.bf16.msra.mxu1 %v17914_v61  ;;  %v11237_v61 = vmax.f32 %v11227_v63, 0.0  ;;  %v11604_v63 = vmax.f32 %v11594_v57, 0.0  ;;  %v14741_v57 = vld [vmem:[%s21787_s3 + $0x368] sm:$0xff] }
 0x7cb   : > { %17919 = vmatprep.subr.bf16.mxu1 %v17918_v23 }
 0x7cd   : > { %17350 = vmatmul.mubr.msk.f32.gmra.mrb[92].mxu1 %vm426_vm3, %v10878_v26 }
 0x7ce   : > { %17352 = vmatprep.mubr.msk.f32.mxu1 %vm426_vm3, %v10879_v24  ;;  %17921 = vmatpush3.bf16.msra.mxu1 %v17918_v23  ;;  %v11415_v23 = vmax.f32 %v11405_v34, 0.0  ;;  %v11774_v34 = vld [vmem:[#allocation4 + $0x5d] sm:$0xff] }
 0x7cf   : > { %17923 = vmatprep.subr.bf16.mxu1 %v17922_v14 }
 0x7d1   : > { %17353 = vmatmul.mubr.msk.f32.gmra.mrb[94].mxu1 %vm426_vm3, %v10880_v29 }
 0x7d2   : > { %17355 = vmatprep.mubr.msk.f32.mxu1 %vm426_vm3, %v10881_v4 }
 0x7d5   : > { %17356 = vmatmul.mubr.msk.f32.gmra.mrb[96].mxu1 %vm426_vm3, %v10882_v38 }
 0x7d6   : > { %17358 = vmatprep.mubr.msk.f32.mxu1 %vm426_vm3, %v10883_v7 }
 0x7d9   : > { %17359 = vmatmul.mubr.msk.f32.gmra.mrb[98].mxu1 %vm426_vm3, %v10884_v28 }
 0x7da   : > { %17369 = vmatprep.mubr.msk.f32.mxu1 %vm426_vm3, %v10876_v42  ;;  %v11244_v42 = vmax.f32 %v11234_v1, 0.0  ;;  %v11773_v1 = vld [vmem:[#allocation4 + $0x55] sm:$0xff] }
 0x7dd   : > { %17370 = vmatmul.mubr.msk.f32.vlgmr.msra.gmra.mrb[90].mxu1 %vm426_vm3, %v10877_v54  ;;  %v11406_v54 = vld [vmem:[#allocation4 + $0x14] sm:$0xff] }
 0x7de   : > { %17372 = vmatprep.mubr.msk.f32.mxu1 %vm426_vm3, %v10878_v26  ;;  %17925 = vmatpush3.bf16.msra.mxu1 %v17922_v14  ;;  %v11416_v0 = vmax.f32 %v11406_v54, 0.0  ;;  %v17942_v26 = vpack.c.bf16 %v14699_v52, %v14698_v20  ;;  %v11417_v14 = vmax.f32 %v11407_v62, 0.0  ;;  %v11784_v54 = vmax.f32 %v11774_v34, 0.0  ;;  %v11945_v20 = vld [vmem:[#allocation4 + $0x16] sm:$0xff]  ;;  %v11946_v62 = vld [vmem:[#allocation4 + $0x1e] sm:$0xff]  ;;  %v14743_v34 = vld [vmem:[%s21787_s3 + $0x378] sm:$0xff] }
 0x7df   : > { %17927 = vmatprep.subr.bf16.mxu1 %v17926_v60  ;;  %v11955_v52 = vmax.f32 %v11945_v20, 0.0 }
 0x7e1   : > { %17373 = vmatmul.mubr.msk.f32.gmra.mrb[92].mxu1 %vm426_vm3, %v10879_v24  ;;  %v11408_v24 = vld [vmem:[#allocation4 + $0x24] sm:$0xff] }
 0x7e2   : > { %17375 = vmatprep.mubr.msk.f32.mxu1 %vm426_vm3, %v10880_v29  ;;  %17929 = vmatpush3.bf16.msra.mxu1 %v17926_v60  ;;  %v11409_v29 = vld [vmem:[#allocation4 + $0x2c] sm:$0xff]  ;;  %v11422_v60 = vmax.f32 %v11412_v44, 0.0 }
 0x7e3   : > { %17931 = vmatprep.subr.bf16.mxu1 %v17930_v30  ;;  %v11419_v36 = vmax.f32 %v11409_v29, 0.0  ;;  %v11959_v29 = vmax.f32 %v11949_v5, 0.0 }
 0x7e5   : > { %17376 = vmatmul.mubr.msk.f32.gmra.mrb[94].mxu1 %vm426_vm3, %v10881_v4  ;;  %v11418_v4 = vmax.f32 %v11408_v24, 0.0  ;;  %v11948_v24 = vld [vmem:[#allocation4 + $0x2e] sm:$0xff] }
 0x7e6   : > { %17378 = vmatprep.mubr.msk.f32.mxu1 %vm426_vm3, %v10882_v38  ;;  %v11410_v38 = vld [vmem:[#allocation4 + $0x34] sm:$0xff]  ;;  %v11958_v22 = vmax.f32 %v11948_v24, 0.0 }
 0x7e7   : > { %v11420_v12 = vmax.f32 %v11410_v38, 0.0 }
 0x7e9   : > { %17379 = vmatmul.mubr.msk.f32.gmra.mrb[96].mxu1 %vm426_vm3, %v10883_v7  ;;  %v11411_v7 = vld [vmem:[#allocation4 + $0x3c] sm:$0xff] }
 0x7ea   : > { %17381 = vmatprep.mubr.msk.f32.mxu1 %vm426_vm3, %v10884_v28  ;;  %v11421_v28 = vmax.f32 %v11411_v7, 0.0  ;;  %v11952_v7 = vld [vmem:[#allocation4 + $0x4e] sm:$0xff] }
 0x7eb   : > { %v11962_v44 = vmax.f32 %v11952_v7, 0.0 }
 0x7ed   : > { %17382 = vmatmul.mubr.msk.f32.gmra.mrb[98].mxu1 %vm426_vm3, %v11064_v25  ;;  %v17950_v25 = vpack.c.bf16 %v14713_v15, %v14712_v32  ;;  %v14746_v32 = vld [vmem:[%s21787_s3 + $0x390] sm:$0xff]  ;;  %v14747_v15 = vld [vmem:[%s21787_s3 + $0x398] sm:$0xff] }
 0x7ee   : > { %17392 = vmatprep.mubr.msk.f32.mxu1 %vm426_vm3, %v11235_v48  ;;  %v14724_v48 = vld [vmem:[%s21787_s3 + $0x340] sm:$0xff] }
 0x7ef   : > { %v17954_v50 = vpack.c.bf16 %v14725_v45, %v14724_v48  ;;  %v12188_v48 = vld [vmem:[#allocation5 + $0x1] sm:$0xff] }
 0x7f0   : > { %v12198_v45 = vmax.f32 %v12188_v48, 0.0 }
 0x7f1   : > { %17393 = vmatmul.mubr.msk.f32.vlgmr.msra.gmra.mrb[90].mxu1 %vm426_vm3, %v11236_v11  ;;  %v11765_v11 = vld [vmem:[#allocation4 + $0x15] sm:$0xff] }
 0x7f2   : > { %17395 = vmatprep.mubr.msk.f32.mxu1 %vm426_vm3, %v11237_v61  ;;  %17933 = vmatpush3.bf16.msra.mxu1 %v17930_v30  ;;  %v11424_v30 = vmax.f32 %v11414_v56, 0.0  ;;  %v11766_v61 = vld [vmem:[#allocation4 + $0x1d] sm:$0xff] }
 0x7f3   : > { %17935 = vmatprep.subr.bf16.mxu1 %v17934_v53  ;;  %v11776_v27 = vmax.f32 %v11766_v61, 0.0  ;;  %v14745_v56 = vld [vmem:[%s21787_s3 + $0x388] sm:$0xff]  ;;  %17507 = vmatprep.mubr.msk.f32.mxu0 %vm426_vm3, %v12198_v45 }
 0x7f5   : > { %17396 = vmatmul.mubr.msk.f32.gmra.mrb[92].mxu1 %vm426_vm3, %v11238_v8  ;;  %v17958_v8 = vpack.c.bf16 %v14727_v58, %v14726_v16 }
 0x7f6   : > { %17398 = vmatprep.mubr.msk.f32.mxu1 %vm426_vm3, %v11239_v6  ;;  %17937 = vmatpush3.bf16.msra.mxu1 %v17934_v53  ;;  %v11775_v53 = vmax.f32 %v11765_v11, 0.0  ;;  %v11768_v6 = vld [vmem:[#allocation4 + $0x2d] sm:$0xff] }
 0x7f7   : > { %17939 = vmatprep.subr.bf16.mxu1 %v17938_v40  ;;  %v11778_v31 = vmax.f32 %v11768_v6, 0.0  ;;  %v14739_v11 = vld [vmem:[%s21788_s4 + $0x2] ss:$0 sm:$0xff] }
 0x7f9   : > { %17399 = vmatmul.mubr.msk.f32.gmra.mrb[94].mxu1 %vm426_vm3, %v11240_v17  ;;  %v11779_v17 = vmax.f32 %v11769_v2, 0.0 }
 0x7fa   : > { %17401 = vmatprep.mubr.msk.f32.mxu1 %vm426_vm3, %v11241_v35  ;;  %v11770_v35 = vld [vmem:[#allocation4 + $0x3d] sm:$0xff] }
 0x7fb   : > { %v11780_v43 = vmax.f32 %v11770_v35, 0.0 }
 0x7fd   : > { %17402 = vmatmul.mubr.msk.f32.gmra.mrb[96].mxu1 %vm426_vm3, %v11242_v46  ;;  %v11781_v46 = vmax.f32 %v11771_v59, 0.0 }
 0x7fe   : > { %17404 = vmatprep.mubr.msk.f32.mxu1 %vm426_vm3, %v11243_v19  ;;  %v11772_v19 = vld [vmem:[#allocation4 + $0x4d] sm:$0xff] }
 0x801   : > { %17405 = vmatmul.mubr.msk.f32.gmra.mrb[98].mxu1 %vm426_vm3, %v11244_v42  ;;  %v11782_v42 = vmax.f32 %v11772_v19, 0.0 }
 0x802   : > { %17415 = vmatprep.mubr.msk.f32.mxu1 %vm426_vm3, %v11415_v23  ;;  %v11783_v23 = vmax.f32 %v11773_v1, 0.0  ;;  %v14742_v1 = vld [vmem:[%s21787_s3 + $0x370] sm:$0xff] }
 0x803   : > { %v17974_v24 = vpack.c.bf16 %v14743_v34, %v14742_v1 }
 0x805   : > { %17416 = vmatmul.mubr.msk.f32.vlgmr.msra.gmra.mrb[90].mxu1 %vm426_vm3, %v11416_v0 }
 0x806   : > { %17418 = vmatprep.mubr.msk.f32.mxu1 %vm426_vm3, %v11417_v14  ;;  %17941 = vmatpush3.bf16.msra.mxu1 %v17938_v40  ;;  %v11777_v40 = vmax.f32 %v11767_v41, 0.0 }
 0x807   : > { %17943 = vmatprep.subr.bf16.mxu1 %v17942_v26 }
 0x809   : > { %17419 = vmatmul.mubr.msk.f32.gmra.mrb[92].mxu1 %vm426_vm3, %v11418_v4 }
 0x80a   : > { %17421 = vmatprep.mubr.msk.f32.mxu1 %vm426_vm3, %v11419_v36  ;;  %17945 = vmatpush3.bf16.msra.mxu1 %v17942_v26  ;;  %v11956_v26 = vmax.f32 %v11946_v62, 0.0 }
 0x80b   : > { %17947 = vmatprep.subr.bf16.mxu1 %v17946_v9 }
 0x80d   : > { %17422 = vmatmul.mubr.msk.f32.gmra.mrb[94].mxu1 %vm426_vm3, %v11420_v12 }
 0x80e   : > { %17424 = vmatprep.mubr.msk.f32.mxu1 %vm426_vm3, %v11421_v28 }
 0x811   : > { %17425 = vmatmul.mubr.msk.f32.gmra.mrb[96].mxu1 %vm426_vm3, %v11422_v60 }
 0x812   : > { %17427 = vmatprep.mubr.msk.f32.mxu1 %vm426_vm3, %v11423_v21 }
 0x815   : > { %17428 = vmatmul.mubr.msk.f32.gmra.mrb[98].mxu1 %vm426_vm3, %v11424_v30 }
 0x816   : > { %17438 = vmatprep.mubr.msk.f32.mxu1 %vm426_vm3, %v11416_v0  ;;  %v11947_v0 = vld [vmem:[#allocation4 + $0x26] sm:$0xff] }
 0x819   : > { %17439 = vmatmul.mubr.msk.f32.vlgmr.msra.gmra.mrb[90].mxu1 %vm426_vm3, %v11417_v14  ;;  %v11957_v14 = vmax.f32 %v11947_v0, 0.0 }
 0x81a   : > { %17441 = vmatprep.mubr.msk.f32.mxu1 %vm426_vm3, %v11418_v4  ;;  %17949 = vmatpush3.bf16.msra.mxu1 %v17946_v9  ;;  %v11950_v4 = vld [vmem:[#allocation4 + $0x3e] sm:$0xff]  ;;  %v11951_v9 = vld [vmem:[#allocation4 + $0x46] sm:$0xff] }
 0x81b   : > { %17951 = vmatprep.subr.bf16.mxu1 %v17950_v25  ;;  %v11961_v38 = vmax.f32 %v11951_v9, 0.0 }
 0x81d   : > { %17442 = vmatmul.mubr.msk.f32.gmra.mrb[92].mxu1 %vm426_vm3, %v11419_v36  ;;  %v11960_v36 = vmax.f32 %v11950_v4, 0.0 }
 0x81e   : > { %17444 = vmatprep.mubr.msk.f32.mxu1 %vm426_vm3, %v11420_v12  ;;  %17953 = vmatpush3.bf16.msra.mxu1 %v17950_v25  ;;  %v11953_v12 = vld [vmem:[#allocation4 + $0x56] sm:$0xff]  ;;  %v17966_v25 = vpack.c.bf16 %v14747_v15, %v14746_v32 }
 0x81f   : > { %17955 = vmatprep.subr.bf16.mxu1 %v17954_v50  ;;  %v11963_v39 = vmax.f32 %v11953_v12, 0.0 }
 0x821   : > { %17445 = vmatmul.mubr.msk.f32.gmra.mrb[94].mxu1 %vm426_vm3, %v11421_v28  ;;  %v11954_v28 = vld [vmem:[#allocation4 + $0x5e] sm:$0xff] }
 0x822   : > { %17447 = vmatprep.mubr.msk.f32.mxu1 %vm426_vm3, %v11422_v60  ;;  %v11964_v60 = vmax.f32 %v11954_v28, 0.0 }
 0x825   : > { %17448 = vmatmul.mubr.msk.f32.gmra.mrb[96].mxu1 %vm426_vm3, %v11423_v21  ;;  %v14744_v21 = vld [vmem:[%s21787_s3 + $0x380] sm:$0xff] }
 0x826   : > { %17450 = vmatprep.mubr.msk.f32.mxu1 %vm426_vm3, %v11424_v30  ;;  %v17962_v30 = vpack.c.bf16 %v14745_v56, %v14744_v21 }
 0x828   : > { %17963 = vmatprep.subr.bf16.mxu0 %v17962_v30 }
 0x829   : > { %17451 = vmatmul.mubr.msk.f32.gmra.mrb[98].mxu1 %vm426_vm3, %v11604_v63  ;;  %17965 = vmatpush3.bf16.msra.mxu0 %v17962_v30 }
 0x82a   : > { %17461 = vmatprep.mubr.msk.f32.mxu1 %vm426_vm3, %v11775_v53  ;;  %17967 = vmatprep.subr.bf16.mxu0 %v17966_v25 }
 0x82d   : > { %17462 = vmatmul.mubr.msk.f32.vlgmr.msra.gmra.mrb[90].mxu1 %vm426_vm3, %v11776_v27  ;;  %17969 = vmatpush3.bf16.msra.mxu0 %v17966_v25 }
 0x82e   : > { %17464 = vmatprep.mubr.msk.f32.mxu1 %vm426_vm3, %v11777_v40  ;;  %17957 = vmatpush3.bf16.msra.mxu1 %v17954_v50  ;;  %v14740_v50 = vld [vmem:[%s21787_s3 + $0x360] sm:$0xff] }
 0x82f   : > { %17959 = vmatprep.subr.bf16.mxu1 %v17958_v8  ;;  %v17970_v63 = vpack.c.bf16 %v14741_v57, %v14740_v50 }
 0x831   : > { %17465 = vmatmul.mubr.msk.f32.gmra.mrb[92].mxu1 %vm426_vm3, %v11778_v31  ;;  %17971 = vmatprep.subr.bf16.mxu0 %v17970_v63 }
 0x832   : > { %17467 = vmatprep.mubr.msk.f32.mxu1 %vm426_vm3, %v11779_v17  ;;  %17961 = vmatpush3.bf16.msra.mxu1 %v17958_v8 }
 0x835   : > { %17468 = vmatmul.mubr.msk.f32.gmra.mrb[94].mxu1 %vm426_vm3, %v11780_v43 }
 0x836   : > { %17470 = vmatprep.mubr.msk.f32.mxu1 %vm426_vm3, %v11781_v46 }
 0x839   : > { %17471 = vmatmul.mubr.msk.f32.gmra.mrb[96].mxu1 %vm426_vm3, %v11782_v42 }
 0x83a   : > { %17473 = vmatprep.mubr.msk.f32.mxu1 %vm426_vm3, %v11783_v23 }
 0x83d   : > { %17474 = vmatmul.mubr.msk.f32.gmra.mrb[98].mxu1 %vm426_vm3, %v11784_v54 }
 0x83e   : > { %17484 = vmatprep.mubr.msk.f32.mxu1 %vm426_vm3, %v11955_v52 }
 0x841   : > { %17485 = vmatmul.mubr.msk.f32.vlgmr.msra.gmra.mrb[90].mxu1 %vm426_vm3, %v11956_v26 }
 0x842   : > { %17487 = vmatprep.mubr.msk.f32.mxu1 %vm426_vm3, %v11957_v14 }
 0x845   : > { %17488 = vmatmul.mubr.msk.f32.gmra.mrb[92].mxu1 %vm426_vm3, %v11958_v22  ;;  %v14768_v22 = vld [vmem:[%s21787_s3 + $0x3a0] sm:$0xff] }
 0x846   : > { %17490 = vmatprep.mubr.msk.f32.mxu1 %vm426_vm3, %v11959_v29  ;;  %v14769_v29 = vld [vmem:[%s21787_s3 + $0x3a8] sm:$0xff] }
 0x849   : > { %17491 = vmatmul.mubr.msk.f32.gmra.mrb[94].mxu1 %vm426_vm3, %v11960_v36 }
 0x84a   : > { %17493 = vmatprep.mubr.msk.f32.mxu1 %vm426_vm3, %v11961_v38 }
 0x84d   : > { %17494 = vmatmul.mubr.msk.f32.gmra.mrb[96].mxu1 %vm426_vm3, %v11962_v44 }
 0x84e   : > { %17496 = vmatprep.mubr.msk.f32.mxu1 %vm426_vm3, %v11963_v39 }
 0x851   : > { %17497 = vmatmul.mubr.msk.f32.gmra.mrb[98].mxu1 %vm426_vm3, %v11964_v60  ;;  %v17978_v60 = vpack.c.bf16 %v14769_v29, %v14768_v22  ;;  %v14785_v22 = vld [vmem:[%s21787_s3 + $0x3d8] sm:$0xff] }
 0x914   : > { %v17486_v53 = vpop.f32.mrb[90].mxu1 }
 0x915   : > { %v12134_v61 = vadd.f32 %v17486_v53, %v14739_v11  ;;  %v12066_v16 = vpop.f32.mrb[91].mxu1 }
 0x916   : > { %v12133_v58 = vadd.f32 %v14739_v11, %v12066_v16 }
 0x917   : > { %v12144_v41 = vmul.f32 %v12134_v61, %v21020_v10 }
 0x918   : > { %v12143_v27 = vmul.f32 %v12133_v58, %v21022_v47  ;;  %v17489_v8 = vpop.f32.mrb[92].mxu1  ;;  %v14770_v58 = vld [vmem:[%s21787_s3 + $0x3b0] sm:$0xff] }
 0x919   : > { %12154 = vst.msk [vmem:[#allocation5 + $0x13] sm:$0xff] %vm426_vm3, %v12144_v41  ;;  %v12136_v40 = vadd.f32 %v17489_v8, %v14739_v11  ;;  %v12076_v6 = vpop.f32.mrb[93].mxu1  ;;  %v14771_v41 = vld [vmem:[%s21787_s3 + $0x3b8] sm:$0xff] }
 0x91a   : > { %12153 = vst.msk [vmem:[#allocation5 + $0xb] sm:$0xff] %vm426_vm3, %v12143_v27  ;;  %v12135_v2 = vadd.f32 %v14739_v11, %v12076_v6 }
 0x91b   : > { %v12146_v31 = vmul.f32 %v12136_v40, %v21027_v18  ;;  %v17982_v40 = vpack.c.bf16 %v14771_v41, %v14770_v58 }
 0x91c   : > { %v12145_v17 = vmul.f32 %v12135_v2, %v21029_v55  ;;  %v17492_v35 = vpop.f32.mrb[94].mxu1 }
 0x91d   : > { %12156 = vst.msk [vmem:[#allocation5 + $0x23] sm:$0xff] %vm426_vm3, %v12146_v31  ;;  %v12138_v59 = vadd.f32 %v17492_v35, %v14739_v11  ;;  %v12086_v43 = vpop.f32.mrb[95].mxu1  ;;  %v14782_v31 = vld [vmem:[%s21787_s3 + $0x3c0] sm:$0xff] }
 0x91e   : > { %12155 = vst.msk [vmem:[#allocation5 + $0x1b] sm:$0xff] %vm426_vm3, %v12145_v17  ;;  %v12137_v46 = vadd.f32 %v14739_v11, %v12086_v43  ;;  %v14783_v17 = vld [vmem:[%s21787_s3 + $0x3c8] sm:$0xff] }
 0x91f   : > { %v12148_v19 = vmul.f32 %v12138_v59, %v21034_v37  ;;  %v17986_v43 = vpack.c.bf16 %v14783_v17, %v14782_v31  ;;  %v14813_v31 = vld [vmem:[%s21787_s3 + $0x418] sm:$0xff] }
 0x920   : > { %v12147_v42 = vmul.f32 %v12137_v46, %v21037_v13  ;;  %v17495_v23 = vpop.f32.mrb[96].mxu1 }
 0x921   : > { %12158 = vst.msk [vmem:[#allocation5 + $0x33] sm:$0xff] %vm426_vm3, %v12148_v19  ;;  %v12140_v54 = vadd.f32 %v17495_v23, %v14739_v11  ;;  %v12096_v20 = vpop.f32.mrb[97].mxu1  ;;  %v12189_v52 = vld [vmem:[#allocation5 + $0x9] sm:$0xff]  ;;  %v12190_v62 = vld [vmem:[#allocation5 + $0x11] sm:$0xff] }
 0x922   : > { %12157 = vst.msk [vmem:[#allocation5 + $0x2b] sm:$0xff] %vm426_vm3, %v12147_v42  ;;  %v12139_v0 = vadd.f32 %v14739_v11, %v12096_v20  ;;  %v12199_v26 = vmax.f32 %v12189_v52, 0.0  ;;  %v12200_v14 = vmax.f32 %v12190_v62, 0.0  ;;  %v12164_v16 = vld [vmem:[#allocation5 + $0x8] sm:$0xff]  ;;  %v12165_v27 = vld [vmem:[#allocation5 + $0x10] sm:$0xff] }
 0x923   : > { %v12150_v5 = vmul.f32 %v12140_v54, %v21050_v51  ;;  %v12174_v8 = vmax.f32 %v12164_v16, 0.0  ;;  %v12175_v6 = vmax.f32 %v12165_v27, 0.0  ;;  %v12503_v52 = vld [vmem:[#allocation5 + $0x2] sm:$0xff]  ;;  %v12505_v29 = vld [vmem:[#allocation5 + $0x12] sm:$0xff] }
 0x924   : > { %v12149_v4 = vmul.f32 %v12139_v0, %v21053_v33  ;;  %v17498_v9 = vpop.f32.mrb[98].mxu1  ;;  %17508 = vmatmul.mubr.msk.f32.vlgmr.msra.gmra.mrb[90].mxu0 %vm426_vm3, %v12199_v26  ;;  %v12513_v26 = vmax.f32 %v12503_v52, 0.0  ;;  %v14811_v16 = vld [vmem:[%s21787_s3 + $0x408] sm:$0xff] }
 0x925   : > { %12160 = vst.msk [vmem:[#allocation5 + $0x43] sm:$0xff] %vm426_vm3, %v12150_v5  ;;  %v12142_v36 = vadd.f32 %v17498_v9, %v14739_v11  ;;  %v12106_v38 = vpop.f32.mrb[99].mxu1  ;;  %17510 = vmatprep.mubr.msk.f32.mxu0 %vm426_vm3, %v12200_v14  ;;  %v12191_v7 = vld [vmem:[#allocation5 + $0x19] sm:$0xff]  ;;  %v12192_v12 = vld [vmem:[#allocation5 + $0x21] sm:$0xff]  ;;  %17973 = vmatpush3.bf16.msra.mxu0 %v17970_v63  ;;  %v12863_v27 = vld [vmem:[#allocation5 + $0xb] sm:$0xff] }
 0x926   : > { %12159 = vst.msk [vmem:[#allocation5 + $0x3b] sm:$0xff] %vm426_vm3, %v12149_v4  ;;  %v12141_v28 = vadd.f32 %v14739_v11, %v12106_v38  ;;  %v12201_v44 = vmax.f32 %v12191_v7, 0.0  ;;  %v12202_v39 = vmax.f32 %v12192_v12, 0.0  ;;  %17975 = vmatprep.subr.bf16.mxu0 %v17974_v24  ;;  %v12163_v63 = vld [vmem:[#allocation5] sm:$0xff]  ;;  %v12166_v2 = vld [vmem:[#allocation5 + $0x18] sm:$0xff]  ;;  %v14796_v7 = vld [vmem:[%s21787_s3 + $0x3e0] sm:$0xff] }
 0x927   : > { %v12152_v21 = vmul.f32 %v12142_v36, %v21068_v3  ;;  %v12173_v53 = vmax.f32 %v12163_v63, 0.0  ;;  %v12167_v35 = vld [vmem:[#allocation5 + $0x20] sm:$0xff]  ;;  %v12176_v59 = vmax.f32 %v12166_v2, 0.0  ;;  %v14784_v5 = vld [vmem:[%s21787_s3 + $0x3d0] sm:$0xff]  ;;  %v12515_v36 = vmax.f32 %v12505_v29, 0.0  ;;  %v14797_v12 = vld [vmem:[%s21787_s3 + $0x3e8] sm:$0xff] }
 0x928   : > { %v12151_v56 = vmul.f32 %v12141_v28, %v21071_v49  ;;  %17511 = vmatmul.mubr.msk.f32.gmra.mrb[92].mxu0 %vm426_vm3, %v12201_v44  ;;  %v12177_v46 = vmax.f32 %v12167_v35, 0.0  ;;  %v17990_v9 = vpack.c.bf16 %v14785_v22, %v14784_v5  ;;  %v12506_v38 = vld [vmem:[#allocation5 + $0x1a] sm:$0xff]  ;;  %v12507_v28 = vld [vmem:[#allocation5 + $0x22] sm:$0xff]  ;;  %v13043_v29 = vld [vmem:[#allocation5 + $0xc] sm:$0xff] }
 0x929   : > { %12162 = vst.msk [vmem:[#allocation5 + $0x53] sm:$0xff] %vm426_vm3, %v12152_v21  ;;  %17513 = vmatprep.mubr.msk.f32.mxu0 %vm426_vm3, %v12202_v39  ;;  %v12193_v30 = vld [vmem:[#allocation5 + $0x29] sm:$0xff]  ;;  %v12194_v32 = vld [vmem:[#allocation5 + $0x31] sm:$0xff]  ;;  %17977 = vmatpush3.bf16.msra.mxu0 %v17974_v24  ;;  %v12516_v44 = vmax.f32 %v12506_v38, 0.0  ;;  %v17994_v39 = vpack.c.bf16 %v14797_v12, %v14796_v7  ;;  %v12865_v17 = vld [vmem:[#allocation5 + $0x1b] sm:$0xff] }
 0x92a   : > { %12161 = vst.msk [vmem:[#allocation5 + $0x4b] sm:$0xff] %vm426_vm3, %v12151_v56  ;;  %v12203_v15 = vmax.f32 %v12193_v30, 0.0  ;;  %v12204_v25 = vmax.f32 %v12194_v32, 0.0  ;;  %17979 = vmatprep.subr.bf16.mxu0 %v17978_v60  ;;  %v12168_v19 = vld [vmem:[#allocation5 + $0x28] sm:$0xff]  ;;  %v12169_v1 = vld [vmem:[#allocation5 + $0x30] sm:$0xff]  ;;  %v14798_v63 = vld [vmem:[%s21787_s3 + $0x3f0] sm:$0xff] }
 0x92b   : > { %v12178_v34 = vmax.f32 %v12168_v19, 0.0  ;;  %v12179_v42 = vmax.f32 %v12169_v1, 0.0  ;;  %v12504_v24 = vld [vmem:[#allocation5 + $0xa] sm:$0xff]  ;;  %v12509_v56 = vld [vmem:[#allocation5 + $0x32] sm:$0xff]  ;;  %v14827_v7 = vld [vmem:[%s21787_s3 + $0x438] sm:$0xff] }
 0x92c   : > { %17514 = vmatmul.mubr.msk.f32.gmra.mrb[94].mxu0 %vm426_vm3, %v12203_v15  ;;  %v12514_v4 = vmax.f32 %v12504_v24, 0.0  ;;  %v12508_v21 = vld [vmem:[#allocation5 + $0x2a] sm:$0xff]  ;;  %v12519_v32 = vmax.f32 %v12509_v56, 0.0  ;;  %v14812_v2 = vld [vmem:[%s21787_s3 + $0x410] sm:$0xff] }
 0x92d   : > { %17516 = vmatprep.mubr.msk.f32.mxu0 %vm426_vm3, %v12204_v25  ;;  %v12195_v48 = vld [vmem:[#allocation5 + $0x39] sm:$0xff]  ;;  %v12196_v45 = vld [vmem:[#allocation5 + $0x41] sm:$0xff]  ;;  %v12518_v30 = vmax.f32 %v12508_v21, 0.0  ;;  %v14825_v1 = vld [vmem:[%s21787_s3 + $0x428] sm:$0xff] }
 0x92e   : > { %v12205_v50 = vmax.f32 %v12195_v48, 0.0  ;;  %v12206_v57 = vmax.f32 %v12196_v45, 0.0  ;;  %v12170_v23 = vld [vmem:[#allocation5 + $0x38] sm:$0xff]  ;;  %v12171_v54 = vld [vmem:[#allocation5 + $0x40] sm:$0xff]  ;;  %v14824_v19 = vld [vmem:[%s21787_s3 + $0x420] sm:$0xff] }
 0x92f   : > { %v12180_v20 = vmax.f32 %v12170_v23, 0.0  ;;  %v12181_v62 = vmax.f32 %v12171_v54, 0.0  ;;  %v12510_v15 = vld [vmem:[#allocation5 + $0x3a] sm:$0xff]  ;;  %v12511_v25 = vld [vmem:[#allocation5 + $0x42] sm:$0xff]  ;;  %v18010_v23 = vpack.c.bf16 %v14825_v1, %v14824_v19  ;;  %v14839_v56 = vld [vmem:[%s21787_s3 + $0x448] sm:$0xff] }
 0x930   : > { %17517 = vmatmul.mubr.msk.f32.gmra.mrb[96].mxu0 %vm426_vm3, %v12205_v50  ;;  %v12520_v48 = vmax.f32 %v12510_v15, 0.0  ;;  %v12521_v45 = vmax.f32 %v12511_v25, 0.0  ;;  %v12869_v52 = vld [vmem:[#allocation5 + $0x3b] sm:$0xff]  ;;  %v12872_v22 = vld [vmem:[#allocation5 + $0x53] sm:$0xff]  ;;  %v14838_v21 = vld [vmem:[%s21787_s3 + $0x440] sm:$0xff] }
 0x931   : > { %17519 = vmatprep.mubr.msk.f32.mxu0 %vm426_vm3, %v12206_v57  ;;  %v12197_v11 = vld [vmem:[#allocation5 + $0x49] sm:$0xff]  ;;  %v12692_v41 = vld [vmem:[#allocation5 + $0x52] sm:$0xff]  ;;  %v13045_v12 = vld [vmem:[#allocation5 + $0x1c] sm:$0xff]  ;;  %v18018_v15 = vpack.c.bf16 %v14839_v56, %v14838_v21 }
 0x932   : > { %v12207_v61 = vmax.f32 %v12197_v11, 0.0  ;;  %v12172_v0 = vld [vmem:[#allocation5 + $0x48] sm:$0xff]  ;;  %v14799_v11 = vld [vmem:[%s21787_s3 + $0x3f8] sm:$0xff]  ;;  %v14826_v38 = vld [vmem:[%s21787_s3 + $0x430] sm:$0xff] }
 0x933   : > { %v12182_v14 = vmax.f32 %v12172_v0, 0.0  ;;  %v12512_v50 = vld [vmem:[#allocation5 + $0x4a] sm:$0xff]  ;;  %v12879_v0 = vmax.f32 %v12869_v52, 0.0  ;;  %v14855_v19 = vld [vmem:[%s21787_s3 + $0x478] sm:$0xff]  ;;  %v13587_v21 = vld [vmem:[#allocation5 + $0x36] sm:$0xff] }
 0x934   : > { %17520 = vmatmul.mubr.msk.f32.gmra.mrb[98].mxu0 %vm426_vm3, %v12207_v61  ;;  %v12522_v57 = vmax.f32 %v12512_v50, 0.0  ;;  %v14810_v61 = vld [vmem:[%s21787_s3 + $0x400] sm:$0xff] }
 0x935   : > { %17530 = vmatprep.mubr.msk.f32.mxu0 %vm426_vm3, %v12173_v53  ;;  %v17998_v53 = vpack.c.bf16 %v14799_v11, %v14798_v63  ;;  %v18002_v58 = vpack.c.bf16 %v14811_v16, %v14810_v61  ;;  %v13050_v63 = vld [vmem:[#allocation5 + $0x44] sm:$0xff]  ;;  %v13051_v11 = vld [vmem:[#allocation5 + $0x4c] sm:$0xff]  ;;  %v13052_v16 = vld [vmem:[#allocation5 + $0x54] sm:$0xff] }
 0x936   : > { %v13061_v61 = vmax.f32 %v13051_v11, 0.0  ;;  %v13405_v1 = vld [vmem:[#allocation5 + $0x25] sm:$0xff] }
 0x938   : > { %17531 = vmatmul.mubr.msk.f32.vlgmr.msra.gmra.mrb[90].mxu0 %vm426_vm3, %v12174_v8  ;;  %v12702_v8 = vmax.f32 %v12692_v41, 0.0  ;;  %v14840_v41 = vld [vmem:[%s21787_s3 + $0x450] sm:$0xff] }
 0x939   : > { %17533 = vmatprep.mubr.msk.f32.mxu0 %vm426_vm3, %v12175_v6  ;;  %17981 = vmatpush3.bf16.msra.mxu0 %v17978_v60  ;;  %v12517_v60 = vmax.f32 %v12507_v28, 0.0  ;;  %v12864_v6 = vld [vmem:[#allocation5 + $0x13] sm:$0xff] }
 0x93a   : > { %17983 = vmatprep.subr.bf16.mxu0 %v17982_v40  ;;  %v12874_v35 = vmax.f32 %v12864_v6, 0.0  ;;  %v14853_v6 = vld [vmem:[%s21787_s3 + $0x468] sm:$0xff] }
 0x93c   : > { %17534 = vmatmul.mubr.msk.f32.gmra.mrb[92].mxu0 %vm426_vm3, %v12176_v59  ;;  %v18006_v59 = vpack.c.bf16 %v14813_v31, %v14812_v2  ;;  %v13232_v31 = vld [vmem:[#allocation5 + $0x5c] sm:$0xff] }
 0x93d   : > { %17536 = vmatprep.mubr.msk.f32.mxu0 %vm426_vm3, %v12177_v46  ;;  %17985 = vmatpush3.bf16.msra.mxu0 %v17982_v40  ;;  %v12873_v40 = vmax.f32 %v12863_v27, 0.0  ;;  %v12866_v46 = vld [vmem:[#allocation5 + $0x23] sm:$0xff] }
 0x93e   : > { %17987 = vmatprep.subr.bf16.mxu0 %v17986_v43  ;;  %v14841_v27 = vld [vmem:[%s21787_s3 + $0x458] sm:$0xff] }
 0x940   : > { %17537 = vmatmul.mubr.msk.f32.gmra.mrb[94].mxu0 %vm426_vm3, %v12178_v34  ;;  %v12867_v34 = vld [vmem:[#allocation5 + $0x2b] sm:$0xff] }
 0x941   : > { %17539 = vmatprep.mubr.msk.f32.mxu0 %vm426_vm3, %v12179_v42  ;;  %v12876_v42 = vmax.f32 %v12866_v46, 0.0  ;;  %v12877_v54 = vmax.f32 %v12867_v34, 0.0  ;;  %v14854_v46 = vld [vmem:[%s21787_s3 + $0x470] sm:$0xff] }
 0x944   : > { %17540 = vmatmul.mubr.msk.f32.gmra.mrb[96].mxu0 %vm426_vm3, %v12180_v20  ;;  %v12868_v20 = vld [vmem:[#allocation5 + $0x33] sm:$0xff] }
 0x945   : > { %17542 = vmatprep.mubr.msk.f32.mxu0 %vm426_vm3, %v12181_v62  ;;  %v12878_v62 = vmax.f32 %v12868_v20, 0.0  ;;  %v13407_v20 = vld [vmem:[#allocation5 + $0x35] sm:$0xff] }
 0x948   : > { %17543 = vmatmul.mubr.msk.f32.gmra.mrb[98].mxu0 %vm426_vm3, %v12182_v14  ;;  %v12871_v14 = vld [vmem:[#allocation5 + $0x4b] sm:$0xff] }
 0x949   : > { %17553 = vmatprep.mubr.msk.f32.mxu0 %vm426_vm3, %v12513_v26  ;;  %v12870_v26 = vld [vmem:[#allocation5 + $0x43] sm:$0xff]  ;;  %v12881_v5 = vmax.f32 %v12871_v14, 0.0 }
 0x94a   : > { %v12880_v24 = vmax.f32 %v12870_v26, 0.0  ;;  %v13409_v26 = vld [vmem:[#allocation5 + $0x45] sm:$0xff] }
 0x94c   : > { %17554 = vmatmul.mubr.msk.f32.vlgmr.msra.gmra.mrb[90].mxu0 %vm426_vm3, %v12514_v4 }
 0x94d   : > { %17556 = vmatprep.mubr.msk.f32.mxu0 %vm426_vm3, %v12515_v36  ;;  %17989 = vmatpush3.bf16.msra.mxu0 %v17986_v43  ;;  %v12875_v43 = vmax.f32 %v12865_v17, 0.0  ;;  %v13242_v17 = vmax.f32 %v13232_v31, 0.0 }
 0x94e   : > { %17991 = vmatprep.subr.bf16.mxu0 %v17990_v9 }
 0x950   : > { %17557 = vmatmul.mubr.msk.f32.gmra.mrb[92].mxu0 %vm426_vm3, %v12516_v44 }
 0x951   : > { %17559 = vmatprep.mubr.msk.f32.mxu0 %vm426_vm3, %v12517_v60  ;;  %17993 = vmatpush3.bf16.msra.mxu0 %v17990_v9  ;;  %v13053_v9 = vmax.f32 %v13043_v29, 0.0  ;;  %v13412_v29 = vld [vmem:[#allocation5 + $0x5d] sm:$0xff] }
 0x952   : > { %17995 = vmatprep.subr.bf16.mxu0 %v17994_v39 }
 0x954   : > { %17560 = vmatmul.mubr.msk.f32.gmra.mrb[94].mxu0 %vm426_vm3, %v12518_v30 }
 0x955   : > { %17562 = vmatprep.mubr.msk.f32.mxu0 %vm426_vm3, %v12519_v32 }
 0x958   : > { %17563 = vmatmul.mubr.msk.f32.gmra.mrb[96].mxu0 %vm426_vm3, %v12520_v48 }
 0x959   : > { %17565 = vmatprep.mubr.msk.f32.mxu0 %vm426_vm3, %v12521_v45 }
 0x95c   : > { %17566 = vmatmul.mubr.msk.f32.gmra.mrb[98].mxu0 %vm426_vm3, %v12522_v57 }
 0x95d   : > { %17576 = vmatprep.mubr.msk.f32.mxu0 %vm426_vm3, %v12514_v4  ;;  %v12882_v4 = vmax.f32 %v12872_v22, 0.0  ;;  %v13411_v22 = vld [vmem:[#allocation5 + $0x55] sm:$0xff] }
 0x960   : > { %17577 = vmatmul.mubr.msk.f32.vlgmr.msra.gmra.mrb[90].mxu0 %vm426_vm3, %v12515_v36  ;;  %v13044_v36 = vld [vmem:[#allocation5 + $0x14] sm:$0xff] }
 0x961   : > { %17579 = vmatprep.mubr.msk.f32.mxu0 %vm426_vm3, %v12516_v44  ;;  %17997 = vmatpush3.bf16.msra.mxu0 %v17994_v39  ;;  %v13054_v28 = vmax.f32 %v13044_v36, 0.0  ;;  %v18014_v44 = vpack.c.bf16 %v14827_v7, %v14826_v38  ;;  %v13055_v39 = vmax.f32 %v13045_v12, 0.0  ;;  %v13422_v36 = vmax.f32 %v13412_v29, 0.0  ;;  %v13583_v38 = vld [vmem:[#allocation5 + $0x16] sm:$0xff]  ;;  %v13584_v12 = vld [vmem:[#allocation5 + $0x1e] sm:$0xff] }
 0x962   : > { %17999 = vmatprep.subr.bf16.mxu0 %v17998_v53  ;;  %v13593_v7 = vmax.f32 %v13583_v38, 0.0 }
 0x964   : > { %17580 = vmatmul.mubr.msk.f32.gmra.mrb[92].mxu0 %vm426_vm3, %v12517_v60  ;;  %v13046_v60 = vld [vmem:[#allocation5 + $0x24] sm:$0xff] }
 0x965   : > { %17582 = vmatprep.mubr.msk.f32.mxu0 %vm426_vm3, %v12518_v30  ;;  %18001 = vmatpush3.bf16.msra.mxu0 %v17998_v53  ;;  %v13047_v30 = vld [vmem:[#allocation5 + $0x2c] sm:$0xff]  ;;  %v13060_v53 = vmax.f32 %v13050_v63, 0.0 }
 0x966   : > { %18003 = vmatprep.subr.bf16.mxu0 %v18002_v58  ;;  %v13057_v25 = vmax.f32 %v13047_v30, 0.0  ;;  %v13597_v30 = vmax.f32 %v13587_v21, 0.0  ;;  %v13800_v21 = vld [vmem:[#allocation4 + $0x53] sm:$0xff] }
 0x968   : > { %17583 = vmatmul.mubr.msk.f32.gmra.mrb[94].mxu0 %vm426_vm3, %v12519_v32  ;;  %v13056_v32 = vmax.f32 %v13046_v60, 0.0  ;;  %v13586_v60 = vld [vmem:[#allocation5 + $0x2e] sm:$0xff] }
 0x969   : > { %17585 = vmatprep.mubr.msk.f32.mxu0 %vm426_vm3, %v12520_v48  ;;  %v13048_v48 = vld [vmem:[#allocation5 + $0x34] sm:$0xff]  ;;  %v13596_v56 = vmax.f32 %v13586_v60, 0.0 }
 0x96a   : > { %v13058_v50 = vmax.f32 %v13048_v48, 0.0 }
 0x96c   : > { %17586 = vmatmul.mubr.msk.f32.gmra.mrb[96].mxu0 %vm426_vm3, %v12521_v45  ;;  %v13049_v45 = vld [vmem:[#allocation5 + $0x3c] sm:$0xff] }
 0x96d   : > { %17588 = vmatprep.mubr.msk.f32.mxu0 %vm426_vm3, %v12522_v57  ;;  %v13059_v57 = vmax.f32 %v13049_v45, 0.0  ;;  %v13590_v45 = vld [vmem:[#allocation5 + $0x4e] sm:$0xff] }
 0x96e   : > { %v13600_v63 = vmax.f32 %v13590_v45, 0.0 }
 0x970   : > { %17589 = vmatmul.mubr.msk.f32.gmra.mrb[98].mxu0 %vm426_vm3, %v12702_v8  ;;  %v18022_v8 = vpack.c.bf16 %v14841_v27, %v14840_v41 }
 0x971   : > { %17599 = vmatprep.mubr.msk.f32.mxu0 %vm426_vm3, %v12873_v40  ;;  %v14852_v40 = vld [vmem:[%s21787_s3 + $0x460] sm:$0xff] }
 0x972   : > { %v18026_v2 = vpack.c.bf16 %v14853_v6, %v14852_v40  ;;  %v13792_v40 = vld [vmem:[#allocation4 + $0x13] sm:$0xff] }
 0x974   : > { %17600 = vmatmul.mubr.msk.f32.vlgmr.msra.gmra.mrb[90].mxu0 %vm426_vm3, %v12874_v35  ;;  %v13403_v35 = vld [vmem:[#allocation5 + $0x15] sm:$0xff] }
 0x975   : > { %17602 = vmatprep.mubr.msk.f32.mxu0 %vm426_vm3, %v12875_v43  ;;  %18005 = vmatpush3.bf16.msra.mxu0 %v18002_v58  ;;  %v13062_v58 = vmax.f32 %v13052_v16, 0.0  ;;  %v13404_v43 = vld [vmem:[#allocation5 + $0x1d] sm:$0xff] }
 0x976   : > { %18007 = vmatprep.subr.bf16.mxu0 %v18006_v59  ;;  %v13414_v34 = vmax.f32 %v13404_v43, 0.0 }
 0x978   : > { %17603 = vmatmul.mubr.msk.f32.gmra.mrb[92].mxu0 %vm426_vm3, %v12876_v42  ;;  %v18030_v42 = vpack.c.bf16 %v14855_v19, %v14854_v46 }
 0x979   : > { %17605 = vmatprep.mubr.msk.f32.mxu0 %vm426_vm3, %v12877_v54  ;;  %18009 = vmatpush3.bf16.msra.mxu0 %v18006_v59  ;;  %v13413_v59 = vmax.f32 %v13403_v35, 0.0  ;;  %v13406_v54 = vld [vmem:[#allocation5 + $0x2d] sm:$0xff] }
 0x97a   : > { %18011 = vmatprep.subr.bf16.mxu0 %v18010_v23  ;;  %v13416_v52 = vmax.f32 %v13406_v54, 0.0 }
 0x97c   : > { %17606 = vmatmul.mubr.msk.f32.gmra.mrb[94].mxu0 %vm426_vm3, %v12878_v62  ;;  %v13417_v62 = vmax.f32 %v13407_v20, 0.0 }
 0x97d   : > { %17608 = vmatprep.mubr.msk.f32.mxu0 %vm426_vm3, %v12879_v0  ;;  %v13408_v0 = vld [vmem:[#allocation5 + $0x3d] sm:$0xff] }
 0x97e   : > { %v13418_v14 = vmax.f32 %v13408_v0, 0.0 }
 0x980   : > { %17609 = vmatmul.mubr.msk.f32.gmra.mrb[96].mxu0 %vm426_vm3, %v12880_v24  ;;  %v13419_v24 = vmax.f32 %v13409_v26, 0.0 }
 0x981   : > { %17611 = vmatprep.mubr.msk.f32.mxu0 %vm426_vm3, %v12881_v5  ;;  %v13410_v5 = vld [vmem:[#allocation5 + $0x4d] sm:$0xff] }
 0x984   : > { %17612 = vmatmul.mubr.msk.f32.gmra.mrb[98].mxu0 %vm426_vm3, %v12882_v4  ;;  %v13420_v4 = vmax.f32 %v13410_v5, 0.0 }
 0x985   : > { %17622 = vmatprep.mubr.msk.f32.mxu0 %vm426_vm3, %v13053_v9  ;;  %v13421_v9 = vmax.f32 %v13411_v22, 0.0 }
 0x988   : > { %17623 = vmatmul.mubr.msk.f32.vlgmr.msra.gmra.mrb[90].mxu0 %vm426_vm3, %v13054_v28 }
 0x989   : > { %17625 = vmatprep.mubr.msk.f32.mxu0 %vm426_vm3, %v13055_v39  ;;  %18013 = vmatpush3.bf16.msra.mxu0 %v18010_v23  ;;  %v13415_v23 = vmax.f32 %v13405_v1, 0.0  ;;  %v13794_v1 = vld [vmem:[#allocation4 + $0x23] sm:$0xff] }
 0x98a   : > { %18015 = vmatprep.subr.bf16.mxu0 %v18014_v44 }
 0x98c   : > { %17626 = vmatmul.mubr.msk.f32.gmra.mrb[92].mxu0 %vm426_vm3, %v13056_v32 }
 0x98d   : > { %17628 = vmatprep.mubr.msk.f32.mxu0 %vm426_vm3, %v13057_v25  ;;  %18017 = vmatpush3.bf16.msra.mxu0 %v18014_v44  ;;  %v13594_v44 = vmax.f32 %v13584_v12, 0.0 }
 0x98e   : > { %18019 = vmatprep.subr.bf16.mxu0 %v18018_v15 }
 0x990   : > { %17629 = vmatmul.mubr.msk.f32.gmra.mrb[94].mxu0 %vm426_vm3, %v13058_v50 }
 0x991   : > { %17631 = vmatprep.mubr.msk.f32.mxu0 %vm426_vm3, %v13059_v57 }
 0x994   : > { %17632 = vmatmul.mubr.msk.f32.gmra.mrb[96].mxu0 %vm426_vm3, %v13060_v53 }
 0x995   : > { %17634 = vmatprep.mubr.msk.f32.mxu0 %vm426_vm3, %v13061_v61 }
 0x998   : > { %17635 = vmatmul.mubr.msk.f32.gmra.mrb[98].mxu0 %vm426_vm3, %v13062_v58 }
 0x999   : > { %17645 = vmatprep.mubr.msk.f32.mxu0 %vm426_vm3, %v13054_v28  ;;  %v13585_v28 = vld [vmem:[#allocation5 + $0x26] sm:$0xff] }
 0x99c   : > { %17646 = vmatmul.mubr.msk.f32.vlgmr.msra.gmra.mrb[90].mxu0 %vm426_vm3, %v13055_v39  ;;  %v13595_v39 = vmax.f32 %v13585_v28, 0.0 }
 0x99d   : > { %17648 = vmatprep.mubr.msk.f32.mxu0 %vm426_vm3, %v13056_v32  ;;  %18021 = vmatpush3.bf16.msra.mxu0 %v18018_v15  ;;  %v13588_v32 = vld [vmem:[#allocation5 + $0x3e] sm:$0xff]  ;;  %v13589_v15 = vld [vmem:[#allocation5 + $0x46] sm:$0xff] }
 0x99e   : > { %18023 = vmatprep.subr.bf16.mxu0 %v18022_v8  ;;  %v13599_v48 = vmax.f32 %v13589_v15, 0.0 }
 0x9a0   : > { %17649 = vmatmul.mubr.msk.f32.gmra.mrb[92].mxu0 %vm426_vm3, %v13057_v25  ;;  %v13598_v25 = vmax.f32 %v13588_v32, 0.0  ;;  %v13799_v32 = vld [vmem:[#allocation4 + $0x4b] sm:$0xff] }
 0x9a1   : > { %17651 = vmatprep.mubr.msk.f32.mxu0 %vm426_vm3, %v13058_v50  ;;  %18025 = vmatpush3.bf16.msra.mxu0 %v18022_v8  ;;  %v13591_v50 = vld [vmem:[#allocation5 + $0x56] sm:$0xff] }
 0x9a2   : > { %18027 = vmatprep.subr.bf16.mxu0 %v18026_v2  ;;  %v13601_v11 = vmax.f32 %v13591_v50, 0.0 }
 0x9a4   : > { %17652 = vmatmul.mubr.msk.f32.gmra.mrb[94].mxu0 %vm426_vm3, %v13059_v57  ;;  %v13592_v57 = vld [vmem:[#allocation5 + $0x5e] sm:$0xff] }
 0x9a5   : > { %17654 = vmatprep.mubr.msk.f32.mxu0 %vm426_vm3, %v13060_v53  ;;  %v13602_v53 = vmax.f32 %v13592_v57, 0.0 }
 0x9a8   : > { %17655 = vmatmul.mubr.msk.f32.gmra.mrb[96].mxu0 %vm426_vm3, %v13061_v61  ;;  %v14867_v61 = vld [vmem:[%s21788_s4 + $0x3] ss:$0 sm:$0xff] }
 0x9a9   : > { %17657 = vmatprep.mubr.msk.f32.mxu0 %vm426_vm3, %v13062_v58 }
 0x9ac   : > { %17658 = vmatmul.mubr.msk.f32.gmra.mrb[98].mxu0 %vm426_vm3, %v13242_v17  ;;  %v13791_v17 = vld [vmem:[#allocation4 + $0xb] sm:$0xff] }
 0x9ad   : > { %17668 = vmatprep.mubr.msk.f32.mxu0 %vm426_vm3, %v13413_v59 }
 0x9b0   : > { %17669 = vmatmul.mubr.msk.f32.vlgmr.msra.gmra.mrb[90].mxu0 %vm426_vm3, %v13414_v34 }
 0x9b1   : > { %17671 = vmatprep.mubr.msk.f32.mxu0 %vm426_vm3, %v13415_v23  ;;  %18029 = vmatpush3.bf16.msra.mxu0 %v18026_v2 }
 0x9b2   : > { %18031 = vmatprep.subr.bf16.mxu0 %v18030_v42 }
 0x9b4   : > { %17672 = vmatmul.mubr.msk.f32.gmra.mrb[92].mxu0 %vm426_vm3, %v13416_v52 }
 0x9b5   : > { %17674 = vmatprep.mubr.msk.f32.mxu0 %vm426_vm3, %v13417_v62  ;;  %18033 = vmatpush3.bf16.msra.mxu0 %v18030_v42  ;;  %v13793_v42 = vld [vmem:[#allocation4 + $0x1b] sm:$0xff] }
 0x9b8   : > { %17675 = vmatmul.mubr.msk.f32.gmra.mrb[94].mxu0 %vm426_vm3, %v13418_v14  ;;  %v13795_v14 = vld [vmem:[#allocation4 + $0x2b] sm:$0xff] }
 0x9b9   : > { %17677 = vmatprep.mubr.msk.f32.mxu0 %vm426_vm3, %v13419_v24 }
 0x9bc   : > { %17678 = vmatmul.mubr.msk.f32.gmra.mrb[96].mxu0 %vm426_vm3, %v13420_v4 }
 0x9bd   : > { %17680 = vmatprep.mubr.msk.f32.mxu0 %vm426_vm3, %v13421_v9 }
 0x9c0   : > { %17681 = vmatmul.mubr.msk.f32.gmra.mrb[98].mxu0 %vm426_vm3, %v13422_v36 }
 0x9c1   : > { %17691 = vmatprep.mubr.msk.f32.mxu0 %vm426_vm3, %v13593_v7  ;;  %v13797_v7 = vld [vmem:[#allocation4 + $0x3b] sm:$0xff] }
 0x9c4   : > { %17692 = vmatmul.mubr.msk.f32.vlgmr.msra.gmra.mrb[90].mxu0 %vm426_vm3, %v13594_v44 }
 0x9c5   : > { %17694 = vmatprep.mubr.msk.f32.mxu0 %vm426_vm3, %v13595_v39 }
 0x9c8   : > { %17695 = vmatmul.mubr.msk.f32.gmra.mrb[92].mxu0 %vm426_vm3, %v13596_v56 }
 0x9c9   : > { %17697 = vmatprep.mubr.msk.f32.mxu0 %vm426_vm3, %v13597_v30 }
 0x9cc   : > { %17698 = vmatmul.mubr.msk.f32.gmra.mrb[94].mxu0 %vm426_vm3, %v13598_v25 }
 0x9cd   : > { %17700 = vmatprep.mubr.msk.f32.mxu0 %vm426_vm3, %v13599_v48 }
 0x9d0   : > { %17701 = vmatmul.mubr.msk.f32.gmra.mrb[96].mxu0 %vm426_vm3, %v13600_v63 }
 0x9d1   : > { %17703 = vmatprep.mubr.msk.f32.mxu0 %vm426_vm3, %v13601_v11 }
 0x9d4   : > { %17704 = vmatmul.mubr.msk.f32.gmra.mrb[98].mxu0 %vm426_vm3, %v13602_v53 }
 0xa97   : > { %v17693_v16 = vpop.f32.mrb[90].mxu0 }
 0xa98   : > { %v13772_v58 = vadd.f32 %v17693_v16, %v14867_v61  ;;  %v13704_v41 = vpop.f32.mrb[91].mxu0 }
 0xa99   : > { %v13771_v27 = vadd.f32 %v14867_v61, %v13704_v41 }
 0xa9a   : > { %v13782_v8 = vmul.f32 %v13772_v58, %v21020_v10 }
 0xa9b   : > { %v13781_v6 = vmul.f32 %v13771_v27, %v21022_v47  ;;  %v17696_v2 = vpop.f32.mrb[92].mxu0 }
 0xa9c   : > { %v13802_v31 = vadd.f32 %v13792_v40, %v13782_v8  ;;  %v13774_v35 = vadd.f32 %v17696_v2, %v14867_v61  ;;  %v13714_v59 = vpop.f32.mrb[93].mxu0 }
 0xa9d   : > { %v13801_v43 = vadd.f32 %v13791_v17, %v13781_v6  ;;  %v13773_v46 = vadd.f32 %v14867_v61, %v13714_v59 }
 0xa9e   : > { %13812 = vst.msk [vmem:[#allocation4 + $0x13] sm:$0xff] %vm426_vm3, %v13802_v31  ;;  %v13784_v19 = vmul.f32 %v13774_v35, %v21027_v18  ;;  %v13796_v18 = vld [vmem:[#allocation4 + $0x33] sm:$0xff] }
 0xa9f   : > { %13811 = vst.msk [vmem:[#allocation4 + $0xb] sm:$0xff] %vm426_vm3, %v13801_v43  ;;  %v13783_v10 = vmul.f32 %v13773_v46, %v21029_v55  ;;  %v17699_v34 = vpop.f32.mrb[94].mxu0 }
 0xaa0   : > { %v13804_v47 = vadd.f32 %v13794_v1, %v13784_v19  ;;  %v13776_v23 = vadd.f32 %v17699_v34, %v14867_v61  ;;  %v13724_v54 = vpop.f32.mrb[95].mxu0 }
 0xaa1   : > { %v13803_v20 = vadd.f32 %v13793_v42, %v13783_v10  ;;  %v13775_v52 = vadd.f32 %v14867_v61, %v13724_v54 }
 0xaa2   : > { %13814 = vst.msk [vmem:[#allocation4 + $0x23] sm:$0xff] %vm426_vm3, %v13804_v47  ;;  %v13786_v62 = vmul.f32 %v13776_v23, %v21034_v37  ;;  %v13798_v37 = vld [vmem:[#allocation4 + $0x43] sm:$0xff] }
 0xaa3   : > { %13813 = vst.msk [vmem:[#allocation4 + $0x1b] sm:$0xff] %vm426_vm3, %v13803_v20  ;;  %v13785_v0 = vmul.f32 %v13775_v52, %v21037_v13  ;;  %v17702_v26 = vpop.f32.mrb[96].mxu0 }
 0xaa4   : > { %v13806_v55 = vadd.f32 %v13796_v18, %v13786_v62  ;;  %v13778_v24 = vadd.f32 %v17702_v26, %v14867_v61  ;;  %v13734_v5 = vpop.f32.mrb[97].mxu0 }
 0xaa5   : > { %v13805_v22 = vadd.f32 %v13795_v14, %v13785_v0  ;;  %v13777_v29 = vadd.f32 %v14867_v61, %v13734_v5 }
 0xaa6   : > { %13816 = vst.msk [vmem:[#allocation4 + $0x33] sm:$0xff] %vm426_vm3, %v13806_v55  ;;  %v13788_v4 = vmul.f32 %v13778_v24, %v21050_v51  ;;  %v13821_v9 = vld [vmem:[#allocation4 + $0xb] sm:$0xff] }
 0xaa7   : > { %13815 = vst.msk [vmem:[#allocation4 + $0x2b] sm:$0xff] %vm426_vm3, %v13805_v22  ;;  %v13787_v36 = vmul.f32 %v13777_v29, %v21053_v33  ;;  %v17705_v38 = vpop.f32.mrb[98].mxu0  ;;  %13822 = vst.msk [vmem:[%s21708_s10] sm:$0xff] %vm426_vm3, %v13821_v9 }
 0xaa8   : > { %v13808_v13 = vadd.f32 %v13798_v37, %v13788_v4  ;;  %v13780_v12 = vadd.f32 %v17705_v38, %v14867_v61  ;;  %v13744_v28 = vpop.f32.mrb[99].mxu0 }
 0xaa9   : > { %v13807_v44 = vadd.f32 %v13797_v7, %v13787_v36  ;;  %v13779_v51 = vadd.f32 %v14867_v61, %v13744_v28 }
 0xaaa   : > { %13818 = vst.msk [vmem:[#allocation4 + $0x43] sm:$0xff] %vm426_vm3, %v13808_v13  ;;  %v13790_v39 = vmul.f32 %v13780_v12, %v21068_v3  ;;  %v13823_v33 = vld [vmem:[#allocation4 + $0x15] sm:$0xff]  ;;  %v13826_v60 = vld [vmem:[#allocation4 + $0x1f] sm:$0xff] }
 0xaab   : > { %13817 = vst.msk [vmem:[#allocation4 + $0x3b] sm:$0xff] %vm426_vm3, %v13807_v44  ;;  %v13789_v56 = vmul.f32 %v13779_v51, %v21071_v49  ;;  %14868 = vst.msk [vmem:[%s21708_s10 + $0x8] sm:$0xff] %vm426_vm3, %v13823_v33 }
 0xaac   : > { %14869 = vst.msk [vmem:[%s21708_s10 + $0x10] sm:$0xff] %vm426_vm3, %v13826_v60  ;;  %v13810_v30 = vadd.f32 %v13800_v21, %v13790_v39 }
 0xaad   : > { %v13809_v15 = vadd.f32 %v13799_v32, %v13789_v56  ;;  %v13832_v3 = vld [vmem:[#allocation4 + $0x33] sm:$0xff] }
 0xaae   : > { %13820 = vst.msk [vmem:[#allocation4 + $0x53] sm:$0xff] %vm426_vm3, %v13810_v30  ;;  %v13829_v25 = vld [vmem:[#allocation4 + $0x29] sm:$0xff]  ;;  %14871 = vst.msk [vmem:[%s21708_s10 + $0x20] sm:$0xff] %vm426_vm3, %v13832_v3 }
 0xaaf   : > { %13819 = vst.msk [vmem:[#allocation4 + $0x4b] sm:$0xff] %vm426_vm3, %v13809_v15  ;;  %14870 = vst.msk [vmem:[%s21708_s10 + $0x18] sm:$0xff] %vm426_vm3, %v13829_v25 }
 0xab2   : > { %v13835_v49 = vld [vmem:[#allocation4 + $0x3d] sm:$0xff] }
 0xab3   : > { %14872 = vst.msk [vmem:[%s21708_s10 + $0x28] sm:$0xff] %vm426_vm3, %v13835_v49 }
 0xab6   : > { %v13838_v48 = vld [vmem:[#allocation4 + $0x47] sm:$0xff]  ;;  %v13841_v45 = vld [vmem:[#allocation4 + $0x51] sm:$0xff] }
 0xab7   : > { %14873 = vst.msk [vmem:[%s21708_s10 + $0x30] sm:$0xff] %vm426_vm3, %v13838_v48  ;;  %14874 = vst.msk [vmem:[%s21708_s10 + $0x38] sm:$0xff] %vm426_vm3, %v13841_v45 }
 0xab8   : > { %18417 = shalt.err (!%p18414_p3)
}
 0xab9   : > { %s18418_s24 = scalar_lea.hbm %s21733_s19, 1024  ;;  %s18422_s10 = scalar_lea.hbm %s21792_s8, 2048 }
 0xaba   : > { %p18419_p4 = scmp.ne.s32.totalorder %s21733_s19, %s18418_s24  ;;  %p18423_p9 = scmp.lt.u32.totalorder %s21733_s19, %s21792_s8 }
 0xabb   : > { %p18424_p10 = scmp.lt.u32.totalorder %s18422_s10, %s18418_s24  ;;  %p18426_p12 = scmp.lt.u32.totalorder %s18418_s24, %s21733_s19 }
 0xabc   : > { %p18420_p7 = pnand %p18419_p4, %p18558_p5 }
 0xabd   : > { %p18425_p11 = por %p18424_p10, %p18423_p9 }
 0xabe   : > { %p18421_p8 = pneg %p18420_p7 }
 0xabf   : > { %p18427_p13 = por %p18426_p12, %p18425_p11 }
 0xac1   : > { %p18428_p0 = pnand %p18427_p13, %p18421_p8 }
 0xac3   : > { %18431 = shalt.err (!%p18428_p0)
}
 0xac4   : > { %s18473_s18 = smov 128   ;;  %s18474_s20 = smov 8  }
 0xac5   : > { %18356 = dma.vmem_to_hbm [thread:$0]  (%p18558_p5), %s21735_s13, 1024, %s21733_s19, %s21743_s9, %s18473_s18, %s18473_s18, %s18474_s20  }
 0xac6 PF: > { %p18362_p1 = scmp.ge.s32.totalorder %s18466_s30, 2  ;;  %s13873_s21 = sand.u32 1, %s18454_s27  }
 0xac7   : > { %s13874_s22 = scalar_lea.sflag [#allocation7], %s13873_s21 }
 0xac8   : > { %p18359_p2 = pnand %p18362_p1, %p18562_p6 }
 0xaca   : > { %18449 = dma.done.wait (!%p18359_p2), %s13874_s22, 1024  }
 0xacb   : > { %18451 = vsyncadd (!%p18359_p2), %s13874_s22, 4294966272  ;;  %p18_p3 = scmp.ge.s32.totalorder %s18545_s11, 4   ;;  %s21795_s27 = smov %s18458_s28 }
 0xacc   : > { %s21796_s28 = smov %s18462_s29  ;;  %s21797_s29 = smov %s18556_s14 }
 0xacd   : > { %s21798_s30 = smov %s18545_s11  ;;  %20 = sbr.rel (!%p18_p3) target bundleno = 3 (0x3), region = 155 }
 0xad4   :  { %13879 = vsyncpa [#allocation7], 1 }
 0xad5   :  { %13881 = vsyncpa [#allocation7 + $0x1], 1 }

</bundles_post_ra>
